<compile_context>
chip_gen: v7x
topology: tpu7x:2x2x1
jax: 0.10.0
libtpu: 0.0.40
codegen_flags: <defaults>
</compile_context>

<pallas_src>
import jax
import jax.numpy as jnp
from jax.experimental import pallas as pl
from jax.experimental.pallas import tpu as pltpu

LRELU_SLOPE = 0.2  # matches nn.LeakyReLU(0.2) in the PyTorch model


def vae_kernel(
    x_ref, eps_ref,
    w1e_ref, b1e_ref, w2e_ref, b2e_ref,
    wmv_ref, bmv_ref,                      # fused [mu | logvar] projection
    w1d_ref, b1d_ref, w2d_ref, b2d_ref,
    wout_ref, bout_ref,
    xhat_ref, mv_ref,
):
    L = eps_ref.shape[-1]

    def hidden(a_bf16, w_ref, b_ref):
        # MXU bf16 matmul with f32 accumulation; bias-add + leaky-relu epilogue in
        # bf16 (v6e/v7x VPU have bf16; on v5e the compiler falls back through f32,
        # which is no worse than the previous f32 epilogue).
        acc = jnp.dot(a_bf16, w_ref[...], preferred_element_type=jnp.float32)
        h = acc.astype(jnp.bfloat16) + b_ref[...]
        return jnp.where(h > 0, h, LRELU_SLOPE * h)

    # ---- Encoder ----
    h = hidden(x_ref[...], w1e_ref, b1e_ref)           # x streamed in as bf16
    h = hidden(h, w2e_ref, b2e_ref)
    mv = jnp.dot(h, wmv_ref[...], preferred_element_type=jnp.float32) + bmv_ref[...]
    mu = mv[:, :L]                                      # L is a multiple of 128
    logvar = mv[:, L:]

    # ---- Reparameterize: z = mu + eps * exp(0.5*logvar)  (f32; exp goes to EUP) ----
    z = mu + eps_ref[...] * jnp.exp(0.5 * logvar)

    # ---- Decoder ----
    hd = hidden(z.astype(jnp.bfloat16), w1d_ref, b1d_ref)
    hd = hidden(hd, w2d_ref, b2d_ref)
    logits = jnp.dot(hd, wout_ref[...], preferred_element_type=jnp.float32) + bout_ref[...]

    xhat_ref[...] = jax.nn.sigmoid(logits).astype(xhat_ref.dtype)
    mv_ref[...] = mv.astype(mv_ref.dtype)               # single lane-dense (TB, 2L) store


def vae_forward(x, eps, params, *, tb=512):
    """x: (B, input_dim) f32, eps: (B, latent_dim) f32, params: dict (bf16 weights,
    (1,out) biases: bf16 for hidden layers, f32 for mv/out). Returns (x_hat, mu, logvar)."""
    B, D_in = x.shape
    L = eps.shape[1]
    H = params["w1e"].shape[1]
    assert D_in % 128 == 0 and L % 128 == 0 and H % 128 == 0, (
        "pad feature dims to multiples of 128 at parameter-setup time")

    # Stream x in bf16: it is consumed only by the bf16 MXU matmul, so this halves the
    # largest input activation stream with no extra precision loss.
    x = x.astype(jnp.bfloat16)

    n_tiles = pl.cdiv(B, tb)
    Bp = n_tiles * tb
    if Bp != B:
        pad = Bp - B
        x = jnp.pad(x, ((0, pad), (0, 0)))
        eps = jnp.pad(eps, ((0, pad), (0, 0)))

    weight_args = (
        params["w1e"], params["b1e"], params["w2e"], params["b2e"],
        params["wmv"], params["bmv"],
        params["w1d"], params["b1d"], params["w2d"], params["b2d"],
        params["wout"], params["bout"],
    )

    def row_spec(cols):
        # Batch-tiled streams: new (tb, cols) block each grid step -> double-buffered.
        return pl.BlockSpec((tb, cols), lambda i: (i, 0))

    def const_spec(arr):
        # Weights/biases: same block every step -> fetched once, VMEM-resident.
        # TODO(synk): pipeline_mode=pl.Buffered(1) would single-buffer these constants
        # (halves weight VMEM on v7x); left at the default for JAX-version portability.
        return pl.BlockSpec(arr.shape, lambda i: (0, 0))

    in_specs = [row_spec(D_in), row_spec(L)] + [const_spec(a) for a in weight_args]
    out_specs = (row_spec(D_in), row_spec(2 * L))
    out_shapes = (
        jax.ShapeDtypeStruct((Bp, D_in), jnp.float32),    # x_hat
        jax.ShapeDtypeStruct((Bp, 2 * L), jnp.float32),   # fused [mu | logvar]
    )

    # Advisory cost estimate so XLA schedules the pad/slice/loss neighbors correctly.
    layer_dims = [(D_in, H), (H, H), (H, 2 * L), (L, H), (H, H), (H, D_in)]
    flops = 2 * Bp * sum(i * o for i, o in layer_dims)
    transcendentals = Bp * (L + D_in)                     # exp per latent + sigmoid per pixel
    param_bytes = sum(int(a.size) * a.dtype.itemsize for a in weight_args)
    act_bytes = Bp * (D_in * 2 + L * 4) + Bp * (D_in * 4 + 2 * L * 4)
    cost = pl.CostEstimate(flops=flops, transcendentals=transcendentals,
                           bytes_accessed=param_bytes + act_bytes)

    # VMEM budget from the actual working set (double-buffered tiles + resident
    # weights + live intermediates), with 2x margin; clamped to stay well inside
    # v7x's 64 MiB physical VMEM and leave scoped headroom on v5e's 128 MiB chip.
    tile_bytes = tb * (D_in * 2 + L * 4) + tb * (D_in * 4 + 2 * L * 4)
    scratch_bytes = 6 * tb * max(H, D_in, 2 * L) * 4
    vmem_need = 2 * param_bytes + 2 * tile_bytes + scratch_bytes
    vmem_limit = int(min(64 * 2 ** 20, max(8 * 2 ** 20, 2 * vmem_need)))

    compiler_params = pltpu.CompilerParams(
        dimension_semantics=("parallel",),    # shard batch tiles across TCs on v7x
        vmem_limit_bytes=vmem_limit,
    )

    x_hat, mv = pl.pallas_call(
        vae_kernel,
        grid=(n_tiles,),
        out_shape=out_shapes,
        in_specs=in_specs,
        out_specs=out_specs,
        compiler_params=compiler_params,
        cost_estimate=cost,
    )(x, eps, *weight_args)

    if Bp != B:
        x_hat, mv = x_hat[:B], mv[:B]
    return x_hat, mv[:, :L], mv[:, L:]


def init_params(key, input_dim, hidden_dim, latent_dim):
    """Deterministic synthetic init mirroring nn.Linear's uniform init.
    Weights stored (in, out) in bf16 (MXU operands). Hidden-layer biases in bf16
    (bf16 epilogue); mu/logvar and output biases in f32 (f32 reparam/sigmoid path).
    fcmu/fcvar are fused into one (hidden, 2*latent) projection."""
    def lin(k, fan_in, fan_out, bias_dtype):
        kw, kb = jax.random.split(k)
        bound = 1.0 / jnp.sqrt(fan_in)
        w = jax.random.uniform(kw, (fan_in, fan_out), jnp.float32, -bound, bound)
        b = jax.random.uniform(kb, (1, fan_out), jnp.float32, -bound, bound)
        return w.astype(jnp.bfloat16), b.astype(bias_dtype)

    keys = jax.random.split(key, 7)
    p = {}
    p["w1e"], p["b1e"] = lin(keys[0], input_dim, hidden_dim, jnp.bfloat16)
    p["w2e"], p["b2e"] = lin(keys[1], hidden_dim, hidden_dim, jnp.bfloat16)
    wmu, bmu = lin(keys[2], hidden_dim, latent_dim, jnp.float32)
    wvar, bvar = lin(keys[3], hidden_dim, latent_dim, jnp.float32)
    p["wmv"] = jnp.concatenate([wmu, wvar], axis=1)       # (hidden, 2*latent) bf16
    p["bmv"] = jnp.concatenate([bmu, bvar], axis=1)       # (1, 2*latent) f32
    p["w1d"], p["b1d"] = lin(keys[4], latent_dim, hidden_dim, jnp.bfloat16)
    p["w2d"], p["b2d"] = lin(keys[5], hidden_dim, hidden_dim, jnp.bfloat16)
    p["wout"], p["bout"] = lin(keys[6], hidden_dim, input_dim, jnp.float32)
    return p


if __name__ == "__main__":
    # TPU-tile-friendly shapes (the real 784/400/200 model would be padded to
    # 896/512/256 at setup time). Batch chosen so grid = 4 steps with TB=512:
    # even and >=2 steps per TensorCore on v7x, so DMA overlaps compute.
    B, INPUT_DIM, HIDDEN_DIM, LATENT_DIM = 2048, 256, 256, 128
    TB = 512

    key = jax.random.PRNGKey(0)
    k_x, k_eps, k_params = jax.random.split(key, 3)

    x = jax.random.uniform(k_x, (B, INPUT_DIM), jnp.float32)       # flattened image
    eps = jax.random.normal(k_eps, (B, LATENT_DIM), jnp.float32)   # torch.randn_like
    params = init_params(k_params, INPUT_DIM, HIDDEN_DIM, LATENT_DIM)

    x_hat, mu, logvar = jax.block_until_ready(vae_forward(x, eps, params, tb=TB))

    # Pure-JAX reference of the exact same mixed-precision math.
    def ref(x, eps, p):
        def hid(a_bf16, w, b):
            acc = jnp.dot(a_bf16, w, preferred_element_type=jnp.float32)
            h = acc.astype(jnp.bfloat16) + b
            return jnp.where(h > 0, h, LRELU_SLOPE * h)
        xb = x.astype(jnp.bfloat16)
        h = hid(xb, p["w1e"], p["b1e"])
        h = hid(h, p["w2e"], p["b2e"])
        mv = jnp.dot(h, p["wmv"], preferred_element_type=jnp.float32) + p["bmv"]
        L = eps.shape[1]
        mu_r, lv_r = mv[:, :L], mv[:, L:]
        z = mu_r + eps * jnp.exp(0.5 * lv_r)
        hd = hid(z.astype(jnp.bfloat16), p["w1d"], p["b1d"])
        hd = hid(hd, p["w2d"], p["b2d"])
        logits = jnp.dot(hd, p["wout"], preferred_element_type=jnp.float32) + p["bout"]
        return jax.nn.sigmoid(logits), mu_r, lv_r

    xr, mr, lr = ref(x, eps, params)
    assert jnp.allclose(x_hat, xr, atol=3e-3, rtol=3e-3), "x_hat mismatch"
    assert jnp.allclose(mu, mr, atol=3e-3, rtol=3e-3), "mu mismatch"
    assert jnp.allclose(logvar, lr, atol=3e-3, rtol=3e-3), "logvar mismatch"
    assert x_hat.shape == (B, INPUT_DIM) and mu.shape == (B, LATENT_DIM)
    assert logvar.shape == (B, LATENT_DIM)

    print("KERNEL_OK")
</pallas_src>

<mosaic_0001>
module attributes {stable_mosaic.version = 11 : i64} {
  func.func @vae_kernel(%arg0: i32, %arg1: memref<512x256xbf16, #tpu.memory_space<vmem>>, %arg2: memref<512x128xf32, #tpu.memory_space<vmem>>, %arg3: memref<256x256xbf16, #tpu.memory_space<vmem>>, %arg4: memref<1x256xbf16, #tpu.memory_space<vmem>>, %arg5: memref<256x256xbf16, #tpu.memory_space<vmem>>, %arg6: memref<1x256xbf16, #tpu.memory_space<vmem>>, %arg7: memref<256x256xbf16, #tpu.memory_space<vmem>>, %arg8: memref<1x256xf32, #tpu.memory_space<vmem>>, %arg9: memref<128x256xbf16, #tpu.memory_space<vmem>>, %arg10: memref<1x256xbf16, #tpu.memory_space<vmem>>, %arg11: memref<256x256xbf16, #tpu.memory_space<vmem>>, %arg12: memref<1x256xbf16, #tpu.memory_space<vmem>>, %arg13: memref<256x256xbf16, #tpu.memory_space<vmem>>, %arg14: memref<1x256xf32, #tpu.memory_space<vmem>>, %arg15: memref<512x256xf32, #tpu.memory_space<vmem>>, %arg16: memref<512x256xf32, #tpu.memory_space<vmem>>) attributes {dimension_semantics = [#tpu.dimension_semantics<parallel>], iteration_bounds = array<i64: 4>, scalar_prefetch = 0 : i64, scratch_operands = 0 : i64, tpu.core_type = #tpu.core_type<tc>, window_params = [{transform_indices = @transform_0, window_bounds = array<i64: 512, 256>}, {transform_indices = @transform_1, window_bounds = array<i64: 512, 128>}, {pipeline_mode = #tpu.pipeline_mode<synchronous>, transform_indices = @transform_2, window_bounds = array<i64: 256, 256>}, {pipeline_mode = #tpu.pipeline_mode<synchronous>, transform_indices = @transform_3, window_bounds = array<i64: 1, 256>}, {pipeline_mode = #tpu.pipeline_mode<synchronous>, transform_indices = @transform_4, window_bounds = array<i64: 256, 256>}, {pipeline_mode = #tpu.pipeline_mode<synchronous>, transform_indices = @transform_5, window_bounds = array<i64: 1, 256>}, {pipeline_mode = #tpu.pipeline_mode<synchronous>, transform_indices = @transform_6, window_bounds = array<i64: 256, 256>}, {pipeline_mode = #tpu.pipeline_mode<synchronous>, transform_indices = @transform_7, window_bounds = array<i64: 1, 256>}, {pipeline_mode = #tpu.pipeline_mode<synchronous>, transform_indices = @transform_8, window_bounds = array<i64: 128, 256>}, {pipeline_mode = #tpu.pipeline_mode<synchronous>, transform_indices = @transform_9, window_bounds = array<i64: 1, 256>}, {pipeline_mode = #tpu.pipeline_mode<synchronous>, transform_indices = @transform_10, window_bounds = array<i64: 256, 256>}, {pipeline_mode = #tpu.pipeline_mode<synchronous>, transform_indices = @transform_11, window_bounds = array<i64: 1, 256>}, {pipeline_mode = #tpu.pipeline_mode<synchronous>, transform_indices = @transform_12, window_bounds = array<i64: 256, 256>}, {pipeline_mode = #tpu.pipeline_mode<synchronous>, transform_indices = @transform_13, window_bounds = array<i64: 1, 256>}, {transform_indices = @transform_14, window_bounds = array<i64: 512, 256>}, {transform_indices = @transform_15, window_bounds = array<i64: 512, 256>}]} {
    %c0 = arith.constant 0 : index
    %c0_0 = arith.constant 0 : index
    %0 = vector.load %arg1[%c0, %c0_0] : memref<512x256xbf16, #tpu.memory_space<vmem>>, vector<512x256xbf16>
    %c0_1 = arith.constant 0 : index
    %c0_2 = arith.constant 0 : index
    %1 = vector.load %arg3[%c0_1, %c0_2] : memref<256x256xbf16, #tpu.memory_space<vmem>>, vector<256x256xbf16>
    %cst = arith.constant dense<0.000000e+00> : vector<512x256xf32>
    %2 = tpu.matmul %0, %1, %cst {dimension_numbers = #tpu.dot_dimension_numbers<[1], [0], [0], [1], [0, 0, 1, 1], [], []>} : vector<512x256xbf16>, vector<256x256xbf16>, vector<512x256xf32> -> vector<512x256xf32>
    %3 = arith.truncf %2 : vector<512x256xf32> to vector<512x256xbf16>
    %c0_3 = arith.constant 0 : index
    %c0_4 = arith.constant 0 : index
    %4 = vector.load %arg4[%c0_3, %c0_4] : memref<1x256xbf16, #tpu.memory_space<vmem>>, vector<1x256xbf16>
    %5 = vector.broadcast %4 : vector<1x256xbf16> to vector<512x256xbf16>
    %6 = arith.addf %3, %5 : vector<512x256xbf16>
    %cst_5 = arith.constant 0.000000e+00 : bf16
    %7 = vector.broadcast %cst_5 : bf16 to vector<512x256xbf16>
    %8 = arith.cmpf ogt, %6, %7 : vector<512x256xbf16>
    %cst_6 = arith.constant 2.001950e-01 : bf16
    %9 = vector.broadcast %cst_6 : bf16 to vector<512x256xbf16>
    %10 = arith.mulf %9, %6 : vector<512x256xbf16>
    %11 = arith.select %8, %6, %10 : vector<512x256xi1>, vector<512x256xbf16>
    %c0_7 = arith.constant 0 : index
    %c0_8 = arith.constant 0 : index
    %12 = vector.load %arg5[%c0_7, %c0_8] : memref<256x256xbf16, #tpu.memory_space<vmem>>, vector<256x256xbf16>
    %cst_9 = arith.constant dense<0.000000e+00> : vector<512x256xf32>
    %13 = tpu.matmul %11, %12, %cst_9 {dimension_numbers = #tpu.dot_dimension_numbers<[1], [0], [0], [1], [0, 0, 1, 1], [], []>} : vector<512x256xbf16>, vector<256x256xbf16>, vector<512x256xf32> -> vector<512x256xf32>
    %14 = arith.truncf %13 : vector<512x256xf32> to vector<512x256xbf16>
    %c0_10 = arith.constant 0 : index
    %c0_11 = arith.constant 0 : index
    %15 = vector.load %arg6[%c0_10, %c0_11] : memref<1x256xbf16, #tpu.memory_space<vmem>>, vector<1x256xbf16>
    %16 = vector.broadcast %15 : vector<1x256xbf16> to vector<512x256xbf16>
    %17 = arith.addf %14, %16 : vector<512x256xbf16>
    %cst_12 = arith.constant 0.000000e+00 : bf16
    %18 = vector.broadcast %cst_12 : bf16 to vector<512x256xbf16>
    %19 = arith.cmpf ogt, %17, %18 : vector<512x256xbf16>
    %cst_13 = arith.constant 2.001950e-01 : bf16
    %20 = vector.broadcast %cst_13 : bf16 to vector<512x256xbf16>
    %21 = arith.mulf %20, %17 : vector<512x256xbf16>
    %22 = arith.select %19, %17, %21 : vector<512x256xi1>, vector<512x256xbf16>
    %c0_14 = arith.constant 0 : index
    %c0_15 = arith.constant 0 : index
    %23 = vector.load %arg7[%c0_14, %c0_15] : memref<256x256xbf16, #tpu.memory_space<vmem>>, vector<256x256xbf16>
    %cst_16 = arith.constant dense<0.000000e+00> : vector<512x256xf32>
    %24 = tpu.matmul %22, %23, %cst_16 {dimension_numbers = #tpu.dot_dimension_numbers<[1], [0], [0], [1], [0, 0, 1, 1], [], []>} : vector<512x256xbf16>, vector<256x256xbf16>, vector<512x256xf32> -> vector<512x256xf32>
    %c0_17 = arith.constant 0 : index
    %c0_18 = arith.constant 0 : index
    %25 = vector.load %arg8[%c0_17, %c0_18] : memref<1x256xf32, #tpu.memory_space<vmem>>, vector<1x256xf32>
    %26 = vector.broadcast %25 : vector<1x256xf32> to vector<512x256xf32>
    %27 = arith.addf %24, %26 : vector<512x256xf32>
    %28 = vector.extract_strided_slice %27 {offsets = [0, 0], sizes = [512, 128], strides = [1, 1]} : vector<512x256xf32> to vector<512x128xf32>
    %29 = vector.extract_strided_slice %27 {offsets = [0, 128], sizes = [512, 128], strides = [1, 1]} : vector<512x256xf32> to vector<512x128xf32>
    %c0_19 = arith.constant 0 : index
    %c0_20 = arith.constant 0 : index
    %30 = vector.load %arg2[%c0_19, %c0_20] : memref<512x128xf32, #tpu.memory_space<vmem>>, vector<512x128xf32>
    %cst_21 = arith.constant 5.000000e-01 : f32
    %31 = vector.broadcast %cst_21 : f32 to vector<512x128xf32>
    %32 = arith.mulf %31, %29 : vector<512x128xf32>
    %33 = math.exp %32 : vector<512x128xf32>
    %34 = arith.mulf %30, %33 : vector<512x128xf32>
    %35 = arith.addf %28, %34 : vector<512x128xf32>
    %36 = arith.truncf %35 : vector<512x128xf32> to vector<512x128xbf16>
    %c0_22 = arith.constant 0 : index
    %c0_23 = arith.constant 0 : index
    %37 = vector.load %arg9[%c0_22, %c0_23] : memref<128x256xbf16, #tpu.memory_space<vmem>>, vector<128x256xbf16>
    %cst_24 = arith.constant dense<0.000000e+00> : vector<512x256xf32>
    %38 = tpu.matmul %36, %37, %cst_24 {dimension_numbers = #tpu.dot_dimension_numbers<[1], [0], [0], [1], [0, 0, 1, 1], [], []>} : vector<512x128xbf16>, vector<128x256xbf16>, vector<512x256xf32> -> vector<512x256xf32>
    %39 = arith.truncf %38 : vector<512x256xf32> to vector<512x256xbf16>
    %c0_25 = arith.constant 0 : index
    %c0_26 = arith.constant 0 : index
    %40 = vector.load %arg10[%c0_25, %c0_26] : memref<1x256xbf16, #tpu.memory_space<vmem>>, vector<1x256xbf16>
    %41 = vector.broadcast %40 : vector<1x256xbf16> to vector<512x256xbf16>
    %42 = arith.addf %39, %41 : vector<512x256xbf16>
    %cst_27 = arith.constant 0.000000e+00 : bf16
    %43 = vector.broadcast %cst_27 : bf16 to vector<512x256xbf16>
    %44 = arith.cmpf ogt, %42, %43 : vector<512x256xbf16>
    %cst_28 = arith.constant 2.001950e-01 : bf16
    %45 = vector.broadcast %cst_28 : bf16 to vector<512x256xbf16>
    %46 = arith.mulf %45, %42 : vector<512x256xbf16>
    %47 = arith.select %44, %42, %46 : vector<512x256xi1>, vector<512x256xbf16>
    %c0_29 = arith.constant 0 : index
    %c0_30 = arith.constant 0 : index
    %48 = vector.load %arg11[%c0_29, %c0_30] : memref<256x256xbf16, #tpu.memory_space<vmem>>, vector<256x256xbf16>
    %cst_31 = arith.constant dense<0.000000e+00> : vector<512x256xf32>
    %49 = tpu.matmul %47, %48, %cst_31 {dimension_numbers = #tpu.dot_dimension_numbers<[1], [0], [0], [1], [0, 0, 1, 1], [], []>} : vector<512x256xbf16>, vector<256x256xbf16>, vector<512x256xf32> -> vector<512x256xf32>
    %50 = arith.truncf %49 : vector<512x256xf32> to vector<512x256xbf16>
    %c0_32 = arith.constant 0 : index
    %c0_33 = arith.constant 0 : index
    %51 = vector.load %arg12[%c0_32, %c0_33] : memref<1x256xbf16, #tpu.memory_space<vmem>>, vector<1x256xbf16>
    %52 = vector.broadcast %51 : vector<1x256xbf16> to vector<512x256xbf16>
    %53 = arith.addf %50, %52 : vector<512x256xbf16>
    %cst_34 = arith.constant 0.000000e+00 : bf16
    %54 = vector.broadcast %cst_34 : bf16 to vector<512x256xbf16>
    %55 = arith.cmpf ogt, %53, %54 : vector<512x256xbf16>
    %cst_35 = arith.constant 2.001950e-01 : bf16
    %56 = vector.broadcast %cst_35 : bf16 to vector<512x256xbf16>
    %57 = arith.mulf %56, %53 : vector<512x256xbf16>
    %58 = arith.select %55, %53, %57 : vector<512x256xi1>, vector<512x256xbf16>
    %c0_36 = arith.constant 0 : index
    %c0_37 = arith.constant 0 : index
    %59 = vector.load %arg13[%c0_36, %c0_37] : memref<256x256xbf16, #tpu.memory_space<vmem>>, vector<256x256xbf16>
    %cst_38 = arith.constant dense<0.000000e+00> : vector<512x256xf32>
    %60 = tpu.matmul %58, %59, %cst_38 {dimension_numbers = #tpu.dot_dimension_numbers<[1], [0], [0], [1], [0, 0, 1, 1], [], []>} : vector<512x256xbf16>, vector<256x256xbf16>, vector<512x256xf32> -> vector<512x256xf32>
    %c0_39 = arith.constant 0 : index
    %c0_40 = arith.constant 0 : index
    %61 = vector.load %arg14[%c0_39, %c0_40] : memref<1x256xf32, #tpu.memory_space<vmem>>, vector<1x256xf32>
    %62 = vector.broadcast %61 : vector<1x256xf32> to vector<512x256xf32>
    %63 = arith.addf %60, %62 : vector<512x256xf32>
    %64 = arith.negf %63 : vector<512x256xf32>
    %65 = math.exp %64 : vector<512x256xf32>
    %cst_41 = arith.constant 1.000000e+00 : f32
    %66 = vector.broadcast %cst_41 : f32 to vector<512x256xf32>
    %67 = arith.addf %66, %65 : vector<512x256xf32>
    %68 = arith.divf %66, %67 : vector<512x256xf32>
    %c0_42 = arith.constant 0 : index
    %c0_43 = arith.constant 0 : index
    %69 = vector.load %arg15[%c0_42, %c0_43] : memref<512x256xf32, #tpu.memory_space<vmem>>, vector<512x256xf32>
    tpu.vector_store %arg15[%c0_42, %c0_43], %68 {strides = array<i32>} : memref<512x256xf32, #tpu.memory_space<vmem>>, vector<512x256xf32>,
    %c0_44 = arith.constant 0 : index
    %c0_45 = arith.constant 0 : index
    %70 = vector.load %arg16[%c0_44, %c0_45] : memref<512x256xf32, #tpu.memory_space<vmem>>, vector<512x256xf32>
    tpu.vector_store %arg16[%c0_44, %c0_45], %27 {strides = array<i32>} : memref<512x256xf32, #tpu.memory_space<vmem>>, vector<512x256xf32>,
    return
  }
  func.func @transform_0(%arg0: i32) -> (i32, i32) {
    %c0_i32 = arith.constant 0 : i32
    %c0_i32_0 = arith.constant 0 : i32
    return %arg0, %c0_i32 : i32, i32
  }
  func.func @transform_1(%arg0: i32) -> (i32, i32) {
    %c0_i32 = arith.constant 0 : i32
    %c0_i32_0 = arith.constant 0 : i32
    return %arg0, %c0_i32 : i32, i32
  }
  func.func @transform_2(%arg0: i32) -> (i32, i32) {
    %c0_i32 = arith.constant 0 : i32
    %c0_i32_0 = arith.constant 0 : i32
    %c0_i32_1 = arith.constant 0 : i32
    return %c0_i32, %c0_i32_0 : i32, i32
  }
  func.func @transform_3(%arg0: i32) -> (i32, i32) {
    %c0_i32 = arith.constant 0 : i32
    %c0_i32_0 = arith.constant 0 : i32
    %c0_i32_1 = arith.constant 0 : i32
    return %c0_i32, %c0_i32_0 : i32, i32
  }
  func.func @transform_4(%arg0: i32) -> (i32, i32) {
    %c0_i32 = arith.constant 0 : i32
    %c0_i32_0 = arith.constant 0 : i32
    %c0_i32_1 = arith.constant 0 : i32
    return %c0_i32, %c0_i32_0 : i32, i32
  }
  func.func @transform_5(%arg0: i32) -> (i32, i32) {
    %c0_i32 = arith.constant 0 : i32
    %c0_i32_0 = arith.constant 0 : i32
    %c0_i32_1 = arith.constant 0 : i32
    return %c0_i32, %c0_i32_0 : i32, i32
  }
  func.func @transform_6(%arg0: i32) -> (i32, i32) {
    %c0_i32 = arith.constant 0 : i32
    %c0_i32_0 = arith.constant 0 : i32
    %c0_i32_1 = arith.constant 0 : i32
    return %c0_i32, %c0_i32_0 : i32, i32
  }
  func.func @transform_7(%arg0: i32) -> (i32, i32) {
    %c0_i32 = arith.constant 0 : i32
    %c0_i32_0 = arith.constant 0 : i32
    %c0_i32_1 = arith.constant 0 : i32
    return %c0_i32, %c0_i32_0 : i32, i32
  }
  func.func @transform_8(%arg0: i32) -> (i32, i32) {
    %c0_i32 = arith.constant 0 : i32
    %c0_i32_0 = arith.constant 0 : i32
    %c0_i32_1 = arith.constant 0 : i32
    return %c0_i32, %c0_i32_0 : i32, i32
  }
  func.func @transform_9(%arg0: i32) -> (i32, i32) {
    %c0_i32 = arith.constant 0 : i32
    %c0_i32_0 = arith.constant 0 : i32
    %c0_i32_1 = arith.constant 0 : i32
    return %c0_i32, %c0_i32_0 : i32, i32
  }
  func.func @transform_10(%arg0: i32) -> (i32, i32) {
    %c0_i32 = arith.constant 0 : i32
    %c0_i32_0 = arith.constant 0 : i32
    %c0_i32_1 = arith.constant 0 : i32
    return %c0_i32, %c0_i32_0 : i32, i32
  }
  func.func @transform_11(%arg0: i32) -> (i32, i32) {
    %c0_i32 = arith.constant 0 : i32
    %c0_i32_0 = arith.constant 0 : i32
    %c0_i32_1 = arith.constant 0 : i32
    return %c0_i32, %c0_i32_0 : i32, i32
  }
  func.func @transform_12(%arg0: i32) -> (i32, i32) {
    %c0_i32 = arith.constant 0 : i32
    %c0_i32_0 = arith.constant 0 : i32
    %c0_i32_1 = arith.constant 0 : i32
    return %c0_i32, %c0_i32_0 : i32, i32
  }
  func.func @transform_13(%arg0: i32) -> (i32, i32) {
    %c0_i32 = arith.constant 0 : i32
    %c0_i32_0 = arith.constant 0 : i32
    %c0_i32_1 = arith.constant 0 : i32
    return %c0_i32, %c0_i32_0 : i32, i32
  }
  func.func @transform_14(%arg0: i32) -> (i32, i32) {
    %c0_i32 = arith.constant 0 : i32
    %c0_i32_0 = arith.constant 0 : i32
    return %arg0, %c0_i32 : i32, i32
  }
  func.func @transform_15(%arg0: i32) -> (i32, i32) {
    %c0_i32 = arith.constant 0 : i32
    %c0_i32_0 = arith.constant 0 : i32
    return %arg0, %c0_i32 : i32, i32
  }
}

</mosaic_0001>

<bundles_post_ra>
// kernel: tpu_custom_call.1
= control target key start
LH: loop header
LB: loop body
LE: loop exit
PB: predicated region body
PF: predicated region fallthrough
CT: control target
= control target key end

     0   :  { %s11529_s0 = inlined_call_operand.hbm [shape: bf16[2048,256], index: 0, kind: input, shape index: {}]   ;;  %s11530_s1 = inlined_call_operand.hbm [shape: f32[2048,128], index: 1, kind: input, shape index: {}]   ;;  %s11531_s2 = inlined_call_operand.hbm [shape: bf16[256,256], index: 2, kind: input, shape index: {}]   ;;  %s11532_s3 = inlined_call_operand.hbm [shape: bf16[1,256], index: 3, kind: input, shape index: {}]   ;;  %s11533_s4 = inlined_call_operand.hbm [shape: bf16[256,256], index: 4, kind: input, shape index: {}]   ;;  %s11534_s5 = inlined_call_operand.hbm [shape: bf16[1,256], index: 5, kind: input, shape index: {}]   ;;  %s11535_s6 = inlined_call_operand.hbm [shape: bf16[256,256], index: 6, kind: input, shape index: {}]   ;;  %s11536_s7 = inlined_call_operand.hbm [shape: f32[1,256], index: 7, kind: input, shape index: {}]   ;;  %s11537_s8 = inlined_call_operand.hbm [shape: bf16[128,256], index: 8, kind: input, shape index: {}]   ;;  %s11538_s9 = inlined_call_operand.hbm [shape: bf16[1,256], index: 9, kind: input, shape index: {}]   ;;  %s11539_s10 = inlined_call_operand.hbm [shape: bf16[256,256], index: 10, kind: input, shape index: {}]   ;;  %s11540_s11 = inlined_call_operand.hbm [shape: bf16[1,256], index: 11, kind: input, shape index: {}]   ;;  %s11541_s12 = inlined_call_operand.hbm [shape: bf16[256,256], index: 12, kind: input, shape index: {}]   ;;  %s11542_s13 = inlined_call_operand.hbm [shape: f32[1,256], index: 13, kind: input, shape index: {}]   ;;  %s11543_s14 = inlined_call_operand.hbm [shape: f32[2048,256], index: 14, kind: output, shape index: {0}]   ;;  %s11544_s15 = inlined_call_operand.hbm [shape: f32[2048,256], index: 15, kind: output, shape index: {1}]  }
   0x1   :  { %11560 = sst [smem:[#allocation42_spill]] %s11529_s0 }
   0x2   :  { %11561 = sst [smem:[#allocation43_spill]] %s11530_s1 }
   0x3   :  { %11562 = sst [smem:[#allocation44_spill]] %s11531_s2 }
   0x4   :  { %11563 = sst [smem:[#allocation45_spill]] %s11532_s3 }
   0x5   :  { %11564 = sst [smem:[#allocation46_spill]] %s11533_s4 }
   0x6   :  { %11565 = sst [smem:[#allocation47_spill]] %s11534_s5 }
   0x7   :  { %11566 = sst [smem:[#allocation48_spill]] %s11535_s6 }
   0x8   :  { %11567 = sst [smem:[#allocation49_spill]] %s11536_s7 }
   0x9   :  { %11568 = sst [smem:[#allocation50_spill]] %s11537_s8 }
   0xa   :  { %11569 = sst [smem:[#allocation51_spill]] %s11543_s14 }
   0xb   :  { %11570 = sst [smem:[#allocation52_spill]] %s11544_s15 }
   0xc   :  { %21 = vsyncpa [#allocation3], 0 }
   0xd   :  { %23 = vsyncpa [#allocation3 + $0x1], 0 }
   0xe   :  { %24 = vsyncpa [#allocation6], 0 }
   0xf   :  { %26 = vsyncpa [#allocation6 + $0x1], 0 }
  0x10   :  { %27 = vsyncpa [#allocation9], 0 }
  0x11   :  { %28 = vsyncpa [#allocation12], 0 }
  0x12   :  { %29 = vsyncpa [#allocation15], 0 }
  0x13   :  { %30 = vsyncpa [#allocation18], 0 }
  0x14   :  { %31 = vsyncpa [#allocation21], 0 }
  0x15   :  { %32 = vsyncpa [#allocation24], 0 }
  0x16   :  { %33 = vsyncpa [#allocation4], 0 }
  0x17   :  { %35 = vsyncpa [#allocation4 + $0x1], 0 }
  0x18   :  { %36 = vsyncpa [#allocation27], 0 }
  0x19   :  { %38 = vsyncpa [#allocation27 + $0x1], 0  ;;  %s9707_s18 = smov 0   ;;  %s9709_s19 = smov 0  }
  0x1a   :  { %s9711_s20 = smov 0   ;;  %s9713_s21 = smov 0  }
  0x1b LB: > { %11571 = sst [smem:[#allocation39_spill]] %s9591_s18  ;;  %s9605_s22 = smov [#allocation7]   ;;  %s9603_s21 = sphi %s9713_s21, %s11621_s21   ;;  %s9599_s20 = sphi %s9711_s20, %s11620_s20   ;;  %s9595_s19 = sphi %s9709_s19, %s11619_s19   ;;  %s9591_s18 = sphi %s9707_s18, %s11618_s18  }
  0x1c   : > { %s417_s23 = sshll.u32 %s9605_s22, 4  ;;  %s9728_s24 = sadd.s32 4294967295, %s9603_s21   ;;  %s9733_s23 = int_to_ptr.vmem [resolvable:$true] %s417_s23 }
  0x1d   : > { %11572 = sst [smem:[#allocation40_spill]] %s9728_s24  ;;  %p7467_p0 = scmp.ge.s32.totalorder %s9603_s21, 1 }
  0x1e   : > { %p11555_p1 = scmp.eq.s32.totalorder %s9728_s24, 0  ;;  %p405_p2 = scmp.lt.s32.totalorder %s9603_s21, 5 }
  0x1f   : > { %s9606_s26 = smov [#allocation8]   ;;  %s9607_s29 = smov [#allocation11]  }
  0x20   : > { %p9735_p3 = pnand %p7467_p0, %p405_p2  ;;  %s431_s27 = sshll.u32 %s9606_s26, 4  ;;  %s9747_s27 = int_to_ptr.vmem [resolvable:$true] %s431_s27 }
  0x21   : > { %s455_s30 = sshll.u32 %s9607_s29, 4  ;;  %s11576_s2 = sld [smem:[#allocation44_spill]]  ;;  %s9749_s30 = int_to_ptr.vmem [resolvable:$true] %s455_s30 }
  0x22   : > { %s11573_s25 = scalar_select %p9735_p3, 1, 0 }
  0x23   : > { %p7950_p4 = pneg %p9735_p3 }
  0x24   : > { %11574 = sst [smem:[#allocation41_spill]] %s11573_s25 }
  0x25   : > { %p9743_p5 = pnand %p7950_p4, %p11555_p1 }
  0x27   : > { %s9077_s22 = scalar_lea.hbm %s11576_s2, 4096  ;;  %p9759_p7 = pneg %p9743_p5 }
  0x28   : > { %p9078_p6 = scmp.ne.s32.totalorder %s11576_s2, %s9077_s22  ;;  %p9084_p10 = scmp.lt.u32.totalorder %s9077_s22, %s11576_s2 }
  0x2a   : > { %p9080_p8 = pnand %p9759_p7, %p9078_p6 }
  0x2c   : > { %p9081_p9 = pneg %p9080_p8 }
  0x2e   : > { %p9086_p11 = pnand %p9084_p10, %p9081_p9 }
  0x30   : > { %9089 = shalt.err (!%p9086_p11)
}
  0x31   : > { %s9090_s14 = scalar_lea.vmem %s9733_s23, 4096  ;;  %p9098_p2 = scmp.lt.s32.totalorder %s9733_s23, %s9733_s23 }
  0x32   : > { %p9091_p12 = scmp.ne.s32.totalorder %s9733_s23, %s9090_s14  ;;  %p9099_p4 = scmp.lt.s32.totalorder %s9090_s14, %s9090_s14 }
  0x34   : > { %p9093_p13 = pnand %p9091_p12, %p9759_p7  ;;  %p9100_p6 = por %p9099_p4, %p9098_p2 }
  0x36   : > { %p9094_p0 = pneg %p9093_p13 }
  0x38   : > { %p9101_p8 = pnand %p9100_p6, %p9094_p0 }
  0x3a   : > { %9104 = shalt.err (!%p9101_p8)
}
  0x3b   : > { %s11553_s15 = smov 128   ;;  %s11557_s25 = smov 8  }
  0x3c   : > { %7953 = dma.hbm_to_vmem [thread:$0]  (!%p9743_p5), %s11576_s2, 4096, %s9733_s23, [#allocation6], %s11553_s15, %s11553_s15, %s11557_s25  }
  0x3d   : > { %s11578_s3 = sld [smem:[#allocation45_spill]] }
  0x43   : > { %s9105_s14 = scalar_lea.hbm %s11578_s3, 32 }
  0x44   : > { %p9106_p9 = scmp.ne.s32.totalorder %s11578_s3, %s9105_s14  ;;  %p9112_p12 = scmp.lt.u32.totalorder %s9105_s14, %s11578_s3 }
  0x46   : > { %p9108_p10 = pnand %p9106_p9, %p9759_p7 }
  0x48   : > { %p9109_p11 = pneg %p9108_p10 }
  0x4a   : > { %p9114_p13 = pnand %p9112_p12, %p9109_p11 }
  0x4c   : > { %9117 = shalt.err (!%p9114_p13)
}
  0x4d   : > { %s9118_s23 = scalar_lea.vmem %s9747_s27, 32  ;;  %p9126_p6 = scmp.lt.s32.totalorder %s9747_s27, %s9747_s27 }
  0x4e   : > { %p9119_p0 = scmp.ne.s32.totalorder %s9747_s27, %s9118_s23  ;;  %p9127_p8 = scmp.lt.s32.totalorder %s9118_s23, %s9118_s23 }
  0x50   : > { %p9121_p2 = pnand %p9119_p0, %p9759_p7  ;;  %p9128_p9 = por %p9127_p8, %p9126_p6 }
  0x52   : > { %p9122_p4 = pneg %p9121_p2 }
  0x54   : > { %p9129_p10 = pnand %p9128_p9, %p9122_p4 }
  0x56   : > { %9132 = shalt.err (!%p9129_p10)
}
  0x57   : > { %7956 = dma.hbm_to_vmem [thread:$0]  (!%p9743_p5), %s11578_s3, 32, %s9747_s27, [#allocation9]  }
  0x58   : > { %s11579_s5 = sld [smem:[#allocation47_spill]] }
  0x5e   : > { %s9133_s16 = scalar_lea.hbm %s11579_s5, 32 }
  0x5f   : > { %p9134_p11 = scmp.ne.s32.totalorder %s11579_s5, %s9133_s16  ;;  %p9140_p0 = scmp.lt.u32.totalorder %s9133_s16, %s11579_s5 }
  0x61   : > { %p9136_p12 = pnand %p9134_p11, %p9759_p7 }
  0x63   : > { %p9137_p13 = pneg %p9136_p12 }
  0x65   : > { %p9142_p2 = pnand %p9140_p0, %p9137_p13 }
  0x67   : > { %9145 = shalt.err (!%p9142_p2)
}
  0x68   : > { %s9146_s27 = scalar_lea.vmem %s9749_s30, 32  ;;  %p9154_p9 = scmp.lt.s32.totalorder %s9749_s30, %s9749_s30 }
  0x69   : > { %p9147_p4 = scmp.ne.s32.totalorder %s9749_s30, %s9146_s27  ;;  %p9155_p10 = scmp.lt.s32.totalorder %s9146_s27, %s9146_s27 }
  0x6b   : > { %p9149_p6 = pnand %p9147_p4, %p9759_p7  ;;  %p9156_p11 = por %p9155_p10, %p9154_p9 }
  0x6d   : > { %p9150_p8 = pneg %p9149_p6 }
  0x6f   : > { %p9157_p12 = pnand %p9156_p11, %p9150_p8 }
  0x71   : > { %9160 = shalt.err (!%p9157_p12)
}
  0x72   : > { %7962 = dma.hbm_to_vmem [thread:$0]  (!%p9743_p5), %s11579_s5, 32, %s9749_s30, [#allocation12]  }
  0x73   : > { %s9610_s1 = smov [#allocation14]   ;;  %s9611_s24 = smov [#allocation17]  }
  0x74   : > { %s479_s18 = sshll.u32 %s9610_s1, 4  ;;  %s503_s16 = sshll.u32 %s9611_s24, 4  ;;  %s480_s18 = int_to_ptr.vmem [resolvable:$true] %s479_s18  ;;  %s504_s16 = int_to_ptr.vmem [resolvable:$true] %s503_s16 }
  0x75   : > { %s11580_s7 = sld [smem:[#allocation49_spill]] }
  0x7b   : > { %s9161_s29 = scalar_lea.hbm %s11580_s7, 32 }
  0x7c   : > { %p9162_p13 = scmp.ne.s32.totalorder %s11580_s7, %s9161_s29  ;;  %p9168_p4 = scmp.lt.u32.totalorder %s9161_s29, %s11580_s7 }
  0x7e   : > { %p9164_p0 = pnand %p9162_p13, %p9759_p7 }
  0x80   : > { %p9165_p2 = pneg %p9164_p0 }
  0x82   : > { %p9170_p6 = pnand %p9168_p4, %p9165_p2 }
  0x84   : > { %9173 = shalt.err (!%p9170_p6)
}
  0x85   : > { %s9174_s30 = scalar_lea.vmem %s480_s18, 32  ;;  %p9182_p11 = scmp.lt.s32.totalorder %s480_s18, %s480_s18 }
  0x86   : > { %p9175_p8 = scmp.ne.s32.totalorder %s480_s18, %s9174_s30  ;;  %p9183_p12 = scmp.lt.s32.totalorder %s9174_s30, %s9174_s30 }
  0x88   : > { %p9177_p9 = pnand %p9175_p8, %p9759_p7  ;;  %p9184_p1 = por %p9183_p12, %p9182_p11 }
  0x8a   : > { %p9178_p10 = pneg %p9177_p9 }
  0x8c   : > { %p9185_p3 = pnand %p9184_p1, %p9178_p10 }
  0x8e   : > { %9188 = shalt.err (!%p9185_p3)
}
  0x8f   : > { %7968 = dma.hbm_to_vmem [thread:$0]  (!%p9743_p5), %s11580_s7, 32, %s480_s18, [#allocation15]  }
  0x90   : > { %s9189_s17 = scalar_lea.hbm %s11538_s9, 32 }
  0x91   : > { %p9190_p13 = scmp.ne.s32.totalorder %s11538_s9, %s9189_s17  ;;  %p9196_p3 = scmp.lt.u32.totalorder %s9189_s17, %s11538_s9 }
  0x93   : > { %p9192_p0 = pnand %p9190_p13, %p9759_p7 }
  0x95   : > { %p9193_p1 = pneg %p9192_p0 }
  0x97   : > { %p9198_p2 = pnand %p9196_p3, %p9193_p1 }
  0x99   : > { %9201 = shalt.err (!%p9198_p2)
}
  0x9a   : > { %s9202_s23 = scalar_lea.vmem %s504_s16, 32  ;;  %p9210_p9 = scmp.lt.s32.totalorder %s504_s16, %s504_s16 }
  0x9b   : > { %p9203_p4 = scmp.ne.s32.totalorder %s504_s16, %s9202_s23  ;;  %p9211_p10 = scmp.lt.s32.totalorder %s9202_s23, %s9202_s23 }
  0x9d   : > { %p9205_p6 = pnand %p9203_p4, %p9759_p7  ;;  %p9212_p11 = por %p9211_p10, %p9210_p9 }
  0x9f   : > { %p9206_p8 = pneg %p9205_p6 }
  0xa1   : > { %p9213_p12 = pnand %p9212_p11, %p9206_p8 }
  0xa3   : > { %9216 = shalt.err (!%p9213_p12)
}
  0xa4   : > { %7974 = dma.hbm_to_vmem [thread:$0]  (!%p9743_p5), %s11538_s9, 32, %s504_s16, [#allocation18]  }
  0xa5   : > { %s9612_s0 = smov [#allocation20]   ;;  %s9613_s15 = smov [#allocation10]  }
  0xa6   : > { %s527_s1 = sshll.u32 %s9612_s0, 4  ;;  %s441_s24 = sshll.u32 %s9613_s15, 4  ;;  %s528_s1 = int_to_ptr.vmem [resolvable:$true] %s527_s1  ;;  %s442_s24 = int_to_ptr.vmem [resolvable:$true] %s441_s24 }
  0xa7   : > { %s9217_s29 = scalar_lea.hbm %s11540_s11, 32 }
  0xa8   : > { %p9218_p13 = scmp.ne.s32.totalorder %s11540_s11, %s9217_s29  ;;  %p9224_p3 = scmp.lt.u32.totalorder %s9217_s29, %s11540_s11 }
  0xaa   : > { %p9220_p0 = pnand %p9218_p13, %p9759_p7 }
  0xac   : > { %p9221_p1 = pneg %p9220_p0 }
  0xae   : > { %p9226_p2 = pnand %p9224_p3, %p9221_p1 }
  0xb0   : > { %9229 = shalt.err (!%p9226_p2)
}
  0xb1   : > { %s9230_s16 = scalar_lea.vmem %s528_s1, 32  ;;  %p9238_p9 = scmp.lt.s32.totalorder %s528_s1, %s528_s1 }
  0xb2   : > { %p9231_p4 = scmp.ne.s32.totalorder %s528_s1, %s9230_s16  ;;  %p9239_p10 = scmp.lt.s32.totalorder %s9230_s16, %s9230_s16 }
  0xb4   : > { %p9233_p6 = pnand %p9231_p4, %p9759_p7  ;;  %p9240_p11 = por %p9239_p10, %p9238_p9 }
  0xb6   : > { %p9234_p8 = pneg %p9233_p6 }
  0xb8   : > { %p9241_p12 = pnand %p9240_p11, %p9234_p8 }
  0xba   : > { %9244 = shalt.err (!%p9241_p12)
}
  0xbb   : > { %7980 = dma.hbm_to_vmem [thread:$0]  (!%p9743_p5), %s11540_s11, 32, %s528_s1, [#allocation21]  }
  0xbc   : > { %s11581_s4 = sld [smem:[#allocation46_spill]] }
  0xc2   : > { %s9245_s22 = scalar_lea.hbm %s11581_s4, 4096 }
  0xc3   : > { %p9246_p13 = scmp.ne.s32.totalorder %s11581_s4, %s9245_s22  ;;  %p9252_p3 = scmp.lt.u32.totalorder %s9245_s22, %s11581_s4 }
  0xc5   : > { %p9248_p0 = pnand %p9246_p13, %p9759_p7 }
  0xc7   : > { %p9249_p1 = pneg %p9248_p0 }
  0xc9   : > { %p9254_p2 = pnand %p9252_p3, %p9249_p1 }
  0xcb   : > { %9257 = shalt.err (!%p9254_p2)
}
  0xcc   : > { %s9258_s18 = scalar_lea.vmem %s442_s24, 4096  ;;  %p9266_p9 = scmp.lt.s32.totalorder %s442_s24, %s442_s24 }
  0xcd   : > { %p9259_p4 = scmp.ne.s32.totalorder %s442_s24, %s9258_s18  ;;  %p9267_p10 = scmp.lt.s32.totalorder %s9258_s18, %s9258_s18 }
  0xcf   : > { %p9261_p6 = pnand %p9259_p4, %p9759_p7  ;;  %p9268_p11 = por %p9267_p10, %p9266_p9 }
  0xd1   : > { %p9262_p8 = pneg %p9261_p6 }
  0xd3   : > { %p9269_p12 = pnand %p9268_p11, %p9262_p8 }
  0xd5   : > { %9272 = shalt.err (!%p9269_p12)
}
  0xd6   : > { %s11582_s1 = smov 128   ;;  %s9614_s0 = smov [#allocation13]  }
  0xd7   : > { %7959 = dma.hbm_to_vmem [thread:$0]  (!%p9743_p5), %s11581_s4, 4096, %s442_s24, [#allocation9], %s11582_s1, %s11582_s1, %s11557_s25  }
  0xd8   : > { %s465_s15 = sshll.u32 %s9614_s0, 4  ;;  %s9615_s17 = smov [#allocation16]   ;;  %s466_s15 = int_to_ptr.vmem [resolvable:$true] %s465_s15 }
  0xd9   : > { %s489_s22 = sshll.u32 %s9615_s17, 4  ;;  %s11583_s6 = sld [smem:[#allocation48_spill]]  ;;  %s490_s22 = int_to_ptr.vmem [resolvable:$true] %s489_s22 }
  0xdf   : > { %s9273_s27 = scalar_lea.hbm %s11583_s6, 4096 }
  0xe0   : > { %p9274_p13 = scmp.ne.s32.totalorder %s11583_s6, %s9273_s27  ;;  %p9280_p3 = scmp.lt.u32.totalorder %s9273_s27, %s11583_s6 }
  0xe2   : > { %p9276_p0 = pnand %p9274_p13, %p9759_p7 }
  0xe4   : > { %p9277_p1 = pneg %p9276_p0 }
  0xe6   : > { %p9282_p2 = pnand %p9280_p3, %p9277_p1 }
  0xe8   : > { %9285 = shalt.err (!%p9282_p2)
}
  0xe9   : > { %s9286_s24 = scalar_lea.vmem %s466_s15, 4096  ;;  %p9294_p9 = scmp.lt.s32.totalorder %s466_s15, %s466_s15 }
  0xea   : > { %p9287_p4 = scmp.ne.s32.totalorder %s466_s15, %s9286_s24  ;;  %p9295_p10 = scmp.lt.s32.totalorder %s9286_s24, %s9286_s24 }
  0xec   : > { %p9289_p6 = pnand %p9287_p4, %p9759_p7  ;;  %p9296_p11 = por %p9295_p10, %p9294_p9 }
  0xee   : > { %p9290_p8 = pneg %p9289_p6 }
  0xf0   : > { %p9297_p12 = pnand %p9296_p11, %p9290_p8 }
  0xf2   : > { %9300 = shalt.err (!%p9297_p12)
}
  0xf3   : > { %7965 = dma.hbm_to_vmem [thread:$0]  (!%p9743_p5), %s11583_s6, 4096, %s466_s15, [#allocation12], %s11582_s1, %s11582_s1, %s11557_s25  }
  0xf4   : > { %s11584_s8 = sld [smem:[#allocation50_spill]] }
  0xfa   : > { %s9301_s29 = scalar_lea.hbm %s11584_s8, 2048 }
  0xfb   : > { %p9302_p13 = scmp.ne.s32.totalorder %s11584_s8, %s9301_s29  ;;  %p9308_p3 = scmp.lt.u32.totalorder %s9301_s29, %s11584_s8 }
  0xfd   : > { %p9304_p0 = pnand %p9302_p13, %p9759_p7 }
  0xff   : > { %p9305_p1 = pneg %p9304_p0 }
 0x101   : > { %p9310_p2 = pnand %p9308_p3, %p9305_p1 }
 0x103   : > { %9313 = shalt.err (!%p9310_p2)
}
 0x104   : > { %s9314_s16 = scalar_lea.vmem %s490_s22, 2048  ;;  %p9322_p9 = scmp.lt.s32.totalorder %s490_s22, %s490_s22 }
 0x105   : > { %p9315_p4 = scmp.ne.s32.totalorder %s490_s22, %s9314_s16  ;;  %p9323_p10 = scmp.lt.s32.totalorder %s9314_s16, %s9314_s16 }
 0x107   : > { %p9317_p6 = pnand %p9315_p4, %p9759_p7  ;;  %p9324_p11 = por %p9323_p10, %p9322_p9 }
 0x109   : > { %p9318_p8 = pneg %p9317_p6 }
 0x10b   : > { %p9325_p12 = pnand %p9324_p11, %p9318_p8 }
 0x10d   : > { %9328 = shalt.err (!%p9325_p12)
}
 0x10e   : > { %7971 = dma.hbm_to_vmem [thread:$0]  (!%p9743_p5), %s11584_s8, 2048, %s490_s22, [#allocation15], %s11582_s1, %s11582_s1, %s11557_s25  }
 0x10f   : > { %s9616_s2 = smov [#allocation19]   ;;  %s9617_s0 = smov [#allocation22]  }
 0x110   : > { %s513_s30 = sshll.u32 %s9616_s2, 4  ;;  %s537_s17 = sshll.u32 %s9617_s0, 4  ;;  %s514_s30 = int_to_ptr.vmem [resolvable:$true] %s513_s30  ;;  %s538_s17 = int_to_ptr.vmem [resolvable:$true] %s537_s17 }
 0x111   : > { %s9329_s27 = scalar_lea.hbm %s11539_s10, 4096 }
 0x112   : > { %p9330_p13 = scmp.ne.s32.totalorder %s11539_s10, %s9329_s27  ;;  %p9336_p3 = scmp.lt.u32.totalorder %s9329_s27, %s11539_s10 }
 0x114   : > { %p9332_p0 = pnand %p9330_p13, %p9759_p7 }
 0x116   : > { %p9333_p1 = pneg %p9332_p0 }
 0x118   : > { %p9338_p2 = pnand %p9336_p3, %p9333_p1 }
 0x11a   : > { %9341 = shalt.err (!%p9338_p2)
}
 0x11b   : > { %s9342_s22 = scalar_lea.vmem %s514_s30, 4096  ;;  %p9350_p9 = scmp.lt.s32.totalorder %s514_s30, %s514_s30 }
 0x11c   : > { %p9343_p4 = scmp.ne.s32.totalorder %s514_s30, %s9342_s22  ;;  %p9351_p10 = scmp.lt.s32.totalorder %s9342_s22, %s9342_s22 }
 0x11e   : > { %p9345_p6 = pnand %p9343_p4, %p9759_p7  ;;  %p9352_p11 = por %p9351_p10, %p9350_p9 }
 0x120   : > { %p9346_p8 = pneg %p9345_p6 }
 0x122   : > { %p9353_p12 = pnand %p9352_p11, %p9346_p8 }
 0x124   : > { %9356 = shalt.err (!%p9353_p12)
}
 0x125   : > { %7977 = dma.hbm_to_vmem [thread:$0]  (!%p9743_p5), %s11539_s10, 4096, %s514_s30, [#allocation18], %s11582_s1, %s11582_s1, %s11557_s25  }
 0x126   : > { %s9357_s14 = scalar_lea.hbm %s11541_s12, 4096 }
 0x127   : > { %p9358_p13 = scmp.ne.s32.totalorder %s11541_s12, %s9357_s14  ;;  %p9364_p3 = scmp.lt.u32.totalorder %s9357_s14, %s11541_s12 }
 0x129   : > { %p9360_p0 = pnand %p9358_p13, %p9759_p7 }
 0x12b   : > { %p9361_p1 = pneg %p9360_p0 }
 0x12d   : > { %p9366_p2 = pnand %p9364_p3, %p9361_p1 }
 0x12f   : > { %9369 = shalt.err (!%p9366_p2)
}
 0x130   : > { %s9370_s15 = scalar_lea.vmem %s538_s17, 4096  ;;  %p9378_p9 = scmp.lt.s32.totalorder %s538_s17, %s538_s17 }
 0x131   : > { %p9371_p4 = scmp.ne.s32.totalorder %s538_s17, %s9370_s15  ;;  %p9379_p10 = scmp.lt.s32.totalorder %s9370_s15, %s9370_s15 }
 0x133   : > { %p9373_p6 = pnand %p9371_p4, %p9759_p7  ;;  %p9380_p11 = por %p9379_p10, %p9378_p9 }
 0x135   : > { %p9374_p8 = pneg %p9373_p6 }
 0x137   : > { %p9381_p12 = pnand %p9380_p11, %p9374_p8 }
 0x139   : > { %9384 = shalt.err (!%p9381_p12)
}
 0x13a   : > { %7983 = dma.hbm_to_vmem [thread:$0]  (!%p9743_p5), %s11541_s12, 4096, %s538_s17, [#allocation21], %s11582_s1, %s11582_s1, %s11557_s25  }
 0x13b   : > { %s9618_s24 = smov [#allocation23]   ;;  %s9385_s14 = scalar_lea.hbm %s11542_s13, 32 }
 0x13c   : > { %s551_s2 = sshll.u32 %s9618_s24, 4  ;;  %p9386_p13 = scmp.ne.s32.totalorder %s11542_s13, %s9385_s14  ;;  %s552_s2 = int_to_ptr.vmem [resolvable:$true] %s551_s2 }
 0x13d   : > { %p9392_p3 = scmp.lt.u32.totalorder %s9385_s14, %s11542_s13 }
 0x13e   : > { %p9388_p0 = pnand %p9386_p13, %p9759_p7 }
 0x140   : > { %p9389_p1 = pneg %p9388_p0 }
 0x142   : > { %p9394_p2 = pnand %p9392_p3, %p9389_p1 }
 0x144   : > { %9397 = shalt.err (!%p9394_p2)
}
 0x145   : > { %s9398_s17 = scalar_lea.vmem %s552_s2, 32  ;;  %p9406_p9 = scmp.lt.s32.totalorder %s552_s2, %s552_s2 }
 0x146   : > { %p9399_p4 = scmp.ne.s32.totalorder %s552_s2, %s9398_s17  ;;  %p9407_p10 = scmp.lt.s32.totalorder %s9398_s17, %s9398_s17 }
 0x148   : > { %p9401_p6 = pnand %p9399_p4, %p9759_p7  ;;  %p9408_p11 = por %p9407_p10, %p9406_p9 }
 0x14a   : > { %p9402_p8 = pneg %p9401_p6 }
 0x14c   : > { %p9409_p12 = pnand %p9408_p11, %p9402_p8 }
 0x14e   : > { %9412 = shalt.err (!%p9409_p12)
}
 0x14f   : > { %s11585_s26 = sld [smem:[#allocation39_spill]]  ;;  %s11586_s22 = sld [smem:[#allocation40_spill]] }
 0x150   : > { %7986 = dma.hbm_to_vmem [thread:$0]  (!%p9743_p5), %s11542_s13, 32, %s552_s2, [#allocation24]  }
 0x151   : > { %s7466_s24 = sadd.s32 4294967294, %s9603_s21   ;;  %s10008_s28 = sadd.s32 1, %s9603_s21  }
 0x152   : > { %s48_s0 = ssub.s32 %s9603_s21, %s10008_s28  ;;  %s51_s29 = sadd.s32 1, %s9599_s20 }
 0x153   : > { %p49_p7 = scmp.eq.s32.totalorder %s48_s0, 0  ;;  %p58_p13 = scmp.ne.s32.totalorder %s9599_s20, %s9595_s19 }
 0x154   : > { %p59_p0 = scmp.eq.s32.totalorder %s9603_s21, 0  ;;  %p372_p6 = scmp.eq.s32.totalorder %s7466_s24, 3 }
 0x155   : > { %p64_p1 = scmp.ne.s32.totalorder %s9595_s19, %s11585_s26  ;;  %p11588_p2 = scmp.eq.s32.totalorder %s11586_s22, 0 }
 0x156   : > { %s10019_s14 = scalar_select %p49_p7, %s9599_s20, %s51_s29  }
 0x157   : > { %p10021_p3 = por %p59_p0, %p58_p13  ;;  %p10027_p5 = por %p11588_p2, %p64_p1 }
 0x158   : > { %p366_p4 = scmp.eq.s32.totalorder %s11586_s22, 3  ;;  %p8013_p8 = scmp.lt.s32.totalorder %s9603_s21, 4 }
 0x159   : > { %s562_s23 = sand.u32 1, %s9599_s20   ;;  %p10038_p10 = por %p372_p6, %p64_p1 }
 0x15a   : > { %p10034_p9 = por %p366_p4, %p58_p13  ;;  %s7481_s17 = sshll.u32 %s562_s23, 9 }
 0x15b   : > { %s11591_s16 = scalar_select %p10038_p10, 1, 0 }
 0x15c   : > { %s11590_s18 = scalar_select %p10034_p9, 1, 0 }
 0x15d   : > { %s7888_s15 = sshll.u32 %s9603_s21, 13  ;;  %s11592_s0 = sld [smem:[#allocation42_spill]] }
 0x15e   : > { %s566_s22 = scalar_lea.vmem [#allocation2], %s7481_s17  ;;  %p10052_p11 = pnand %p8013_p8, %p10021_p3 }
 0x15f   : > { %s574_s24 = sshll.u32 %s566_s22, 4  ;;  %s11594_s5 = sld [smem:[#allocation43_spill]]  ;;  %s10048_s24 = int_to_ptr.vmem [resolvable:$true] %s574_s24 }
 0x160   : > { %s588_s26 = scalar_lea.vmem [#allocation5], %s7481_s17  ;;  %s10063_s7 = scalar_lea.sflag [#allocation3], %s562_s23 }
 0x161   : > { %s10061_s6 = sshll.u32 %s588_s26, 4  ;;  %p9415_p7 = pneg %p10052_p11  ;;  %s10095_s6 = int_to_ptr.vmem [resolvable:$true] %s10061_s6 }
 0x163   : > { %s10046_s29 = scalar_lea.hbm %s11592_s0, %s7888_s15  ;;  %s9418_s3 = scalar_lea.hbm %s11592_s0, 32768 }
 0x164   : > { %s9413_s22 = scalar_lea.hbm %s10046_s29, 8192  ;;  %p9419_p1 = scmp.lt.u32.totalorder %s10046_s29, %s11592_s0 }
 0x165   : > { %s10059_s30 = scalar_lea.hbm %s11594_s5, %s7888_s15  ;;  %p9414_p12 = scmp.ne.s32.totalorder %s10046_s29, %s9413_s22 }
 0x166   : > { %p9420_p3 = scmp.lt.u32.totalorder %s9418_s3, %s9413_s22  ;;  %p9422_p4 = scmp.lt.u32.totalorder %s9413_s22, %s10046_s29 }
 0x167   : > { %p9416_p13 = pnand %p9415_p7, %p9414_p12 }
 0x168   : > { %p9421_p2 = por %p9420_p3, %p9419_p1 }
 0x169   : > { %p9417_p0 = pneg %p9416_p13 }
 0x16a   : > { %p9423_p6 = por %p9422_p4, %p9421_p2 }
 0x16c   : > { %p9424_p8 = pnand %p9423_p6, %p9417_p0 }
 0x16e   : > { %9427 = shalt.err (!%p9424_p8)
}
 0x16f   : > { %s9428_s23 = scalar_lea.vmem %s10048_s24, 8192  ;;  %s9619_s8 = smov [#allocation2]  }
 0x170   : > { %p9429_p12 = scmp.ne.s32.totalorder %s10048_s24, %s9428_s23  ;;  %s9433_s17 = sshll.u32 %s9619_s8, 4  ;;  %s9434_s17 = int_to_ptr.vmem [resolvable:$false] %s9433_s17 }
 0x171   : > { %s9435_s26 = scalar_lea.vmem %s9434_s17, 16384  ;;  %p9436_p9 = scmp.lt.s32.totalorder %s10048_s24, %s9434_s17 }
 0x172   : > { %p9431_p13 = pnand %p9429_p12, %p9415_p7  ;;  %p9437_p1 = scmp.lt.s32.totalorder %s9435_s26, %s9428_s23 }
 0x174   : > { %p9432_p10 = pneg %p9431_p13  ;;  %p9438_p3 = por %p9437_p1, %p9436_p9 }
 0x176   : > { %p9439_p2 = pnand %p9438_p3, %p9432_p10 }
 0x178   : > { %9442 = shalt.err (!%p9439_p2)
}
 0x179   : > { %s11595_s22 = smov 8   ;;  %s584_s27 = sand.u32 1, %s9603_s21  }
 0x17a   : > { %7990 = dma.hbm_to_vmem [thread:$0]  (!%p10052_p11), %s10046_s29, 8192, %s10048_s24, %s10063_s7, %s11582_s1, %s11582_s1, %s11595_s22  }
 0x17b   : > { %s10098_s3 = scalar_lea.sflag [#allocation6], %s584_s27  ;;  %s9443_s4 = scalar_lea.hbm %s10059_s30, 8192 }
 0x17c   : > { %p9444_p9 = scmp.ne.s32.totalorder %s10059_s30, %s9443_s4  ;;  %s9448_s8 = scalar_lea.hbm %s11594_s5, 32768 }
 0x17d   : > { %p9449_p4 = scmp.lt.u32.totalorder %s10059_s30, %s11594_s5  ;;  %p9450_p6 = scmp.lt.u32.totalorder %s9448_s8, %s9443_s4 }
 0x17e   : > { %p9446_p10 = pnand %p9444_p9, %p9415_p7  ;;  %p9452_p12 = scmp.lt.u32.totalorder %s9443_s4, %s10059_s30 }
 0x17f   : > { %p9451_p8 = por %p9450_p6, %p9449_p4 }
 0x180   : > { %p9447_p0 = pneg %p9446_p10 }
 0x181   : > { %p9453_p13 = por %p9452_p12, %p9451_p8 }
 0x183   : > { %p9454_p1 = pnand %p9453_p13, %p9447_p0 }
 0x185   : > { %9457 = shalt.err (!%p9454_p1)
}
 0x186   : > { %s9458_s7 = scalar_lea.vmem %s10095_s6, 8192  ;;  %s9620_s29 = smov [#allocation5]  }
 0x187   : > { %p9459_p3 = scmp.ne.s32.totalorder %s10095_s6, %s9458_s7  ;;  %s9463_s24 = sshll.u32 %s9620_s29, 4  ;;  %s9464_s24 = int_to_ptr.vmem [resolvable:$false] %s9463_s24 }
 0x188   : > { %s9465_s27 = scalar_lea.vmem %s9464_s24, 16384  ;;  %p9466_p10 = scmp.lt.s32.totalorder %s10095_s6, %s9464_s24 }
 0x189   : > { %p9461_p2 = pnand %p9459_p3, %p9415_p7  ;;  %p9467_p4 = scmp.lt.s32.totalorder %s9465_s27, %s9458_s7 }
 0x18b   : > { %p9462_p9 = pneg %p9461_p2  ;;  %p9468_p6 = por %p9467_p4, %p9466_p10 }
 0x18d   : > { %p9469_p8 = pnand %p9468_p6, %p9462_p9 }
 0x18f   : > { %9472 = shalt.err (!%p9469_p8)
}
 0x190   : > { %7993 = dma.hbm_to_vmem [thread:$0]  (!%p10052_p11), %s10059_s30, 8192, %s10095_s6, %s10098_s3, %s11582_s1, %s11582_s1, %s11595_s22  }
 0x191   : > { %s11596_s4 = sld [smem:[#allocation41_spill]] }
 0x197   : > { %p11597_p7 = scmp.ne.s32.totalorder %s11596_s4, 0 }
 0x198   : > { %s10130_s15 = sand.u32 (!%p11597_p7), 1, %s9595_s19  }
 0x199   : > { %607 = sbr.rel (%p11597_p7) target bundleno = 2168 (0x878), region = 76  ;;  %s7489_s23 = sshll.u32 (!%p11597_p7), %s10130_s15, 9 }
 0x19a   : > { %s610_s8 = scalar_lea.sflag (!%p11597_p7), [#allocation3], %s10130_s15  ;;  %s10134_s17 = scalar_lea.vmem (!%p11597_p7), [#allocation2], %s7489_s23 }
 0x1a0   : > { %9546 = dma.done.wait (%p10027_p5), %s610_s8, 8192  }
 0x1a1   : > { %9548 = vsyncadd (%p10027_p5), %s610_s8, 4294959104  ;;  %s11598_s25 = sld [smem:[#allocation40_spill]]  ;;  %s10141_s30 = scalar_lea.vmem [#allocation5], %s7489_s23 }
 0x1a7   : > { %s618_s6 = sand.u32 1, %s11598_s25  }
 0x1a8   : > { %s619_s1 = scalar_lea.sflag [#allocation6], %s618_s6 }
 0x1a9   : > { %9550 = dma.done.wait (%p10027_p5), %s619_s1, 8192  }
 0x1aa   : > { %9552 = vsyncadd (%p10027_p5), %s619_s1, 4294959104  ;;  %p11599_p11 = scmp.eq.s32.totalorder %s11598_s25, 0 }
 0x1ac   : > { %9554 = dma.done.wait (%p11599_p11), [#allocation6], 4096   ;;  %p11600_p0 = pmov %p11599_p11 }
 0x1ae   : > { %9556 = vsyncadd (%p11600_p0), [#allocation6], 4294963200  ;;  %p11601_p12 = pmov %p11600_p0 }
 0x1af   : > { %p11602_p13 = pmov %p11600_p0 }
 0x1b0   : > { %9558 = dma.done.wait (%p11601_p12), [#allocation9], 4128  }
 0x1b1   : > { %9560 = vsyncadd (%p11602_p13), [#allocation9], 4294963168  ;;  %p11603_p1 = pmov %p11600_p0 }
 0x1b2   : > { %p11604_p3 = pmov %p11600_p0 }
 0x1b3   : > { %9562 = dma.done.wait (%p11603_p1), [#allocation12], 4128  }
 0x1b4   : > { %9564 = vsyncadd (%p11604_p3), [#allocation12], 4294963168  ;;  %p11605_p5 = pmov %p11600_p0 }
 0x1b5   : > { %p11606_p2 = pmov %p11600_p0 }
 0x1b6   : > { %9566 = dma.done.wait (%p11605_p5), [#allocation15], 2080  }
 0x1b7   : > { %9568 = vsyncadd (%p11606_p2), [#allocation15], 4294965216  ;;  %p11607_p9 = pmov %p11600_p0 }
 0x1b8   : > { %p11608_p10 = pmov %p11600_p0 }
 0x1b9   : > { %9570 = dma.done.wait (%p11607_p9), [#allocation18], 4128  }
 0x1ba   : > { %9572 = vsyncadd (%p11608_p10), [#allocation18], 4294963168  ;;  %p11609_p4 = pmov %p11600_p0 }
 0x1bb   : > { %p11610_p6 = pmov %p11600_p0 }
 0x1bc   : > { %9574 = dma.done.wait (%p11609_p4), [#allocation21], 4128  }
 0x1bd   : > { %9576 = vsyncadd (%p11610_p6), [#allocation21], 4294963168  ;;  %p11611_p8 = pmov %p11600_p0 }
 0x1be   : > { %p11612_p7 = pmov %p11600_p0 }
 0x1bf   : > { %9578 = dma.done.wait (%p11611_p8), [#allocation24], 32  }
 0x1c0   : > { %9580 = vsyncadd (%p11612_p7), [#allocation24], 4294967264  ;;  %v8077_v0 = vld [vmem:[#allocation7 + $0x4] ss:$8 sps:$4 sm:$0xff]   ;;  %v8079_v1 = vld [vmem:[#allocation7] ss:$8 sps:$4 sm:$0xff]  }
 0x1c1   : > { %1309 = vmatprep.subr.bf16.mxu0 %v8077_v0  ;;  %v8080_v2 = vld [vmem:[#allocation7 + $0x14] ss:$8 sps:$4 sm:$0xff]   ;;  %v8082_v3 = vld [vmem:[#allocation7 + $0x10] ss:$8 sps:$4 sm:$0xff]   ;;  %v8083_v4 = vld [vmem:[#allocation7 + $0x24] ss:$8 sps:$4 sm:$0xff]  }
 0x1c2   : > { %1310 = vmatpush1.bf16.msra.mxu0 %v8079_v1  ;;  %v8085_v5 = vld [vmem:[#allocation7 + $0x20] ss:$8 sps:$4 sm:$0xff]   ;;  %v8086_v6 = vld [vmem:[#allocation7 + $0x34] ss:$8 sps:$4 sm:$0xff]   ;;  %v8088_v7 = vld [vmem:[#allocation7 + $0x30] ss:$8 sps:$4 sm:$0xff]  }
 0x1c3   : > { %1311 = vmatprep.subr.bf16.mxu0 %v8080_v2  ;;  %v8089_v8 = vld [vmem:[#allocation7 + $0x44] ss:$8 sps:$4 sm:$0xff]   ;;  %v8091_v9 = vld [vmem:[#allocation7 + $0x40] ss:$8 sps:$4 sm:$0xff]   ;;  %v8092_v10 = vld [vmem:[#allocation7 + $0x54] ss:$8 sps:$4 sm:$0xff]  }
 0x1c4   : > { %v8094_v11 = vld [vmem:[#allocation7 + $0x50] ss:$8 sps:$4 sm:$0xff]   ;;  %v8095_v12 = vld [vmem:[#allocation7 + $0x64] ss:$8 sps:$4 sm:$0xff]   ;;  %v8097_v14 = vld [vmem:[#allocation7 + $0x60] ss:$8 sps:$4 sm:$0xff]  }
 0x1c5   : > { %v8127_v13 = vld [vmem:[%s10134_s17 + $0x4] ss:$8 sps:$4 sm:$0xff]   ;;  %v8098_v15 = vld [vmem:[#allocation7 + $0x74] ss:$8 sps:$4 sm:$0xff]   ;;  %v8100_v16 = vld [vmem:[#allocation7 + $0x70] ss:$8 sps:$4 sm:$0xff]  }
 0x1c6   : > { %1312 = vmatpush1.bf16.msra.mxu0 %v8082_v3  ;;  %1341 = vmatprep.mubr.bf16.mxu0 %v8127_v13  ;;  %v8101_v17 = vld [vmem:[#allocation7 + $0x84] ss:$8 sps:$4 sm:$0xff]   ;;  %v8103_v18 = vld [vmem:[#allocation7 + $0x80] ss:$8 sps:$4 sm:$0xff]   ;;  %v8104_v19 = vld [vmem:[#allocation7 + $0x94] ss:$8 sps:$4 sm:$0xff]  }
 0x1c7   : > { %1313 = vmatprep.subr.bf16.mxu0 %v8083_v4  ;;  %v8106_v20 = vld [vmem:[#allocation7 + $0x90] ss:$8 sps:$4 sm:$0xff]   ;;  %v8107_v21 = vld [vmem:[#allocation7 + $0xa4] ss:$8 sps:$4 sm:$0xff]   ;;  %v8109_v22 = vld [vmem:[#allocation7 + $0xa0] ss:$8 sps:$4 sm:$0xff]  }
 0x1c8   : > { %v8110_v23 = vld [vmem:[#allocation7 + $0xb4] ss:$8 sps:$4 sm:$0xff]   ;;  %v8112_v24 = vld [vmem:[#allocation7 + $0xb0] ss:$8 sps:$4 sm:$0xff]   ;;  %v8113_v25 = vld [vmem:[#allocation7 + $0xc4] ss:$8 sps:$4 sm:$0xff]  }
 0x1c9   : > { %v8115_v26 = vld [vmem:[#allocation7 + $0xc0] ss:$8 sps:$4 sm:$0xff]   ;;  %v8116_v27 = vld [vmem:[#allocation7 + $0xd4] ss:$8 sps:$4 sm:$0xff]   ;;  %v8118_v28 = vld [vmem:[#allocation7 + $0xd0] ss:$8 sps:$4 sm:$0xff]  }
 0x1ca   : > { %1314 = vmatpush1.bf16.msra.mxu0 %v8085_v5  ;;  %v8119_v29 = vld [vmem:[#allocation7 + $0xe4] ss:$8 sps:$4 sm:$0xff]   ;;  %v8121_v30 = vld [vmem:[#allocation7 + $0xe0] ss:$8 sps:$4 sm:$0xff]   ;;  %v8122_v31 = vld [vmem:[#allocation7 + $0xf4] ss:$8 sps:$4 sm:$0xff]  }
 0x1cb   : > { %1315 = vmatprep.subr.bf16.mxu0 %v8086_v6  ;;  %v8124_v32 = vld [vmem:[#allocation7 + $0xf0] ss:$8 sps:$4 sm:$0xff]   ;;  %v8125_v33 = vld [vmem:[%s10134_s17] ss:$8 sps:$4 sm:$0xff]   ;;  %v8128_v34 = vld [vmem:[%s10134_s17 + $0x14] ss:$8 sps:$4 sm:$0xff]  }
 0x1cc   : > { %v8130_v35 = vld [vmem:[%s10134_s17 + $0x10] ss:$8 sps:$4 sm:$0xff]   ;;  %v8131_v36 = vld [vmem:[%s10134_s17 + $0x24] ss:$8 sps:$4 sm:$0xff]   ;;  %v8133_v37 = vld [vmem:[%s10134_s17 + $0x20] ss:$8 sps:$4 sm:$0xff]  }
 0x1cd   : > { %v8134_v38 = vld [vmem:[%s10134_s17 + $0x34] ss:$8 sps:$4 sm:$0xff]   ;;  %v8136_v39 = vld [vmem:[%s10134_s17 + $0x30] ss:$8 sps:$4 sm:$0xff]   ;;  %v8137_v40 = vld [vmem:[%s10134_s17 + $0x44] ss:$8 sps:$4 sm:$0xff]  }
 0x1ce   : > { %1316 = vmatpush1.bf16.msra.mxu0 %v8088_v7  ;;  %v8187_v41 = vld [vmem:[#allocation10 + $0x4] ss:$8 sps:$4 sm:$0xff]   ;;  %v8140_v43 = vld [vmem:[%s10134_s17 + $0x54] ss:$8 sps:$4 sm:$0xff]   ;;  %v8190_v44 = vld [vmem:[#allocation10] ss:$8 sps:$4 sm:$0xff]  }
 0x1cf   : > { %1317 = vmatprep.subr.bf16.mxu0 %v8089_v8  ;;  %v8139_v42 = vld [vmem:[%s10134_s17 + $0x40] ss:$8 sps:$4 sm:$0xff]   ;;  %2212 = vmatprep.subr.bf16.mxu1 %v8187_v41  ;;  %v8193_v46 = vld [vmem:[#allocation10 + $0x10] ss:$8 sps:$4 sm:$0xff]   ;;  %v8143_v49 = vld [vmem:[%s10134_s17 + $0x64] ss:$8 sps:$4 sm:$0xff]  }
 0x1d0   : > { %2213 = vmatpush1.bf16.msra.mxu1 %v8190_v44  ;;  %v8191_v45 = vld [vmem:[#allocation10 + $0x14] ss:$8 sps:$4 sm:$0xff]   ;;  %v8196_v47 = vld [vmem:[#allocation10 + $0x24] ss:$8 sps:$4 sm:$0xff]   ;;  %v8199_v50 = vld [vmem:[#allocation10 + $0x20] ss:$8 sps:$4 sm:$0xff]  }
 0x1d1   : > { %v8142_v48 = vld [vmem:[%s10134_s17 + $0x50] ss:$8 sps:$4 sm:$0xff]   ;;  %2214 = vmatprep.subr.bf16.mxu1 %v8191_v45  ;;  %v8145_v54 = vld [vmem:[%s10134_s17 + $0x60] ss:$8 sps:$4 sm:$0xff]   ;;  %v8146_v55 = vld [vmem:[%s10134_s17 + $0x74] ss:$8 sps:$4 sm:$0xff]  }
 0x1d2   : > { %1318 = vmatpush1.bf16.msra.mxu0 %v8091_v9  ;;  %v8200_v51 = vld [vmem:[#allocation10 + $0x34] ss:$8 sps:$4 sm:$0xff]   ;;  %v8202_v52 = vld [vmem:[#allocation10 + $0x30] ss:$8 sps:$4 sm:$0xff]   ;;  %v8205_v53 = vld [vmem:[#allocation10 + $0x44] ss:$8 sps:$4 sm:$0xff]  }
 0x1d3   : > { %1319 = vmatprep.subr.bf16.mxu0 %v8092_v10  ;;  %v8208_v56 = vld [vmem:[#allocation10 + $0x40] ss:$8 sps:$4 sm:$0xff]   ;;  %v8209_v57 = vld [vmem:[#allocation10 + $0x54] ss:$8 sps:$4 sm:$0xff]   ;;  %v8211_v58 = vld [vmem:[#allocation10 + $0x50] ss:$8 sps:$4 sm:$0xff]  }
 0x1d4   : > { %2215 = vmatpush1.bf16.msra.mxu1 %v8193_v46  ;;  %v8214_v59 = vld [vmem:[#allocation10 + $0x64] ss:$8 sps:$4 sm:$0xff]   ;;  %v8217_v62 = vld [vmem:[#allocation10 + $0x60] ss:$8 sps:$4 sm:$0xff]   ;;  %v8218_v63 = vld [vmem:[#allocation10 + $0x74] ss:$8 sps:$4 sm:$0xff]  }
 0x1d5   : > { %2216 = vmatprep.subr.bf16.mxu1 %v8196_v47  ;;  %v8148_v60 = vld [vmem:[%s10134_s17 + $0x70] ss:$8 sps:$4 sm:$0xff]   ;;  %v8149_v61 = vld [vmem:[%s10134_s17 + $0x84] ss:$8 sps:$4 sm:$0xff]   ;;  %v8151_v4 = vld [vmem:[%s10134_s17 + $0x80] ss:$8 sps:$4 sm:$0xff]  }
 0x1d6   : > { %1320 = vmatpush1.bf16.msra.mxu0 %v8094_v11  ;;  %v8220_v0 = vld [vmem:[#allocation10 + $0x70] ss:$8 sps:$4 sm:$0xff]   ;;  %v8221_v1 = vld [vmem:[#allocation13] ss:$8 sps:$4 sm:$0xff]   ;;  %v8230_v7 = vld [vmem:[#allocation10 + $0x94] ss:$8 sps:$4 sm:$0xff]  }
 0x1d7   : > { %1321 = vmatprep.subr.bf16.mxu0 %v8095_v12  ;;  %v8223_v2 = vld [vmem:[#allocation13 + $0x4] ss:$8 sps:$4 sm:$0xff]   ;;  %v8152_v5 = vld [vmem:[%s10134_s17 + $0x94] ss:$8 sps:$4 sm:$0xff]   ;;  %v8155_v11 = vld [vmem:[%s10134_s17 + $0xa4] ss:$8 sps:$4 sm:$0xff]  }
 0x1d8   : > { %2217 = vmatpush1.bf16.msra.mxu1 %v8199_v50  ;;  %v8226_v3 = vld [vmem:[#allocation10 + $0x84] ss:$8 sps:$4 sm:$0xff]   ;;  %v8229_v6 = vld [vmem:[#allocation10 + $0x80] ss:$8 sps:$4 sm:$0xff]   ;;  %v8232_v8 = vld [vmem:[#allocation10 + $0x90] ss:$8 sps:$4 sm:$0xff]  }
 0x1d9   : > { %2218 = vmatprep.subr.bf16.mxu1 %v8200_v51  ;;  %v8235_v9 = vld [vmem:[#allocation10 + $0xa4] ss:$8 sps:$4 sm:$0xff]   ;;  %v8238_v12 = vld [vmem:[#allocation10 + $0xa0] ss:$8 sps:$4 sm:$0xff]   ;;  %v8239_v13 = vld [vmem:[#allocation10 + $0xb4] ss:$8 sps:$4 sm:$0xff]  }
 0x1da   : > { %1322 = vmatpush1.bf16.msra.mxu0 %v8097_v14  ;;  %v8154_v10 = vld [vmem:[%s10134_s17 + $0x90] ss:$8 sps:$4 sm:$0xff]   ;;  %v8175_v41 = vld [vmem:[%s10134_s17 + $0x100] ss:$8 sps:$4 sm:$0xff]   ;;  %v8179_v46 = vld [vmem:[%s10134_s17 + $0x124] ss:$8 sps:$4 sm:$0xff]  }
 0x1db   : > { %1323 = vmatprep.subr.bf16.mxu0 %v8098_v15  ;;  %v8241_v14 = vld [vmem:[#allocation10 + $0xb0] ss:$8 sps:$4 sm:$0xff]   ;;  %v8181_v47 = vld [vmem:[%s10134_s17 + $0x120] ss:$8 sps:$4 sm:$0xff]   ;;  %s7503_s2 = sshll.u32 %s10130_s15, 10  ;;  %s7891_s26 = sshll.u32 %s11598_s25, 14 }
 0x1dc   : > { %2219 = vmatpush1.bf16.msra.mxu1 %v8202_v52  ;;  %v8242_v15 = vld [vmem:[#allocation13 + $0x10] ss:$8 sps:$4 sm:$0xff]   ;;  %v8283_v44 = vld [vmem:[#allocation13 + $0x44] ss:$8 sps:$4 sm:$0xff]   ;;  %v8286_v50 = vld [vmem:[#allocation13 + $0x54] ss:$8 sps:$4 sm:$0xff]  }
 0x1dd   : > { %2220 = vmatprep.subr.bf16.mxu1 %v8205_v53  ;;  %v8178_v45 = vld [vmem:[%s10134_s17 + $0x110] ss:$8 sps:$4 sm:$0xff]   ;;  %v8185_v52 = vld [vmem:[%s10134_s17 + $0x144] ss:$8 sps:$4 sm:$0xff]   ;;  %v8189_v53 = vld [vmem:[%s10134_s17 + $0x140] ss:$8 sps:$4 sm:$0xff]  }
 0x1de   : > { %1324 = vmatpush1.bf16.msra.mxu0 %v8100_v16  ;;  %v8244_v16 = vld [vmem:[#allocation13 + $0x14] ss:$8 sps:$4 sm:$0xff]   ;;  %s10403_s22 = scalar_lea.vmem [#allocation26], %s7503_s2  ;;  %s11190_s3 = scalar_lea.vmem [#allocation25], %s7503_s2 }
 0x1df   : > { %1325 = vmatprep.subr.bf16.mxu0 %v8101_v17  ;;  %v8247_v17 = vld [vmem:[#allocation10 + $0xc4] ss:$8 sps:$4 sm:$0xff]   ;;  %s11613_s24 = sld [smem:[#allocation52_spill]]  ;;  %s7224_s4 = sshll.u32 %s10403_s22, 4  ;;  %s11341_s4 = int_to_ptr.vmem [resolvable:$true] %s7224_s4 }
 0x1e0   : > { %2221 = vmatpush1.bf16.msra.mxu1 %v8208_v56  ;;  %v8184_v51 = vld [vmem:[%s10134_s17 + $0x130] ss:$8 sps:$4 sm:$0xff]   ;;  %s7193_s23 = scalar_lea.sflag [#allocation27], %s10130_s15  ;;  %s9473_s8 = scalar_lea.vmem %s11341_s4, 16384 }
 0x1e1   : > { %2222 = vmatprep.subr.bf16.mxu1 %v8209_v57  ;;  %v8289_v56 = vld [vmem:[#allocation13 + $0x64] ss:$8 sps:$4 sm:$0xff]   ;;  %p9474_p11 = scmp.ne.s32.totalorder %s11341_s4, %s9473_s8  ;;  %p11614_p0 = scmp.ne.s32.totalorder %s11590_s18, 0 }
 0x1e2   : > { %1326 = vmatpush1.bf16.msra.mxu0 %v8103_v18  ;;  %v8157_v18 = vld [vmem:[%s10134_s17 + $0xa0] ss:$8 sps:$4 sm:$0xff]   ;;  %v8198_v57 = vld [vmem:[%s10134_s17 + $0x150] ss:$8 sps:$4 sm:$0xff]  }
 0x1e3   : > { %1327 = vmatprep.subr.bf16.mxu0 %v8104_v19  ;;  %v8158_v19 = vld [vmem:[%s10134_s17 + $0xb4] ss:$8 sps:$4 sm:$0xff]   ;;  %p9475_p12 = pnand %p9474_p11, %p11614_p0 }
 0x1e4   : > { %2223 = vmatpush1.bf16.msra.mxu1 %v8211_v58  ;;  %v8203_v58 = vld [vmem:[%s10134_s17 + $0x164] ss:$8 sps:$4 sm:$0xff]  }
 0x1e5   : > { %2224 = vmatprep.subr.bf16.mxu1 %v8214_v59  ;;  %v8207_v59 = vld [vmem:[%s10134_s17 + $0x160] ss:$8 sps:$4 sm:$0xff]   ;;  %s11337_s27 = scalar_lea.hbm %s11613_s24, %s7891_s26  ;;  %p9476_p13 = pneg %p9475_p12 }
 0x1e6   : > { %1328 = vmatpush1.bf16.msra.mxu0 %v8106_v20  ;;  %v8250_v20 = vld [vmem:[#allocation10 + $0xc0] ss:$8 sps:$4 sm:$0xff]  }
 0x1e7   : > { %1329 = vmatprep.subr.bf16.mxu0 %v8107_v21  ;;  %v8251_v21 = vld [vmem:[#allocation10 + $0xd4] ss:$8 sps:$4 sm:$0xff]  }
 0x1e8   : > { %2225 = vmatpush1.bf16.msra.mxu1 %v8217_v62  ;;  %v8292_v62 = vld [vmem:[#allocation13 + $0x74] ss:$8 sps:$4 sm:$0xff]  }
 0x1e9   : > { %2226 = vmatprep.subr.bf16.mxu1 %v8218_v63  ;;  %v8216_v63 = vld [vmem:[%s10134_s17 + $0x170] ss:$8 sps:$4 sm:$0xff]  }
 0x1ea   : > { %1330 = vmatpush1.bf16.msra.mxu0 %v8109_v22  ;;  %v8253_v22 = vld [vmem:[#allocation10 + $0xd0] ss:$8 sps:$4 sm:$0xff]  }
 0x1eb   : > { %1331 = vmatprep.subr.bf16.mxu0 %v8110_v23  ;;  %v8160_v23 = vld [vmem:[%s10134_s17 + $0xb0] ss:$8 sps:$4 sm:$0xff]  }
 0x1ec   : > { %2227 = vmatpush1.bf16.msra.mxu1 %v8220_v0  ;;  %v8224_v0 = vld [vmem:[%s10134_s17 + $0x184] ss:$8 sps:$4 sm:$0xff]  }
 0x1ed   : > { %2228 = vmatprep.subr.bf16.mxu1 %v8226_v3  ;;  %v9621_v3 = vmov 1966171168  }
 0x1ee   : > { %1332 = vmatpush1.bf16.msra.mxu0 %v8112_v24  ;;  %v8161_v24 = vld [vmem:[%s10134_s17 + $0xc4] ss:$8 sps:$4 sm:$0xff]  }
 0x1ef   : > { %1333 = vmatprep.subr.bf16.mxu0 %v8113_v25  ;;  %v8256_v25 = vld [vmem:[#allocation10 + $0xe4] ss:$8 sps:$4 sm:$0xff]  }
 0x1f0   : > { %2229 = vmatpush1.bf16.msra.mxu1 %v8229_v6  ;;  %v8293_v6 = vld [vmem:[#allocation13 + $0x80] ss:$8 sps:$4 sm:$0xff]  }
 0x1f1   : > { %2230 = vmatprep.subr.bf16.mxu1 %v8230_v7  ;;  %v8295_v7 = vld [vmem:[#allocation13 + $0x84] ss:$8 sps:$4 sm:$0xff]  }
 0x1f2   : > { %1334 = vmatpush1.bf16.msra.mxu0 %v8115_v26  ;;  %v8259_v26 = vld [vmem:[#allocation10 + $0xe0] ss:$8 sps:$4 sm:$0xff]  }
 0x1f3   : > { %1335 = vmatprep.subr.bf16.mxu0 %v8116_v27  ;;  %v8260_v27 = vld [vmem:[#allocation10 + $0xf4] ss:$8 sps:$4 sm:$0xff]  }
 0x1f4   : > { %2231 = vmatpush1.bf16.msra.mxu1 %v8232_v8  ;;  %v8237_v8 = vld [vmem:[%s10134_s17 + $0x190] ss:$8 sps:$4 sm:$0xff]  }
 0x1f5   : > { %2232 = vmatprep.subr.bf16.mxu1 %v8235_v9 }
 0x1f6   : > { %1336 = vmatpush1.bf16.msra.mxu0 %v8118_v28  ;;  %v8262_v28 = vld [vmem:[#allocation10 + $0xf0] ss:$8 sps:$4 sm:$0xff]  }
 0x1f7   : > { %1337 = vmatprep.subr.bf16.mxu0 %v8119_v29  ;;  %v8163_v29 = vld [vmem:[%s10134_s17 + $0xc0] ss:$8 sps:$4 sm:$0xff]  }
 0x1f8   : > { %2233 = vmatpush1.bf16.msra.mxu1 %v8238_v12  ;;  %v7601_v12 = vld.sshfl [vmem:[#allocation8] sm:$0x11 pattern:$0x75316420] }
 0x1f9   : > { %2234 = vmatprep.subr.bf16.mxu1 %v8239_v13 }
 0x1fa   : > { %1338 = vmatpush1.bf16.msra.mxu0 %v8121_v30  ;;  %v8164_v30 = vld [vmem:[%s10134_s17 + $0xd4] ss:$8 sps:$4 sm:$0xff]  }
 0x1fb   : > { %1339 = vmatprep.subr.bf16.mxu0 %v8122_v31  ;;  %v8263_v31 = vld [vmem:[#allocation13 + $0x20] ss:$8 sps:$4 sm:$0xff]  }
 0x1fc   : > { %2235 = vmatpush1.bf16.msra.mxu1 %v8241_v14  ;;  %v1735_v14 = vcombine.high %v7601_v12, %v7601_v12 }
 0x1fd   : > { %2236 = vmatprep.subr.bf16.mxu1 %v8247_v17  ;;  %v8254_v17 = vld [vmem:[%s10134_s17 + $0x1b4] ss:$8 sps:$4 sm:$0xff]  }
 0x1fe   : > { %1340 = vmatpush1.bf16.msra.mxu0 %v8124_v32  ;;  %v8265_v32 = vld [vmem:[#allocation13 + $0x24] ss:$8 sps:$4 sm:$0xff]  }
 0x1ff   : > { %3127 = vmatprep.subr.bf16.mxu0 %v8223_v2  ;;  %v8233_v2 = vld [vmem:[%s10134_s17 + $0x194] ss:$8 sps:$4 sm:$0xff]  }
 0x200   : > { %2237 = vmatpush1.bf16.msra.mxu1 %v8250_v20 }
 0x201   : > { %1342 = vmatmul.mubr.bf16.vlgmr.msra.gmra.mrb[0].mxu0 %v8125_v33  ;;  %2238 = vmatprep.subr.bf16.mxu1 %v8251_v21  ;;  %v8166_v33 = vld [vmem:[%s10134_s17 + $0xd0] ss:$8 sps:$4 sm:$0xff]   ;;  %v8296_v21 = vld [vmem:[#allocation13 + $0x90] ss:$8 sps:$4 sm:$0xff]  }
 0x202   : > { %1351 = vmatprep.mubr.bf16.mxu0 %v8128_v34  ;;  %3128 = vmatpush1.bf16.msra.mxu0 %v8221_v1  ;;  %v8167_v34 = vld [vmem:[%s10134_s17 + $0xe4] ss:$8 sps:$4 sm:$0xff]   ;;  %v8228_v1 = vld [vmem:[%s10134_s17 + $0x180] ss:$8 sps:$4 sm:$0xff]  }
 0x203   : > { %3129 = vmatprep.subr.bf16.mxu0 %v8244_v16 }
 0x204   : > { %2239 = vmatpush1.bf16.msra.mxu1 %v8253_v22  ;;  %v8298_v22 = vld [vmem:[#allocation13 + $0x94] ss:$8 sps:$4 sm:$0xff]  }
 0x205   : > { %2240 = vmatprep.subr.bf16.mxu1 %v8256_v25 }
 0x206   : > { %3130 = vmatpush1.bf16.msra.mxu0 %v8242_v15  ;;  %v8249_v15 = vld [vmem:[%s10134_s17 + $0x1a0] ss:$8 sps:$4 sm:$0xff]  }
 0x207   : > { %3131 = vmatprep.subr.bf16.mxu0 %v8265_v32 }
 0x208   : > { %2241 = vmatpush1.bf16.msra.mxu1 %v8259_v26 }
 0x209   : > { %1352 = vmatmul.mubr.bf16.gmra.mrb[4].mxu0 %v8130_v35  ;;  %2242 = vmatprep.subr.bf16.mxu1 %v8260_v27  ;;  %v8169_v35 = vld [vmem:[%s10134_s17 + $0xe0] ss:$8 sps:$4 sm:$0xff]   ;;  %v8258_v27 = vld [vmem:[%s10134_s17 + $0x1b0] ss:$8 sps:$4 sm:$0xff]  }
 0x20a   : > { %1361 = vmatprep.mubr.bf16.mxu0 %v8131_v36  ;;  %3132 = vmatpush1.bf16.msra.mxu0 %v8263_v31  ;;  %v8170_v36 = vld [vmem:[%s10134_s17 + $0xf4] ss:$8 sps:$4 sm:$0xff]  }
 0x20c   : > { %2243 = vmatpush1.bf16.msra.mxu1 %v8262_v28 }
 0x211   : > { %1362 = vmatmul.mubr.bf16.gmra.mrb[8].mxu0 %v8133_v37  ;;  %v8272_v37 = vld [vmem:[#allocation13 + $0x30] ss:$8 sps:$4 sm:$0xff]  }
 0x212   : > { %1371 = vmatprep.mubr.bf16.mxu0 %v8134_v38  ;;  %v8274_v38 = vld [vmem:[#allocation13 + $0x34] ss:$8 sps:$4 sm:$0xff]  }
 0x213   : > { %3133 = vmatprep.subr.bf16.mxu0 %v8274_v38 }
 0x214   : > { %3134 = vmatpush1.bf16.msra.mxu0 %v8272_v37 }
 0x215   : > { %3135 = vmatprep.subr.bf16.mxu0 %v8283_v44 }
 0x219   : > { %1372 = vmatmul.mubr.bf16.gmra.mrb[12].mxu0 %v8136_v39  ;;  %v8172_v39 = vld [vmem:[%s10134_s17 + $0xf0] ss:$8 sps:$4 sm:$0xff]  }
 0x21a   : > { %1381 = vmatprep.mubr.bf16.mxu0 %v8137_v40  ;;  %v8173_v40 = vld [vmem:[%s10134_s17 + $0x104] ss:$8 sps:$4 sm:$0xff]  }
 0x221   : > { %1382 = vmatmul.mubr.bf16.gmra.mrb[16].mxu0 %v8139_v42  ;;  %v8176_v42 = vld [vmem:[%s10134_s17 + $0x114] ss:$8 sps:$4 sm:$0xff]  }
 0x222   : > { %1391 = vmatprep.mubr.bf16.mxu0 %v8140_v43  ;;  %v8281_v43 = vld [vmem:[#allocation13 + $0x40] ss:$8 sps:$4 sm:$0xff]  }
 0x223   : > { %3136 = vmatpush1.bf16.msra.mxu0 %v8281_v43  ;;  %v8269_v43 = vld [vmem:[%s10134_s17 + $0x1d4] ss:$8 sps:$4 sm:$0xff]  }
 0x224   : > { %3137 = vmatprep.subr.bf16.mxu0 %v8286_v50  ;;  %v8301_v50 = vld [vmem:[#allocation13 + $0xa4] ss:$8 sps:$4 sm:$0xff]  }
 0x229   : > { %1392 = vmatmul.mubr.bf16.gmra.mrb[20].mxu0 %v8142_v48  ;;  %v8182_v48 = vld [vmem:[%s10134_s17 + $0x134] ss:$8 sps:$4 sm:$0xff]  }
 0x22a   : > { %1401 = vmatprep.mubr.bf16.mxu0 %v8143_v49  ;;  %v8284_v49 = vld [vmem:[#allocation13 + $0x50] ss:$8 sps:$4 sm:$0xff]  }
 0x22b   : > { %3138 = vmatpush1.bf16.msra.mxu0 %v8284_v49  ;;  %v8299_v49 = vld [vmem:[#allocation13 + $0xa0] ss:$8 sps:$4 sm:$0xff]  }
 0x22c   : > { %3139 = vmatprep.subr.bf16.mxu0 %v8289_v56  ;;  %v8271_v56 = vld [vmem:[%s10134_s17 + $0x1d0] ss:$8 sps:$4 sm:$0xff]  }
 0x231   : > { %1402 = vmatmul.mubr.bf16.gmra.mrb[24].mxu0 %v8145_v54  ;;  %v8194_v54 = vld [vmem:[%s10134_s17 + $0x154] ss:$8 sps:$4 sm:$0xff]  }
 0x232   : > { %1411 = vmatprep.mubr.bf16.mxu0 %v8146_v55  ;;  %v8287_v55 = vld [vmem:[#allocation13 + $0x60] ss:$8 sps:$4 sm:$0xff]  }
 0x233   : > { %3140 = vmatpush1.bf16.msra.mxu0 %v8287_v55 }
 0x234   : > { %3141 = vmatprep.subr.bf16.mxu0 %v8292_v62 }
 0x239   : > { %1412 = vmatmul.mubr.bf16.gmra.mrb[28].mxu0 %v8148_v60  ;;  %v8212_v60 = vld [vmem:[%s10134_s17 + $0x174] ss:$8 sps:$4 sm:$0xff]  }
 0x23a   : > { %1421 = vmatprep.mubr.bf16.mxu0 %v8149_v61  ;;  %v8290_v61 = vld [vmem:[#allocation13 + $0x70] ss:$8 sps:$4 sm:$0xff]  }
 0x23b   : > { %3142 = vmatpush1.bf16.msra.mxu0 %v8290_v61 }
 0x23c   : > { %3143 = vmatprep.subr.bf16.mxu0 %v8295_v7 }
 0x23f   : > { %3144 = vmatpush1.bf16.msra.mxu0 %v8293_v6  ;;  %v8277_v6 = vld [vmem:[%s10134_s17 + $0x1e0] ss:$8 sps:$4 sm:$0xff]  }
 0x240   : > { %3145 = vmatprep.subr.bf16.mxu0 %v8298_v22 }
 0x241   : > { %1422 = vmatmul.mubr.bf16.gmra.mrb[32].mxu0 %v8151_v4  ;;  %v1737_v4 = vunpack.c.l.s4 %v9621_v3 }
 0x242   : > { %1431 = vmatprep.mubr.bf16.mxu0 %v8152_v5  ;;  %v1739_v5 = vlaneseq }
 0x243   : > { %v1738_v9 = vunpack.c.0.s8 %v1737_v4  ;;  %3146 = vmatpush1.bf16.msra.mxu0 %v8296_v21 }
 0x244   : > { %3147 = vmatprep.subr.bf16.mxu0 %v8301_v50 }
 0x247   : > { %3148 = vmatpush1.bf16.msra.mxu0 %v8299_v49 }
 0x249   : > { %1432 = vmatmul.mubr.bf16.gmra.mrb[36].mxu0 %v8154_v10  ;;  %v10227_v10 = vshrl.u32 %v1739_v5, 7 }
 0x24a   : > { %1441 = vmatprep.mubr.bf16.mxu0 %v8155_v11  ;;  %v8245_v11 = vld [vmem:[%s10134_s17 + $0x1a4] ss:$8 sps:$4 sm:$0xff]  }
 0x24b   : > { %v10231_v13 = vsub.s32 %v1738_v9, %v10227_v10  ;;  %v10238_v20 = vsub.s32 0, %v10227_v10  ;;  %v8278_v9 = vld [vmem:[%s10134_s17 + $0x1f4] ss:$8 sps:$4 sm:$0xff]  }
 0x24d   : > { %v1742_v16 = vrot.slane %v7601_v12, %v10231_v13 }
 0x251   : > { %1442 = vmatmul.mubr.bf16.gmra.mrb[40].mxu0 %v8157_v18  ;;  %v1749_v18 = vrot.slane %v1735_v14, %v10231_v13 }
 0x252   : > { %1451 = vmatprep.mubr.bf16.mxu0 %v8158_v19  ;;  %v1751_v19 = vpack.i.b16 %v1742_v16, %v1742_v16 }
 0x254   : > { %v10241_v26 = vrot.slane %v1751_v19, %v10238_v20 }
 0x259   : > { %1452 = vmatmul.mubr.bf16.gmra.mrb[44].mxu0 %v8160_v23  ;;  %v1758_v23 = vpack.i.b16 %v1749_v18, %v1749_v18  ;;  %v8304_v18 = vld [vmem:[#allocation13 + $0xb4] ss:$8 sps:$4 sm:$0xff]  }
 0x25a   : > { %1461 = vmatprep.mubr.bf16.mxu0 %v8161_v24  ;;  %3149 = vmatprep.subr.bf16.mxu0 %v8304_v18 }
 0x261   : > { %1462 = vmatmul.mubr.bf16.gmra.mrb[48].mxu0 %v8163_v29  ;;  %v10245_v29 = vrot.slane %v1758_v23, %v10238_v20 }
 0x262   : > { %1471 = vmatprep.mubr.bf16.mxu0 %v8164_v30  ;;  %v8266_v30 = vld [vmem:[%s10134_s17 + $0x1c4] ss:$8 sps:$4 sm:$0xff]  }
 0x269   : > { %1472 = vmatmul.mubr.bf16.gmra.mrb[52].mxu0 %v8166_v33 }
 0x26a   : > { %1481 = vmatprep.mubr.bf16.mxu0 %v8167_v34 }
 0x271   : > { %1482 = vmatmul.mubr.bf16.gmra.mrb[56].mxu0 %v8169_v35 }
 0x272   : > { %1491 = vmatprep.mubr.bf16.mxu0 %v8170_v36 }
 0x279   : > { %1492 = vmatmul.mubr.bf16.gmra.mrb[60].mxu0 %v8172_v39 }
 0x27a   : > { %1501 = vmatprep.mubr.bf16.mxu0 %v8173_v40  ;;  %v8268_v40 = vld [vmem:[%s10134_s17 + $0x1c0] ss:$8 sps:$4 sm:$0xff]  }
 0x281   : > { %1502 = vmatmul.mubr.bf16.gmra.mrb[64].mxu0 %v8175_v41 }
 0x282   : > { %1511 = vmatprep.mubr.bf16.mxu0 %v8176_v42 }
 0x289   : > { %1512 = vmatmul.mubr.bf16.gmra.mrb[68].mxu0 %v8178_v45 }
 0x28a   : > { %1521 = vmatprep.mubr.bf16.mxu0 %v8179_v46 }
 0x291   : > { %1522 = vmatmul.mubr.bf16.gmra.mrb[72].mxu0 %v8181_v47 }
 0x292   : > { %1531 = vmatprep.mubr.bf16.mxu0 %v8182_v48 }
 0x299   : > { %1532 = vmatmul.mubr.bf16.gmra.mrb[76].mxu0 %v8184_v51 }
 0x29a   : > { %1541 = vmatprep.mubr.bf16.mxu0 %v8185_v52 }
 0x2a1   : > { %1542 = vmatmul.mubr.bf16.gmra.mrb[80].mxu0 %v8189_v53 }
 0x2a2   : > { %1551 = vmatprep.mubr.bf16.mxu0 %v8194_v54 }
 0x2a9   : > { %1552 = vmatmul.mubr.bf16.gmra.mrb[84].mxu0 %v8198_v57 }
 0x2aa   : > { %1561 = vmatprep.mubr.bf16.mxu0 %v8203_v58 }
 0x2b1   : > { %1562 = vmatmul.mubr.bf16.gmra.mrb[88].mxu0 %v8207_v59  ;;  %v8275_v59 = vld [vmem:[%s10134_s17 + $0x1e4] ss:$8 sps:$4 sm:$0xff]  }
 0x2b2   : > { %1571 = vmatprep.mubr.bf16.mxu0 %v8212_v60 }
 0x2b9   : > { %1572 = vmatmul.mubr.bf16.gmra.mrb[92].mxu0 %v8216_v63 }
 0x2ba   : > { %1581 = vmatprep.mubr.bf16.mxu0 %v8224_v0 }
 0x2c1   : > { %1582 = vmatmul.mubr.bf16.gmra.mrb[96].mxu0 %v8228_v1 }
 0x2c2   : > { %1591 = vmatprep.mubr.bf16.mxu0 %v8233_v2 }
 0x2c9   : > { %1592 = vmatmul.mubr.bf16.gmra.mrb[100].mxu0 %v8237_v8 }
 0x2ca   : > { %1601 = vmatprep.mubr.bf16.mxu0 %v8245_v11 }
 0x2d1   : > { %1602 = vmatmul.mubr.bf16.gmra.mrb[104].mxu0 %v8249_v15 }
 0x2d2   : > { %1611 = vmatprep.mubr.bf16.mxu0 %v8254_v17  ;;  %v8302_v17 = vld [vmem:[#allocation13 + $0xb0] ss:$8 sps:$4 sm:$0xff]  }
 0x2d3   : > { %3150 = vmatpush1.bf16.msra.mxu0 %v8302_v17 }
 0x2d4   : > { %v1343_v24 = vpop.f32.mrb[0].mxu0 }
 0x2d5   : > { %v1345_v25 = vpop.f32.mrb[1].mxu0 }
 0x2d6   : > { %v1347_v28 = vpop.f32.mrb[2].mxu0 }
 0x2d7   : > { %v1662_v31 = vpack.c.bf16 %v1347_v28, %v1343_v24  ;;  %v1349_v32 = vpop.f32.mrb[3].mxu0 }
 0x2d8   : > { %v1663_v33 = vpack.c.bf16 %v1349_v32, %v1345_v25  ;;  %v8280_v25 = vld [vmem:[%s10134_s17 + $0x1f0] ss:$8 sps:$4 sm:$0xff]   ;;  %s9623_s17 = smov [#allocation26]  }
 0x2d9   : > { %v1764_v34 = vadd.bf16 %v10241_v26, %v1662_v31  ;;  %1612 = vmatmul.mubr.bf16.gmra.mrb[108].mxu0 %v8258_v27  ;;  %s9477_s6 = sshll.u32 %s9623_s17, 4  ;;  %s9478_s6 = int_to_ptr.vmem [resolvable:$false] %s9477_s6 }
 0x2da   : > { %v1765_v35 = vadd.bf16 %v10245_v29, %v1663_v33  ;;  %1621 = vmatprep.mubr.bf16.mxu0 %v8266_v30  ;;  %s9479_s1 = scalar_lea.vmem %s9478_s6, 32768  ;;  %p9480_p1 = scmp.lt.s32.totalorder %s11341_s4, %s9478_s6 }
 0x2db   : > { %v1892_v36 = vmul.bf16 1045249613, %v1764_v34  ;;  %vm1828_vm1 = vcmp.gt.bf16.partialorder %v1764_v34, 0  ;;  %p9481_p3 = scmp.lt.s32.totalorder %s9479_s1, %s9473_s8 }
 0x2dc   : > { %v1353_v37 = vpop.f32.mrb[4].mxu0  ;;  %vm1829_vm0 = vcmp.gt.bf16.partialorder %v1765_v35, 0  ;;  %v1893_v38 = vmul.bf16 1045249613, %v1765_v35 }
 0x2dd   : > { %v1355_v39 = vpop.f32.mrb[5].mxu0  ;;  %v1956_v46 = vsel %vm1828_vm1, %v1764_v34, %v1892_v36  ;;  %p9482_p5 = por %p9481_p3, %p9480_p1 }
 0x2de   : > { %v1357_v41 = vpop.f32.mrb[6].mxu0  ;;  %v1957_v42 = vsel %vm1829_vm0, %v1765_v35, %v1893_v38 }
 0x2df   : > { %v1664_v44 = vpack.c.bf16 %v1357_v41, %v1353_v37  ;;  %v1359_v45 = vpop.f32.mrb[7].mxu0  ;;  %2244 = vmatprep.mubr.bf16.mxu1 %v1957_v42  ;;  %p9483_p2 = pnand %p9482_p5, %p9476_p13 }
 0x2e0   : > { %v1665_v47 = vpack.c.bf16 %v1359_v45, %v1355_v39  ;;  %2245 = vmatmul.mubr.bf16.vlgmr.msra.gmra.mrb[0].mxu1 %v1956_v46 }
 0x2e1   : > { %v1766_v48 = vadd.bf16 %v10241_v26, %v1664_v44  ;;  %1622 = vmatmul.mubr.bf16.gmra.mrb[112].mxu0 %v8268_v40 }
 0x2e2   : > { %v1767_v51 = vadd.bf16 %v10245_v29, %v1665_v47  ;;  %1631 = vmatprep.mubr.bf16.mxu0 %v8269_v43  ;;  %v8305_v47 = vld [vmem:[#allocation13 + $0xc0] ss:$8 sps:$4 sm:$0xff]  }
 0x2e3   : > { %v1894_v52 = vmul.bf16 1045249613, %v1766_v48  ;;  %vm1830_vm3 = vcmp.gt.bf16.partialorder %v1766_v48, 0 }
 0x2e4   : > { %v1363_v53 = vpop.f32.mrb[8].mxu0  ;;  %vm1831_vm2 = vcmp.gt.bf16.partialorder %v1767_v51, 0  ;;  %v1895_v54 = vmul.bf16 1045249613, %v1767_v51 }
 0x2e5   : > { %v1365_v55 = vpop.f32.mrb[9].mxu0  ;;  %v1958_v62 = vsel %vm1830_vm3, %v1766_v48, %v1894_v52  ;;  %v8307_v48 = vld [vmem:[#allocation13 + $0xc4] ss:$8 sps:$4 sm:$0xff]  }
 0x2e6   : > { %v1367_v57 = vpop.f32.mrb[10].mxu0  ;;  %v1959_v58 = vsel %vm1831_vm2, %v1767_v51, %v1895_v54  ;;  %3151 = vmatprep.subr.bf16.mxu0 %v8307_v48 }
 0x2e7   : > { %v1666_v60 = vpack.c.bf16 %v1367_v57, %v1363_v53  ;;  %v1369_v61 = vpop.f32.mrb[11].mxu0  ;;  %2254 = vmatprep.mubr.bf16.mxu1 %v1959_v58  ;;  %3152 = vmatpush1.bf16.msra.mxu0 %v8305_v47 }
 0x2e8   : > { %v1667_v63 = vpack.c.bf16 %v1369_v61, %v1365_v55  ;;  %2255 = vmatmul.mubr.bf16.gmra.mrb[4].mxu1 %v1958_v62 }
 0x2e9   : > { %v1768_v0 = vadd.bf16 %v10241_v26, %v1666_v60  ;;  %1632 = vmatmul.mubr.bf16.gmra.mrb[116].mxu0 %v8271_v56 }
 0x2ea   : > { %v1769_v1 = vadd.bf16 %v10245_v29, %v1667_v63  ;;  %1641 = vmatprep.mubr.bf16.mxu0 %v8275_v59 }
 0x2eb   : > { %v1896_v2 = vmul.bf16 1045249613, %v1768_v0  ;;  %vm1832_vm5 = vcmp.gt.bf16.partialorder %v1768_v0, 0 }
 0x2ec   : > { %v1373_v3 = vpop.f32.mrb[12].mxu0  ;;  %vm1833_vm4 = vcmp.gt.bf16.partialorder %v1769_v1, 0  ;;  %v1897_v4 = vmul.bf16 1045249613, %v1769_v1 }
 0x2ed   : > { %v1375_v5 = vpop.f32.mrb[13].mxu0  ;;  %v1960_v14 = vsel %vm1832_vm5, %v1768_v0, %v1896_v2 }
 0x2ee   : > { %v1377_v7 = vpop.f32.mrb[14].mxu0  ;;  %v1961_v8 = vsel %vm1833_vm4, %v1769_v1, %v1897_v4 }
 0x2ef   : > { %v1668_v11 = vpack.c.bf16 %v1377_v7, %v1373_v3  ;;  %v1379_v12 = vpop.f32.mrb[15].mxu0  ;;  %2264 = vmatprep.mubr.bf16.mxu1 %v1961_v8 }
 0x2f0   : > { %v1669_v15 = vpack.c.bf16 %v1379_v12, %v1375_v5  ;;  %2265 = vmatmul.mubr.bf16.gmra.mrb[8].mxu1 %v1960_v14 }
 0x2f1   : > { %v1770_v16 = vadd.bf16 %v10241_v26, %v1668_v11  ;;  %1642 = vmatmul.mubr.bf16.gmra.mrb[120].mxu0 %v8277_v6  ;;  %v8310_v11 = vld [vmem:[#allocation13 + $0xd4] ss:$8 sps:$4 sm:$0xff]  }
 0x2f2   : > { %v1771_v19 = vadd.bf16 %v10245_v29, %v1669_v15  ;;  %1651 = vmatprep.mubr.bf16.mxu0 %v8278_v9  ;;  %v8308_v9 = vld [vmem:[#allocation13 + $0xd0] ss:$8 sps:$4 sm:$0xff]   ;;  %3153 = vmatprep.subr.bf16.mxu0 %v8310_v11 }
 0x2f3   : > { %v1898_v21 = vmul.bf16 1045249613, %v1770_v16  ;;  %vm1834_vm7 = vcmp.gt.bf16.partialorder %v1770_v16, 0  ;;  %3154 = vmatpush1.bf16.msra.mxu0 %v8308_v9 }
 0x2f4   : > { %v1383_v22 = vpop.f32.mrb[16].mxu0  ;;  %vm1835_vm6 = vcmp.gt.bf16.partialorder %v1771_v19, 0  ;;  %v1899_v23 = vmul.bf16 1045249613, %v1771_v19 }
 0x2f5   : > { %v1385_v24 = vpop.f32.mrb[17].mxu0  ;;  %v1962_v32 = vsel %vm1834_vm7, %v1770_v16, %v1898_v21 }
 0x2f6   : > { %v1387_v27 = vpop.f32.mrb[18].mxu0  ;;  %v1963_v28 = vsel %vm1835_vm6, %v1771_v19, %v1899_v23 }
 0x2f7   : > { %v1670_v30 = vpack.c.bf16 %v1387_v27, %v1383_v22  ;;  %v1389_v31 = vpop.f32.mrb[19].mxu0  ;;  %2274 = vmatprep.mubr.bf16.mxu1 %v1963_v28 }
 0x2f8   : > { %v1671_v33 = vpack.c.bf16 %v1389_v31, %v1385_v24  ;;  %2275 = vmatmul.mubr.bf16.gmra.mrb[12].mxu1 %v1962_v32 }
 0x2f9   : > { %v1772_v34 = vadd.bf16 %v10241_v26, %v1670_v30  ;;  %1652 = vmatmul.mubr.bf16.gmra.mrb[124].mxu0 %v8280_v25 }
 0x2fa   : > { %v1773_v35 = vadd.bf16 %v10245_v29, %v1671_v33 }
 0x2fb   : > { %v1900_v36 = vmul.bf16 1045249613, %v1772_v34  ;;  %vm1836_vm9 = vcmp.gt.bf16.partialorder %v1772_v34, 0 }
 0x2fc   : > { %v1393_v37 = vpop.f32.mrb[20].mxu0  ;;  %vm1837_vm8 = vcmp.gt.bf16.partialorder %v1773_v35, 0  ;;  %v1901_v38 = vmul.bf16 1045249613, %v1773_v35 }
 0x2fd   : > { %v1395_v39 = vpop.f32.mrb[21].mxu0  ;;  %v1964_v44 = vsel %vm1836_vm9, %v1772_v34, %v1900_v36 }
 0x2fe   : > { %v1397_v40 = vpop.f32.mrb[22].mxu0  ;;  %v1965_v41 = vsel %vm1837_vm8, %v1773_v35, %v1901_v38 }
 0x2ff   : > { %v1672_v42 = vpack.c.bf16 %v1397_v40, %v1393_v37  ;;  %v1399_v43 = vpop.f32.mrb[23].mxu0  ;;  %2284 = vmatprep.mubr.bf16.mxu1 %v1965_v41  ;;  %v8311_v40 = vld [vmem:[#allocation13 + $0xe0] ss:$8 sps:$4 sm:$0xff]   ;;  %v8313_v41 = vld [vmem:[#allocation13 + $0xe4] ss:$8 sps:$4 sm:$0xff]  }
 0x300   : > { %v1673_v45 = vpack.c.bf16 %v1399_v43, %v1395_v39  ;;  %2285 = vmatmul.mubr.bf16.gmra.mrb[16].mxu1 %v1964_v44  ;;  %3155 = vmatprep.subr.bf16.mxu0 %v8313_v41 }
 0x301   : > { %v1774_v46 = vadd.bf16 %v10241_v26, %v1672_v42  ;;  %3156 = vmatpush1.bf16.msra.mxu0 %v8311_v40 }
 0x302   : > { %v1775_v49 = vadd.bf16 %v10245_v29, %v1673_v45 }
 0x303   : > { %v1902_v50 = vmul.bf16 1045249613, %v1774_v46  ;;  %vm1838_vm11 = vcmp.gt.bf16.partialorder %v1774_v46, 0 }
 0x304   : > { %v1403_v51 = vpop.f32.mrb[24].mxu0  ;;  %vm1839_vm10 = vcmp.gt.bf16.partialorder %v1775_v49, 0  ;;  %v1903_v52 = vmul.bf16 1045249613, %v1775_v49 }
 0x305   : > { %v1405_v53 = vpop.f32.mrb[25].mxu0  ;;  %v1966_v58 = vsel %vm1838_vm11, %v1774_v46, %v1902_v50 }
 0x306   : > { %v1407_v54 = vpop.f32.mrb[26].mxu0  ;;  %v1967_v55 = vsel %vm1839_vm10, %v1775_v49, %v1903_v52 }
 0x307   : > { %v1674_v56 = vpack.c.bf16 %v1407_v54, %v1403_v51  ;;  %v1409_v57 = vpop.f32.mrb[27].mxu0  ;;  %2294 = vmatprep.mubr.bf16.mxu1 %v1967_v55 }
 0x308   : > { %v1675_v59 = vpack.c.bf16 %v1409_v57, %v1405_v53  ;;  %2295 = vmatmul.mubr.bf16.gmra.mrb[20].mxu1 %v1966_v58 }
 0x309   : > { %v1776_v60 = vadd.bf16 %v10241_v26, %v1674_v56 }
 0x30a   : > { %v1777_v61 = vadd.bf16 %v10245_v29, %v1675_v59  ;;  %v8314_v59 = vld [vmem:[#allocation16] ss:$8 sps:$4 sm:$0xff]  }
 0x30b   : > { %v1904_v62 = vmul.bf16 1045249613, %v1776_v60  ;;  %vm1840_vm13 = vcmp.gt.bf16.partialorder %v1776_v60, 0 }
 0x30c   : > { %v1413_v63 = vpop.f32.mrb[28].mxu0  ;;  %vm1841_vm12 = vcmp.gt.bf16.partialorder %v1777_v61, 0  ;;  %v1905_v0 = vmul.bf16 1045249613, %v1777_v61 }
 0x30d   : > { %v1415_v1 = vpop.f32.mrb[29].mxu0  ;;  %v1968_v6 = vsel %vm1840_vm13, %v1776_v60, %v1904_v62  ;;  %v8316_v60 = vld [vmem:[#allocation16 + $0x4] ss:$8 sps:$4 sm:$0xff]  }
 0x30e   : > { %v1417_v2 = vpop.f32.mrb[30].mxu0  ;;  %v1969_v3 = vsel %vm1841_vm12, %v1777_v61, %v1905_v0  ;;  %3992 = vmatprep.subr.bf16.mxu1 %v8316_v60 }
 0x30f   : > { %v1676_v4 = vpack.c.bf16 %v1417_v2, %v1413_v63  ;;  %v1419_v5 = vpop.f32.mrb[31].mxu0  ;;  %2304 = vmatprep.mubr.bf16.mxu1 %v1969_v3  ;;  %3993 = vmatpush1.bf16.msra.mxu1 %v8314_v59 }
 0x310   : > { %v1677_v7 = vpack.c.bf16 %v1419_v5, %v1415_v1  ;;  %2305 = vmatmul.mubr.bf16.gmra.mrb[24].mxu1 %v1968_v6  ;;  %v8319_v5 = vld [vmem:[#allocation13 + $0xf4] ss:$8 sps:$4 sm:$0xff]  }
 0x311   : > { %v1778_v8 = vadd.bf16 %v10241_v26, %v1676_v4  ;;  %v8317_v4 = vld [vmem:[#allocation13 + $0xf0] ss:$8 sps:$4 sm:$0xff]   ;;  %3157 = vmatprep.subr.bf16.mxu0 %v8319_v5 }
 0x312   : > { %v1779_v12 = vadd.bf16 %v10245_v29, %v1677_v7  ;;  %3158 = vmatpush1.bf16.msra.mxu0 %v8317_v4 }
 0x313   : > { %v1906_v14 = vmul.bf16 1045249613, %v1778_v8  ;;  %vm1842_vm15 = vcmp.gt.bf16.partialorder %v1778_v8, 0 }
 0x314   : > { %v1423_v15 = vpop.f32.mrb[32].mxu0  ;;  %vm1843_vm14 = vcmp.gt.bf16.partialorder %v1779_v12, 0  ;;  %v1907_v16 = vmul.bf16 1045249613, %v1779_v12 }
 0x315   : > { %v1425_v17 = vpop.f32.mrb[33].mxu0  ;;  %v1970_v23 = vsel %vm1842_vm15, %v1778_v8, %v1906_v14 }
 0x316   : > { %v1427_v18 = vpop.f32.mrb[34].mxu0  ;;  %v1971_v19 = vsel %vm1843_vm14, %v1779_v12, %v1907_v16 }
 0x317   : > { %v1678_v21 = vpack.c.bf16 %v1427_v18, %v1423_v15  ;;  %v1429_v22 = vpop.f32.mrb[35].mxu0  ;;  %2314 = vmatprep.mubr.bf16.mxu1 %v1971_v19 }
 0x318   : > { %v1679_v24 = vpack.c.bf16 %v1429_v22, %v1425_v17  ;;  %2315 = vmatmul.mubr.bf16.gmra.mrb[28].mxu1 %v1970_v23 }
 0x319   : > { %v1780_v25 = vadd.bf16 %v10241_v26, %v1678_v21 }
 0x31a   : > { %v1781_v27 = vadd.bf16 %v10245_v29, %v1679_v24 }
 0x31b   : > { %v1908_v28 = vmul.bf16 1045249613, %v1780_v25  ;;  %vm1844_vm1 = vcmp.gt.bf16.partialorder %v1780_v25, 0 }
 0x31c   : > { %v1433_v30 = vpop.f32.mrb[36].mxu0  ;;  %vm1845_vm0 = vcmp.gt.bf16.partialorder %v1781_v27, 0  ;;  %v1909_v31 = vmul.bf16 1045249613, %v1781_v27 }
 0x31d   : > { %v1435_v32 = vpop.f32.mrb[37].mxu0  ;;  %v1972_v37 = vsel %vm1844_vm1, %v1780_v25, %v1908_v28 }
 0x31e   : > { %v1437_v33 = vpop.f32.mrb[38].mxu0  ;;  %v1973_v34 = vsel %vm1845_vm0, %v1781_v27, %v1909_v31 }
 0x31f   : > { %v1680_v35 = vpack.c.bf16 %v1437_v33, %v1433_v30  ;;  %v1439_v36 = vpop.f32.mrb[39].mxu0  ;;  %2324 = vmatprep.mubr.bf16.mxu1 %v1973_v34 }
 0x320   : > { %v1681_v38 = vpack.c.bf16 %v1439_v36, %v1435_v32  ;;  %2325 = vmatmul.mubr.bf16.gmra.mrb[32].mxu1 %v1972_v37 }
 0x321   : > { %v1782_v39 = vadd.bf16 %v10241_v26, %v1680_v35 }
 0x322   : > { %v1783_v42 = vadd.bf16 %v10245_v29, %v1681_v38 }
 0x323   : > { %v1910_v43 = vmul.bf16 1045249613, %v1782_v39  ;;  %vm1846_vm3 = vcmp.gt.bf16.partialorder %v1782_v39, 0 }
 0x324   : > { %v1443_v44 = vpop.f32.mrb[40].mxu0  ;;  %vm1847_vm2 = vcmp.gt.bf16.partialorder %v1783_v42, 0  ;;  %v1911_v45 = vmul.bf16 1045249613, %v1783_v42 }
 0x325   : > { %v1445_v46 = vpop.f32.mrb[41].mxu0  ;;  %v1974_v51 = vsel %vm1846_vm3, %v1782_v39, %v1910_v43 }
 0x326   : > { %v1447_v47 = vpop.f32.mrb[42].mxu0  ;;  %v1975_v48 = vsel %vm1847_vm2, %v1783_v42, %v1911_v45 }
 0x327   : > { %v1682_v49 = vpack.c.bf16 %v1447_v47, %v1443_v44  ;;  %v1449_v50 = vpop.f32.mrb[43].mxu0  ;;  %2334 = vmatprep.mubr.bf16.mxu1 %v1975_v48 }
 0x328   : > { %v1683_v52 = vpack.c.bf16 %v1449_v50, %v1445_v46  ;;  %2335 = vmatmul.mubr.bf16.gmra.mrb[36].mxu1 %v1974_v51 }
 0x329   : > { %v1784_v53 = vadd.bf16 %v10241_v26, %v1682_v49 }
 0x32a   : > { %v1785_v54 = vadd.bf16 %v10245_v29, %v1683_v52  ;;  %v8320_v52 = vld [vmem:[#allocation16 + $0x10] ss:$8 sps:$4 sm:$0xff]  }
 0x32b   : > { %v1912_v55 = vmul.bf16 1045249613, %v1784_v53  ;;  %vm1848_vm5 = vcmp.gt.bf16.partialorder %v1784_v53, 0 }
 0x32c   : > { %v1453_v56 = vpop.f32.mrb[44].mxu0  ;;  %vm1849_vm4 = vcmp.gt.bf16.partialorder %v1785_v54, 0  ;;  %v1913_v57 = vmul.bf16 1045249613, %v1785_v54 }
 0x32d   : > { %v1455_v58 = vpop.f32.mrb[45].mxu0  ;;  %v1976_v1 = vsel %vm1848_vm5, %v1784_v53, %v1912_v55  ;;  %v8322_v53 = vld [vmem:[#allocation16 + $0x14] ss:$8 sps:$4 sm:$0xff]  }
 0x32e   : > { %v1457_v61 = vpop.f32.mrb[46].mxu0  ;;  %v1977_v62 = vsel %vm1849_vm4, %v1785_v54, %v1913_v57  ;;  %3994 = vmatprep.subr.bf16.mxu1 %v8322_v53 }
 0x32f   : > { %v1684_v63 = vpack.c.bf16 %v1457_v61, %v1453_v56  ;;  %v1459_v0 = vpop.f32.mrb[47].mxu0  ;;  %2344 = vmatprep.mubr.bf16.mxu1 %v1977_v62  ;;  %3995 = vmatpush1.bf16.msra.mxu1 %v8320_v52 }
 0x330   : > { %v1685_v2 = vpack.c.bf16 %v1459_v0, %v1455_v58  ;;  %2345 = vmatmul.mubr.bf16.gmra.mrb[40].mxu1 %v1976_v1 }
 0x331   : > { %v1786_v3 = vadd.bf16 %v10241_v26, %v1684_v63 }
 0x332   : > { %v1787_v6 = vadd.bf16 %v10245_v29, %v1685_v2 }
 0x333   : > { %v1914_v7 = vmul.bf16 1045249613, %v1786_v3  ;;  %vm1850_vm7 = vcmp.gt.bf16.partialorder %v1786_v3, 0 }
 0x334   : > { %v1463_v8 = vpop.f32.mrb[48].mxu0  ;;  %vm1851_vm6 = vcmp.gt.bf16.partialorder %v1787_v6, 0  ;;  %v1915_v9 = vmul.bf16 1045249613, %v1787_v6 }
 0x335   : > { %v1465_v11 = vpop.f32.mrb[49].mxu0  ;;  %v1978_v17 = vsel %vm1850_vm7, %v1786_v3, %v1914_v7 }
 0x336   : > { %v1467_v12 = vpop.f32.mrb[50].mxu0  ;;  %v1979_v14 = vsel %vm1851_vm6, %v1787_v6, %v1915_v9 }
 0x337   : > { %v1686_v15 = vpack.c.bf16 %v1467_v12, %v1463_v8  ;;  %v1469_v16 = vpop.f32.mrb[51].mxu0  ;;  %2354 = vmatprep.mubr.bf16.mxu1 %v1979_v14 }
 0x338   : > { %v1687_v18 = vpack.c.bf16 %v1469_v16, %v1465_v11  ;;  %2355 = vmatmul.mubr.bf16.gmra.mrb[44].mxu1 %v1978_v17 }
 0x339   : > { %v1788_v19 = vadd.bf16 %v10241_v26, %v1686_v15 }
 0x33a   : > { %v1789_v21 = vadd.bf16 %v10245_v29, %v1687_v18 }
 0x33b   : > { %v1916_v22 = vmul.bf16 1045249613, %v1788_v19  ;;  %vm1852_vm9 = vcmp.gt.bf16.partialorder %v1788_v19, 0 }
 0x33c   : > { %v1473_v23 = vpop.f32.mrb[52].mxu0  ;;  %vm1853_vm8 = vcmp.gt.bf16.partialorder %v1789_v21, 0  ;;  %v1917_v24 = vmul.bf16 1045249613, %v1789_v21 }
 0x33d   : > { %v1475_v25 = vpop.f32.mrb[53].mxu0  ;;  %v1980_v32 = vsel %vm1852_vm9, %v1788_v19, %v1916_v22 }
 0x33e   : > { %v1477_v27 = vpop.f32.mrb[54].mxu0  ;;  %v1981_v28 = vsel %vm1853_vm8, %v1789_v21, %v1917_v24 }
 0x33f   : > { %v1688_v30 = vpack.c.bf16 %v1477_v27, %v1473_v23  ;;  %v1479_v31 = vpop.f32.mrb[55].mxu0  ;;  %2364 = vmatprep.mubr.bf16.mxu1 %v1981_v28 }
 0x340   : > { %v1689_v33 = vpack.c.bf16 %v1479_v31, %v1475_v25  ;;  %2365 = vmatmul.mubr.bf16.gmra.mrb[48].mxu1 %v1980_v32 }
 0x341   : > { %v1790_v34 = vadd.bf16 %v10241_v26, %v1688_v30 }
 0x342   : > { %v1791_v35 = vadd.bf16 %v10245_v29, %v1689_v33 }
 0x343   : > { %v1918_v36 = vmul.bf16 1045249613, %v1790_v34  ;;  %vm1854_vm11 = vcmp.gt.bf16.partialorder %v1790_v34, 0 }
 0x344   : > { %v1483_v37 = vpop.f32.mrb[56].mxu0  ;;  %vm1855_vm10 = vcmp.gt.bf16.partialorder %v1791_v35, 0  ;;  %v1919_v38 = vmul.bf16 1045249613, %v1791_v35 }
 0x345   : > { %v1485_v39 = vpop.f32.mrb[57].mxu0  ;;  %v1982_v44 = vsel %vm1854_vm11, %v1790_v34, %v1918_v36 }
 0x346   : > { %v1487_v40 = vpop.f32.mrb[58].mxu0  ;;  %v1983_v41 = vsel %vm1855_vm10, %v1791_v35, %v1919_v38 }
 0x347   : > { %v1690_v42 = vpack.c.bf16 %v1487_v40, %v1483_v37  ;;  %v1489_v43 = vpop.f32.mrb[59].mxu0  ;;  %2374 = vmatprep.mubr.bf16.mxu1 %v1983_v41 }
 0x348   : > { %v1691_v45 = vpack.c.bf16 %v1489_v43, %v1485_v39  ;;  %2375 = vmatmul.mubr.bf16.gmra.mrb[52].mxu1 %v1982_v44  ;;  %v8323_v43 = vld [vmem:[#allocation16 + $0x20] ss:$8 sps:$4 sm:$0xff]   ;;  %v8325_v44 = vld [vmem:[#allocation16 + $0x24] ss:$8 sps:$4 sm:$0xff]  }
 0x349   : > { %v1792_v46 = vadd.bf16 %v10241_v26, %v1690_v42  ;;  %3996 = vmatprep.subr.bf16.mxu1 %v8325_v44 }
 0x34a   : > { %v1793_v47 = vadd.bf16 %v10245_v29, %v1691_v45  ;;  %3997 = vmatpush1.bf16.msra.mxu1 %v8323_v43 }
 0x34b   : > { %v1920_v48 = vmul.bf16 1045249613, %v1792_v46  ;;  %vm1856_vm13 = vcmp.gt.bf16.partialorder %v1792_v46, 0 }
 0x34c   : > { %v1493_v49 = vpop.f32.mrb[60].mxu0  ;;  %vm1857_vm12 = vcmp.gt.bf16.partialorder %v1793_v47, 0  ;;  %v1921_v50 = vmul.bf16 1045249613, %v1793_v47 }
 0x34d   : > { %v1495_v51 = vpop.f32.mrb[61].mxu0  ;;  %v1984_v58 = vsel %vm1856_vm13, %v1792_v46, %v1920_v48 }
 0x34e   : > { %v1497_v54 = vpop.f32.mrb[62].mxu0  ;;  %v1985_v55 = vsel %vm1857_vm12, %v1793_v47, %v1921_v50 }
 0x34f   : > { %v1692_v56 = vpack.c.bf16 %v1497_v54, %v1493_v49  ;;  %v1499_v57 = vpop.f32.mrb[63].mxu0  ;;  %2384 = vmatprep.mubr.bf16.mxu1 %v1985_v55 }
 0x350   : > { %v1693_v59 = vpack.c.bf16 %v1499_v57, %v1495_v51  ;;  %2385 = vmatmul.mubr.bf16.gmra.mrb[56].mxu1 %v1984_v58 }
 0x351   : > { %v1794_v60 = vadd.bf16 %v10241_v26, %v1692_v56 }
 0x352   : > { %v1795_v61 = vadd.bf16 %v10245_v29, %v1693_v59 }
 0x353   : > { %v1922_v62 = vmul.bf16 1045249613, %v1794_v60  ;;  %vm1858_vm15 = vcmp.gt.bf16.partialorder %v1794_v60, 0 }
 0x354   : > { %v1503_v63 = vpop.f32.mrb[64].mxu0  ;;  %vm1859_vm14 = vcmp.gt.bf16.partialorder %v1795_v61, 0  ;;  %v1923_v0 = vmul.bf16 1045249613, %v1795_v61 }
 0x355   : > { %v1505_v1 = vpop.f32.mrb[65].mxu0  ;;  %v1986_v6 = vsel %vm1858_vm15, %v1794_v60, %v1922_v62 }
 0x356   : > { %v1507_v2 = vpop.f32.mrb[66].mxu0  ;;  %v1987_v3 = vsel %vm1859_vm14, %v1795_v61, %v1923_v0 }
 0x357   : > { %v1694_v4 = vpack.c.bf16 %v1507_v2, %v1503_v63  ;;  %v1509_v5 = vpop.f32.mrb[67].mxu0  ;;  %2394 = vmatprep.mubr.bf16.mxu1 %v1987_v3 }
 0x358   : > { %v1695_v7 = vpack.c.bf16 %v1509_v5, %v1505_v1  ;;  %2395 = vmatmul.mubr.bf16.gmra.mrb[60].mxu1 %v1986_v6 }
 0x359   : > { %v1796_v8 = vadd.bf16 %v10241_v26, %v1694_v4 }
 0x35a   : > { %v1797_v9 = vadd.bf16 %v10245_v29, %v1695_v7 }
 0x35b   : > { %v1924_v11 = vmul.bf16 1045249613, %v1796_v8  ;;  %vm1860_vm1 = vcmp.gt.bf16.partialorder %v1796_v8, 0 }
 0x35c   : > { %v1513_v12 = vpop.f32.mrb[68].mxu0  ;;  %vm1861_vm0 = vcmp.gt.bf16.partialorder %v1797_v9, 0  ;;  %v1925_v14 = vmul.bf16 1045249613, %v1797_v9 }
 0x35d   : > { %v1515_v15 = vpop.f32.mrb[69].mxu0  ;;  %v1988_v21 = vsel %vm1860_vm1, %v1796_v8, %v1924_v11 }
 0x35e   : > { %v1517_v16 = vpop.f32.mrb[70].mxu0  ;;  %v1989_v17 = vsel %vm1861_vm0, %v1797_v9, %v1925_v14 }
 0x35f   : > { %v1696_v18 = vpack.c.bf16 %v1517_v16, %v1513_v12  ;;  %v1519_v19 = vpop.f32.mrb[71].mxu0  ;;  %2404 = vmatprep.mubr.bf16.mxu1 %v1989_v17 }
 0x360   : > { %v1697_v22 = vpack.c.bf16 %v1519_v19, %v1515_v15  ;;  %2405 = vmatmul.mubr.bf16.gmra.mrb[64].mxu1 %v1988_v21 }
 0x361   : > { %v1798_v23 = vadd.bf16 %v10241_v26, %v1696_v18 }
 0x362   : > { %v1799_v24 = vadd.bf16 %v10245_v29, %v1697_v22 }
 0x363   : > { %v1926_v25 = vmul.bf16 1045249613, %v1798_v23  ;;  %vm1862_vm3 = vcmp.gt.bf16.partialorder %v1798_v23, 0 }
 0x364   : > { %v1523_v27 = vpop.f32.mrb[72].mxu0  ;;  %vm1863_vm2 = vcmp.gt.bf16.partialorder %v1799_v24, 0  ;;  %v1927_v28 = vmul.bf16 1045249613, %v1799_v24 }
 0x365   : > { %v1525_v30 = vpop.f32.mrb[73].mxu0  ;;  %v1990_v35 = vsel %vm1862_vm3, %v1798_v23, %v1926_v25 }
 0x366   : > { %v1527_v31 = vpop.f32.mrb[74].mxu0  ;;  %v1991_v32 = vsel %vm1863_vm2, %v1799_v24, %v1927_v28 }
 0x367   : > { %v1698_v33 = vpack.c.bf16 %v1527_v31, %v1523_v27  ;;  %v1529_v34 = vpop.f32.mrb[75].mxu0  ;;  %2414 = vmatprep.mubr.bf16.mxu1 %v1991_v32 }
 0x368   : > { %v1699_v36 = vpack.c.bf16 %v1529_v34, %v1525_v30  ;;  %2415 = vmatmul.mubr.bf16.gmra.mrb[68].mxu1 %v1990_v35  ;;  %v8326_v34 = vld [vmem:[#allocation16 + $0x30] ss:$8 sps:$4 sm:$0xff]   ;;  %v8328_v35 = vld [vmem:[#allocation16 + $0x34] ss:$8 sps:$4 sm:$0xff]  }
 0x369   : > { %v1800_v37 = vadd.bf16 %v10241_v26, %v1698_v33  ;;  %3998 = vmatprep.subr.bf16.mxu1 %v8328_v35 }
 0x36a   : > { %v1801_v38 = vadd.bf16 %v10245_v29, %v1699_v36  ;;  %3999 = vmatpush1.bf16.msra.mxu1 %v8326_v34 }
 0x36b   : > { %v1928_v39 = vmul.bf16 1045249613, %v1800_v37  ;;  %vm1864_vm5 = vcmp.gt.bf16.partialorder %v1800_v37, 0 }
 0x36c   : > { %v1533_v40 = vpop.f32.mrb[76].mxu0  ;;  %vm1865_vm4 = vcmp.gt.bf16.partialorder %v1801_v38, 0  ;;  %v1929_v41 = vmul.bf16 1045249613, %v1801_v38 }
 0x36d   : > { %v1535_v42 = vpop.f32.mrb[77].mxu0  ;;  %v1992_v49 = vsel %vm1864_vm5, %v1800_v37, %v1928_v39 }
 0x36e   : > { %v1537_v45 = vpop.f32.mrb[78].mxu0  ;;  %v1993_v46 = vsel %vm1865_vm4, %v1801_v38, %v1929_v41 }
 0x36f   : > { %v1700_v47 = vpack.c.bf16 %v1537_v45, %v1533_v40  ;;  %v1539_v48 = vpop.f32.mrb[79].mxu0  ;;  %2424 = vmatprep.mubr.bf16.mxu1 %v1993_v46 }
 0x370   : > { %v1701_v50 = vpack.c.bf16 %v1539_v48, %v1535_v42  ;;  %2425 = vmatmul.mubr.bf16.gmra.mrb[72].mxu1 %v1992_v49 }
 0x371   : > { %v1802_v51 = vadd.bf16 %v10241_v26, %v1700_v47 }
 0x372   : > { %v1803_v52 = vadd.bf16 %v10245_v29, %v1701_v50 }
 0x373   : > { %v1930_v53 = vmul.bf16 1045249613, %v1802_v51  ;;  %vm1866_vm7 = vcmp.gt.bf16.partialorder %v1802_v51, 0 }
 0x374   : > { %v1543_v54 = vpop.f32.mrb[80].mxu0  ;;  %vm1867_vm6 = vcmp.gt.bf16.partialorder %v1803_v52, 0  ;;  %v1931_v55 = vmul.bf16 1045249613, %v1803_v52 }
 0x375   : > { %v1545_v56 = vpop.f32.mrb[81].mxu0  ;;  %v1994_v61 = vsel %vm1866_vm7, %v1802_v51, %v1930_v53 }
 0x376   : > { %v1547_v57 = vpop.f32.mrb[82].mxu0  ;;  %v1995_v58 = vsel %vm1867_vm6, %v1803_v52, %v1931_v55 }
 0x377   : > { %v1702_v59 = vpack.c.bf16 %v1547_v57, %v1543_v54  ;;  %v1549_v60 = vpop.f32.mrb[83].mxu0  ;;  %2434 = vmatprep.mubr.bf16.mxu1 %v1995_v58 }
 0x378   : > { %v1703_v62 = vpack.c.bf16 %v1549_v60, %v1545_v56  ;;  %2435 = vmatmul.mubr.bf16.gmra.mrb[76].mxu1 %v1994_v61 }
 0x379   : > { %v1804_v63 = vadd.bf16 %v10241_v26, %v1702_v59 }
 0x37a   : > { %v1805_v0 = vadd.bf16 %v10245_v29, %v1703_v62 }
 0x37b   : > { %v1932_v1 = vmul.bf16 1045249613, %v1804_v63  ;;  %vm1868_vm9 = vcmp.gt.bf16.partialorder %v1804_v63, 0 }
 0x37c   : > { %v1553_v2 = vpop.f32.mrb[84].mxu0  ;;  %vm1869_vm8 = vcmp.gt.bf16.partialorder %v1805_v0, 0  ;;  %v1933_v3 = vmul.bf16 1045249613, %v1805_v0 }
 0x37d   : > { %v1555_v4 = vpop.f32.mrb[85].mxu0  ;;  %v1996_v9 = vsel %vm1868_vm9, %v1804_v63, %v1932_v1 }
 0x37e   : > { %v1557_v5 = vpop.f32.mrb[86].mxu0  ;;  %v1997_v6 = vsel %vm1869_vm8, %v1805_v0, %v1933_v3 }
 0x37f   : > { %v1704_v7 = vpack.c.bf16 %v1557_v5, %v1553_v2  ;;  %v1559_v8 = vpop.f32.mrb[87].mxu0  ;;  %2444 = vmatprep.mubr.bf16.mxu1 %v1997_v6 }
 0x380   : > { %v1705_v11 = vpack.c.bf16 %v1559_v8, %v1555_v4  ;;  %2445 = vmatmul.mubr.bf16.gmra.mrb[80].mxu1 %v1996_v9 }
 0x381   : > { %v1806_v12 = vadd.bf16 %v10241_v26, %v1704_v7 }
 0x382   : > { %v1807_v14 = vadd.bf16 %v10245_v29, %v1705_v11  ;;  %v7634_v11 = vld.sshfl [vmem:[#allocation11] sm:$0x11 pattern:$0x75316420] }
 0x383   : > { %v1934_v15 = vmul.bf16 1045249613, %v1806_v12  ;;  %vm1870_vm11 = vcmp.gt.bf16.partialorder %v1806_v12, 0 }
 0x384   : > { %v1563_v16 = vpop.f32.mrb[88].mxu0  ;;  %vm1871_vm10 = vcmp.gt.bf16.partialorder %v1807_v14, 0  ;;  %v1935_v17 = vmul.bf16 1045249613, %v1807_v14 }
 0x385   : > { %v1565_v18 = vpop.f32.mrb[89].mxu0  ;;  %v1998_v24 = vsel %vm1870_vm11, %v1806_v12, %v1934_v15 }
 0x386   : > { %v1567_v19 = vpop.f32.mrb[90].mxu0  ;;  %v1999_v21 = vsel %vm1871_vm10, %v1807_v14, %v1935_v17 }
 0x387   : > { %v1706_v22 = vpack.c.bf16 %v1567_v19, %v1563_v16  ;;  %v1569_v23 = vpop.f32.mrb[91].mxu0  ;;  %2454 = vmatprep.mubr.bf16.mxu1 %v1999_v21 }
 0x388   : > { %v1707_v25 = vpack.c.bf16 %v1569_v23, %v1565_v18  ;;  %2455 = vmatmul.mubr.bf16.gmra.mrb[84].mxu1 %v1998_v24  ;;  %v2638_v18 = vcombine.high %v7634_v11, %v7634_v11  ;;  %v2645_v24 = vrot.slane %v7634_v11, %v10231_v13 }
 0x389   : > { %v1808_v27 = vadd.bf16 %v10241_v26, %v1706_v22 }
 0x38a   : > { %v1809_v28 = vadd.bf16 %v10245_v29, %v1707_v25 }
 0x38b   : > { %v1936_v30 = vmul.bf16 1045249613, %v1808_v27  ;;  %vm1872_vm13 = vcmp.gt.bf16.partialorder %v1808_v27, 0 }
 0x38c   : > { %v1573_v31 = vpop.f32.mrb[92].mxu0  ;;  %vm1873_vm12 = vcmp.gt.bf16.partialorder %v1809_v28, 0  ;;  %v1937_v32 = vmul.bf16 1045249613, %v1809_v28 }
 0x38d   : > { %v1575_v33 = vpop.f32.mrb[93].mxu0  ;;  %v2000_v40 = vsel %vm1872_vm13, %v1808_v27, %v1936_v30  ;;  %v2652_v27 = vrot.slane %v2638_v18, %v10231_v13  ;;  %v8331_v30 = vld [vmem:[#allocation16 + $0x44] ss:$8 sps:$4 sm:$0xff]  }
 0x38e   : > { %v1577_v36 = vpop.f32.mrb[94].mxu0  ;;  %v2001_v37 = vsel %vm1873_vm12, %v1809_v28, %v1937_v32  ;;  %v8329_v28 = vld [vmem:[#allocation16 + $0x40] ss:$8 sps:$4 sm:$0xff]   ;;  %4000 = vmatprep.subr.bf16.mxu1 %v8331_v30 }
 0x38f   : > { %v1708_v38 = vpack.c.bf16 %v1577_v36, %v1573_v31  ;;  %v1579_v39 = vpop.f32.mrb[95].mxu0  ;;  %2464 = vmatprep.mubr.bf16.mxu1 %v2001_v37  ;;  %v2654_v37 = vpack.i.b16 %v2645_v24, %v2645_v24  ;;  %4001 = vmatpush1.bf16.msra.mxu1 %v8329_v28 }
 0x390   : > { %v1709_v41 = vpack.c.bf16 %v1579_v39, %v1575_v33  ;;  %2465 = vmatmul.mubr.bf16.gmra.mrb[88].mxu1 %v2000_v40  ;;  %v2661_v39 = vpack.i.b16 %v2652_v27, %v2652_v27 }
 0x391   : > { %v1810_v42 = vadd.bf16 %v10241_v26, %v1708_v38 }
 0x392   : > { %v1811_v43 = vadd.bf16 %v10245_v29, %v1709_v41 }
 0x393   : > { %v1938_v44 = vmul.bf16 1045249613, %v1810_v42  ;;  %vm1874_vm15 = vcmp.gt.bf16.partialorder %v1810_v42, 0 }
 0x394   : > { %v1583_v45 = vpop.f32.mrb[96].mxu0  ;;  %vm1875_vm14 = vcmp.gt.bf16.partialorder %v1811_v43, 0  ;;  %v1939_v46 = vmul.bf16 1045249613, %v1811_v43 }
 0x395   : > { %v1585_v47 = vpop.f32.mrb[97].mxu0  ;;  %v2002_v52 = vsel %vm1874_vm15, %v1810_v42, %v1938_v44 }
 0x396   : > { %v1587_v48 = vpop.f32.mrb[98].mxu0  ;;  %v2003_v49 = vsel %vm1875_vm14, %v1811_v43, %v1939_v46 }
 0x397   : > { %v1710_v50 = vpack.c.bf16 %v1587_v48, %v1583_v45  ;;  %v1589_v51 = vpop.f32.mrb[99].mxu0  ;;  %2474 = vmatprep.mubr.bf16.mxu1 %v2003_v49  ;;  %v10314_v45 = vrot.slane %v2654_v37, %v10238_v20  ;;  %v10317_v49 = vrot.slane %v2661_v39, %v10238_v20 }
 0x398   : > { %v1711_v53 = vpack.c.bf16 %v1589_v51, %v1585_v47  ;;  %2475 = vmatmul.mubr.bf16.gmra.mrb[92].mxu1 %v2002_v52 }
 0x399   : > { %v1812_v54 = vadd.bf16 %v10241_v26, %v1710_v50 }
 0x39a   : > { %v1813_v55 = vadd.bf16 %v10245_v29, %v1711_v53 }
 0x39b   : > { %v1940_v56 = vmul.bf16 1045249613, %v1812_v54  ;;  %vm1876_vm1 = vcmp.gt.bf16.partialorder %v1812_v54, 0 }
 0x39c   : > { %v1593_v57 = vpop.f32.mrb[100].mxu0  ;;  %vm1877_vm0 = vcmp.gt.bf16.partialorder %v1813_v55, 0  ;;  %v1941_v58 = vmul.bf16 1045249613, %v1813_v55 }
 0x39d   : > { %v1595_v59 = vpop.f32.mrb[101].mxu0  ;;  %v2004_v0 = vsel %vm1876_vm1, %v1812_v54, %v1940_v56 }
 0x39e   : > { %v1597_v60 = vpop.f32.mrb[102].mxu0  ;;  %v2005_v61 = vsel %vm1877_vm0, %v1813_v55, %v1941_v58 }
 0x39f   : > { %v1712_v62 = vpack.c.bf16 %v1597_v60, %v1593_v57  ;;  %v1599_v63 = vpop.f32.mrb[103].mxu0  ;;  %2484 = vmatprep.mubr.bf16.mxu1 %v2005_v61 }
 0x3a0   : > { %v1713_v1 = vpack.c.bf16 %v1599_v63, %v1595_v59  ;;  %2485 = vmatmul.mubr.bf16.gmra.mrb[96].mxu1 %v2004_v0 }
 0x3a1   : > { %v1814_v2 = vadd.bf16 %v10241_v26, %v1712_v62 }
 0x3a2   : > { %v1815_v3 = vadd.bf16 %v10245_v29, %v1713_v1 }
 0x3a3   : > { %v1942_v4 = vmul.bf16 1045249613, %v1814_v2  ;;  %vm1878_vm3 = vcmp.gt.bf16.partialorder %v1814_v2, 0 }
 0x3a4   : > { %v1603_v5 = vpop.f32.mrb[104].mxu0  ;;  %vm1879_vm2 = vcmp.gt.bf16.partialorder %v1815_v3, 0  ;;  %v1943_v6 = vmul.bf16 1045249613, %v1815_v3 }
 0x3a5   : > { %v1605_v7 = vpop.f32.mrb[105].mxu0  ;;  %v2006_v15 = vsel %vm1878_vm3, %v1814_v2, %v1942_v4 }
 0x3a6   : > { %v1607_v8 = vpop.f32.mrb[106].mxu0  ;;  %v2007_v9 = vsel %vm1879_vm2, %v1815_v3, %v1943_v6 }
 0x3a7   : > { %v1714_v12 = vpack.c.bf16 %v1607_v8, %v1603_v5  ;;  %v1609_v14 = vpop.f32.mrb[107].mxu0  ;;  %2494 = vmatprep.mubr.bf16.mxu1 %v2007_v9 }
 0x3a8   : > { %v1715_v16 = vpack.c.bf16 %v1609_v14, %v1605_v7  ;;  %2495 = vmatmul.mubr.bf16.gmra.mrb[100].mxu1 %v2006_v15 }
 0x3a9   : > { %v1816_v17 = vadd.bf16 %v10241_v26, %v1714_v12 }
 0x3aa   : > { %v1817_v19 = vadd.bf16 %v10245_v29, %v1715_v16 }
 0x3ab   : > { %v1944_v21 = vmul.bf16 1045249613, %v1816_v17  ;;  %vm1880_vm5 = vcmp.gt.bf16.partialorder %v1816_v17, 0 }
 0x3ac   : > { %v1613_v22 = vpop.f32.mrb[108].mxu0  ;;  %vm1881_vm4 = vcmp.gt.bf16.partialorder %v1817_v19, 0  ;;  %v1945_v23 = vmul.bf16 1045249613, %v1817_v19 }
 0x3ad   : > { %v1615_v25 = vpop.f32.mrb[109].mxu0  ;;  %v2008_v35 = vsel %vm1880_vm5, %v1816_v17, %v1944_v21 }
 0x3ae   : > { %v1617_v31 = vpop.f32.mrb[110].mxu0  ;;  %v2009_v32 = vsel %vm1881_vm4, %v1817_v19, %v1945_v23 }
 0x3af   : > { %v1716_v33 = vpack.c.bf16 %v1617_v31, %v1613_v22  ;;  %v1619_v34 = vpop.f32.mrb[111].mxu0  ;;  %2504 = vmatprep.mubr.bf16.mxu1 %v2009_v32 }
 0x3b0   : > { %v1717_v36 = vpack.c.bf16 %v1619_v34, %v1615_v25  ;;  %2505 = vmatmul.mubr.bf16.gmra.mrb[104].mxu1 %v2008_v35 }
 0x3b1   : > { %v1818_v38 = vadd.bf16 %v10241_v26, %v1716_v33 }
 0x3b2   : > { %v1819_v40 = vadd.bf16 %v10245_v29, %v1717_v36 }
 0x3b3   : > { %v2246_v41 = vpop.f32.mrb[0].mxu1  ;;  %v1946_v42 = vmul.bf16 1045249613, %v1818_v38  ;;  %vm1882_vm7 = vcmp.gt.bf16.partialorder %v1818_v38, 0 }
 0x3b4   : > { %v1623_v43 = vpop.f32.mrb[112].mxu0  ;;  %v2248_v44 = vpop.f32.mrb[1].mxu1  ;;  %vm1883_vm6 = vcmp.gt.bf16.partialorder %v1819_v40, 0  ;;  %v1947_v46 = vmul.bf16 1045249613, %v1819_v40 }
 0x3b5   : > { %v1625_v47 = vpop.f32.mrb[113].mxu0  ;;  %v2250_v48 = vpop.f32.mrb[2].mxu1  ;;  %v2010_v57 = vsel %vm1882_vm7, %v1818_v38, %v1946_v42 }
 0x3b6   : > { %v2565_v50 = vpack.c.bf16 %v2250_v48, %v2246_v41  ;;  %v1627_v51 = vpop.f32.mrb[114].mxu0  ;;  %v2252_v52 = vpop.f32.mrb[3].mxu1  ;;  %v2011_v53 = vsel %vm1883_vm6, %v1819_v40, %v1947_v46 }
 0x3b7   : > { %v1718_v54 = vpack.c.bf16 %v1627_v51, %v1623_v43  ;;  %v2566_v55 = vpack.c.bf16 %v2252_v52, %v2248_v44  ;;  %v1629_v56 = vpop.f32.mrb[115].mxu0  ;;  %2514 = vmatprep.mubr.bf16.mxu1 %v2011_v53 }
 0x3b8   : > { %v2667_v58 = vadd.bf16 %v10314_v45, %v2565_v50  ;;  %v1719_v59 = vpack.c.bf16 %v1629_v56, %v1625_v47  ;;  %2515 = vmatmul.mubr.bf16.gmra.mrb[108].mxu1 %v2010_v57 }
 0x3b9   : > { %v1820_v60 = vadd.bf16 %v10241_v26, %v1718_v54  ;;  %v2668_v61 = vadd.bf16 %v10317_v49, %v2566_v55 }
 0x3ba   : > { %v2795_v62 = vmul.bf16 1045249613, %v2667_v58  ;;  %v1821_v63 = vadd.bf16 %v10245_v29, %v1719_v59  ;;  %vm2731_vm9 = vcmp.gt.bf16.partialorder %v2667_v58, 0 }
 0x3bb   : > { %v2256_v0 = vpop.f32.mrb[4].mxu1  ;;  %vm2732_vm8 = vcmp.gt.bf16.partialorder %v2668_v61, 0  ;;  %v2796_v1 = vmul.bf16 1045249613, %v2668_v61  ;;  %vm1884_vm11 = vcmp.gt.bf16.partialorder %v1820_v60, 0 }
 0x3bc   : > { %v1633_v2 = vpop.f32.mrb[116].mxu0  ;;  %v2258_v3 = vpop.f32.mrb[5].mxu1  ;;  %vm1885_vm10 = vcmp.gt.bf16.partialorder %v1821_v63, 0  ;;  %v1949_v4 = vmul.bf16 1045249613, %v1821_v63  ;;  %v2859_v15 = vsel %vm2731_vm9, %v2667_v58, %v2795_v62 }
 0x3bd   : > { %v1635_v5 = vpop.f32.mrb[117].mxu0  ;;  %v2260_v6 = vpop.f32.mrb[6].mxu1  ;;  %v2860_v7 = vsel %vm2732_vm8, %v2668_v61, %v2796_v1  ;;  %v1948_v8 = vmul.bf16 1045249613, %v1820_v60 }
 0x3be   : > { %v2567_v9 = vpack.c.bf16 %v2260_v6, %v2256_v0  ;;  %v1637_v11 = vpop.f32.mrb[118].mxu0  ;;  %v2262_v12 = vpop.f32.mrb[7].mxu1  ;;  %3159 = vmatprep.mubr.bf16.mxu0 %v2860_v7  ;;  %v2013_v14 = vsel %vm1885_vm10, %v1821_v63, %v1949_v4  ;;  %v8332_v0 = vld [vmem:[#allocation16 + $0x50] ss:$8 sps:$4 sm:$0xff]   ;;  %v8334_v6 = vld [vmem:[#allocation16 + $0x54] ss:$8 sps:$4 sm:$0xff]  }
 0x3bf   : > { %v1720_v16 = vpack.c.bf16 %v1637_v11, %v1633_v2  ;;  %v2568_v17 = vpack.c.bf16 %v2262_v12, %v2258_v3  ;;  %v1639_v18 = vpop.f32.mrb[119].mxu0  ;;  %2524 = vmatprep.mubr.bf16.mxu1 %v2013_v14  ;;  %3160 = vmatmul.mubr.bf16.vlgmr.msra.gmra.mrb[128].mxu0 %v2859_v15  ;;  %v2012_v19 = vsel %vm1884_vm11, %v1820_v60, %v1948_v8 }
 0x3c0   : > { %v2669_v21 = vadd.bf16 %v10314_v45, %v2567_v9  ;;  %v1721_v22 = vpack.c.bf16 %v1639_v18, %v1635_v5  ;;  %2525 = vmatmul.mubr.bf16.gmra.mrb[112].mxu1 %v2012_v19  ;;  %4002 = vmatprep.subr.bf16.mxu1 %v8334_v6 }
 0x3c1   : > { %v1822_v23 = vadd.bf16 %v10241_v26, %v1720_v16  ;;  %v2670_v24 = vadd.bf16 %v10317_v49, %v2568_v17  ;;  %4003 = vmatpush1.bf16.msra.mxu1 %v8332_v0 }
 0x3c2   : > { %v1823_v25 = vadd.bf16 %v10245_v29, %v1721_v22  ;;  %v2797_v27 = vmul.bf16 1045249613, %v2669_v21  ;;  %vm2733_vm13 = vcmp.gt.bf16.partialorder %v2669_v21, 0 }
 0x3c3   : > { %v2266_v28 = vpop.f32.mrb[8].mxu1  ;;  %vm2734_vm12 = vcmp.gt.bf16.partialorder %v2670_v24, 0  ;;  %v2798_v30 = vmul.bf16 1045249613, %v2670_v24  ;;  %vm1886_vm15 = vcmp.gt.bf16.partialorder %v1822_v23, 0 }
 0x3c4   : > { %v1643_v31 = vpop.f32.mrb[120].mxu0  ;;  %v2268_v32 = vpop.f32.mrb[9].mxu1  ;;  %vm1887_vm14 = vcmp.gt.bf16.partialorder %v1823_v25, 0  ;;  %v1951_v33 = vmul.bf16 1045249613, %v1823_v25  ;;  %v2861_v42 = vsel %vm2733_vm13, %v2669_v21, %v2797_v27 }
 0x3c5   : > { %v1645_v34 = vpop.f32.mrb[121].mxu0  ;;  %v2270_v35 = vpop.f32.mrb[10].mxu1  ;;  %v2862_v36 = vsel %vm2734_vm12, %v2670_v24, %v2798_v30  ;;  %v1950_v37 = vmul.bf16 1045249613, %v1822_v23 }
 0x3c6   : > { %v2569_v38 = vpack.c.bf16 %v2270_v35, %v2266_v28  ;;  %v1647_v39 = vpop.f32.mrb[122].mxu0  ;;  %v2272_v40 = vpop.f32.mrb[11].mxu1  ;;  %3169 = vmatprep.mubr.bf16.mxu0 %v2862_v36  ;;  %v2015_v41 = vsel %vm1887_vm14, %v1823_v25, %v1951_v33 }
 0x3c7   : > { %v1722_v43 = vpack.c.bf16 %v1647_v39, %v1643_v31  ;;  %v2570_v44 = vpack.c.bf16 %v2272_v40, %v2268_v32  ;;  %v1649_v46 = vpop.f32.mrb[123].mxu0  ;;  %2534 = vmatprep.mubr.bf16.mxu1 %v2015_v41  ;;  %3170 = vmatmul.mubr.bf16.gmra.mrb[132].mxu0 %v2861_v42  ;;  %v2014_v47 = vsel %vm1886_vm15, %v1822_v23, %v1950_v37 }
 0x3c8   : > { %v2671_v48 = vadd.bf16 %v10314_v45, %v2569_v38  ;;  %v1723_v50 = vpack.c.bf16 %v1649_v46, %v1645_v34  ;;  %2535 = vmatmul.mubr.bf16.gmra.mrb[116].mxu1 %v2014_v47 }
 0x3c9   : > { %v1824_v51 = vadd.bf16 %v10241_v26, %v1722_v43  ;;  %v2672_v52 = vadd.bf16 %v10317_v49, %v2570_v44 }
 0x3ca   : > { %v1825_v53 = vadd.bf16 %v10245_v29, %v1723_v50  ;;  %v2799_v54 = vmul.bf16 1045249613, %v2671_v48  ;;  %vm2735_vm1 = vcmp.gt.bf16.partialorder %v2671_v48, 0 }
 0x3cb   : > { %v2276_v55 = vpop.f32.mrb[12].mxu1  ;;  %vm2736_vm0 = vcmp.gt.bf16.partialorder %v2672_v52, 0  ;;  %v2800_v56 = vmul.bf16 1045249613, %v2672_v52  ;;  %vm1888_vm3 = vcmp.gt.bf16.partialorder %v1824_v51, 0 }
 0x3cc   : > { %v1653_v57 = vpop.f32.mrb[124].mxu0  ;;  %v2278_v58 = vpop.f32.mrb[13].mxu1  ;;  %vm1889_vm2 = vcmp.gt.bf16.partialorder %v1825_v53, 0  ;;  %v1953_v59 = vmul.bf16 1045249613, %v1825_v53  ;;  %v2863_v5 = vsel %vm2735_vm1, %v2671_v48, %v2799_v54 }
 0x3cd   : > { %v1655_v60 = vpop.f32.mrb[125].mxu0  ;;  %v2280_v61 = vpop.f32.mrb[14].mxu1  ;;  %v2864_v62 = vsel %vm2736_vm0, %v2672_v52, %v2800_v56  ;;  %v1952_v63 = vmul.bf16 1045249613, %v1824_v51 }
 0x3ce   : > { %v2571_v1 = vpack.c.bf16 %v2280_v61, %v2276_v55  ;;  %v1657_v2 = vpop.f32.mrb[126].mxu0  ;;  %v2282_v3 = vpop.f32.mrb[15].mxu1  ;;  %3179 = vmatprep.mubr.bf16.mxu0 %v2864_v62  ;;  %v2017_v4 = vsel %vm1889_vm2, %v1825_v53, %v1953_v59 }
 0x3cf   : > { %v1724_v7 = vpack.c.bf16 %v1657_v2, %v1653_v57  ;;  %v2572_v8 = vpack.c.bf16 %v2282_v3, %v2278_v58  ;;  %v1659_v9 = vpop.f32.mrb[127].mxu0  ;;  %2544 = vmatprep.mubr.bf16.mxu1 %v2017_v4  ;;  %3180 = vmatmul.mubr.bf16.gmra.mrb[136].mxu0 %v2863_v5  ;;  %v2016_v11 = vsel %vm1888_vm3, %v1824_v51, %v1952_v63  ;;  %v8337_v2 = vld [vmem:[#allocation16 + $0x64] ss:$8 sps:$4 sm:$0xff]  }
 0x3d0   : > { %v2673_v12 = vadd.bf16 %v10314_v45, %v2571_v1  ;;  %v1725_v14 = vpack.c.bf16 %v1659_v9, %v1655_v60  ;;  %2545 = vmatmul.mubr.bf16.gmra.mrb[120].mxu1 %v2016_v11  ;;  %v8335_v1 = vld [vmem:[#allocation16 + $0x60] ss:$8 sps:$4 sm:$0xff]   ;;  %4004 = vmatprep.subr.bf16.mxu1 %v8337_v2 }
 0x3d1   : > { %v1826_v15 = vadd.bf16 %v10241_v26, %v1724_v7  ;;  %v2674_v16 = vadd.bf16 %v10317_v49, %v2572_v8  ;;  %4005 = vmatpush1.bf16.msra.mxu1 %v8335_v1 }
 0x3d2   : > { %v1827_v17 = vadd.bf16 %v10245_v29, %v1725_v14  ;;  %v2801_v18 = vmul.bf16 1045249613, %v2673_v12  ;;  %vm2737_vm5 = vcmp.gt.bf16.partialorder %v2673_v12, 0 }
 0x3d3   : > { %v2286_v19 = vpop.f32.mrb[16].mxu1  ;;  %vm2738_vm4 = vcmp.gt.bf16.partialorder %v2674_v16, 0  ;;  %v2802_v21 = vmul.bf16 1045249613, %v2674_v16  ;;  %vm1890_vm6 = vcmp.gt.bf16.partialorder %v1826_v15, 0 }
 0x3d4   : > { %v2288_v22 = vpop.f32.mrb[17].mxu1  ;;  %vm1891_vm7 = vcmp.gt.bf16.partialorder %v1827_v17, 0  ;;  %v1955_v23 = vmul.bf16 1045249613, %v1827_v17  ;;  %v1954_v24 = vmul.bf16 1045249613, %v1826_v15  ;;  %v2865_v31 = vsel %vm2737_vm5, %v2673_v12, %v2801_v18 }
 0x3d5   : > { %v2290_v25 = vpop.f32.mrb[18].mxu1  ;;  %v2866_v27 = vsel %vm2738_vm4, %v2674_v16, %v2802_v21 }
 0x3d6   : > { %v2573_v28 = vpack.c.bf16 %v2290_v25, %v2286_v19  ;;  %v2292_v30 = vpop.f32.mrb[19].mxu1  ;;  %3189 = vmatprep.mubr.bf16.mxu0 %v2866_v27  ;;  %v2019_v26 = vsel %vm1891_vm7, %v1827_v17, %v1955_v23  ;;  %v2018_v29 = vsel %vm1890_vm6, %v1826_v15, %v1954_v24 }
 0x3d7   : > { %v2574_v32 = vpack.c.bf16 %v2292_v30, %v2288_v22  ;;  %2554 = vmatprep.mubr.bf16.mxu1 %v2019_v26  ;;  %3190 = vmatmul.mubr.bf16.gmra.mrb[140].mxu0 %v2865_v31 }
 0x3d8   : > { %v2675_v33 = vadd.bf16 %v10314_v45, %v2573_v28  ;;  %2555 = vmatmul.mubr.bf16.gmra.mrb[124].mxu1 %v2018_v29 }
 0x3d9   : > { %v2676_v34 = vadd.bf16 %v10317_v49, %v2574_v32 }
 0x3da   : > { %v2803_v35 = vmul.bf16 1045249613, %v2675_v33  ;;  %vm2739_vm9 = vcmp.gt.bf16.partialorder %v2675_v33, 0 }
 0x3db   : > { %v2296_v36 = vpop.f32.mrb[20].mxu1  ;;  %vm2740_vm8 = vcmp.gt.bf16.partialorder %v2676_v34, 0  ;;  %v2804_v37 = vmul.bf16 1045249613, %v2676_v34 }
 0x3dc   : > { %v2298_v38 = vpop.f32.mrb[21].mxu1  ;;  %v2867_v43 = vsel %vm2739_vm9, %v2675_v33, %v2803_v35 }
 0x3dd   : > { %v2300_v39 = vpop.f32.mrb[22].mxu1  ;;  %v2868_v40 = vsel %vm2740_vm8, %v2676_v34, %v2804_v37 }
 0x3de   : > { %v2575_v41 = vpack.c.bf16 %v2300_v39, %v2296_v36  ;;  %v2302_v42 = vpop.f32.mrb[23].mxu1  ;;  %3199 = vmatprep.mubr.bf16.mxu0 %v2868_v40 }
 0x3df   : > { %v2576_v44 = vpack.c.bf16 %v2302_v42, %v2298_v38  ;;  %3200 = vmatmul.mubr.bf16.gmra.mrb[144].mxu0 %v2867_v43 }
 0x3e0   : > { %v2677_v46 = vadd.bf16 %v10314_v45, %v2575_v41 }
 0x3e1   : > { %v2678_v47 = vadd.bf16 %v10317_v49, %v2576_v44 }
 0x3e2   : > { %v2805_v48 = vmul.bf16 1045249613, %v2677_v46  ;;  %vm2741_vm11 = vcmp.gt.bf16.partialorder %v2677_v46, 0 }
 0x3e3   : > { %v2306_v50 = vpop.f32.mrb[24].mxu1  ;;  %vm2742_vm10 = vcmp.gt.bf16.partialorder %v2678_v47, 0  ;;  %v2806_v51 = vmul.bf16 1045249613, %v2678_v47 }
 0x3e4   : > { %v2308_v52 = vpop.f32.mrb[25].mxu1  ;;  %v2869_v57 = vsel %vm2741_vm11, %v2677_v46, %v2805_v48 }
 0x3e5   : > { %v2310_v53 = vpop.f32.mrb[26].mxu1  ;;  %v2870_v54 = vsel %vm2742_vm10, %v2678_v47, %v2806_v51 }
 0x3e6   : > { %v2577_v55 = vpack.c.bf16 %v2310_v53, %v2306_v50  ;;  %v2312_v56 = vpop.f32.mrb[27].mxu1  ;;  %3209 = vmatprep.mubr.bf16.mxu0 %v2870_v54 }
 0x3e7   : > { %v2578_v58 = vpack.c.bf16 %v2312_v56, %v2308_v52  ;;  %3210 = vmatmul.mubr.bf16.gmra.mrb[148].mxu0 %v2869_v57  ;;  %v8340_v57 = vld [vmem:[#allocation19 + $0x4] ss:$8 sps:$4 sm:$0xff]  }
 0x3e8   : > { %v2679_v59 = vadd.bf16 %v10314_v45, %v2577_v55  ;;  %v8338_v55 = vld [vmem:[#allocation19] ss:$8 sps:$4 sm:$0xff]   ;;  %4895 = vmatprep.subr.bf16.mxu0 %v8340_v57 }
 0x3e9   : > { %v2680_v60 = vadd.bf16 %v10317_v49, %v2578_v58  ;;  %v8341_v58 = vld [vmem:[#allocation16 + $0x70] ss:$8 sps:$4 sm:$0xff]   ;;  %4896 = vmatpush1.bf16.msra.mxu0 %v8338_v55 }
 0x3ea   : > { %v2807_v61 = vmul.bf16 1045249613, %v2679_v59  ;;  %vm2743_vm13 = vcmp.gt.bf16.partialorder %v2679_v59, 0 }
 0x3eb   : > { %v2316_v62 = vpop.f32.mrb[28].mxu1  ;;  %vm2744_vm12 = vcmp.gt.bf16.partialorder %v2680_v60, 0  ;;  %v2808_v63 = vmul.bf16 1045249613, %v2680_v60 }
 0x3ec   : > { %v2318_v0 = vpop.f32.mrb[29].mxu1  ;;  %v2871_v7 = vsel %vm2743_vm13, %v2679_v59, %v2807_v61  ;;  %v8343_v61 = vld [vmem:[#allocation16 + $0x74] ss:$8 sps:$4 sm:$0xff]  }
 0x3ed   : > { %v2320_v3 = vpop.f32.mrb[30].mxu1  ;;  %v2872_v4 = vsel %vm2744_vm12, %v2680_v60, %v2808_v63  ;;  %4006 = vmatprep.subr.bf16.mxu1 %v8343_v61  ;;  %v8347_v61 = vld [vmem:[#allocation19 + $0x20] ss:$8 sps:$4 sm:$0xff]  }
 0x3ee   : > { %v2579_v5 = vpack.c.bf16 %v2320_v3, %v2316_v62  ;;  %v2322_v6 = vpop.f32.mrb[31].mxu1  ;;  %3219 = vmatprep.mubr.bf16.mxu0 %v2872_v4  ;;  %4007 = vmatpush1.bf16.msra.mxu1 %v8341_v58 }
 0x3ef   : > { %v2580_v8 = vpack.c.bf16 %v2322_v6, %v2318_v0  ;;  %3220 = vmatmul.mubr.bf16.gmra.mrb[152].mxu0 %v2871_v7 }
 0x3f0   : > { %v2681_v9 = vadd.bf16 %v10314_v45, %v2579_v5 }
 0x3f1   : > { %v2682_v11 = vadd.bf16 %v10317_v49, %v2580_v8 }
 0x3f2   : > { %v2809_v12 = vmul.bf16 1045249613, %v2681_v9  ;;  %vm2745_vm15 = vcmp.gt.bf16.partialorder %v2681_v9, 0 }
 0x3f3   : > { %v2326_v14 = vpop.f32.mrb[32].mxu1  ;;  %vm2746_vm14 = vcmp.gt.bf16.partialorder %v2682_v11, 0  ;;  %v2810_v15 = vmul.bf16 1045249613, %v2682_v11 }
 0x3f4   : > { %v2328_v16 = vpop.f32.mrb[33].mxu1  ;;  %v2873_v22 = vsel %vm2745_vm15, %v2681_v9, %v2809_v12 }
 0x3f5   : > { %v2330_v17 = vpop.f32.mrb[34].mxu1  ;;  %v2874_v18 = vsel %vm2746_vm14, %v2682_v11, %v2810_v15 }
 0x3f6   : > { %v2581_v19 = vpack.c.bf16 %v2330_v17, %v2326_v14  ;;  %v2332_v21 = vpop.f32.mrb[35].mxu1  ;;  %3229 = vmatprep.mubr.bf16.mxu0 %v2874_v18 }
 0x3f7   : > { %v2582_v23 = vpack.c.bf16 %v2332_v21, %v2328_v16  ;;  %3230 = vmatmul.mubr.bf16.gmra.mrb[156].mxu0 %v2873_v22 }
 0x3f8   : > { %v2683_v24 = vadd.bf16 %v10314_v45, %v2581_v19 }
 0x3f9   : > { %v2684_v25 = vadd.bf16 %v10317_v49, %v2582_v23 }
 0x3fa   : > { %v2811_v27 = vmul.bf16 1045249613, %v2683_v24  ;;  %vm2747_vm1 = vcmp.gt.bf16.partialorder %v2683_v24, 0 }
 0x3fb   : > { %v2336_v28 = vpop.f32.mrb[36].mxu1  ;;  %vm2748_vm0 = vcmp.gt.bf16.partialorder %v2684_v25, 0  ;;  %v2812_v30 = vmul.bf16 1045249613, %v2684_v25 }
 0x3fc   : > { %v2338_v26 = vpop.f32.mrb[37].mxu1  ;;  %v2875_v34 = vsel %vm2747_vm1, %v2683_v24, %v2811_v27 }
 0x3fd   : > { %v2340_v31 = vpop.f32.mrb[38].mxu1  ;;  %v2876_v32 = vsel %vm2748_vm0, %v2684_v25, %v2812_v30 }
 0x3fe   : > { %v2583_v29 = vpack.c.bf16 %v2340_v31, %v2336_v28  ;;  %v2342_v33 = vpop.f32.mrb[39].mxu1  ;;  %3239 = vmatprep.mubr.bf16.mxu0 %v2876_v32 }
 0x3ff   : > { %v2584_v35 = vpack.c.bf16 %v2342_v33, %v2338_v26  ;;  %3240 = vmatmul.mubr.bf16.gmra.mrb[160].mxu0 %v2875_v34 }
 0x400   : > { %v2685_v36 = vadd.bf16 %v10314_v45, %v2583_v29 }
 0x401   : > { %v2686_v37 = vadd.bf16 %v10317_v49, %v2584_v35 }
 0x402   : > { %v2813_v38 = vmul.bf16 1045249613, %v2685_v36  ;;  %vm2749_vm3 = vcmp.gt.bf16.partialorder %v2685_v36, 0 }
 0x403   : > { %v2346_v39 = vpop.f32.mrb[40].mxu1  ;;  %vm2750_vm2 = vcmp.gt.bf16.partialorder %v2686_v37, 0  ;;  %v2814_v40 = vmul.bf16 1045249613, %v2686_v37 }
 0x404   : > { %v2348_v41 = vpop.f32.mrb[41].mxu1  ;;  %v2877_v47 = vsel %vm2749_vm3, %v2685_v36, %v2813_v38 }
 0x405   : > { %v2350_v42 = vpop.f32.mrb[42].mxu1  ;;  %v2878_v43 = vsel %vm2750_vm2, %v2686_v37, %v2814_v40 }
 0x406   : > { %v2585_v44 = vpack.c.bf16 %v2350_v42, %v2346_v39  ;;  %v2352_v46 = vpop.f32.mrb[43].mxu1  ;;  %3249 = vmatprep.mubr.bf16.mxu0 %v2878_v43  ;;  %v8346_v42 = vld [vmem:[#allocation19 + $0x14] ss:$8 sps:$4 sm:$0xff]  }
 0x407   : > { %v2586_v48 = vpack.c.bf16 %v2352_v46, %v2348_v41  ;;  %3250 = vmatmul.mubr.bf16.gmra.mrb[164].mxu0 %v2877_v47  ;;  %v8344_v41 = vld [vmem:[#allocation19 + $0x10] ss:$8 sps:$4 sm:$0xff]   ;;  %4897 = vmatprep.subr.bf16.mxu0 %v8346_v42 }
 0x408   : > { %v2687_v50 = vadd.bf16 %v10314_v45, %v2585_v44  ;;  %4898 = vmatpush1.bf16.msra.mxu0 %v8344_v41 }
 0x409   : > { %v2688_v51 = vadd.bf16 %v10317_v49, %v2586_v48 }
 0x40a   : > { %vm2751_vm4 = vcmp.gt.bf16.partialorder %v2687_v50, 0  ;;  %v2815_v52 = vmul.bf16 1045249613, %v2687_v50 }
 0x40b   : > { %v2356_v53 = vpop.f32.mrb[44].mxu1  ;;  %vm2752_vm5 = vcmp.gt.bf16.partialorder %v2688_v51, 0  ;;  %v2816_v54 = vmul.bf16 1045249613, %v2688_v51 }
 0x40c   : > { %v2358_v56 = vpop.f32.mrb[45].mxu1  ;;  %v2879_v0 = vsel %vm2751_vm4, %v2687_v50, %v2815_v52 }
 0x40d   : > { %v2360_v59 = vpop.f32.mrb[46].mxu1  ;;  %v2880_v60 = vsel %vm2752_vm5, %v2688_v51, %v2816_v54 }
 0x40e   : > { %v2587_v62 = vpack.c.bf16 %v2360_v59, %v2356_v53  ;;  %v2362_v63 = vpop.f32.mrb[47].mxu1  ;;  %3259 = vmatprep.mubr.bf16.mxu0 %v2880_v60 }
 0x40f   : > { %v2588_v1 = vpack.c.bf16 %v2362_v63, %v2358_v56  ;;  %3260 = vmatmul.mubr.bf16.gmra.mrb[168].mxu0 %v2879_v0  ;;  %v9622_v56 = vmov 0   ;;  %v8349_v0 = vld [vmem:[#allocation19 + $0x24] ss:$8 sps:$4 sm:$0xff]  }
 0x410   : > { %v2689_v2 = vadd.bf16 %v10314_v45, %v2587_v62  ;;  %4024 = vmatprep.mubr.bf16.mxu1 %v9622_v56  ;;  %4899 = vmatprep.subr.bf16.mxu0 %v8349_v0 }
 0x411   : > { %v2690_v3 = vadd.bf16 %v10317_v49, %v2588_v1  ;;  %4900 = vmatpush1.bf16.msra.mxu0 %v8347_v61 }
 0x412   : > { %v2817_v4 = vmul.bf16 1045249613, %v2689_v2  ;;  %vm2753_vm7 = vcmp.gt.bf16.partialorder %v2689_v2, 0 }
 0x413   : > { %v2366_v5 = vpop.f32.mrb[48].mxu1  ;;  %vm2754_vm6 = vcmp.gt.bf16.partialorder %v2690_v3, 0  ;;  %v2818_v6 = vmul.bf16 1045249613, %v2690_v3 }
 0x414   : > { %v2368_v7 = vpop.f32.mrb[49].mxu1  ;;  %v2881_v14 = vsel %vm2753_vm7, %v2689_v2, %v2817_v4 }
 0x415   : > { %v2370_v8 = vpop.f32.mrb[50].mxu1  ;;  %v2882_v9 = vsel %vm2754_vm6, %v2690_v3, %v2818_v6 }
 0x416   : > { %v2589_v11 = vpack.c.bf16 %v2370_v8, %v2366_v5  ;;  %v2372_v12 = vpop.f32.mrb[51].mxu1  ;;  %3269 = vmatprep.mubr.bf16.mxu0 %v2882_v9 }
 0x417   : > { %v2590_v15 = vpack.c.bf16 %v2372_v12, %v2368_v7  ;;  %3270 = vmatmul.mubr.bf16.gmra.mrb[172].mxu0 %v2881_v14 }
 0x418   : > { %v2691_v16 = vadd.bf16 %v10314_v45, %v2589_v11 }
 0x419   : > { %v2692_v17 = vadd.bf16 %v10317_v49, %v2590_v15 }
 0x41a   : > { %v2819_v18 = vmul.bf16 1045249613, %v2691_v16  ;;  %vm2755_vm9 = vcmp.gt.bf16.partialorder %v2691_v16, 0 }
 0x41b   : > { %v2376_v19 = vpop.f32.mrb[52].mxu1  ;;  %vm2756_vm8 = vcmp.gt.bf16.partialorder %v2692_v17, 0  ;;  %v2820_v21 = vmul.bf16 1045249613, %v2692_v17 }
 0x41c   : > { %v2378_v22 = vpop.f32.mrb[53].mxu1  ;;  %v2883_v28 = vsel %vm2755_vm9, %v2691_v16, %v2819_v18 }
 0x41d   : > { %v2380_v23 = vpop.f32.mrb[54].mxu1  ;;  %v2884_v24 = vsel %vm2756_vm8, %v2692_v17, %v2820_v21 }
 0x41e   : > { %v2591_v25 = vpack.c.bf16 %v2380_v23, %v2376_v19  ;;  %v2382_v27 = vpop.f32.mrb[55].mxu1  ;;  %3279 = vmatprep.mubr.bf16.mxu0 %v2884_v24 }
 0x41f   : > { %v2592_v30 = vpack.c.bf16 %v2382_v27, %v2378_v22  ;;  %3280 = vmatmul.mubr.bf16.gmra.mrb[176].mxu0 %v2883_v28  ;;  %v8350_v27 = vld [vmem:[#allocation19 + $0x30] ss:$8 sps:$4 sm:$0xff]  }
 0x420   : > { %v2693_v26 = vadd.bf16 %v10314_v45, %v2591_v25 }
 0x421   : > { %v2694_v31 = vadd.bf16 %v10317_v49, %v2592_v30 }
 0x422   : > { %v2821_v32 = vmul.bf16 1045249613, %v2693_v26  ;;  %vm2757_vm11 = vcmp.gt.bf16.partialorder %v2693_v26, 0 }
 0x423   : > { %v2386_v29 = vpop.f32.mrb[56].mxu1  ;;  %vm2758_vm10 = vcmp.gt.bf16.partialorder %v2694_v31, 0  ;;  %v2822_v33 = vmul.bf16 1045249613, %v2694_v31 }
 0x424   : > { %v2388_v34 = vpop.f32.mrb[57].mxu1  ;;  %v2885_v39 = vsel %vm2757_vm11, %v2693_v26, %v2821_v32  ;;  %v8352_v26 = vld [vmem:[#allocation19 + $0x34] ss:$8 sps:$4 sm:$0xff]  }
 0x425   : > { %v2390_v35 = vpop.f32.mrb[58].mxu1  ;;  %v2886_v36 = vsel %vm2758_vm10, %v2694_v31, %v2822_v33  ;;  %4901 = vmatprep.subr.bf16.mxu0 %v8352_v26 }
 0x426   : > { %v2593_v37 = vpack.c.bf16 %v2390_v35, %v2386_v29  ;;  %v2392_v38 = vpop.f32.mrb[59].mxu1  ;;  %3289 = vmatprep.mubr.bf16.mxu0 %v2886_v36  ;;  %4902 = vmatpush1.bf16.msra.mxu0 %v8350_v27 }
 0x427   : > { %v2594_v40 = vpack.c.bf16 %v2392_v38, %v2388_v34  ;;  %3290 = vmatmul.mubr.bf16.gmra.mrb[180].mxu0 %v2885_v39 }
 0x428   : > { %v2695_v43 = vadd.bf16 %v10314_v45, %v2593_v37 }
 0x429   : > { %v2696_v44 = vadd.bf16 %v10317_v49, %v2594_v40 }
 0x42a   : > { %v2823_v46 = vmul.bf16 1045249613, %v2695_v43  ;;  %vm2759_vm13 = vcmp.gt.bf16.partialorder %v2695_v43, 0 }
 0x42b   : > { %v2396_v47 = vpop.f32.mrb[60].mxu1  ;;  %vm2760_vm12 = vcmp.gt.bf16.partialorder %v2696_v44, 0  ;;  %v2824_v48 = vmul.bf16 1045249613, %v2696_v44 }
 0x42c   : > { %v2398_v50 = vpop.f32.mrb[61].mxu1  ;;  %v2887_v55 = vsel %vm2759_vm13, %v2695_v43, %v2823_v46 }
 0x42d   : > { %v2400_v51 = vpop.f32.mrb[62].mxu1  ;;  %v2888_v52 = vsel %vm2760_vm12, %v2696_v44, %v2824_v48 }
 0x42e   : > { %v2595_v53 = vpack.c.bf16 %v2400_v51, %v2396_v47  ;;  %v2402_v54 = vpop.f32.mrb[63].mxu1  ;;  %3299 = vmatprep.mubr.bf16.mxu0 %v2888_v52 }
 0x42f   : > { %v2596_v57 = vpack.c.bf16 %v2402_v54, %v2398_v50  ;;  %3300 = vmatmul.mubr.bf16.gmra.mrb[184].mxu0 %v2887_v55  ;;  %v8353_v54 = vld [vmem:[#allocation19 + $0x40] ss:$8 sps:$4 sm:$0xff]  }
 0x430   : > { %v2697_v58 = vadd.bf16 %v10314_v45, %v2595_v53 }
 0x431   : > { %v2698_v59 = vadd.bf16 %v10317_v49, %v2596_v57 }
 0x432   : > { %vm2761_vm14 = vcmp.gt.bf16.partialorder %v2697_v58, 0  ;;  %v2825_v60 = vmul.bf16 1045249613, %v2697_v58 }
 0x433   : > { %v2406_v62 = vpop.f32.mrb[64].mxu1  ;;  %vm2762_vm15 = vcmp.gt.bf16.partialorder %v2698_v59, 0  ;;  %v2826_v63 = vmul.bf16 1045249613, %v2698_v59 }
 0x434   : > { %v2408_v1 = vpop.f32.mrb[65].mxu1  ;;  %v2889_v6 = vsel %vm2761_vm14, %v2697_v58, %v2825_v60  ;;  %v8355_v58 = vld [vmem:[#allocation19 + $0x44] ss:$8 sps:$4 sm:$0xff]  }
 0x435   : > { %v2410_v2 = vpop.f32.mrb[66].mxu1  ;;  %v2890_v3 = vsel %vm2762_vm15, %v2698_v59, %v2826_v63  ;;  %4903 = vmatprep.subr.bf16.mxu0 %v8355_v58 }
 0x436   : > { %v2597_v4 = vpack.c.bf16 %v2410_v2, %v2406_v62  ;;  %v2412_v5 = vpop.f32.mrb[67].mxu1  ;;  %3309 = vmatprep.mubr.bf16.mxu0 %v2890_v3  ;;  %4904 = vmatpush1.bf16.msra.mxu0 %v8353_v54 }
 0x437   : > { %v2598_v7 = vpack.c.bf16 %v2412_v5, %v2408_v1  ;;  %3310 = vmatmul.mubr.bf16.gmra.mrb[188].mxu0 %v2889_v6 }
 0x438   : > { %v2699_v8 = vadd.bf16 %v10314_v45, %v2597_v4 }
 0x439   : > { %v2700_v9 = vadd.bf16 %v10317_v49, %v2598_v7 }
 0x43a   : > { %v2827_v11 = vmul.bf16 1045249613, %v2699_v8  ;;  %vm2763_vm1 = vcmp.gt.bf16.partialorder %v2699_v8, 0 }
 0x43b   : > { %v2416_v12 = vpop.f32.mrb[68].mxu1  ;;  %vm2764_vm0 = vcmp.gt.bf16.partialorder %v2700_v9, 0  ;;  %v2828_v14 = vmul.bf16 1045249613, %v2700_v9 }
 0x43c   : > { %v2418_v15 = vpop.f32.mrb[69].mxu1  ;;  %v2891_v21 = vsel %vm2763_vm1, %v2699_v8, %v2827_v11 }
 0x43d   : > { %v2420_v16 = vpop.f32.mrb[70].mxu1  ;;  %v2892_v17 = vsel %vm2764_vm0, %v2700_v9, %v2828_v14 }
 0x43e   : > { %v2599_v18 = vpack.c.bf16 %v2420_v16, %v2416_v12  ;;  %v2422_v19 = vpop.f32.mrb[71].mxu1  ;;  %3319 = vmatprep.mubr.bf16.mxu0 %v2892_v17 }
 0x43f   : > { %v2600_v22 = vpack.c.bf16 %v2422_v19, %v2418_v15  ;;  %3320 = vmatmul.mubr.bf16.gmra.mrb[192].mxu0 %v2891_v21  ;;  %v8356_v19 = vld [vmem:[#allocation19 + $0x50] ss:$8 sps:$4 sm:$0xff]  }
 0x440   : > { %v2701_v23 = vadd.bf16 %v10314_v45, %v2599_v18 }
 0x441   : > { %v2702_v24 = vadd.bf16 %v10317_v49, %v2600_v22 }
 0x442   : > { %vm2765_vm2 = vcmp.gt.bf16.partialorder %v2701_v23, 0  ;;  %v2829_v25 = vmul.bf16 1045249613, %v2701_v23 }
 0x443   : > { %v2426_v28 = vpop.f32.mrb[72].mxu1  ;;  %vm2766_vm3 = vcmp.gt.bf16.partialorder %v2702_v24, 0  ;;  %v2830_v30 = vmul.bf16 1045249613, %v2702_v24 }
 0x444   : > { %v2428_v31 = vpop.f32.mrb[73].mxu1  ;;  %v2893_v35 = vsel %vm2765_vm2, %v2701_v23, %v2829_v25  ;;  %v8358_v23 = vld [vmem:[#allocation19 + $0x54] ss:$8 sps:$4 sm:$0xff]  }
 0x445   : > { %v2430_v32 = vpop.f32.mrb[74].mxu1  ;;  %v2894_v29 = vsel %vm2766_vm3, %v2702_v24, %v2830_v30  ;;  %4905 = vmatprep.subr.bf16.mxu0 %v8358_v23 }
 0x446   : > { %v2601_v33 = vpack.c.bf16 %v2430_v32, %v2426_v28  ;;  %v2432_v34 = vpop.f32.mrb[75].mxu1  ;;  %3329 = vmatprep.mubr.bf16.mxu0 %v2894_v29  ;;  %4906 = vmatpush1.bf16.msra.mxu0 %v8356_v19 }
 0x447   : > { %v2602_v36 = vpack.c.bf16 %v2432_v34, %v2428_v31  ;;  %3330 = vmatmul.mubr.bf16.gmra.mrb[196].mxu0 %v2893_v35 }
 0x448   : > { %v2703_v37 = vadd.bf16 %v10314_v45, %v2601_v33 }
 0x449   : > { %v2704_v38 = vadd.bf16 %v10317_v49, %v2602_v36 }
 0x44a   : > { %v2831_v39 = vmul.bf16 1045249613, %v2703_v37  ;;  %vm2767_vm5 = vcmp.gt.bf16.partialorder %v2703_v37, 0 }
 0x44b   : > { %v2436_v40 = vpop.f32.mrb[76].mxu1  ;;  %vm2768_vm4 = vcmp.gt.bf16.partialorder %v2704_v38, 0  ;;  %v2832_v41 = vmul.bf16 1045249613, %v2704_v38 }
 0x44c   : > { %v2438_v42 = vpop.f32.mrb[77].mxu1  ;;  %v2895_v48 = vsel %vm2767_vm5, %v2703_v37, %v2831_v39 }
 0x44d   : > { %v2440_v43 = vpop.f32.mrb[78].mxu1  ;;  %v2896_v44 = vsel %vm2768_vm4, %v2704_v38, %v2832_v41 }
 0x44e   : > { %v2603_v46 = vpack.c.bf16 %v2440_v43, %v2436_v40  ;;  %v2442_v47 = vpop.f32.mrb[79].mxu1  ;;  %3339 = vmatprep.mubr.bf16.mxu0 %v2896_v44 }
 0x44f   : > { %v2604_v50 = vpack.c.bf16 %v2442_v47, %v2438_v42  ;;  %3340 = vmatmul.mubr.bf16.gmra.mrb[200].mxu0 %v2895_v48  ;;  %v8359_v47 = vld [vmem:[#allocation19 + $0x60] ss:$8 sps:$4 sm:$0xff]  }
 0x450   : > { %v2705_v51 = vadd.bf16 %v10314_v45, %v2603_v46 }
 0x451   : > { %v2706_v52 = vadd.bf16 %v10317_v49, %v2604_v50 }
 0x452   : > { %vm2769_vm6 = vcmp.gt.bf16.partialorder %v2705_v51, 0  ;;  %v2833_v53 = vmul.bf16 1045249613, %v2705_v51 }
 0x453   : > { %v2446_v55 = vpop.f32.mrb[80].mxu1  ;;  %vm2770_vm7 = vcmp.gt.bf16.partialorder %v2706_v52, 0  ;;  %v2834_v57 = vmul.bf16 1045249613, %v2706_v52 }
 0x454   : > { %v2448_v59 = vpop.f32.mrb[81].mxu1  ;;  %v2897_v0 = vsel %vm2769_vm6, %v2705_v51, %v2833_v53  ;;  %v8361_v51 = vld [vmem:[#allocation19 + $0x64] ss:$8 sps:$4 sm:$0xff]  }
 0x455   : > { %v2450_v60 = vpop.f32.mrb[82].mxu1  ;;  %v2898_v61 = vsel %vm2770_vm7, %v2706_v52, %v2834_v57  ;;  %4907 = vmatprep.subr.bf16.mxu0 %v8361_v51 }
 0x456   : > { %v2605_v62 = vpack.c.bf16 %v2450_v60, %v2446_v55  ;;  %v2452_v63 = vpop.f32.mrb[83].mxu1  ;;  %3349 = vmatprep.mubr.bf16.mxu0 %v2898_v61  ;;  %4908 = vmatpush1.bf16.msra.mxu0 %v8359_v47 }
 0x457   : > { %v2606_v1 = vpack.c.bf16 %v2452_v63, %v2448_v59  ;;  %3350 = vmatmul.mubr.bf16.gmra.mrb[204].mxu0 %v2897_v0 }
 0x458   : > { %v2707_v2 = vadd.bf16 %v10314_v45, %v2605_v62 }
 0x459   : > { %v2708_v3 = vadd.bf16 %v10317_v49, %v2606_v1 }
 0x45a   : > { %v2835_v4 = vmul.bf16 1045249613, %v2707_v2  ;;  %vm2771_vm9 = vcmp.gt.bf16.partialorder %v2707_v2, 0 }
 0x45b   : > { %v2456_v5 = vpop.f32.mrb[84].mxu1  ;;  %vm2772_vm8 = vcmp.gt.bf16.partialorder %v2708_v3, 0  ;;  %v2836_v6 = vmul.bf16 1045249613, %v2708_v3 }
 0x45c   : > { %v2458_v7 = vpop.f32.mrb[85].mxu1  ;;  %v2899_v14 = vsel %vm2771_vm9, %v2707_v2, %v2835_v4 }
 0x45d   : > { %v2460_v8 = vpop.f32.mrb[86].mxu1  ;;  %v2900_v9 = vsel %vm2772_vm8, %v2708_v3, %v2836_v6 }
 0x45e   : > { %v2607_v11 = vpack.c.bf16 %v2460_v8, %v2456_v5  ;;  %v2462_v12 = vpop.f32.mrb[87].mxu1  ;;  %3359 = vmatprep.mubr.bf16.mxu0 %v2900_v9 }
 0x45f   : > { %v2608_v15 = vpack.c.bf16 %v2462_v12, %v2458_v7  ;;  %3360 = vmatmul.mubr.bf16.gmra.mrb[208].mxu0 %v2899_v14  ;;  %v8362_v12 = vld [vmem:[#allocation19 + $0x70] ss:$8 sps:$4 sm:$0xff]  }
 0x460   : > { %v2709_v16 = vadd.bf16 %v10314_v45, %v2607_v11 }
 0x461   : > { %v2710_v17 = vadd.bf16 %v10317_v49, %v2608_v15 }
 0x462   : > { %vm2773_vm10 = vcmp.gt.bf16.partialorder %v2709_v16, 0  ;;  %v2837_v18 = vmul.bf16 1045249613, %v2709_v16 }
 0x463   : > { %v2466_v21 = vpop.f32.mrb[88].mxu1  ;;  %vm2774_vm11 = vcmp.gt.bf16.partialorder %v2710_v17, 0  ;;  %v2838_v22 = vmul.bf16 1045249613, %v2710_v17 }
 0x464   : > { %v2468_v24 = vpop.f32.mrb[89].mxu1  ;;  %v2901_v26 = vsel %vm2773_vm10, %v2709_v16, %v2837_v18  ;;  %v8364_v16 = vld [vmem:[#allocation19 + $0x74] ss:$8 sps:$4 sm:$0xff]  }
 0x465   : > { %v2470_v25 = vpop.f32.mrb[90].mxu1  ;;  %v2902_v27 = vsel %vm2774_vm11, %v2710_v17, %v2838_v22  ;;  %4909 = vmatprep.subr.bf16.mxu0 %v8364_v16 }
 0x466   : > { %v2609_v28 = vpack.c.bf16 %v2470_v25, %v2466_v21  ;;  %v2472_v30 = vpop.f32.mrb[91].mxu1  ;;  %3369 = vmatprep.mubr.bf16.mxu0 %v2902_v27  ;;  %4910 = vmatpush1.bf16.msra.mxu0 %v8362_v12 }
 0x467   : > { %v2610_v31 = vpack.c.bf16 %v2472_v30, %v2468_v24  ;;  %3370 = vmatmul.mubr.bf16.gmra.mrb[212].mxu0 %v2901_v26 }
 0x468   : > { %v2711_v32 = vadd.bf16 %v10314_v45, %v2609_v28 }
 0x469   : > { %v2712_v29 = vadd.bf16 %v10317_v49, %v2610_v31  ;;  %v2955_v31 = vld [vmem:[#allocation14] sm:$0x3] }
 0x46a   : > { %v2839_v33 = vmul.bf16 1045249613, %v2711_v32  ;;  %vm2775_vm13 = vcmp.gt.bf16.partialorder %v2711_v32, 0 }
 0x46b   : > { %v2476_v34 = vpop.f32.mrb[92].mxu1  ;;  %vm2776_vm12 = vcmp.gt.bf16.partialorder %v2712_v29, 0  ;;  %v2840_v35 = vmul.bf16 1045249613, %v2712_v29 }
 0x46c   : > { %v2478_v36 = vpop.f32.mrb[93].mxu1  ;;  %v2903_v41 = vsel %vm2775_vm13, %v2711_v32, %v2839_v33  ;;  %v2963_v32 = vsub.s32 1, %v10227_v10 }
 0x46d   : > { %v2480_v37 = vpop.f32.mrb[94].mxu1  ;;  %v2904_v38 = vsel %vm2776_vm12, %v2712_v29, %v2840_v35 }
 0x46e   : > { %v2611_v39 = vpack.c.bf16 %v2480_v37, %v2476_v34  ;;  %v2482_v40 = vpop.f32.mrb[95].mxu1  ;;  %3379 = vmatprep.mubr.bf16.mxu0 %v2904_v38  ;;  %v10388_v38 = vrot.slane %v2955_v31, %v10238_v20 }
 0x46f   : > { %v2612_v42 = vpack.c.bf16 %v2482_v40, %v2478_v36  ;;  %3380 = vmatmul.mubr.bf16.gmra.mrb[216].mxu0 %v2903_v41  ;;  %v10393_v40 = vrot.slane %v2955_v31, %v2963_v32 }
 0x470   : > { %v2713_v43 = vadd.bf16 %v10314_v45, %v2611_v39 }
 0x471   : > { %v2714_v44 = vadd.bf16 %v10317_v49, %v2612_v42 }
 0x472   : > { %vm2777_vm14 = vcmp.gt.bf16.partialorder %v2713_v43, 0  ;;  %v2841_v46 = vmul.bf16 1045249613, %v2713_v43 }
 0x473   : > { %v2486_v48 = vpop.f32.mrb[96].mxu1  ;;  %vm2778_vm15 = vcmp.gt.bf16.partialorder %v2714_v44, 0  ;;  %v2842_v50 = vmul.bf16 1045249613, %v2714_v44 }
 0x474   : > { %v2488_v52 = vpop.f32.mrb[97].mxu1  ;;  %v2905_v58 = vsel %vm2777_vm14, %v2713_v43, %v2841_v46 }
 0x475   : > { %v2490_v53 = vpop.f32.mrb[98].mxu1  ;;  %v2906_v54 = vsel %vm2778_vm15, %v2714_v44, %v2842_v50 }
 0x476   : > { %v2613_v55 = vpack.c.bf16 %v2490_v53, %v2486_v48  ;;  %v2492_v57 = vpop.f32.mrb[99].mxu1  ;;  %3389 = vmatprep.mubr.bf16.mxu0 %v2906_v54  ;;  %v8365_v54 = vld [vmem:[#allocation19 + $0x80] ss:$8 sps:$4 sm:$0xff]  }
 0x477   : > { %v2614_v59 = vpack.c.bf16 %v2492_v57, %v2488_v52  ;;  %3390 = vmatmul.mubr.bf16.gmra.mrb[220].mxu0 %v2905_v58 }
 0x478   : > { %v2715_v60 = vadd.bf16 %v10314_v45, %v2613_v55  ;;  %v8367_v55 = vld [vmem:[#allocation19 + $0x84] ss:$8 sps:$4 sm:$0xff]  }
 0x479   : > { %v2716_v61 = vadd.bf16 %v10317_v49, %v2614_v59  ;;  %4911 = vmatprep.subr.bf16.mxu0 %v8367_v55 }
 0x47a   : > { %v2843_v62 = vmul.bf16 1045249613, %v2715_v60  ;;  %vm2779_vm1 = vcmp.gt.bf16.partialorder %v2715_v60, 0  ;;  %4912 = vmatpush1.bf16.msra.mxu0 %v8365_v54  ;;  %v8370_v54 = vld [vmem:[#allocation19 + $0x94] ss:$8 sps:$4 sm:$0xff]  }
 0x47b   : > { %v2496_v63 = vpop.f32.mrb[100].mxu1  ;;  %vm2780_vm0 = vcmp.gt.bf16.partialorder %v2716_v61, 0  ;;  %v2844_v0 = vmul.bf16 1045249613, %v2716_v61  ;;  %4913 = vmatprep.subr.bf16.mxu0 %v8370_v54 }
 0x47c   : > { %v2498_v1 = vpop.f32.mrb[101].mxu1  ;;  %v2907_v6 = vsel %vm2779_vm1, %v2715_v60, %v2843_v62 }
 0x47d   : > { %v2500_v2 = vpop.f32.mrb[102].mxu1  ;;  %v2908_v3 = vsel %vm2780_vm0, %v2716_v61, %v2844_v0 }
 0x47e   : > { %v2615_v4 = vpack.c.bf16 %v2500_v2, %v2496_v63  ;;  %v2502_v5 = vpop.f32.mrb[103].mxu1  ;;  %3399 = vmatprep.mubr.bf16.mxu0 %v2908_v3 }
 0x47f   : > { %v2616_v7 = vpack.c.bf16 %v2502_v5, %v2498_v1  ;;  %3400 = vmatmul.mubr.bf16.gmra.mrb[224].mxu0 %v2907_v6 }
 0x480   : > { %v2717_v8 = vadd.bf16 %v10314_v45, %v2615_v4 }
 0x481   : > { %v2718_v9 = vadd.bf16 %v10317_v49, %v2616_v7 }
 0x482   : > { %vm2781_vm2 = vcmp.gt.bf16.partialorder %v2717_v8, 0  ;;  %v2845_v11 = vmul.bf16 1045249613, %v2717_v8 }
 0x483   : > { %v2506_v14 = vpop.f32.mrb[104].mxu1  ;;  %vm2782_vm3 = vcmp.gt.bf16.partialorder %v2718_v9, 0  ;;  %v2846_v15 = vmul.bf16 1045249613, %v2718_v9 }
 0x484   : > { %v2508_v17 = vpop.f32.mrb[105].mxu1  ;;  %v2909_v23 = vsel %vm2781_vm2, %v2717_v8, %v2845_v11 }
 0x485   : > { %v2510_v18 = vpop.f32.mrb[106].mxu1  ;;  %v2910_v19 = vsel %vm2782_vm3, %v2718_v9, %v2846_v15 }
 0x486   : > { %v2617_v21 = vpack.c.bf16 %v2510_v18, %v2506_v14  ;;  %v2512_v22 = vpop.f32.mrb[107].mxu1  ;;  %3409 = vmatprep.mubr.bf16.mxu0 %v2910_v19 }
 0x487   : > { %v2618_v24 = vpack.c.bf16 %v2512_v22, %v2508_v17  ;;  %3410 = vmatmul.mubr.bf16.gmra.mrb[228].mxu0 %v2909_v23 }
 0x488   : > { %v2719_v25 = vadd.bf16 %v10314_v45, %v2617_v21 }
 0x489   : > { %v2720_v27 = vadd.bf16 %v10317_v49, %v2618_v24 }
 0x48a   : > { %v2847_v28 = vmul.bf16 1045249613, %v2719_v25  ;;  %vm2783_vm5 = vcmp.gt.bf16.partialorder %v2719_v25, 0 }
 0x48b   : > { %v2516_v30 = vpop.f32.mrb[108].mxu1  ;;  %vm2784_vm4 = vcmp.gt.bf16.partialorder %v2720_v27, 0  ;;  %v2848_v26 = vmul.bf16 1045249613, %v2720_v27 }
 0x48c   : > { %v2518_v29 = vpop.f32.mrb[109].mxu1  ;;  %v2911_v37 = vsel %vm2783_vm5, %v2719_v25, %v2847_v28 }
 0x48d   : > { %v2520_v33 = vpop.f32.mrb[110].mxu1  ;;  %v2912_v34 = vsel %vm2784_vm4, %v2720_v27, %v2848_v26 }
 0x48e   : > { %v2619_v35 = vpack.c.bf16 %v2520_v33, %v2516_v30  ;;  %v2522_v36 = vpop.f32.mrb[111].mxu1  ;;  %3419 = vmatprep.mubr.bf16.mxu0 %v2912_v34  ;;  %v3480_v34 = vld [vmem:[%s10141_s30] sm:$0xff] }
 0x48f   : > { %v2620_v39 = vpack.c.bf16 %v2522_v36, %v2518_v29  ;;  %3420 = vmatmul.mubr.bf16.gmra.mrb[232].mxu0 %v2911_v37  ;;  %v3481_v36 = vld [vmem:[%s10141_s30 + $0x8] sm:$0xff] }
 0x490   : > { %v2721_v41 = vadd.bf16 %v10314_v45, %v2619_v35 }
 0x491   : > { %v2722_v42 = vadd.bf16 %v10317_v49, %v2620_v39 }
 0x492   : > { %v3161_v43 = vpop.f32.mrb[128].mxu0  ;;  %v2849_v44 = vmul.bf16 1045249613, %v2721_v41  ;;  %vm2785_vm7 = vcmp.gt.bf16.partialorder %v2721_v41, 0 }
 0x493   : > { %v10398_v46 = vadd.f32 %v3161_v43, %v10388_v38  ;;  %v2526_v47 = vpop.f32.mrb[112].mxu1  ;;  %v3163_v48 = vpop.f32.mrb[129].mxu0  ;;  %vm2786_vm6 = vcmp.gt.bf16.partialorder %v2722_v42, 0  ;;  %v2850_v50 = vmul.bf16 1045249613, %v2722_v42 }
 0x494   : > { %v3164_v51 = vadd.f32 %v3163_v48, %v10393_v40  ;;  %v2528_v52 = vpop.f32.mrb[113].mxu1  ;;  %v3165_v53 = vpop.f32.mrb[130].mxu0  ;;  %v2913_v1 = vsel %vm2785_vm7, %v2721_v41, %v2849_v44 }
 0x495   : > { %7059 = vst [vmem:[%s10403_s22] sm:$0xff] %v10398_v46  ;;  %v10408_v57 = vadd.f32 %v3165_v53, %v10388_v38  ;;  %v2530_v58 = vpop.f32.mrb[114].mxu1  ;;  %v3167_v59 = vpop.f32.mrb[131].mxu0  ;;  %v2914_v60 = vsel %vm2786_vm6, %v2722_v42, %v2850_v50  ;;  %v8368_v53 = vld [vmem:[#allocation19 + $0x90] ss:$8 sps:$4 sm:$0xff]  }
 0x496   : > { %v3544_v61 = vmul.f32 0.5, %v3164_v51  ;;  %7060 = vst [vmem:[%s10403_s22 + $0x8] sm:$0xff] %v3164_v51  ;;  %v2621_v62 = vpack.c.bf16 %v2530_v58, %v2526_v47  ;;  %v3168_v63 = vadd.f32 %v3167_v59, %v10393_v40  ;;  %v2532_v0 = vpop.f32.mrb[115].mxu1  ;;  %3429 = vmatprep.mubr.bf16.mxu0 %v2914_v60  ;;  %4914 = vmatpush1.bf16.msra.mxu0 %v8368_v53 }
 0x497   : > { %7061 = vst [vmem:[%s10403_s22 + $0x10] sm:$0xff] %v10408_v57  ;;  %v2622_v2 = vpack.c.bf16 %v2532_v0, %v2528_v52  ;;  %3430 = vmatmul.mubr.bf16.gmra.mrb[236].mxu0 %v2913_v1 }
 0x498   : > { %v3608_v3 = vmul.f32 1.442695, %v3544_v61  ;;  %v2723_v4 = vadd.bf16 %v10314_v45, %v2621_v62  ;;  %v3545_v5 = vmul.f32 0.5, %v3168_v63  ;;  %7062 = vst [vmem:[%s10403_s22 + $0x18] sm:$0xff] %v3168_v63 }
 0x499   : > { %v2724_v6 = vadd.bf16 %v10317_v49, %v2622_v2 }
 0x49a   : > { %8437 = vpow2.f32 %v3608_v3  ;;  %v3610_v7 = vmul.f32 1.442695, %v3545_v5  ;;  %v3171_v8 = vpop.f32.mrb[132].mxu0  ;;  %v2851_v9 = vmul.bf16 1045249613, %v2723_v4  ;;  %vm2787_vm9 = vcmp.gt.bf16.partialorder %v2723_v4, 0 }
 0x49b   : > { %v10419_v11 = vadd.f32 %v3171_v8, %v10388_v38  ;;  %v2536_v12 = vpop.f32.mrb[116].mxu1  ;;  %v3173_v14 = vpop.f32.mrb[133].mxu0  ;;  %vm2788_vm8 = vcmp.gt.bf16.partialorder %v2724_v6, 0  ;;  %v2852_v15 = vmul.bf16 1045249613, %v2724_v6 }
 0x49c   : > { %8439 = vpow2.f32 %v3610_v7  ;;  %v3174_v16 = vadd.f32 %v3173_v14, %v10393_v40  ;;  %v2538_v17 = vpop.f32.mrb[117].mxu1  ;;  %v3175_v18 = vpop.f32.mrb[134].mxu0  ;;  %v2915_v30 = vsel %vm2787_vm9, %v2723_v4, %v2851_v9 }
 0x49d   : > { %7063 = vst [vmem:[%s10403_s22 + $0x20] sm:$0xff] %v10419_v11  ;;  %v10425_v19 = vadd.f32 %v3175_v18, %v10388_v38  ;;  %v2540_v21 = vpop.f32.mrb[118].mxu1  ;;  %v3177_v22 = vpop.f32.mrb[135].mxu0  ;;  %v2916_v23 = vsel %vm2788_vm8, %v2724_v6, %v2852_v15  ;;  %v3482_v15 = vld [vmem:[%s10141_s30 + $0x10] sm:$0xff] }
 0x49e   : > { %v3546_v24 = vmul.f32 0.5, %v3174_v16  ;;  %7064 = vst [vmem:[%s10403_s22 + $0x28] sm:$0xff] %v3174_v16  ;;  %v2623_v25 = vpack.c.bf16 %v2540_v21, %v2536_v12  ;;  %v3178_v27 = vadd.f32 %v3177_v22, %v10393_v40  ;;  %v2542_v28 = vpop.f32.mrb[119].mxu1  ;;  %3439 = vmatprep.mubr.bf16.mxu0 %v2916_v23 }
 0x49f   : > { %7065 = vst [vmem:[%s10403_s22 + $0x30] sm:$0xff] %v10425_v19  ;;  %v2624_v26 = vpack.c.bf16 %v2542_v28, %v2538_v17  ;;  %3440 = vmatmul.mubr.bf16.gmra.mrb[240].mxu0 %v2915_v30  ;;  %v3483_v30 = vld [vmem:[%s10141_s30 + $0x18] sm:$0xff] }
 0x4a0   : > { %v3612_v31 = vmul.f32 1.442695, %v3546_v24  ;;  %v2725_v29 = vadd.bf16 %v10314_v45, %v2623_v25  ;;  %v3547_v33 = vmul.f32 0.5, %v3178_v27  ;;  %7066 = vst [vmem:[%s10403_s22 + $0x38] sm:$0xff] %v3178_v27 }
 0x4a1   : > { %v2726_v35 = vadd.bf16 %v10317_v49, %v2624_v26 }
 0x4a2   : > { %8441 = vpow2.f32 %v3612_v31  ;;  %v3614_v37 = vmul.f32 1.442695, %v3547_v33  ;;  %v3181_v39 = vpop.f32.mrb[136].mxu0  ;;  %v2853_v41 = vmul.bf16 1045249613, %v2725_v29  ;;  %vm2789_vm11 = vcmp.gt.bf16.partialorder %v2725_v29, 0 }
 0x4a3   : > { %v10438_v42 = vadd.f32 %v3181_v39, %v10388_v38  ;;  %v2546_v43 = vpop.f32.mrb[120].mxu1  ;;  %v3183_v44 = vpop.f32.mrb[137].mxu0  ;;  %vm2790_vm10 = vcmp.gt.bf16.partialorder %v2726_v35, 0  ;;  %v2854_v47 = vmul.bf16 1045249613, %v2726_v35 }
 0x4a4   : > { %v8438_v48 = vpop.eup %8437  ;;  %8443 = vpow2.f32 %v3614_v37  ;;  %v3184_v50 = vadd.f32 %v3183_v44, %v10393_v40  ;;  %v2548_v51 = vpop.f32.mrb[121].mxu1  ;;  %v2917_v3 = vsel %vm2789_vm11, %v2725_v29, %v2853_v41 }
 0x4a5   : > { %v3185_v52 = vpop.f32.mrb[138].mxu0  ;;  %v3736_v55 = vmul.f32 %v8438_v48, %v3480_v34  ;;  %7067 = vst [vmem:[%s10403_s22 + $0x40] sm:$0xff] %v10438_v42  ;;  %v2550_v59 = vpop.f32.mrb[122].mxu1  ;;  %v2918_v61 = vsel %vm2790_vm10, %v2726_v35, %v2854_v47 }
 0x4a6   : > { %v10444_v58 = vadd.f32 %v3185_v52, %v10388_v38  ;;  %v3187_v60 = vpop.f32.mrb[139].mxu0  ;;  %v8440_v62 = vpop.eup %8439  ;;  %v3548_v63 = vmul.f32 0.5, %v3184_v50  ;;  %7068 = vst [vmem:[%s10403_s22 + $0x48] sm:$0xff] %v3184_v50  ;;  %v2625_v0 = vpack.c.bf16 %v2550_v59, %v2546_v43  ;;  %3449 = vmatprep.mubr.bf16.mxu0 %v2918_v61 }
 0x4a7   : > { %v3188_v1 = vadd.f32 %v3187_v60, %v10393_v40  ;;  %v2552_v2 = vpop.f32.mrb[123].mxu1  ;;  %v3737_v4 = vmul.f32 %v8440_v62, %v3481_v36  ;;  %3450 = vmatmul.mubr.bf16.gmra.mrb[244].mxu0 %v2917_v3  ;;  %v3800_v6 = vadd.f32 %v3736_v55, %v10398_v46  ;;  %v3484_v55 = vld [vmem:[%s10141_s30 + $0x20] sm:$0xff]  ;;  %v8373_v3 = vld [vmem:[#allocation19 + $0xa4] ss:$8 sps:$4 sm:$0xff]  }
 0x4a8   : > { %7069 = vst [vmem:[%s10403_s22 + $0x50] sm:$0xff] %v10444_v58  ;;  %v2626_v5 = vpack.c.bf16 %v2552_v2, %v2548_v51  ;;  %v3616_v7 = vmul.f32 1.442695, %v3548_v63  ;;  %v2727_v8 = vadd.bf16 %v10314_v45, %v2625_v0  ;;  %v8371_v2 = vld [vmem:[#allocation19 + $0xa0] ss:$8 sps:$4 sm:$0xff]   ;;  %4915 = vmatprep.subr.bf16.mxu0 %v8373_v3 }
 0x4a9   : > { %v3549_v9 = vmul.f32 0.5, %v3188_v1  ;;  %7070 = vst [vmem:[%s10403_s22 + $0x58] sm:$0xff] %v3188_v1  ;;  %v3801_v14 = vadd.f32 %v3737_v4, %v10408_v57  ;;  %v3485_v1 = vld [vmem:[%s10141_s30 + $0x28] sm:$0xff]  ;;  %4916 = vmatpush1.bf16.msra.mxu0 %v8371_v2 }
 0x4aa   : > { %v2728_v12 = vadd.bf16 %v10317_v49, %v2626_v5  ;;  %8445 = vpow2.f32 %v3616_v7  ;;  %v3191_v17 = vpop.f32.mrb[140].mxu0  ;;  %vm2791_vm12 = vcmp.gt.bf16.partialorder %v2727_v8, 0  ;;  %v2855_v18 = vmul.bf16 1045249613, %v2727_v8 }
 0x4ab   : > { %v3618_v16 = vmul.f32 1.442695, %v3549_v9  ;;  %v10458_v46 = vadd.f32 %v3191_v17, %v10388_v38  ;;  %v2556_v21 = vpop.f32.mrb[124].mxu1  ;;  %v3193_v22 = vpop.f32.mrb[141].mxu0  ;;  %v3864_v23 = vpack.c.bf16 %v3801_v14, %v3800_v6 }
 0x4ac   : > { %vm2792_vm13 = vcmp.gt.bf16.partialorder %v2728_v12, 0  ;;  %v2856_v24 = vmul.bf16 1045249613, %v2728_v12  ;;  %v8442_v25 = vpop.eup %8441  ;;  %v3194_v57 = vadd.f32 %v3193_v22, %v10393_v40  ;;  %v2558_v27 = vpop.f32.mrb[125].mxu1  ;;  %v2919_v43 = vsel %vm2791_vm12, %v2727_v8, %v2855_v18 }
 0x4ad   : > { %8447 = vpow2.f32 %v3618_v16  ;;  %v3195_v28 = vpop.f32.mrb[142].mxu0  ;;  %7071 = vst [vmem:[%s10403_s22 + $0x60] sm:$0xff] %v10458_v46  ;;  %v2560_v31 = vpop.f32.mrb[126].mxu1  ;;  %4025 = vmatmul.mubr.bf16.vlgmr.msra.gmra.mrb[128].mxu1 %v3864_v23  ;;  %v3738_v34 = vmul.f32 %v8442_v25, %v3482_v15 }
 0x4ae   : > { %v10465_v26 = vadd.f32 %v3195_v28, %v10388_v38  ;;  %v3197_v29 = vpop.f32.mrb[143].mxu0  ;;  %v2920_v33 = vsel %vm2792_vm13, %v2728_v12, %v2856_v24  ;;  %v8444_v35 = vpop.eup %8443  ;;  %v3550_v36 = vmul.f32 0.5, %v3194_v57  ;;  %7072 = vst [vmem:[%s10403_s22 + $0x68] sm:$0xff] %v3194_v57  ;;  %v2627_v37 = vpack.c.bf16 %v2560_v31, %v2556_v21  ;;  %4034 = vmatprep.mubr.bf16.mxu1 %v9622_v56  ;;  %v3486_v24 = vld [vmem:[%s10141_s30 + $0x30] sm:$0xff]  ;;  %v3487_v31 = vld [vmem:[%s10141_s30 + $0x38] sm:$0xff] }
 0x4af   : > { %v3198_v39 = vadd.f32 %v3197_v29, %v10393_v40  ;;  %v2562_v41 = vpop.f32.mrb[127].mxu1  ;;  %3459 = vmatprep.mubr.bf16.mxu0 %v2920_v33  ;;  %v3739_v47 = vmul.f32 %v8444_v35, %v3483_v30  ;;  %v3802_v48 = vadd.f32 %v3738_v34, %v10419_v11 }
 0x4b0   : > { %7073 = vst [vmem:[%s10403_s22 + $0x70] sm:$0xff] %v10465_v26  ;;  %v2628_v44 = vpack.c.bf16 %v2562_v41, %v2558_v27  ;;  %3460 = vmatmul.mubr.bf16.gmra.mrb[248].mxu0 %v2919_v43  ;;  %v3620_v50 = vmul.f32 1.442695, %v3550_v36  ;;  %v2729_v51 = vadd.bf16 %v10314_v45, %v2627_v37 }
 0x4b1   : > { %v3551_v52 = vmul.f32 0.5, %v3198_v39  ;;  %7074 = vst [vmem:[%s10403_s22 + $0x78] sm:$0xff] %v3198_v39  ;;  %v3803_v54 = vadd.f32 %v3739_v47, %v10425_v19 }
 0x4b2   : > { %v2730_v53 = vadd.bf16 %v10317_v49, %v2628_v44  ;;  %8449 = vpow2.f32 %v3620_v50  ;;  %v3201_v60 = vpop.f32.mrb[144].mxu0  ;;  %vm2793_vm14 = vcmp.gt.bf16.partialorder %v2729_v51, 0  ;;  %v2857_v61 = vmul.bf16 1045249613, %v2729_v51  ;;  %v3488_v50 = vld [vmem:[%s10141_s30 + $0x40] sm:$0xff] }
 0x4b3   : > { %v3622_v59 = vmul.f32 1.442695, %v3551_v52  ;;  %v10480_v62 = vadd.f32 %v3201_v60, %v10388_v38  ;;  %v3203_v11 = vpop.f32.mrb[145].mxu0  ;;  %v3865_v63 = vpack.c.bf16 %v3803_v54, %v3802_v48 }
 0x4b4   : > { %vm2794_vm15 = vcmp.gt.bf16.partialorder %v2730_v53, 0  ;;  %v2858_v45 = vmul.bf16 1045249613, %v2730_v53  ;;  %v8446_v0 = vpop.eup %8445  ;;  %v3204_v49 = vadd.f32 %v3203_v11, %v10393_v40  ;;  %v3205_v19 = vpop.f32.mrb[146].mxu0  ;;  %v2921_v14 = vsel %vm2793_vm14, %v2729_v51, %v2857_v61  ;;  %v8374_v51 = vld [vmem:[#allocation19 + $0xb0] ss:$8 sps:$4 sm:$0xff]  }
 0x4b5   : > { %8451 = vpow2.f32 %v3622_v59  ;;  %7075 = vst [vmem:[%s10403_s22 + $0x80] sm:$0xff] %v10480_v62  ;;  %v10487_v4 = vadd.f32 %v3205_v19, %v10388_v38  ;;  %v3207_v5 = vpop.f32.mrb[147].mxu0  ;;  %4035 = vmatmul.mubr.bf16.gmra.mrb[132].mxu1 %v3865_v63  ;;  %v3740_v7 = vmul.f32 %v8446_v0, %v3484_v55  ;;  %v8376_v55 = vld [vmem:[#allocation19 + $0xb4] ss:$8 sps:$4 sm:$0xff]   ;;  %v3489_v61 = vld [vmem:[%s10141_s30 + $0x48] sm:$0xff] }
 0x4b6   : > { %v2922_v6 = vsel %vm2794_vm15, %v2730_v53, %v2858_v45  ;;  %v3552_v9 = vmul.f32 0.5, %v3204_v49  ;;  %7076 = vst [vmem:[%s10403_s22 + $0x88] sm:$0xff] %v3204_v49  ;;  %v3208_v12 = vadd.f32 %v3207_v5, %v10393_v40  ;;  %4044 = vmatprep.mubr.bf16.mxu1 %v9622_v56  ;;  %4917 = vmatprep.subr.bf16.mxu0 %v8376_v55 }
 0x4b7   : > { %v8448_v8 = vpop.eup %8447  ;;  %3469 = vmatprep.mubr.bf16.mxu0 %v2922_v6  ;;  %7077 = vst [vmem:[%s10403_s22 + $0x90] sm:$0xff] %v10487_v4  ;;  %v3804_v16 = vadd.f32 %v3740_v7, %v10438_v42  ;;  %4918 = vmatpush1.bf16.msra.mxu0 %v8374_v51 }
 0x4b8   : > { %3470 = vmatmul.mubr.bf16.gmra.mrb[252].mxu0 %v2921_v14  ;;  %v3741_v15 = vmul.f32 %v8448_v8, %v3485_v1  ;;  %v3624_v17 = vmul.f32 1.442695, %v3552_v9  ;;  %v3553_v18 = vmul.f32 0.5, %v3208_v12  ;;  %7078 = vst [vmem:[%s10403_s22 + $0x98] sm:$0xff] %v3208_v12  ;;  %v3490_v8 = vld [vmem:[%s10141_s30 + $0x50] sm:$0xff] }
 0x4ba   : > { %v3805_v21 = vadd.f32 %v3741_v15, %v10444_v58  ;;  %8453 = vpow2.f32 %v3624_v17  ;;  %v3626_v22 = vmul.f32 1.442695, %v3553_v18  ;;  %v3211_v23 = vpop.f32.mrb[148].mxu0  ;;  %v3491_v17 = vld [vmem:[%s10141_s30 + $0x58] sm:$0xff] }
 0x4bb   : > { %v10500_v25 = vadd.f32 %v3211_v23, %v10388_v38  ;;  %v3213_v57 = vpop.f32.mrb[149].mxu0 }
 0x4bc   : > { %v3866_v27 = vpack.c.bf16 %v3805_v21, %v3804_v16  ;;  %v8450_v42 = vpop.eup %8449  ;;  %8455 = vpow2.f32 %v3626_v22  ;;  %v3214_v28 = vadd.f32 %v3213_v57, %v10393_v40  ;;  %v3215_v30 = vpop.f32.mrb[150].mxu0 }
 0x4bd   : > { %7079 = vst [vmem:[%s10403_s22 + $0xa0] sm:$0xff] %v10500_v25  ;;  %v10507_v58 = vadd.f32 %v3215_v30, %v10388_v38  ;;  %v3217_v29 = vpop.f32.mrb[151].mxu0  ;;  %v3742_v33 = vmul.f32 %v8450_v42, %v3486_v24 }
 0x4be   : > { %4045 = vmatmul.mubr.bf16.gmra.mrb[136].mxu1 %v3866_v27  ;;  %v3554_v35 = vmul.f32 0.5, %v3214_v28  ;;  %7080 = vst [vmem:[%s10403_s22 + $0xa8] sm:$0xff] %v3214_v28  ;;  %v3218_v36 = vadd.f32 %v3217_v29, %v10393_v40 }
 0x4bf   : > { %v8452_v34 = vpop.eup %8451  ;;  %4054 = vmatprep.mubr.bf16.mxu1 %v9622_v56  ;;  %7081 = vst [vmem:[%s10403_s22 + $0xb0] sm:$0xff] %v10507_v58  ;;  %v3806_v39 = vadd.f32 %v3742_v33, %v10458_v46  ;;  %v3492_v33 = vld [vmem:[%s10141_s30 + $0x60] sm:$0xff] }
 0x4c0   : > { %v3743_v37 = vmul.f32 %v8452_v34, %v3487_v31  ;;  %v3628_v41 = vmul.f32 1.442695, %v3554_v35  ;;  %v3555_v43 = vmul.f32 0.5, %v3218_v36  ;;  %7082 = vst [vmem:[%s10403_s22 + $0xb8] sm:$0xff] %v3218_v36  ;;  %v8377_v34 = vld [vmem:[#allocation19 + $0xc0] ss:$8 sps:$4 sm:$0xff]  }
 0x4c2   : > { %v3807_v44 = vadd.f32 %v3743_v37, %v10465_v26  ;;  %8457 = vpow2.f32 %v3628_v41  ;;  %v3630_v47 = vmul.f32 1.442695, %v3555_v43  ;;  %v3221_v48 = vpop.f32.mrb[152].mxu0 }
 0x4c3   : > { %v10519_v52 = vadd.f32 %v3221_v48, %v10388_v38  ;;  %v3223_v53 = vpop.f32.mrb[153].mxu0 }
 0x4c4   : > { %v3867_v54 = vpack.c.bf16 %v3807_v44, %v3806_v39  ;;  %v8454_v46 = vpop.eup %8453  ;;  %8459 = vpow2.f32 %v3630_v47  ;;  %v3224_v59 = vadd.f32 %v3223_v53, %v10393_v40  ;;  %v3225_v60 = vpop.f32.mrb[154].mxu0  ;;  %v8379_v39 = vld [vmem:[#allocation19 + $0xc4] ss:$8 sps:$4 sm:$0xff]  }
 0x4c5   : > { %7083 = vst [vmem:[%s10403_s22 + $0xc0] sm:$0xff] %v10519_v52  ;;  %v10526_v26 = vadd.f32 %v3225_v60, %v10388_v38  ;;  %v3227_v11 = vpop.f32.mrb[155].mxu0  ;;  %v3744_v63 = vmul.f32 %v8454_v46, %v3488_v50  ;;  %v3493_v44 = vld [vmem:[%s10141_s30 + $0x68] sm:$0xff]  ;;  %4919 = vmatprep.subr.bf16.mxu0 %v8379_v39 }
 0x4c6   : > { %4055 = vmatmul.mubr.bf16.gmra.mrb[140].mxu1 %v3867_v54  ;;  %v8456_v45 = vpop.eup %8455  ;;  %v3556_v0 = vmul.f32 0.5, %v3224_v59  ;;  %7084 = vst [vmem:[%s10403_s22 + $0xc8] sm:$0xff] %v3224_v59  ;;  %v3228_v49 = vadd.f32 %v3227_v11, %v10393_v40  ;;  %4920 = vmatpush1.bf16.msra.mxu0 %v8377_v34 }
 0x4c7   : > { %4064 = vmatprep.mubr.bf16.mxu1 %v9622_v56  ;;  %7085 = vst [vmem:[%s10403_s22 + $0xd0] sm:$0xff] %v10526_v26  ;;  %v3745_v19 = vmul.f32 %v8456_v45, %v3489_v61  ;;  %v3808_v1 = vadd.f32 %v3744_v63, %v10480_v62  ;;  %v3494_v63 = vld [vmem:[%s10141_s30 + $0x70] sm:$0xff] }
 0x4c8   : > { %v3632_v2 = vmul.f32 1.442695, %v3556_v0  ;;  %v3557_v3 = vmul.f32 0.5, %v3228_v49  ;;  %7086 = vst [vmem:[%s10403_s22 + $0xd8] sm:$0xff] %v3228_v49 }
 0x4c9   : > { %v3809_v5 = vadd.f32 %v3745_v19, %v10487_v4 }
 0x4ca   : > { %8461 = vpow2.f32 %v3632_v2  ;;  %v3634_v6 = vmul.f32 1.442695, %v3557_v3  ;;  %v3231_v7 = vpop.f32.mrb[156].mxu0  ;;  %v3495_v2 = vld [vmem:[%s10141_s30 + $0x78] sm:$0xff] }
 0x4cb   : > { %v10538_v9 = vadd.f32 %v3231_v7, %v10388_v38  ;;  %v3233_v12 = vpop.f32.mrb[157].mxu0  ;;  %v3868_v14 = vpack.c.bf16 %v3809_v5, %v3808_v1 }
 0x4cc   : > { %v8458_v15 = vpop.eup %8457  ;;  %8463 = vpow2.f32 %v3634_v6  ;;  %v3234_v62 = vadd.f32 %v3233_v12, %v10393_v40  ;;  %v3235_v16 = vpop.f32.mrb[158].mxu0 }
 0x4cd   : > { %7087 = vst [vmem:[%s10403_s22 + $0xe0] sm:$0xff] %v10538_v9  ;;  %v10545_v4 = vadd.f32 %v3235_v16, %v10388_v38  ;;  %v3237_v18 = vpop.f32.mrb[159].mxu0  ;;  %v3746_v21 = vmul.f32 %v8458_v15, %v3490_v8 }
 0x4ce   : > { %4065 = vmatmul.mubr.bf16.gmra.mrb[144].mxu1 %v3868_v14  ;;  %v8460_v22 = vpop.eup %8459  ;;  %v3558_v23 = vmul.f32 0.5, %v3234_v62  ;;  %7088 = vst [vmem:[%s10403_s22 + $0xe8] sm:$0xff] %v3234_v62  ;;  %v3238_v24 = vadd.f32 %v3237_v18, %v10393_v40 }
 0x4cf   : > { %4074 = vmatprep.mubr.bf16.mxu1 %v9622_v56  ;;  %7089 = vst [vmem:[%s10403_s22 + $0xf0] sm:$0xff] %v10545_v4  ;;  %v3747_v57 = vmul.f32 %v8460_v22, %v3491_v17  ;;  %v3810_v27 = vadd.f32 %v3746_v21, %v10500_v25  ;;  %v3496_v21 = vld [vmem:[%s10141_s30 + $0x80] sm:$0xff] }
 0x4d0   : > { %v3636_v42 = vmul.f32 1.442695, %v3558_v23  ;;  %v3559_v28 = vmul.f32 0.5, %v3238_v24  ;;  %7090 = vst [vmem:[%s10403_s22 + $0xf8] sm:$0xff] %v3238_v24  ;;  %v8380_v22 = vld [vmem:[#allocation19 + $0xd0] ss:$8 sps:$4 sm:$0xff]  }
 0x4d1   : > { %v3811_v30 = vadd.f32 %v3747_v57, %v10507_v58 }
 0x4d2   : > { %8465 = vpow2.f32 %v3636_v42  ;;  %v3638_v31 = vmul.f32 1.442695, %v3559_v28  ;;  %v3241_v29 = vpop.f32.mrb[160].mxu0 }
 0x4d3   : > { %v10557_v35 = vadd.f32 %v3241_v29, %v10388_v38  ;;  %v3243_v36 = vpop.f32.mrb[161].mxu0  ;;  %v3869_v37 = vpack.c.bf16 %v3811_v30, %v3810_v27  ;;  %v8382_v27 = vld [vmem:[#allocation19 + $0xd4] ss:$8 sps:$4 sm:$0xff]   ;;  %v3497_v30 = vld [vmem:[%s10141_s30 + $0x88] sm:$0xff] }
 0x4d4   : > { %v8462_v25 = vpop.eup %8461  ;;  %8467 = vpow2.f32 %v3638_v31  ;;  %v3244_v41 = vadd.f32 %v3243_v36, %v10393_v40  ;;  %v3245_v43 = vpop.f32.mrb[162].mxu0  ;;  %4921 = vmatprep.subr.bf16.mxu0 %v8382_v27 }
 0x4d5   : > { %7091 = vst [vmem:[%s10403_s22 + $0x100] sm:$0xff] %v10557_v35  ;;  %v10564_v58 = vadd.f32 %v3245_v43, %v10388_v38  ;;  %v3247_v47 = vpop.f32.mrb[163].mxu0  ;;  %v3748_v48 = vmul.f32 %v8462_v25, %v3492_v33  ;;  %4922 = vmatpush1.bf16.msra.mxu0 %v8380_v22 }
 0x4d6   : > { %4075 = vmatmul.mubr.bf16.gmra.mrb[148].mxu1 %v3869_v37  ;;  %v8464_v50 = vpop.eup %8463  ;;  %v3560_v51 = vmul.f32 0.5, %v3244_v41  ;;  %7092 = vst [vmem:[%s10403_s22 + $0x108] sm:$0xff] %v3244_v41  ;;  %v3248_v53 = vadd.f32 %v3247_v47, %v10393_v40 }
 0x4d7   : > { %4084 = vmatprep.mubr.bf16.mxu1 %v9622_v56  ;;  %7093 = vst [vmem:[%s10403_s22 + $0x110] sm:$0xff] %v10564_v58  ;;  %v3749_v54 = vmul.f32 %v8464_v50, %v3493_v44  ;;  %v3812_v55 = vadd.f32 %v3748_v48, %v10519_v52  ;;  %v3498_v48 = vld [vmem:[%s10141_s30 + $0x90] sm:$0xff] }
 0x4d8   : > { %v3640_v46 = vmul.f32 1.442695, %v3560_v51  ;;  %v3561_v59 = vmul.f32 0.5, %v3248_v53  ;;  %7094 = vst [vmem:[%s10403_s22 + $0x118] sm:$0xff] %v3248_v53 }
 0x4d9   : > { %v3813_v60 = vadd.f32 %v3749_v54, %v10526_v26 }
 0x4da   : > { %8469 = vpow2.f32 %v3640_v46  ;;  %v3642_v61 = vmul.f32 1.442695, %v3561_v59  ;;  %v3251_v11 = vpop.f32.mrb[164].mxu0  ;;  %v3499_v46 = vld [vmem:[%s10141_s30 + $0x98] sm:$0xff] }
 0x4db   : > { %v10576_v45 = vadd.f32 %v3251_v11, %v10388_v38  ;;  %v3253_v0 = vpop.f32.mrb[165].mxu0  ;;  %v3870_v49 = vpack.c.bf16 %v3813_v60, %v3812_v55  ;;  %v8385_v11 = vld [vmem:[#allocation22 + $0x4] ss:$8 sps:$4 sm:$0xff]  }
 0x4dc   : > { %v8466_v19 = vpop.eup %8465  ;;  %8471 = vpow2.f32 %v3642_v61  ;;  %v3254_v52 = vadd.f32 %v3253_v0, %v10393_v40  ;;  %v3255_v1 = vpop.f32.mrb[166].mxu0  ;;  %v8383_v61 = vld [vmem:[#allocation22] ss:$8 sps:$4 sm:$0xff]   ;;  %5810 = vmatprep.subr.bf16.mxu1 %v8385_v11 }
 0x4dd   : > { %7095 = vst [vmem:[%s10403_s22 + $0x120] sm:$0xff] %v10576_v45  ;;  %v10583_v26 = vadd.f32 %v3255_v1, %v10388_v38  ;;  %v3257_v3 = vpop.f32.mrb[167].mxu0  ;;  %v3750_v5 = vmul.f32 %v8466_v19, %v3494_v63  ;;  %5811 = vmatpush1.bf16.msra.mxu1 %v8383_v61 }
 0x4de   : > { %4085 = vmatmul.mubr.bf16.gmra.mrb[152].mxu1 %v3870_v49  ;;  %v8468_v6 = vpop.eup %8467  ;;  %v3562_v7 = vmul.f32 0.5, %v3254_v52  ;;  %7096 = vst [vmem:[%s10403_s22 + $0x128] sm:$0xff] %v3254_v52  ;;  %v3258_v8 = vadd.f32 %v3257_v3, %v10393_v40 }
 0x4df   : > { %4094 = vmatprep.mubr.bf16.mxu1 %v9622_v56  ;;  %7097 = vst [vmem:[%s10403_s22 + $0x130] sm:$0xff] %v10583_v26  ;;  %v3751_v12 = vmul.f32 %v8468_v6, %v3495_v2  ;;  %v3814_v14 = vadd.f32 %v3750_v5, %v10538_v9 }
 0x4e0   : > { %v3644_v15 = vmul.f32 1.442695, %v3562_v7  ;;  %v3563_v62 = vmul.f32 0.5, %v3258_v8  ;;  %7098 = vst [vmem:[%s10403_s22 + $0x138] sm:$0xff] %v3258_v8  ;;  %v3500_v7 = vld [vmem:[%s10141_s30 + $0xa0] sm:$0xff] }
 0x4e1   : > { %v3815_v16 = vadd.f32 %v3751_v12, %v10545_v4  ;;  %v8386_v8 = vld [vmem:[#allocation19 + $0xe0] ss:$8 sps:$4 sm:$0xff]  }
 0x4e2   : > { %8473 = vpow2.f32 %v3644_v15  ;;  %v3646_v17 = vmul.f32 1.442695, %v3563_v62  ;;  %v3261_v18 = vpop.f32.mrb[168].mxu0  ;;  %v8388_v15 = vld [vmem:[#allocation19 + $0xe4] ss:$8 sps:$4 sm:$0xff]  }
 0x4e3   : > { %v10595_v23 = vadd.f32 %v3261_v18, %v10388_v38  ;;  %v3263_v24 = vpop.f32.mrb[169].mxu0  ;;  %v3871_v57 = vpack.c.bf16 %v3815_v16, %v3814_v14  ;;  %v3501_v18 = vld [vmem:[%s10141_s30 + $0xa8] sm:$0xff]  ;;  %4923 = vmatprep.subr.bf16.mxu0 %v8388_v15 }
 0x4e4   : > { %v8470_v9 = vpop.eup %8469  ;;  %8475 = vpow2.f32 %v3646_v17  ;;  %v3264_v42 = vadd.f32 %v3263_v24, %v10393_v40  ;;  %v3265_v28 = vpop.f32.mrb[170].mxu0  ;;  %4924 = vmatpush1.bf16.msra.mxu0 %v8386_v8 }
 0x4e5   : > { %7099 = vst [vmem:[%s10403_s22 + $0x140] sm:$0xff] %v10595_v23  ;;  %v10602_v4 = vadd.f32 %v3265_v28, %v10388_v38  ;;  %v3267_v31 = vpop.f32.mrb[171].mxu0  ;;  %v3752_v29 = vmul.f32 %v8470_v9, %v3496_v21 }
 0x4e6   : > { %4095 = vmatmul.mubr.bf16.gmra.mrb[156].mxu1 %v3871_v57  ;;  %v8472_v33 = vpop.eup %8471  ;;  %v3564_v34 = vmul.f32 0.5, %v3264_v42  ;;  %7100 = vst [vmem:[%s10403_s22 + $0x148] sm:$0xff] %v3264_v42  ;;  %v3268_v36 = vadd.f32 %v3267_v31, %v10393_v40 }
 0x4e7   : > { %4104 = vmatprep.mubr.bf16.mxu1 %v9622_v56  ;;  %7101 = vst [vmem:[%s10403_s22 + $0x150] sm:$0xff] %v10602_v4  ;;  %v3753_v37 = vmul.f32 %v8472_v33, %v3497_v30  ;;  %v3816_v39 = vadd.f32 %v3752_v29, %v10557_v35 }
 0x4e8   : > { %v3648_v25 = vmul.f32 1.442695, %v3564_v34  ;;  %v3565_v41 = vmul.f32 0.5, %v3268_v36  ;;  %7102 = vst [vmem:[%s10403_s22 + $0x158] sm:$0xff] %v3268_v36  ;;  %v3502_v34 = vld [vmem:[%s10141_s30 + $0xb0] sm:$0xff] }
 0x4e9   : > { %v3817_v43 = vadd.f32 %v3753_v37, %v10564_v58 }
 0x4ea   : > { %8477 = vpow2.f32 %v3648_v25  ;;  %v3650_v44 = vmul.f32 1.442695, %v3565_v41  ;;  %v3271_v47 = vpop.f32.mrb[172].mxu0 }
 0x4eb   : > { %v10614_v50 = vadd.f32 %v3271_v47, %v10388_v38  ;;  %v3273_v51 = vpop.f32.mrb[173].mxu0  ;;  %v3872_v53 = vpack.c.bf16 %v3817_v43, %v3816_v39  ;;  %v3503_v43 = vld [vmem:[%s10141_s30 + $0xb8] sm:$0xff] }
 0x4ec   : > { %v8474_v54 = vpop.eup %8473  ;;  %8479 = vpow2.f32 %v3650_v44  ;;  %v3274_v35 = vadd.f32 %v3273_v51, %v10393_v40  ;;  %v3275_v55 = vpop.f32.mrb[174].mxu0  ;;  %v8391_v51 = vld [vmem:[#allocation22 + $0x14] ss:$8 sps:$4 sm:$0xff]  }
 0x4ed   : > { %7103 = vst [vmem:[%s10403_s22 + $0x160] sm:$0xff] %v10614_v50  ;;  %v10621_v58 = vadd.f32 %v3275_v55, %v10388_v38  ;;  %v3277_v59 = vpop.f32.mrb[175].mxu0  ;;  %v3754_v60 = vmul.f32 %v8474_v54, %v3498_v48  ;;  %v8389_v48 = vld [vmem:[#allocation22 + $0x10] ss:$8 sps:$4 sm:$0xff]   ;;  %5812 = vmatprep.subr.bf16.mxu1 %v8391_v51 }
 0x4ee   : > { %4105 = vmatmul.mubr.bf16.gmra.mrb[160].mxu1 %v3872_v53  ;;  %v8476_v63 = vpop.eup %8475  ;;  %v3566_v0 = vmul.f32 0.5, %v3274_v35  ;;  %7104 = vst [vmem:[%s10403_s22 + $0x168] sm:$0xff] %v3274_v35  ;;  %v3278_v49 = vadd.f32 %v3277_v59, %v10393_v40 }
 0x4ef   : > { %4114 = vmatprep.mubr.bf16.mxu1 %v9622_v56  ;;  %7105 = vst [vmem:[%s10403_s22 + $0x170] sm:$0xff] %v10621_v58  ;;  %v3755_v19 = vmul.f32 %v8476_v63, %v3499_v46  ;;  %v3818_v52 = vadd.f32 %v3754_v60, %v10576_v45  ;;  %5813 = vmatpush1.bf16.msra.mxu1 %v8389_v48  ;;  %v8397_v48 = vld [vmem:[#allocation22 + $0x24] ss:$8 sps:$4 sm:$0xff]  }
 0x4f0   : > { %v3652_v1 = vmul.f32 1.442695, %v3566_v0  ;;  %v3567_v2 = vmul.f32 0.5, %v3278_v49  ;;  %7106 = vst [vmem:[%s10403_s22 + $0x178] sm:$0xff] %v3278_v49  ;;  %v3504_v0 = vld [vmem:[%s10141_s30 + $0xc0] sm:$0xff]  ;;  %5814 = vmatprep.subr.bf16.mxu1 %v8397_v48 }
 0x4f1   : > { %v3819_v3 = vadd.f32 %v3755_v19, %v10583_v26  ;;  %v8392_v49 = vld [vmem:[#allocation19 + $0xf0] ss:$8 sps:$4 sm:$0xff]  }
 0x4f2   : > { %8481 = vpow2.f32 %v3652_v1  ;;  %v3654_v5 = vmul.f32 1.442695, %v3567_v2  ;;  %v3281_v6 = vpop.f32.mrb[176].mxu0  ;;  %v8394_v1 = vld [vmem:[#allocation19 + $0xf4] ss:$8 sps:$4 sm:$0xff]  }
 0x4f3   : > { %v10633_v12 = vadd.f32 %v3281_v6, %v10388_v38  ;;  %v3283_v14 = vpop.f32.mrb[177].mxu0  ;;  %v3873_v45 = vpack.c.bf16 %v3819_v3, %v3818_v52  ;;  %v3505_v6 = vld [vmem:[%s10141_s30 + $0xc8] sm:$0xff]  ;;  %4925 = vmatprep.subr.bf16.mxu0 %v8394_v1 }
 0x4f4   : > { %v8478_v62 = vpop.eup %8477  ;;  %8483 = vpow2.f32 %v3654_v5  ;;  %v3284_v16 = vadd.f32 %v3283_v14, %v10393_v40  ;;  %v3285_v17 = vpop.f32.mrb[178].mxu0  ;;  %4926 = vmatpush1.bf16.msra.mxu0 %v8392_v49 }
 0x4f5   : > { %7107 = vst [vmem:[%s10403_s22 + $0x180] sm:$0xff] %v10633_v12  ;;  %v10640_v26 = vadd.f32 %v3285_v17, %v10388_v38  ;;  %v3287_v21 = vpop.f32.mrb[179].mxu0  ;;  %v3756_v22 = vmul.f32 %v8478_v62, %v3500_v7 }
 0x4f6   : > { %4115 = vmatmul.mubr.bf16.gmra.mrb[164].mxu1 %v3873_v45  ;;  %v8480_v24 = vpop.eup %8479  ;;  %v3568_v57 = vmul.f32 0.5, %v3284_v16  ;;  %7108 = vst [vmem:[%s10403_s22 + $0x188] sm:$0xff] %v3284_v16  ;;  %v3288_v27 = vadd.f32 %v3287_v21, %v10393_v40 }
 0x4f7   : > { %4124 = vmatprep.mubr.bf16.mxu1 %v9622_v56  ;;  %7109 = vst [vmem:[%s10403_s22 + $0x190] sm:$0xff] %v10640_v26  ;;  %v3757_v9 = vmul.f32 %v8480_v24, %v3501_v18  ;;  %v3820_v42 = vadd.f32 %v3756_v22, %v10595_v23 }
 0x4f8   : > { %v3656_v28 = vmul.f32 1.442695, %v3568_v57  ;;  %v3569_v30 = vmul.f32 0.5, %v3288_v27  ;;  %7110 = vst [vmem:[%s10403_s22 + $0x198] sm:$0xff] %v3288_v27  ;;  %v3506_v57 = vld [vmem:[%s10141_s30 + $0xd0] sm:$0xff] }
 0x4f9   : > { %v3821_v31 = vadd.f32 %v3757_v9, %v10602_v4 }
 0x4fa   : > { %8485 = vpow2.f32 %v3656_v28  ;;  %v3658_v29 = vmul.f32 1.442695, %v3569_v30  ;;  %v3291_v33 = vpop.f32.mrb[180].mxu0 }
 0x4fb   : > { %v10652_v36 = vadd.f32 %v3291_v33, %v10388_v38  ;;  %v3293_v37 = vpop.f32.mrb[181].mxu0  ;;  %v3874_v39 = vpack.c.bf16 %v3821_v31, %v3820_v42  ;;  %v3507_v31 = vld [vmem:[%s10141_s30 + $0xd8] sm:$0xff] }
 0x4fc   : > { %v8482_v25 = vpop.eup %8481  ;;  %8487 = vpow2.f32 %v3658_v29  ;;  %v3294_v23 = vadd.f32 %v3293_v37, %v10393_v40  ;;  %v3295_v41 = vpop.f32.mrb[182].mxu0 }
 0x4fd   : > { %7111 = vst [vmem:[%s10403_s22 + $0x1a0] sm:$0xff] %v10652_v36  ;;  %v10659_v4 = vadd.f32 %v3295_v41, %v10388_v38  ;;  %v3297_v44 = vpop.f32.mrb[183].mxu0  ;;  %v3758_v47 = vmul.f32 %v8482_v25, %v3502_v34 }
 0x4fe   : > { %4125 = vmatmul.mubr.bf16.gmra.mrb[168].mxu1 %v3874_v39  ;;  %v8484_v53 = vpop.eup %8483  ;;  %v3570_v54 = vmul.f32 0.5, %v3294_v23  ;;  %7112 = vst [vmem:[%s10403_s22 + $0x1a8] sm:$0xff] %v3294_v23  ;;  %v3298_v35 = vadd.f32 %v3297_v44, %v10393_v40 }
 0x4ff   : > { %4134 = vmatprep.mubr.bf16.mxu1 %v9622_v56  ;;  %7113 = vst [vmem:[%s10403_s22 + $0x1b0] sm:$0xff] %v10659_v4  ;;  %v3759_v55 = vmul.f32 %v8484_v53, %v3503_v43  ;;  %v3822_v46 = vadd.f32 %v3758_v47, %v10614_v50  ;;  %v8395_v47 = vld [vmem:[#allocation22 + $0x20] ss:$8 sps:$4 sm:$0xff]  }
 0x500   : > { %v3660_v59 = vmul.f32 1.442695, %v3570_v54  ;;  %v3571_v60 = vmul.f32 0.5, %v3298_v35  ;;  %7114 = vst [vmem:[%s10403_s22 + $0x1b8] sm:$0xff] %v3298_v35  ;;  %v3508_v54 = vld [vmem:[%s10141_s30 + $0xe0] sm:$0xff]  ;;  %5815 = vmatpush1.bf16.msra.mxu1 %v8395_v47 }
 0x501   : > { %v3823_v61 = vadd.f32 %v3759_v55, %v10621_v58 }
 0x502   : > { %8489 = vpow2.f32 %v3660_v59  ;;  %v3662_v11 = vmul.f32 1.442695, %v3571_v60  ;;  %v3301_v63 = vpop.f32.mrb[184].mxu0  ;;  %v3509_v60 = vld [vmem:[%s10141_s30 + $0xe8] sm:$0xff] }
 0x503   : > { %v10671_v19 = vadd.f32 %v3301_v63, %v10388_v38  ;;  %v3303_v52 = vpop.f32.mrb[185].mxu0  ;;  %v3875_v50 = vpack.c.bf16 %v3823_v61, %v3822_v46 }
 0x504   : > { %v8486_v2 = vpop.eup %8485  ;;  %8491 = vpow2.f32 %v3662_v11  ;;  %v3304_v3 = vadd.f32 %v3303_v52, %v10393_v40  ;;  %v3305_v5 = vpop.f32.mrb[186].mxu0 }
 0x505   : > { %7115 = vst [vmem:[%s10403_s22 + $0x1c0] sm:$0xff] %v10671_v19  ;;  %v10678_v58 = vadd.f32 %v3305_v5, %v10388_v38  ;;  %v3307_v7 = vpop.f32.mrb[187].mxu0  ;;  %v3760_v8 = vmul.f32 %v8486_v2, %v3504_v0 }
 0x506   : > { %4135 = vmatmul.mubr.bf16.gmra.mrb[172].mxu1 %v3875_v50  ;;  %v8488_v14 = vpop.eup %8487  ;;  %v3572_v45 = vmul.f32 0.5, %v3304_v3  ;;  %7116 = vst [vmem:[%s10403_s22 + $0x1c8] sm:$0xff] %v3304_v3  ;;  %v3308_v15 = vadd.f32 %v3307_v7, %v10393_v40 }
 0x507   : > { %4144 = vmatprep.mubr.bf16.mxu1 %v9622_v56  ;;  %7117 = vst [vmem:[%s10403_s22 + $0x1d0] sm:$0xff] %v10678_v58  ;;  %v3761_v62 = vmul.f32 %v8488_v14, %v3505_v6  ;;  %v3824_v16 = vadd.f32 %v3760_v8, %v10633_v12  ;;  %v3510_v8 = vld [vmem:[%s10141_s30 + $0xf0] sm:$0xff] }
 0x508   : > { %v3664_v17 = vmul.f32 1.442695, %v3572_v45  ;;  %v3573_v18 = vmul.f32 0.5, %v3308_v15  ;;  %7118 = vst [vmem:[%s10403_s22 + $0x1d8] sm:$0xff] %v3308_v15 }
 0x509   : > { %v3825_v21 = vadd.f32 %v3761_v62, %v10640_v26 }
 0x50a   : > { %8493 = vpow2.f32 %v3664_v17  ;;  %v3666_v22 = vmul.f32 1.442695, %v3573_v18  ;;  %v3311_v24 = vpop.f32.mrb[188].mxu0  ;;  %v3511_v17 = vld [vmem:[%s10141_s30 + $0xf8] sm:$0xff] }
 0x50b   : > { %v10690_v27 = vadd.f32 %v3311_v24, %v10388_v38  ;;  %v3313_v9 = vpop.f32.mrb[189].mxu0  ;;  %v3876_v42 = vpack.c.bf16 %v3825_v21, %v3824_v16 }
 0x50c   : > { %v8490_v28 = vpop.eup %8489  ;;  %8495 = vpow2.f32 %v3666_v22  ;;  %v3314_v12 = vadd.f32 %v3313_v9, %v10393_v40  ;;  %v3315_v30 = vpop.f32.mrb[190].mxu0 }
 0x50d   : > { %7119 = vst [vmem:[%s10403_s22 + $0x1e0] sm:$0xff] %v10690_v27  ;;  %v10697_v26 = vadd.f32 %v3315_v30, %v10388_v38  ;;  %v3317_v29 = vpop.f32.mrb[191].mxu0  ;;  %v3762_v33 = vmul.f32 %v8490_v28, %v3506_v57 }
 0x50e   : > { %4145 = vmatmul.mubr.bf16.gmra.mrb[176].mxu1 %v3876_v42  ;;  %v8492_v34 = vpop.eup %8491  ;;  %v3574_v37 = vmul.f32 0.5, %v3314_v12  ;;  %7120 = vst [vmem:[%s10403_s22 + $0x1e8] sm:$0xff] %v3314_v12  ;;  %v3318_v39 = vadd.f32 %v3317_v29, %v10393_v40  ;;  %v8400_v29 = vld [vmem:[#allocation22 + $0x34] ss:$8 sps:$4 sm:$0xff]  }
 0x50f   : > { %4154 = vmatprep.mubr.bf16.mxu1 %v9622_v56  ;;  %7121 = vst [vmem:[%s10403_s22 + $0x1f0] sm:$0xff] %v10697_v26  ;;  %v3763_v25 = vmul.f32 %v8492_v34, %v3507_v31  ;;  %v3826_v23 = vadd.f32 %v3762_v33, %v10652_v36  ;;  %v8398_v31 = vld [vmem:[#allocation22 + $0x30] ss:$8 sps:$4 sm:$0xff]   ;;  %5816 = vmatprep.subr.bf16.mxu1 %v8400_v29 }
 0x510   : > { %v3668_v41 = vmul.f32 1.442695, %v3574_v37  ;;  %v3575_v43 = vmul.f32 0.5, %v3318_v39  ;;  %7122 = vst [vmem:[%s10403_s22 + $0x1f8] sm:$0xff] %v3318_v39  ;;  %v3512_v37 = vld [vmem:[%s10141_s30 + $0x100] sm:$0xff]  ;;  %5817 = vmatpush1.bf16.msra.mxu1 %v8398_v31 }
 0x511   : > { %v3827_v44 = vadd.f32 %v3763_v25, %v10659_v4 }
 0x512   : > { %8497 = vpow2.f32 %v3668_v41  ;;  %v3670_v51 = vmul.f32 1.442695, %v3575_v43  ;;  %v3321_v53 = vpop.f32.mrb[192].mxu0  ;;  %v3513_v43 = vld [vmem:[%s10141_s30 + $0x108] sm:$0xff] }
 0x513   : > { %v10709_v35 = vadd.f32 %v3321_v53, %v10388_v38  ;;  %v3323_v55 = vpop.f32.mrb[193].mxu0  ;;  %v3877_v46 = vpack.c.bf16 %v3827_v44, %v3826_v23 }
 0x514   : > { %v8494_v36 = vpop.eup %8493  ;;  %8499 = vpow2.f32 %v3670_v51  ;;  %v3324_v59 = vadd.f32 %v3323_v55, %v10393_v40  ;;  %v3325_v4 = vpop.f32.mrb[194].mxu0 }
 0x515   : > { %7123 = vst [vmem:[%s10403_s22 + $0x200] sm:$0xff] %v10709_v35  ;;  %v10716_v61 = vadd.f32 %v3325_v4, %v10388_v38  ;;  %v3327_v11 = vpop.f32.mrb[195].mxu0  ;;  %v3764_v63 = vmul.f32 %v8494_v36, %v3508_v54 }
 0x516   : > { %4155 = vmatmul.mubr.bf16.gmra.mrb[180].mxu1 %v3877_v46  ;;  %v8496_v0 = vpop.eup %8495  ;;  %v3576_v49 = vmul.f32 0.5, %v3324_v59  ;;  %7124 = vst [vmem:[%s10403_s22 + $0x208] sm:$0xff] %v3324_v59  ;;  %v3328_v52 = vadd.f32 %v3327_v11, %v10393_v40 }
 0x517   : > { %4164 = vmatprep.mubr.bf16.mxu1 %v9622_v56  ;;  %7125 = vst [vmem:[%s10403_s22 + $0x210] sm:$0xff] %v10716_v61  ;;  %v3765_v50 = vmul.f32 %v8496_v0, %v3509_v60  ;;  %v3828_v1 = vadd.f32 %v3764_v63, %v10671_v19  ;;  %v3514_v63 = vld [vmem:[%s10141_s30 + $0x110] sm:$0xff] }
 0x518   : > { %v3672_v2 = vmul.f32 1.442695, %v3576_v49  ;;  %v3577_v3 = vmul.f32 0.5, %v3328_v52  ;;  %7126 = vst [vmem:[%s10403_s22 + $0x218] sm:$0xff] %v3328_v52 }
 0x519   : > { %v3829_v5 = vadd.f32 %v3765_v50, %v10678_v58 }
 0x51a   : > { %8501 = vpow2.f32 %v3672_v2  ;;  %v3674_v6 = vmul.f32 1.442695, %v3577_v3  ;;  %v3331_v7 = vpop.f32.mrb[196].mxu0  ;;  %v3515_v2 = vld [vmem:[%s10141_s30 + $0x118] sm:$0xff] }
 0x51b   : > { %v10728_v14 = vadd.f32 %v3331_v7, %v10388_v38  ;;  %v3333_v45 = vpop.f32.mrb[197].mxu0  ;;  %v3878_v15 = vpack.c.bf16 %v3829_v5, %v3828_v1 }
 0x51c   : > { %v8498_v62 = vpop.eup %8497  ;;  %8503 = vpow2.f32 %v3674_v6  ;;  %v3334_v19 = vadd.f32 %v3333_v45, %v10393_v40  ;;  %v3335_v16 = vpop.f32.mrb[198].mxu0 }
 0x51d   : > { %7127 = vst [vmem:[%s10403_s22 + $0x220] sm:$0xff] %v10728_v14  ;;  %v10735_v58 = vadd.f32 %v3335_v16, %v10388_v38  ;;  %v3337_v18 = vpop.f32.mrb[199].mxu0  ;;  %v3766_v21 = vmul.f32 %v8498_v62, %v3510_v8 }
 0x51e   : > { %4165 = vmatmul.mubr.bf16.gmra.mrb[184].mxu1 %v3878_v15  ;;  %v8500_v22 = vpop.eup %8499  ;;  %v3578_v24 = vmul.f32 0.5, %v3334_v19  ;;  %7128 = vst [vmem:[%s10403_s22 + $0x228] sm:$0xff] %v3334_v19  ;;  %v3338_v57 = vadd.f32 %v3337_v18, %v10393_v40  ;;  %v8403_v18 = vld [vmem:[#allocation22 + $0x44] ss:$8 sps:$4 sm:$0xff]  }
 0x51f   : > { %4174 = vmatprep.mubr.bf16.mxu1 %v9622_v56  ;;  %7129 = vst [vmem:[%s10403_s22 + $0x230] sm:$0xff] %v10735_v58  ;;  %v3767_v9 = vmul.f32 %v8500_v22, %v3511_v17  ;;  %v3830_v42 = vadd.f32 %v3766_v21, %v10690_v27  ;;  %v8401_v17 = vld [vmem:[#allocation22 + $0x40] ss:$8 sps:$4 sm:$0xff]   ;;  %5818 = vmatprep.subr.bf16.mxu1 %v8403_v18 }
 0x520   : > { %v3676_v28 = vmul.f32 1.442695, %v3578_v24  ;;  %v3579_v12 = vmul.f32 0.5, %v3338_v57  ;;  %7130 = vst [vmem:[%s10403_s22 + $0x238] sm:$0xff] %v3338_v57  ;;  %v3516_v24 = vld [vmem:[%s10141_s30 + $0x120] sm:$0xff]  ;;  %5819 = vmatpush1.bf16.msra.mxu1 %v8401_v17 }
 0x521   : > { %v3831_v30 = vadd.f32 %v3767_v9, %v10697_v26 }
 0x522   : > { %8505 = vpow2.f32 %v3676_v28  ;;  %v3678_v33 = vmul.f32 1.442695, %v3579_v12  ;;  %v3341_v34 = vpop.f32.mrb[200].mxu0  ;;  %v3517_v12 = vld [vmem:[%s10141_s30 + $0x128] sm:$0xff] }
 0x523   : > { %v10747_v39 = vadd.f32 %v3341_v34, %v10388_v38  ;;  %v3343_v25 = vpop.f32.mrb[201].mxu0  ;;  %v3879_v23 = vpack.c.bf16 %v3831_v30, %v3830_v42 }
 0x524   : > { %v8502_v27 = vpop.eup %8501  ;;  %8507 = vpow2.f32 %v3678_v33  ;;  %v3344_v41 = vadd.f32 %v3343_v25, %v10393_v40  ;;  %v3345_v26 = vpop.f32.mrb[202].mxu0 }
 0x525   : > { %7131 = vst [vmem:[%s10403_s22 + $0x240] sm:$0xff] %v10747_v39  ;;  %v10754_v44 = vadd.f32 %v3345_v26, %v10388_v38  ;;  %v3347_v47 = vpop.f32.mrb[203].mxu0  ;;  %v3768_v48 = vmul.f32 %v8502_v27, %v3512_v37 }
 0x526   : > { %4175 = vmatmul.mubr.bf16.gmra.mrb[188].mxu1 %v3879_v23  ;;  %v8504_v51 = vpop.eup %8503  ;;  %v3580_v53 = vmul.f32 0.5, %v3344_v41  ;;  %7132 = vst [vmem:[%s10403_s22 + $0x248] sm:$0xff] %v3344_v41  ;;  %v3348_v54 = vadd.f32 %v3347_v47, %v10393_v40 }
 0x527   : > { %4184 = vmatprep.mubr.bf16.mxu1 %v9622_v56  ;;  %7133 = vst [vmem:[%s10403_s22 + $0x250] sm:$0xff] %v10754_v44  ;;  %v3769_v55 = vmul.f32 %v8504_v51, %v3513_v43  ;;  %v3832_v46 = vadd.f32 %v3768_v48, %v10709_v35  ;;  %v3518_v48 = vld [vmem:[%s10141_s30 + $0x130] sm:$0xff] }
 0x528   : > { %v3680_v36 = vmul.f32 1.442695, %v3580_v53  ;;  %v3581_v59 = vmul.f32 0.5, %v3348_v54  ;;  %7134 = vst [vmem:[%s10403_s22 + $0x258] sm:$0xff] %v3348_v54 }
 0x529   : > { %v3833_v4 = vadd.f32 %v3769_v55, %v10716_v61 }
 0x52a   : > { %8509 = vpow2.f32 %v3680_v36  ;;  %v3682_v60 = vmul.f32 1.442695, %v3581_v59  ;;  %v3351_v11 = vpop.f32.mrb[204].mxu0  ;;  %v3519_v36 = vld [vmem:[%s10141_s30 + $0x138] sm:$0xff] }
 0x52b   : > { %v10766_v0 = vadd.f32 %v3351_v11, %v10388_v38  ;;  %v3353_v49 = vpop.f32.mrb[205].mxu0  ;;  %v3880_v52 = vpack.c.bf16 %v3833_v4, %v3832_v46 }
 0x52c   : > { %v8506_v50 = vpop.eup %8505  ;;  %8511 = vpow2.f32 %v3682_v60  ;;  %v3354_v35 = vadd.f32 %v3353_v49, %v10393_v40  ;;  %v3355_v1 = vpop.f32.mrb[206].mxu0 }
 0x52d   : > { %7135 = vst [vmem:[%s10403_s22 + $0x260] sm:$0xff] %v10766_v0  ;;  %v10773_v61 = vadd.f32 %v3355_v1, %v10388_v38  ;;  %v3357_v3 = vpop.f32.mrb[207].mxu0  ;;  %v3770_v5 = vmul.f32 %v8506_v50, %v3514_v63 }
 0x52e   : > { %4185 = vmatmul.mubr.bf16.gmra.mrb[192].mxu1 %v3880_v52  ;;  %v8508_v6 = vpop.eup %8507  ;;  %v3582_v7 = vmul.f32 0.5, %v3354_v35  ;;  %7136 = vst [vmem:[%s10403_s22 + $0x268] sm:$0xff] %v3354_v35  ;;  %v3358_v8 = vadd.f32 %v3357_v3, %v10393_v40  ;;  %v8406_v3 = vld [vmem:[#allocation22 + $0x54] ss:$8 sps:$4 sm:$0xff]  }
 0x52f   : > { %4194 = vmatprep.mubr.bf16.mxu1 %v9622_v56  ;;  %7137 = vst [vmem:[%s10403_s22 + $0x270] sm:$0xff] %v10773_v61  ;;  %v3771_v45 = vmul.f32 %v8508_v6, %v3515_v2  ;;  %v3834_v15 = vadd.f32 %v3770_v5, %v10728_v14  ;;  %v8404_v2 = vld [vmem:[#allocation22 + $0x50] ss:$8 sps:$4 sm:$0xff]   ;;  %5820 = vmatprep.subr.bf16.mxu1 %v8406_v3 }
 0x530   : > { %v3684_v62 = vmul.f32 1.442695, %v3582_v7  ;;  %v3583_v19 = vmul.f32 0.5, %v3358_v8  ;;  %7138 = vst [vmem:[%s10403_s22 + $0x278] sm:$0xff] %v3358_v8  ;;  %v3520_v7 = vld [vmem:[%s10141_s30 + $0x140] sm:$0xff]  ;;  %5821 = vmatpush1.bf16.msra.mxu1 %v8404_v2 }
 0x531   : > { %v3835_v16 = vadd.f32 %v3771_v45, %v10735_v58 }
 0x532   : > { %8513 = vpow2.f32 %v3684_v62  ;;  %v3686_v21 = vmul.f32 1.442695, %v3583_v19  ;;  %v3361_v22 = vpop.f32.mrb[208].mxu0  ;;  %v3521_v19 = vld [vmem:[%s10141_s30 + $0x148] sm:$0xff] }
 0x533   : > { %v10785_v57 = vadd.f32 %v3361_v22, %v10388_v38  ;;  %v3363_v9 = vpop.f32.mrb[209].mxu0  ;;  %v3881_v42 = vpack.c.bf16 %v3835_v16, %v3834_v15 }
 0x534   : > { %v8510_v14 = vpop.eup %8509  ;;  %8515 = vpow2.f32 %v3686_v21  ;;  %v3364_v28 = vadd.f32 %v3363_v9, %v10393_v40  ;;  %v3365_v58 = vpop.f32.mrb[210].mxu0 }
 0x535   : > { %7139 = vst [vmem:[%s10403_s22 + $0x280] sm:$0xff] %v10785_v57  ;;  %v10792_v30 = vadd.f32 %v3365_v58, %v10388_v38  ;;  %v3367_v31 = vpop.f32.mrb[211].mxu0  ;;  %v3772_v29 = vmul.f32 %v8510_v14, %v3516_v24 }
 0x536   : > { %4195 = vmatmul.mubr.bf16.gmra.mrb[196].mxu1 %v3881_v42  ;;  %v8512_v33 = vpop.eup %8511  ;;  %v3584_v34 = vmul.f32 0.5, %v3364_v28  ;;  %7140 = vst [vmem:[%s10403_s22 + $0x288] sm:$0xff] %v3364_v28  ;;  %v3368_v37 = vadd.f32 %v3367_v31, %v10393_v40 }
 0x537   : > { %4204 = vmatprep.mubr.bf16.mxu1 %v9622_v56  ;;  %7141 = vst [vmem:[%s10403_s22 + $0x290] sm:$0xff] %v10792_v30  ;;  %v3773_v25 = vmul.f32 %v8512_v33, %v3517_v12  ;;  %v3836_v23 = vadd.f32 %v3772_v29, %v10747_v39  ;;  %v3522_v29 = vld [vmem:[%s10141_s30 + $0x150] sm:$0xff] }
 0x538   : > { %v3688_v27 = vmul.f32 1.442695, %v3584_v34  ;;  %v3585_v41 = vmul.f32 0.5, %v3368_v37  ;;  %7142 = vst [vmem:[%s10403_s22 + $0x298] sm:$0xff] %v3368_v37 }
 0x539   : > { %v3837_v26 = vadd.f32 %v3773_v25, %v10754_v44 }
 0x53a   : > { %8517 = vpow2.f32 %v3688_v27  ;;  %v3690_v43 = vmul.f32 1.442695, %v3585_v41  ;;  %v3371_v47 = vpop.f32.mrb[212].mxu0  ;;  %v3523_v27 = vld [vmem:[%s10141_s30 + $0x158] sm:$0xff] }
 0x53b   : > { %v10804_v51 = vadd.f32 %v3371_v47, %v10388_v38  ;;  %v3373_v53 = vpop.f32.mrb[213].mxu0  ;;  %v3882_v54 = vpack.c.bf16 %v3837_v26, %v3836_v23 }
 0x53c   : > { %v8514_v55 = vpop.eup %8513  ;;  %8519 = vpow2.f32 %v3690_v43  ;;  %v3374_v39 = vadd.f32 %v3373_v53, %v10393_v40  ;;  %v3375_v46 = vpop.f32.mrb[214].mxu0 }
 0x53d   : > { %7143 = vst [vmem:[%s10403_s22 + $0x2a0] sm:$0xff] %v10804_v51  ;;  %v10811_v44 = vadd.f32 %v3375_v46, %v10388_v38  ;;  %v3377_v59 = vpop.f32.mrb[215].mxu0  ;;  %v3774_v4 = vmul.f32 %v8514_v55, %v3518_v48 }
 0x53e   : > { %4205 = vmatmul.mubr.bf16.gmra.mrb[200].mxu1 %v3882_v54  ;;  %v8516_v60 = vpop.eup %8515  ;;  %v3586_v11 = vmul.f32 0.5, %v3374_v39  ;;  %7144 = vst [vmem:[%s10403_s22 + $0x2a8] sm:$0xff] %v3374_v39  ;;  %v3378_v63 = vadd.f32 %v3377_v59, %v10393_v40  ;;  %v8409_v59 = vld [vmem:[#allocation22 + $0x64] ss:$8 sps:$4 sm:$0xff]  }
 0x53f   : > { %4214 = vmatprep.mubr.bf16.mxu1 %v9622_v56  ;;  %7145 = vst [vmem:[%s10403_s22 + $0x2b0] sm:$0xff] %v10811_v44  ;;  %v3775_v49 = vmul.f32 %v8516_v60, %v3519_v36  ;;  %v3838_v52 = vadd.f32 %v3774_v4, %v10766_v0  ;;  %v8407_v36 = vld [vmem:[#allocation22 + $0x60] ss:$8 sps:$4 sm:$0xff]   ;;  %5822 = vmatprep.subr.bf16.mxu1 %v8409_v59 }
 0x540   : > { %v3692_v50 = vmul.f32 1.442695, %v3586_v11  ;;  %v3587_v35 = vmul.f32 0.5, %v3378_v63  ;;  %7146 = vst [vmem:[%s10403_s22 + $0x2b8] sm:$0xff] %v3378_v63  ;;  %v3524_v11 = vld [vmem:[%s10141_s30 + $0x160] sm:$0xff]  ;;  %5823 = vmatpush1.bf16.msra.mxu1 %v8407_v36 }
 0x541   : > { %v3839_v1 = vadd.f32 %v3775_v49, %v10773_v61 }
 0x542   : > { %8521 = vpow2.f32 %v3692_v50  ;;  %v3694_v5 = vmul.f32 1.442695, %v3587_v35  ;;  %v3381_v6 = vpop.f32.mrb[216].mxu0  ;;  %v3525_v35 = vld [vmem:[%s10141_s30 + $0x168] sm:$0xff] }
 0x543   : > { %v10823_v8 = vadd.f32 %v3381_v6, %v10388_v38  ;;  %v3383_v45 = vpop.f32.mrb[217].mxu0  ;;  %v3883_v15 = vpack.c.bf16 %v3839_v1, %v3838_v52 }
 0x544   : > { %v8518_v0 = vpop.eup %8517  ;;  %8523 = vpow2.f32 %v3694_v5  ;;  %v3384_v62 = vadd.f32 %v3383_v45, %v10393_v40  ;;  %v3385_v61 = vpop.f32.mrb[218].mxu0 }
 0x545   : > { %7147 = vst [vmem:[%s10403_s22 + $0x2c0] sm:$0xff] %v10823_v8  ;;  %v10830_v16 = vadd.f32 %v3385_v61, %v10388_v38  ;;  %v3387_v17 = vpop.f32.mrb[219].mxu0  ;;  %v3776_v18 = vmul.f32 %v8518_v0, %v3520_v7 }
 0x546   : > { %4215 = vmatmul.mubr.bf16.gmra.mrb[204].mxu1 %v3883_v15  ;;  %v8520_v21 = vpop.eup %8519  ;;  %v3588_v22 = vmul.f32 0.5, %v3384_v62  ;;  %7148 = vst [vmem:[%s10403_s22 + $0x2c8] sm:$0xff] %v3384_v62  ;;  %v3388_v24 = vadd.f32 %v3387_v17, %v10393_v40 }
 0x547   : > { %4224 = vmatprep.mubr.bf16.mxu1 %v9622_v56  ;;  %7149 = vst [vmem:[%s10403_s22 + $0x2d0] sm:$0xff] %v10830_v16  ;;  %v3777_v9 = vmul.f32 %v8520_v21, %v3521_v19  ;;  %v3840_v42 = vadd.f32 %v3776_v18, %v10785_v57  ;;  %v3526_v18 = vld [vmem:[%s10141_s30 + $0x170] sm:$0xff] }
 0x548   : > { %v3696_v14 = vmul.f32 1.442695, %v3588_v22  ;;  %v3589_v28 = vmul.f32 0.5, %v3388_v24  ;;  %7150 = vst [vmem:[%s10403_s22 + $0x2d8] sm:$0xff] %v3388_v24 }
 0x549   : > { %v3841_v58 = vadd.f32 %v3777_v9, %v10792_v30 }
 0x54a   : > { %8525 = vpow2.f32 %v3696_v14  ;;  %v3698_v12 = vmul.f32 1.442695, %v3589_v28  ;;  %v3391_v31 = vpop.f32.mrb[220].mxu0  ;;  %v3527_v14 = vld [vmem:[%s10141_s30 + $0x178] sm:$0xff] }
 0x54b   : > { %v10842_v33 = vadd.f32 %v3391_v31, %v10388_v38  ;;  %v3393_v34 = vpop.f32.mrb[221].mxu0  ;;  %v3884_v37 = vpack.c.bf16 %v3841_v58, %v3840_v42 }
 0x54c   : > { %v8522_v25 = vpop.eup %8521  ;;  %8527 = vpow2.f32 %v3698_v12  ;;  %v3394_v57 = vadd.f32 %v3393_v34, %v10393_v40  ;;  %v3395_v23 = vpop.f32.mrb[222].mxu0 }
 0x54d   : > { %7151 = vst [vmem:[%s10403_s22 + $0x2e0] sm:$0xff] %v10842_v33  ;;  %v10849_v30 = vadd.f32 %v3395_v23, %v10388_v38  ;;  %v3397_v41 = vpop.f32.mrb[223].mxu0  ;;  %v3778_v26 = vmul.f32 %v8522_v25, %v3522_v29 }
 0x54e   : > { %4225 = vmatmul.mubr.bf16.gmra.mrb[208].mxu1 %v3884_v37  ;;  %v8524_v43 = vpop.eup %8523  ;;  %v3590_v47 = vmul.f32 0.5, %v3394_v57  ;;  %7152 = vst [vmem:[%s10403_s22 + $0x2e8] sm:$0xff] %v3394_v57  ;;  %v3398_v48 = vadd.f32 %v3397_v41, %v10393_v40  ;;  %v8412_v41 = vld [vmem:[#allocation22 + $0x74] ss:$8 sps:$4 sm:$0xff]  }
 0x54f   : > { %4234 = vmatprep.mubr.bf16.mxu1 %v9622_v56  ;;  %7153 = vst [vmem:[%s10403_s22 + $0x2f0] sm:$0xff] %v10849_v30  ;;  %v3779_v53 = vmul.f32 %v8524_v43, %v3523_v27  ;;  %v3842_v54 = vadd.f32 %v3778_v26, %v10804_v51  ;;  %v8410_v27 = vld [vmem:[#allocation22 + $0x70] ss:$8 sps:$4 sm:$0xff]   ;;  %5824 = vmatprep.subr.bf16.mxu1 %v8412_v41 }
 0x550   : > { %v3700_v55 = vmul.f32 1.442695, %v3590_v47  ;;  %v3591_v39 = vmul.f32 0.5, %v3398_v48  ;;  %7154 = vst [vmem:[%s10403_s22 + $0x2f8] sm:$0xff] %v3398_v48  ;;  %v3528_v47 = vld [vmem:[%s10141_s30 + $0x180] sm:$0xff]  ;;  %5825 = vmatpush1.bf16.msra.mxu1 %v8410_v27 }
 0x551   : > { %v3843_v46 = vadd.f32 %v3779_v53, %v10811_v44 }
 0x552   : > { %8529 = vpow2.f32 %v3700_v55  ;;  %v3702_v4 = vmul.f32 1.442695, %v3591_v39  ;;  %v3401_v60 = vpop.f32.mrb[224].mxu0  ;;  %v3529_v39 = vld [vmem:[%s10141_s30 + $0x188] sm:$0xff] }
 0x553   : > { %v10861_v63 = vadd.f32 %v3401_v60, %v10388_v38  ;;  %v3403_v49 = vpop.f32.mrb[225].mxu0  ;;  %v3885_v52 = vpack.c.bf16 %v3843_v46, %v3842_v54 }
 0x554   : > { %v8526_v51 = vpop.eup %8525  ;;  %8531 = vpow2.f32 %v3702_v4  ;;  %v3404_v50 = vadd.f32 %v3403_v49, %v10393_v40  ;;  %v3405_v44 = vpop.f32.mrb[226].mxu0 }
 0x555   : > { %7155 = vst [vmem:[%s10403_s22 + $0x300] sm:$0xff] %v10861_v63  ;;  %v10868_v1 = vadd.f32 %v3405_v44, %v10388_v38  ;;  %v3407_v2 = vpop.f32.mrb[227].mxu0  ;;  %v3780_v3 = vmul.f32 %v8526_v51, %v3524_v11 }
 0x556   : > { %4235 = vmatmul.mubr.bf16.gmra.mrb[212].mxu1 %v3885_v52  ;;  %v8528_v5 = vpop.eup %8527  ;;  %v3592_v6 = vmul.f32 0.5, %v3404_v50  ;;  %7156 = vst [vmem:[%s10403_s22 + $0x308] sm:$0xff] %v3404_v50  ;;  %v3408_v7 = vadd.f32 %v3407_v2, %v10393_v40 }
 0x557   : > { %4244 = vmatprep.mubr.bf16.mxu1 %v9622_v56  ;;  %7157 = vst [vmem:[%s10403_s22 + $0x310] sm:$0xff] %v10868_v1  ;;  %v3781_v45 = vmul.f32 %v8528_v5, %v3525_v35  ;;  %v3844_v15 = vadd.f32 %v3780_v3, %v10823_v8  ;;  %v3530_v3 = vld [vmem:[%s10141_s30 + $0x190] sm:$0xff] }
 0x558   : > { %v3704_v0 = vmul.f32 1.442695, %v3592_v6  ;;  %v3593_v62 = vmul.f32 0.5, %v3408_v7  ;;  %7158 = vst [vmem:[%s10403_s22 + $0x318] sm:$0xff] %v3408_v7 }
 0x559   : > { %v3845_v61 = vadd.f32 %v3781_v45, %v10830_v16 }
 0x55a   : > { %8533 = vpow2.f32 %v3704_v0  ;;  %v3706_v19 = vmul.f32 1.442695, %v3593_v62  ;;  %v3411_v17 = vpop.f32.mrb[228].mxu0  ;;  %v3531_v0 = vld [vmem:[%s10141_s30 + $0x198] sm:$0xff] }
 0x55b   : > { %v10880_v21 = vadd.f32 %v3411_v17, %v10388_v38  ;;  %v3413_v22 = vpop.f32.mrb[229].mxu0  ;;  %v3886_v24 = vpack.c.bf16 %v3845_v61, %v3844_v15 }
 0x55c   : > { %v8530_v9 = vpop.eup %8529  ;;  %8535 = vpow2.f32 %v3706_v19  ;;  %v3414_v8 = vadd.f32 %v3413_v22, %v10393_v40  ;;  %v3415_v42 = vpop.f32.mrb[230].mxu0 }
 0x55d   : > { %7159 = vst [vmem:[%s10403_s22 + $0x320] sm:$0xff] %v10880_v21  ;;  %v10887_v16 = vadd.f32 %v3415_v42, %v10388_v38  ;;  %v3417_v28 = vpop.f32.mrb[231].mxu0  ;;  %v3782_v58 = vmul.f32 %v8530_v9, %v3526_v18 }
 0x55e   : > { %4245 = vmatmul.mubr.bf16.gmra.mrb[216].mxu1 %v3886_v24  ;;  %v8532_v12 = vpop.eup %8531  ;;  %v3594_v31 = vmul.f32 0.5, %v3414_v8  ;;  %7160 = vst [vmem:[%s10403_s22 + $0x328] sm:$0xff] %v3414_v8  ;;  %v3418_v29 = vadd.f32 %v3417_v28, %v10393_v40  ;;  %v8415_v28 = vld [vmem:[#allocation22 + $0x84] ss:$8 sps:$4 sm:$0xff]  }
 0x55f   : > { %4254 = vmatprep.mubr.bf16.mxu1 %v9622_v56  ;;  %7161 = vst [vmem:[%s10403_s22 + $0x330] sm:$0xff] %v10887_v16  ;;  %v3783_v34 = vmul.f32 %v8532_v12, %v3527_v14  ;;  %v3846_v37 = vadd.f32 %v3782_v58, %v10842_v33  ;;  %v8413_v14 = vld [vmem:[#allocation22 + $0x80] ss:$8 sps:$4 sm:$0xff]   ;;  %5826 = vmatprep.subr.bf16.mxu1 %v8415_v28 }
 0x560   : > { %v3708_v25 = vmul.f32 1.442695, %v3594_v31  ;;  %v3595_v57 = vmul.f32 0.5, %v3418_v29  ;;  %7162 = vst [vmem:[%s10403_s22 + $0x338] sm:$0xff] %v3418_v29  ;;  %v3532_v31 = vld [vmem:[%s10141_s30 + $0x1a0] sm:$0xff]  ;;  %5827 = vmatpush1.bf16.msra.mxu1 %v8413_v14 }
 0x561   : > { %v3847_v23 = vadd.f32 %v3783_v34, %v10849_v30 }
 0x562   : > { %8537 = vpow2.f32 %v3708_v25  ;;  %v3710_v26 = vmul.f32 1.442695, %v3595_v57  ;;  %v3421_v43 = vpop.f32.mrb[232].mxu0 }
 0x563   : > { %v10899_v48 = vadd.f32 %v3421_v43, %v10388_v38  ;;  %v3423_v53 = vpop.f32.mrb[233].mxu0  ;;  %v3887_v54 = vpack.c.bf16 %v3847_v23, %v3846_v37  ;;  %v3533_v23 = vld [vmem:[%s10141_s30 + $0x1a8] sm:$0xff] }
 0x564   : > { %v8534_v33 = vpop.eup %8533  ;;  %8539 = vpow2.f32 %v3710_v26  ;;  %v3424_v55 = vadd.f32 %v3423_v53, %v10393_v40  ;;  %v3425_v30 = vpop.f32.mrb[234].mxu0 }
 0x565   : > { %7163 = vst [vmem:[%s10403_s22 + $0x340] sm:$0xff] %v10899_v48  ;;  %v10906_v46 = vadd.f32 %v3425_v30, %v10388_v38  ;;  %v3427_v36 = vpop.f32.mrb[235].mxu0  ;;  %v3784_v59 = vmul.f32 %v8534_v33, %v3528_v47 }
 0x566   : > { %4255 = vmatmul.mubr.bf16.gmra.mrb[220].mxu1 %v3887_v54  ;;  %v8536_v4 = vpop.eup %8535  ;;  %v3596_v60 = vmul.f32 0.5, %v3424_v55  ;;  %7164 = vst [vmem:[%s10403_s22 + $0x348] sm:$0xff] %v3424_v55  ;;  %v3428_v11 = vadd.f32 %v3427_v36, %v10393_v40 }
 0x567   : > { %4264 = vmatprep.mubr.bf16.mxu1 %v9622_v56  ;;  %7165 = vst [vmem:[%s10403_s22 + $0x350] sm:$0xff] %v10906_v46  ;;  %v3785_v49 = vmul.f32 %v8536_v4, %v3529_v39  ;;  %v3848_v52 = vadd.f32 %v3784_v59, %v10861_v63 }
 0x568   : > { %v3712_v51 = vmul.f32 1.442695, %v3596_v60  ;;  %v3597_v50 = vmul.f32 0.5, %v3428_v11  ;;  %7166 = vst [vmem:[%s10403_s22 + $0x358] sm:$0xff] %v3428_v11 }
 0x569   : > { %v3849_v44 = vadd.f32 %v3785_v49, %v10868_v1  ;;  %v3534_v49 = vld [vmem:[%s10141_s30 + $0x1b0] sm:$0xff] }
 0x56a   : > { %8541 = vpow2.f32 %v3712_v51  ;;  %v3714_v35 = vmul.f32 1.442695, %v3597_v50  ;;  %v3431_v2 = vpop.f32.mrb[236].mxu0 }
 0x56b   : > { %v10918_v5 = vadd.f32 %v3431_v2, %v10388_v38  ;;  %v3433_v6 = vpop.f32.mrb[237].mxu0  ;;  %v3888_v7 = vpack.c.bf16 %v3849_v44, %v3848_v52 }
 0x56c   : > { %v8538_v45 = vpop.eup %8537  ;;  %8543 = vpow2.f32 %v3714_v35  ;;  %v3434_v63 = vadd.f32 %v3433_v6, %v10393_v40  ;;  %v3435_v15 = vpop.f32.mrb[238].mxu0  ;;  %v3535_v35 = vld [vmem:[%s10141_s30 + $0x1b8] sm:$0xff] }
 0x56d   : > { %7167 = vst [vmem:[%s10403_s22 + $0x360] sm:$0xff] %v10918_v5  ;;  %v10925_v1 = vadd.f32 %v3435_v15, %v10388_v38  ;;  %v3437_v62 = vpop.f32.mrb[239].mxu0  ;;  %v3786_v61 = vmul.f32 %v8538_v45, %v3530_v3 }
 0x56e   : > { %4265 = vmatmul.mubr.bf16.gmra.mrb[224].mxu1 %v3888_v7  ;;  %v8540_v19 = vpop.eup %8539  ;;  %v3598_v17 = vmul.f32 0.5, %v3434_v63  ;;  %7168 = vst [vmem:[%s10403_s22 + $0x368] sm:$0xff] %v3434_v63  ;;  %v3438_v18 = vadd.f32 %v3437_v62, %v10393_v40 }
 0x56f   : > { %4274 = vmatprep.mubr.bf16.mxu1 %v9622_v56  ;;  %7169 = vst [vmem:[%s10403_s22 + $0x370] sm:$0xff] %v10925_v1  ;;  %v3787_v22 = vmul.f32 %v8540_v19, %v3531_v0  ;;  %v3850_v24 = vadd.f32 %v3786_v61, %v10880_v21  ;;  %v7683_v21 = vld.sshfl [vmem:[#allocation17] sm:$0x11 pattern:$0x75316420] }
 0x570   : > { %v3716_v9 = vmul.f32 1.442695, %v3598_v17  ;;  %v3599_v8 = vmul.f32 0.5, %v3438_v18  ;;  %7170 = vst [vmem:[%s10403_s22 + $0x378] sm:$0xff] %v3438_v18  ;;  %v4418_v54 = vcombine.high %v7683_v21, %v7683_v21  ;;  %v4425_v59 = vrot.slane %v7683_v21, %v10231_v13 }
 0x571   : > { %v3851_v42 = vadd.f32 %v3787_v22, %v10887_v16 }
 0x572   : > { %8545 = vpow2.f32 %v3716_v9  ;;  %v3718_v58 = vmul.f32 1.442695, %v3599_v8  ;;  %v3441_v12 = vpop.f32.mrb[240].mxu0  ;;  %v4432_v11 = vrot.slane %v4418_v54, %v10231_v13  ;;  %v4434_v6 = vpack.i.b16 %v4425_v59, %v4425_v59  ;;  %v8416_v8 = vld [vmem:[#allocation22 + $0x90] ss:$8 sps:$4 sm:$0xff]  }
 0x573   : > { %v10937_v29 = vadd.f32 %v3441_v12, %v10388_v38  ;;  %v3443_v34 = vpop.f32.mrb[241].mxu0  ;;  %v3889_v37 = vpack.c.bf16 %v3851_v42, %v3850_v24  ;;  %v8418_v42 = vld [vmem:[#allocation22 + $0x94] ss:$8 sps:$4 sm:$0xff]  }
 0x574   : > { %v8542_v25 = vpop.eup %8541  ;;  %8547 = vpow2.f32 %v3718_v58  ;;  %v3444_v16 = vadd.f32 %v3443_v34, %v10393_v40  ;;  %v3445_v57 = vpop.f32.mrb[242].mxu0  ;;  %v4441_v0 = vpack.i.b16 %v4432_v11, %v4432_v11  ;;  %v10975_v24 = vrot.slane %v4434_v6, %v10238_v20  ;;  %v3536_v12 = vld [vmem:[%s10141_s30 + $0x1c0] sm:$0xff]  ;;  %5828 = vmatprep.subr.bf16.mxu1 %v8418_v42 }
 0x575   : > { %7171 = vst [vmem:[%s10403_s22 + $0x380] sm:$0xff] %v10937_v29  ;;  %v10944_v27 = vadd.f32 %v3445_v57, %v10388_v38  ;;  %v3447_v41 = vpop.f32.mrb[243].mxu0  ;;  %v3788_v26 = vmul.f32 %v8542_v25, %v3532_v31  ;;  %5829 = vmatpush1.bf16.msra.mxu1 %v8416_v8 }
 0x576   : > { %4275 = vmatmul.mubr.bf16.gmra.mrb[228].mxu1 %v3889_v37  ;;  %v8544_v43 = vpop.eup %8543  ;;  %v3600_v47 = vmul.f32 0.5, %v3444_v16  ;;  %7172 = vst [vmem:[%s10403_s22 + $0x388] sm:$0xff] %v3444_v16  ;;  %v3448_v53 = vadd.f32 %v3447_v41, %v10393_v40  ;;  %v3537_v41 = vld [vmem:[%s10141_s30 + $0x1c8] sm:$0xff] }
 0x577   : > { %4284 = vmatprep.mubr.bf16.mxu1 %v9622_v56  ;;  %7173 = vst [vmem:[%s10403_s22 + $0x390] sm:$0xff] %v10944_v27  ;;  %v3789_v33 = vmul.f32 %v8544_v43, %v3533_v23  ;;  %v3852_v55 = vadd.f32 %v3788_v26, %v10899_v48 }
 0x578   : > { %v3720_v30 = vmul.f32 1.442695, %v3600_v47  ;;  %v3601_v39 = vmul.f32 0.5, %v3448_v53  ;;  %7174 = vst [vmem:[%s10403_s22 + $0x398] sm:$0xff] %v3448_v53 }
 0x579   : > { %v3853_v36 = vadd.f32 %v3789_v33, %v10906_v46 }
 0x57a   : > { %8549 = vpow2.f32 %v3720_v30  ;;  %v3722_v4 = vmul.f32 1.442695, %v3601_v39  ;;  %v3451_v60 = vpop.f32.mrb[244].mxu0 }
 0x57b   : > { %v10958_v52 = vadd.f32 %v3451_v60, %v10388_v38  ;;  %v3453_v48 = vpop.f32.mrb[245].mxu0  ;;  %v3890_v51 = vpack.c.bf16 %v3853_v36, %v3852_v55 }
 0x57c   : > { %v8546_v50 = vpop.eup %8545  ;;  %8551 = vpow2.f32 %v3722_v4  ;;  %v3454_v44 = vadd.f32 %v3453_v48, %v10393_v40  ;;  %v3455_v46 = vpop.f32.mrb[246].mxu0 }
 0x57d   : > { %7175 = vst [vmem:[%s10403_s22 + $0x3a0] sm:$0xff] %v10958_v52  ;;  %v10965_v2 = vadd.f32 %v3455_v46, %v10388_v38  ;;  %v3457_v3 = vpop.f32.mrb[247].mxu0  ;;  %v3790_v7 = vmul.f32 %v8546_v50, %v3534_v49 }
 0x57e   : > { %4285 = vmatmul.mubr.bf16.gmra.mrb[232].mxu1 %v3890_v51  ;;  %v8548_v45 = vpop.eup %8547  ;;  %v3602_v63 = vmul.f32 0.5, %v3454_v44  ;;  %7176 = vst [vmem:[%s10403_s22 + $0x3a8] sm:$0xff] %v3454_v44  ;;  %v3458_v15 = vadd.f32 %v3457_v3, %v10393_v40 }
 0x57f   : > { %4294 = vmatprep.mubr.bf16.mxu1 %v9622_v56  ;;  %7177 = vst [vmem:[%s10403_s22 + $0x3b0] sm:$0xff] %v10965_v2  ;;  %v3791_v62 = vmul.f32 %v8548_v45, %v3535_v35  ;;  %v3854_v61 = vadd.f32 %v3790_v7, %v10918_v5  ;;  %v10979_v5 = vrot.slane %v4441_v0, %v10238_v20  ;;  %v3538_v35 = vld [vmem:[%s10141_s30 + $0x1d0] sm:$0xff] }
 0x580   : > { %v3724_v19 = vmul.f32 1.442695, %v3602_v63  ;;  %v3603_v17 = vmul.f32 0.5, %v3458_v15  ;;  %7178 = vst [vmem:[%s10403_s22 + $0x3b8] sm:$0xff] %v3458_v15  ;;  %v4026_v18 = vpop.f32.mrb[128].mxu1 }
 0x581   : > { %v4028_v22 = vpop.f32.mrb[129].mxu1  ;;  %v3855_v9 = vadd.f32 %v3791_v62, %v10925_v1 }
 0x582   : > { %8553 = vpow2.f32 %v3724_v19  ;;  %v3726_v14 = vmul.f32 1.442695, %v3603_v17  ;;  %v4030_v58 = vpop.f32.mrb[130].mxu1  ;;  %v3539_v19 = vld [vmem:[%s10141_s30 + $0x1d8] sm:$0xff] }
 0x583   : > { %v3461_v28 = vpop.f32.mrb[248].mxu0  ;;  %v4345_v34 = vpack.c.bf16 %v4030_v58, %v4026_v18  ;;  %v4032_v21 = vpop.f32.mrb[131].mxu1  ;;  %v3891_v25 = vpack.c.bf16 %v3855_v9, %v3854_v61 }
 0x584   : > { %v10983_v31 = vadd.f32 %v3461_v28, %v10388_v38  ;;  %v3463_v37 = vpop.f32.mrb[249].mxu0  ;;  %v8550_v1 = vpop.eup %8549  ;;  %8555 = vpow2.f32 %v3726_v14  ;;  %v4346_v57 = vpack.c.bf16 %v4032_v21, %v4028_v22 }
 0x585   : > { %v3464_v16 = vadd.f32 %v3463_v37, %v10393_v40  ;;  %v3465_v23 = vpop.f32.mrb[250].mxu0  ;;  %v4447_v26 = vadd.bf16 %v10975_v24, %v4345_v34  ;;  %v3792_v53 = vmul.f32 %v8550_v1, %v3536_v12 }
 0x586   : > { %7179 = vst [vmem:[%s10403_s22 + $0x3c0] sm:$0xff] %v10983_v31  ;;  %v10991_v43 = vadd.f32 %v3465_v23, %v10388_v38  ;;  %v3467_v47 = vpop.f32.mrb[251].mxu0  ;;  %4295 = vmatmul.mubr.bf16.gmra.mrb[236].mxu1 %v3891_v25  ;;  %v8552_v54 = vpop.eup %8551  ;;  %v4448_v55 = vadd.bf16 %v10979_v5, %v4346_v57 }
 0x587   : > { %v3604_v33 = vmul.f32 0.5, %v3464_v16  ;;  %7180 = vst [vmem:[%s10403_s22 + $0x3c8] sm:$0xff] %v3464_v16  ;;  %v3468_v30 = vadd.f32 %v3467_v47, %v10393_v40  ;;  %4304 = vmatprep.mubr.bf16.mxu1 %v9622_v56  ;;  %v4575_v39 = vmul.bf16 1045249613, %v4447_v26  ;;  %v3793_v36 = vmul.f32 %v8552_v54, %v3537_v41  ;;  %v3540_v41 = vld [vmem:[%s10141_s30 + $0x1e0] sm:$0xff] }
 0x588   : > { %7181 = vst [vmem:[%s10403_s22 + $0x3d0] sm:$0xff] %v10991_v43  ;;  %v3856_v59 = vadd.f32 %v3792_v53, %v10937_v29  ;;  %v4036_v11 = vpop.f32.mrb[132].mxu1  ;;  %vm4512_vm0 = vcmp.gt.bf16.partialorder %v4448_v55, 0  ;;  %vm4511_vm1 = vcmp.gt.bf16.partialorder %v4447_v26, 0  ;;  %v4576_v48 = vmul.bf16 1045249613, %v4448_v55 }
 0x589   : > { %v3728_v4 = vmul.f32 1.442695, %v3604_v33  ;;  %v3605_v60 = vmul.f32 0.5, %v3468_v30  ;;  %7182 = vst [vmem:[%s10403_s22 + $0x3d8] sm:$0xff] %v3468_v30  ;;  %v4038_v49 = vpop.f32.mrb[133].mxu1  ;;  %v3857_v51 = vadd.f32 %v3793_v36, %v10944_v27  ;;  %v4639_v0 = vsel %vm4511_vm1, %v4447_v26, %v4575_v39  ;;  %v3541_v39 = vld [vmem:[%s10141_s30 + $0x1e8] sm:$0xff] }
 0x58a   : > { %v4040_v46 = vpop.f32.mrb[134].mxu1  ;;  %v4640_v45 = vsel %vm4512_vm0, %v4448_v55, %v4576_v48  ;;  %v8421_v26 = vld [vmem:[#allocation22 + $0xa4] ss:$8 sps:$4 sm:$0xff]  }
 0x58b   : > { %8557 = vpow2.f32 %v3728_v4  ;;  %v3730_v50 = vmul.f32 1.442695, %v3605_v60  ;;  %v3471_v44 = vpop.f32.mrb[252].mxu0  ;;  %v4347_v29 = vpack.c.bf16 %v4040_v46, %v4036_v11  ;;  %v4042_v7 = vpop.f32.mrb[135].mxu1  ;;  %v3892_v63 = vpack.c.bf16 %v3857_v51, %v3856_v59  ;;  %4927 = vmatprep.mubr.bf16.mxu0 %v4640_v45  ;;  %5830 = vmatprep.subr.bf16.mxu1 %v8421_v26 }
 0x58c   : > { %v11004_v3 = vadd.f32 %v3471_v44, %v10388_v38  ;;  %v3473_v6 = vpop.f32.mrb[253].mxu0  ;;  %v8554_v15 = vpop.eup %8553  ;;  %v4348_v62 = vpack.c.bf16 %v4042_v7, %v4038_v49  ;;  %4928 = vmatmul.mubr.bf16.vlgmr.msra.gmra.mrb[0].mxu0 %v4639_v0 }
 0x58d   : > { %8559 = vpow2.f32 %v3730_v50  ;;  %v3474_v27 = vadd.f32 %v3473_v6, %v10393_v40  ;;  %v3475_v61 = vpop.f32.mrb[254].mxu0  ;;  %v4449_v17 = vadd.bf16 %v10975_v24, %v4347_v29  ;;  %v3794_v9 = vmul.f32 %v8554_v15, %v3538_v35  ;;  %v3542_v29 = vld [vmem:[%s10141_s30 + $0x1f0] sm:$0xff] }
 0x58e   : > { %7183 = vst [vmem:[%s10403_s22 + $0x3e0] sm:$0xff] %v11004_v3  ;;  %v11013_v18 = vadd.f32 %v3475_v61, %v10388_v38  ;;  %v3477_v22 = vpop.f32.mrb[255].mxu0  ;;  %4305 = vmatmul.mubr.bf16.gmra.mrb[240].mxu1 %v3892_v63  ;;  %v8556_v8 = vpop.eup %8555  ;;  %v4450_v14 = vadd.bf16 %v10979_v5, %v4348_v62 }
 0x58f   : > { %v3606_v42 = vmul.f32 0.5, %v3474_v27  ;;  %7184 = vst [vmem:[%s10403_s22 + $0x3e8] sm:$0xff] %v3474_v27  ;;  %v3478_v28 = vadd.f32 %v3477_v22, %v10393_v40  ;;  %4314 = vmatprep.mubr.bf16.mxu1 %v9622_v56  ;;  %v4577_v58 = vmul.bf16 1045249613, %v4449_v17  ;;  %v3795_v38 = vmul.f32 %v8556_v8, %v3539_v19  ;;  %v8419_v40 = vld [vmem:[#allocation22 + $0xa0] ss:$8 sps:$4 sm:$0xff]  }
 0x590   : > { %7185 = vst [vmem:[%s10403_s22 + $0x3f0] sm:$0xff] %v11013_v18  ;;  %v3858_v12 = vadd.f32 %v3794_v9, %v10958_v52  ;;  %vm4514_vm2 = vcmp.gt.bf16.partialorder %v4450_v14, 0  ;;  %vm4513_vm3 = vcmp.gt.bf16.partialorder %v4449_v17, 0  ;;  %v4578_v1 = vmul.bf16 1045249613, %v4450_v14  ;;  %5831 = vmatpush1.bf16.msra.mxu1 %v8419_v40 }
 0x591   : > { %v3732_v34 = vmul.f32 1.442695, %v3606_v42  ;;  %v3607_v37 = vmul.f32 0.5, %v3478_v28  ;;  %7186 = vst [vmem:[%s10403_s22 + $0x3f8] sm:$0xff] %v3478_v28  ;;  %v4046_v21 = vpop.f32.mrb[136].mxu1  ;;  %v3859_v16 = vadd.f32 %v3795_v38, %v10965_v2  ;;  %v4641_v55 = vsel %vm4513_vm3, %v4449_v17, %v4577_v58 }
 0x592   : > { %v4048_v25 = vpop.f32.mrb[137].mxu1  ;;  %v4642_v52 = vsel %vm4514_vm2, %v4450_v14, %v4578_v1  ;;  %v8422_v28 = vld [vmem:[#allocation22 + $0xb0] ss:$8 sps:$4 sm:$0xff]   ;;  %v8424_v58 = vld [vmem:[#allocation22 + $0xb4] ss:$8 sps:$4 sm:$0xff]  }
 0x593   : > { %8561 = vpow2.f32 %v3732_v34  ;;  %v3734_v57 = vmul.f32 1.442695, %v3607_v37  ;;  %v4050_v23 = vpop.f32.mrb[138].mxu1  ;;  %v3893_v54 = vpack.c.bf16 %v3859_v16, %v3858_v12  ;;  %4937 = vmatprep.mubr.bf16.mxu0 %v4642_v52  ;;  %5832 = vmatprep.subr.bf16.mxu1 %v8424_v58 }
 0x594   : > { %v4349_v47 = vpack.c.bf16 %v4050_v23, %v4046_v21  ;;  %v4052_v53 = vpop.f32.mrb[139].mxu1  ;;  %4938 = vmatmul.mubr.bf16.gmra.mrb[4].mxu0 %v4641_v55  ;;  %5833 = vmatpush1.bf16.msra.mxu1 %v8422_v28 }
 0x595   : > { %v8558_v33 = vpop.eup %8557  ;;  %8563 = vpow2.f32 %v3734_v57  ;;  %v4350_v30 = vpack.c.bf16 %v4052_v53, %v4048_v25 }
 0x596   : > { %v4451_v2 = vadd.bf16 %v10975_v24, %v4349_v47  ;;  %4315 = vmatmul.mubr.bf16.gmra.mrb[244].mxu1 %v3893_v54  ;;  %v3796_v36 = vmul.f32 %v8558_v33, %v3540_v41 }
 0x597   : > { %v8560_v59 = vpop.eup %8559  ;;  %v4452_v4 = vadd.bf16 %v10979_v5, %v4350_v30  ;;  %4324 = vmatprep.mubr.bf16.mxu1 %v9622_v56 }
 0x598   : > { %v3797_v60 = vmul.f32 %v8560_v59, %v3541_v39  ;;  %v3860_v11 = vadd.f32 %v3796_v36, %v10983_v31  ;;  %v4579_v49 = vmul.bf16 1045249613, %v4451_v2  ;;  %vm4515_vm5 = vcmp.gt.bf16.partialorder %v4451_v2, 0  ;;  %v3543_v31 = vld [vmem:[%s10141_s30 + $0x1f8] sm:$0xff]  ;;  %v8425_v36 = vld [vmem:[#allocation22 + $0xc0] ss:$8 sps:$4 sm:$0xff]  }
 0x599   : > { %v4056_v48 = vpop.f32.mrb[140].mxu1  ;;  %vm4516_vm4 = vcmp.gt.bf16.partialorder %v4452_v4, 0  ;;  %v4580_v51 = vmul.bf16 1045249613, %v4452_v4  ;;  %v8427_v59 = vld [vmem:[#allocation22 + $0xc4] ss:$8 sps:$4 sm:$0xff]  }
 0x59a   : > { %v4058_v50 = vpop.f32.mrb[141].mxu1  ;;  %v3861_v44 = vadd.f32 %v3797_v60, %v10991_v43  ;;  %v4643_v15 = vsel %vm4515_vm5, %v4451_v2, %v4579_v49  ;;  %5834 = vmatprep.subr.bf16.mxu1 %v8427_v59 }
 0x59b   : > { %v4060_v46 = vpop.f32.mrb[142].mxu1  ;;  %v4644_v35 = vsel %vm4516_vm4, %v4452_v4, %v4580_v51  ;;  %5835 = vmatpush1.bf16.msra.mxu1 %v8425_v36 }
 0x59c   : > { %v4351_v6 = vpack.c.bf16 %v4060_v46, %v4056_v48  ;;  %v4062_v7 = vpop.f32.mrb[143].mxu1  ;;  %4947 = vmatprep.mubr.bf16.mxu0 %v4644_v35  ;;  %v3894_v45 = vpack.c.bf16 %v3861_v44, %v3860_v11 }
 0x59d   : > { %v8562_v63 = vpop.eup %8561  ;;  %v4352_v0 = vpack.c.bf16 %v4062_v7, %v4058_v50  ;;  %4948 = vmatmul.mubr.bf16.gmra.mrb[8].mxu0 %v4643_v15 }
 0x59e   : > { %v4453_v27 = vadd.bf16 %v10975_v24, %v4351_v6  ;;  %4325 = vmatmul.mubr.bf16.gmra.mrb[248].mxu1 %v3894_v45  ;;  %v3798_v62 = vmul.f32 %v8562_v63, %v3542_v29 }
 0x59f   : > { %v8564_v61 = vpop.eup %8563  ;;  %v4454_v19 = vadd.bf16 %v10979_v5, %v4352_v0  ;;  %4334 = vmatprep.mubr.bf16.mxu1 %v9622_v56 }
 0x5a0   : > { %v3799_v43 = vmul.f32 %v8564_v61, %v3543_v31  ;;  %v3862_v17 = vadd.f32 %v3798_v62, %v11004_v3  ;;  %v4581_v22 = vmul.bf16 1045249613, %v4453_v27  ;;  %vm4517_vm7 = vcmp.gt.bf16.partialorder %v4453_v27, 0 }
 0x5a1   : > { %v4066_v9 = vpop.f32.mrb[144].mxu1  ;;  %vm4518_vm6 = vcmp.gt.bf16.partialorder %v4454_v19, 0  ;;  %v4582_v8 = vmul.bf16 1045249613, %v4454_v19 }
 0x5a2   : > { %v4068_v42 = vpop.f32.mrb[145].mxu1  ;;  %v3863_v14 = vadd.f32 %v3799_v43, %v11013_v18  ;;  %v4645_v56 = vsel %vm4517_vm7, %v4453_v27, %v4581_v22  ;;  %v8428_v22 = vld [vmem:[#allocation22 + $0xd0] ss:$8 sps:$4 sm:$0xff]  }
 0x5a3   : > { %v4070_v38 = vpop.f32.mrb[146].mxu1  ;;  %v4646_v12 = vsel %vm4518_vm6, %v4454_v19, %v4582_v8 }
 0x5a4   : > { %v4353_v34 = vpack.c.bf16 %v4070_v38, %v4066_v9  ;;  %v4072_v37 = vpop.f32.mrb[147].mxu1  ;;  %4957 = vmatprep.mubr.bf16.mxu0 %v4646_v12  ;;  %v3895_v21 = vpack.c.bf16 %v3863_v14, %v3862_v17  ;;  %v8430_v9 = vld [vmem:[#allocation22 + $0xd4] ss:$8 sps:$4 sm:$0xff]  }
 0x5a5   : > { %v4354_v25 = vpack.c.bf16 %v4072_v37, %v4068_v42  ;;  %4958 = vmatmul.mubr.bf16.gmra.mrb[12].mxu0 %v4645_v56  ;;  %5836 = vmatprep.subr.bf16.mxu1 %v8430_v9 }
 0x5a6   : > { %v4455_v3 = vadd.bf16 %v10975_v24, %v4353_v34  ;;  %4335 = vmatmul.mubr.bf16.gmra.mrb[252].mxu1 %v3895_v21 }
 0x5a7   : > { %v4456_v1 = vadd.bf16 %v10979_v5, %v4354_v25  ;;  %5837 = vmatpush1.bf16.msra.mxu1 %v8428_v22 }
 0x5a8   : > { %v4583_v16 = vmul.bf16 1045249613, %v4455_v3  ;;  %vm4519_vm9 = vcmp.gt.bf16.partialorder %v4455_v3, 0 }
 0x5a9   : > { %v4076_v18 = vpop.f32.mrb[148].mxu1  ;;  %vm4520_vm8 = vcmp.gt.bf16.partialorder %v4456_v1, 0  ;;  %v4584_v40 = vmul.bf16 1045249613, %v4456_v1 }
 0x5aa   : > { %v4078_v57 = vpop.f32.mrb[149].mxu1  ;;  %v4647_v53 = vsel %vm4519_vm9, %v4455_v3, %v4583_v16 }
 0x5ab   : > { %v4080_v23 = vpop.f32.mrb[150].mxu1  ;;  %v4648_v41 = vsel %vm4520_vm8, %v4456_v1, %v4584_v40 }
 0x5ac   : > { %v4355_v26 = vpack.c.bf16 %v4080_v23, %v4076_v18  ;;  %v4082_v47 = vpop.f32.mrb[151].mxu1  ;;  %4967 = vmatprep.mubr.bf16.mxu0 %v4648_v41 }
 0x5ad   : > { %v4356_v52 = vpack.c.bf16 %v4082_v47, %v4078_v57  ;;  %4968 = vmatmul.mubr.bf16.gmra.mrb[16].mxu0 %v4647_v53 }
 0x5ae   : > { %v4457_v54 = vadd.bf16 %v10975_v24, %v4355_v26 }
 0x5af   : > { %v4458_v33 = vadd.bf16 %v10979_v5, %v4356_v52 }
 0x5b0   : > { %v4585_v55 = vmul.bf16 1045249613, %v4457_v54  ;;  %vm4521_vm11 = vcmp.gt.bf16.partialorder %v4457_v54, 0 }
 0x5b1   : > { %v4086_v30 = vpop.f32.mrb[152].mxu1  ;;  %vm4522_vm10 = vcmp.gt.bf16.partialorder %v4458_v33, 0  ;;  %v4586_v39 = vmul.bf16 1045249613, %v4458_v33 }
 0x5b2   : > { %v4088_v2 = vpop.f32.mrb[153].mxu1  ;;  %v4649_v48 = vsel %vm4521_vm11, %v4457_v54, %v4585_v55  ;;  %v8431_v54 = vld [vmem:[#allocation22 + $0xe0] ss:$8 sps:$4 sm:$0xff]  }
 0x5b3   : > { %v4090_v4 = vpop.f32.mrb[154].mxu1  ;;  %v4650_v60 = vsel %vm4522_vm10, %v4458_v33, %v4586_v39  ;;  %v8433_v33 = vld [vmem:[#allocation22 + $0xe4] ss:$8 sps:$4 sm:$0xff]  }
 0x5b4   : > { %v4357_v11 = vpack.c.bf16 %v4090_v4, %v4086_v30  ;;  %v4092_v49 = vpop.f32.mrb[155].mxu1  ;;  %4977 = vmatprep.mubr.bf16.mxu0 %v4650_v60  ;;  %5838 = vmatprep.subr.bf16.mxu1 %v8433_v33 }
 0x5b5   : > { %v4358_v51 = vpack.c.bf16 %v4092_v49, %v4088_v2  ;;  %4978 = vmatmul.mubr.bf16.gmra.mrb[20].mxu0 %v4649_v48  ;;  %5839 = vmatpush1.bf16.msra.mxu1 %v8431_v54 }
 0x5b6   : > { %v4459_v50 = vadd.bf16 %v10975_v24, %v4357_v11 }
 0x5b7   : > { %v4460_v44 = vadd.bf16 %v10979_v5, %v4358_v51 }
 0x5b8   : > { %v4587_v46 = vmul.bf16 1045249613, %v4459_v50  ;;  %vm4523_vm13 = vcmp.gt.bf16.partialorder %v4459_v50, 0 }
 0x5b9   : > { %v4096_v35 = vpop.f32.mrb[156].mxu1  ;;  %vm4524_vm12 = vcmp.gt.bf16.partialorder %v4460_v44, 0  ;;  %v4588_v29 = vmul.bf16 1045249613, %v4460_v44 }
 0x5ba   : > { %v4098_v6 = vpop.f32.mrb[157].mxu1  ;;  %v4651_v0 = vsel %vm4523_vm13, %v4459_v50, %v4587_v46 }
 0x5bb   : > { %v4100_v7 = vpop.f32.mrb[158].mxu1  ;;  %v4652_v45 = vsel %vm4524_vm12, %v4460_v44, %v4588_v29 }
 0x5bc   : > { %v4359_v63 = vpack.c.bf16 %v4100_v7, %v4096_v35  ;;  %v4102_v15 = vpop.f32.mrb[159].mxu1  ;;  %4987 = vmatprep.mubr.bf16.mxu0 %v4652_v45 }
 0x5bd   : > { %v4360_v31 = vpack.c.bf16 %v4102_v15, %v4098_v6  ;;  %4988 = vmatmul.mubr.bf16.gmra.mrb[24].mxu0 %v4651_v0 }
 0x5be   : > { %v4461_v27 = vadd.bf16 %v10975_v24, %v4359_v63 }
 0x5bf   : > { %v4462_v62 = vadd.bf16 %v10979_v5, %v4360_v31 }
 0x5c0   : > { %v4589_v61 = vmul.bf16 1045249613, %v4461_v27  ;;  %vm4525_vm15 = vcmp.gt.bf16.partialorder %v4461_v27, 0 }
 0x5c1   : > { %v4106_v19 = vpop.f32.mrb[160].mxu1  ;;  %vm4526_vm14 = vcmp.gt.bf16.partialorder %v4462_v62, 0  ;;  %v4590_v43 = vmul.bf16 1045249613, %v4462_v62 }
 0x5c2   : > { %v4108_v17 = vpop.f32.mrb[161].mxu1  ;;  %v4653_v58 = vsel %vm4525_vm15, %v4461_v27, %v4589_v61  ;;  %v8434_v27 = vld [vmem:[#allocation22 + $0xf0] ss:$8 sps:$4 sm:$0xff]  }
 0x5c3   : > { %v4110_v8 = vpop.f32.mrb[162].mxu1  ;;  %v4654_v42 = vsel %vm4526_vm14, %v4462_v62, %v4590_v43  ;;  %v8436_v62 = vld [vmem:[#allocation22 + $0xf4] ss:$8 sps:$4 sm:$0xff]  }
 0x5c4   : > { %v4361_v14 = vpack.c.bf16 %v4110_v8, %v4106_v19  ;;  %v4112_v28 = vpop.f32.mrb[163].mxu1  ;;  %4997 = vmatprep.mubr.bf16.mxu0 %v4654_v42  ;;  %5840 = vmatprep.subr.bf16.mxu1 %v8436_v62 }
 0x5c5   : > { %v4362_v38 = vpack.c.bf16 %v4112_v28, %v4108_v17  ;;  %4998 = vmatmul.mubr.bf16.gmra.mrb[28].mxu0 %v4653_v58  ;;  %5841 = vmatpush1.bf16.msra.mxu1 %v8434_v27 }
 0x5c6   : > { %v4463_v12 = vadd.bf16 %v10975_v24, %v4361_v14 }
 0x5c7   : > { %v4464_v34 = vadd.bf16 %v10979_v5, %v4362_v38 }
 0x5c8   : > { %v4591_v37 = vmul.bf16 1045249613, %v4463_v12  ;;  %vm4527_vm1 = vcmp.gt.bf16.partialorder %v4463_v12, 0 }
 0x5c9   : > { %v4116_v21 = vpop.f32.mrb[164].mxu1  ;;  %vm4528_vm0 = vcmp.gt.bf16.partialorder %v4464_v34, 0  ;;  %v4592_v56 = vmul.bf16 1045249613, %v4464_v34 }
 0x5ca   : > { %v4118_v25 = vpop.f32.mrb[165].mxu1  ;;  %v4655_v40 = vsel %vm4527_vm1, %v4463_v12, %v4591_v37 }
 0x5cb   : > { %v4120_v3 = vpop.f32.mrb[166].mxu1  ;;  %v4656_v1 = vsel %vm4528_vm0, %v4464_v34, %v4592_v56 }
 0x5cc   : > { %v4363_v16 = vpack.c.bf16 %v4120_v3, %v4116_v21  ;;  %v4122_v18 = vpop.f32.mrb[167].mxu1  ;;  %5007 = vmatprep.mubr.bf16.mxu0 %v4656_v1 }
 0x5cd   : > { %v4364_v57 = vpack.c.bf16 %v4122_v18, %v4118_v25  ;;  %5008 = vmatmul.mubr.bf16.gmra.mrb[32].mxu0 %v4655_v40 }
 0x5ce   : > { %v4465_v23 = vadd.bf16 %v10975_v24, %v4363_v16 }
 0x5cf   : > { %v4466_v41 = vadd.bf16 %v10979_v5, %v4364_v57 }
 0x5d0   : > { %v4593_v26 = vmul.bf16 1045249613, %v4465_v23  ;;  %vm4529_vm3 = vcmp.gt.bf16.partialorder %v4465_v23, 0 }
 0x5d1   : > { %v4126_v47 = vpop.f32.mrb[168].mxu1  ;;  %vm4530_vm2 = vcmp.gt.bf16.partialorder %v4466_v41, 0  ;;  %v4594_v53 = vmul.bf16 1045249613, %v4466_v41 }
 0x5d2   : > { %v4128_v52 = vpop.f32.mrb[169].mxu1  ;;  %v4657_v36 = vsel %vm4529_vm3, %v4465_v23, %v4593_v26 }
 0x5d3   : > { %v4130_v55 = vpop.f32.mrb[170].mxu1  ;;  %v4658_v30 = vsel %vm4530_vm2, %v4466_v41, %v4594_v53 }
 0x5d4   : > { %v4365_v39 = vpack.c.bf16 %v4130_v55, %v4126_v47  ;;  %v4132_v2 = vpop.f32.mrb[171].mxu1  ;;  %5017 = vmatprep.mubr.bf16.mxu0 %v4658_v30 }
 0x5d5   : > { %v4366_v59 = vpack.c.bf16 %v4132_v2, %v4128_v52  ;;  %5018 = vmatmul.mubr.bf16.gmra.mrb[36].mxu0 %v4657_v36 }
 0x5d6   : > { %v4467_v4 = vadd.bf16 %v10975_v24, %v4365_v39 }
 0x5d7   : > { %v4468_v60 = vadd.bf16 %v10979_v5, %v4366_v59 }
 0x5d8   : > { %v4595_v11 = vmul.bf16 1045249613, %v4467_v4  ;;  %vm4531_vm5 = vcmp.gt.bf16.partialorder %v4467_v4, 0 }
 0x5d9   : > { %v4136_v49 = vpop.f32.mrb[172].mxu1  ;;  %vm4532_vm4 = vcmp.gt.bf16.partialorder %v4468_v60, 0  ;;  %v4596_v48 = vmul.bf16 1045249613, %v4468_v60 }
 0x5da   : > { %v4138_v51 = vpop.f32.mrb[173].mxu1  ;;  %v4659_v29 = vsel %vm4531_vm5, %v4467_v4, %v4595_v11 }
 0x5db   : > { %v4140_v50 = vpop.f32.mrb[174].mxu1  ;;  %v4660_v44 = vsel %vm4532_vm4, %v4468_v60, %v4596_v48 }
 0x5dc   : > { %v4367_v46 = vpack.c.bf16 %v4140_v50, %v4136_v49  ;;  %v4142_v35 = vpop.f32.mrb[175].mxu1  ;;  %5027 = vmatprep.mubr.bf16.mxu0 %v4660_v44 }
 0x5dd   : > { %v4368_v6 = vpack.c.bf16 %v4142_v35, %v4138_v51  ;;  %5028 = vmatmul.mubr.bf16.gmra.mrb[40].mxu0 %v4659_v29 }
 0x5de   : > { %v4469_v7 = vadd.bf16 %v10975_v24, %v4367_v46 }
 0x5df   : > { %v4470_v45 = vadd.bf16 %v10979_v5, %v4368_v6 }
 0x5e0   : > { %v4597_v63 = vmul.bf16 1045249613, %v4469_v7  ;;  %vm4533_vm7 = vcmp.gt.bf16.partialorder %v4469_v7, 0 }
 0x5e1   : > { %v4146_v15 = vpop.f32.mrb[176].mxu1  ;;  %vm4534_vm6 = vcmp.gt.bf16.partialorder %v4470_v45, 0  ;;  %v4598_v0 = vmul.bf16 1045249613, %v4470_v45 }
 0x5e2   : > { %v4148_v31 = vpop.f32.mrb[177].mxu1  ;;  %v4661_v22 = vsel %vm4533_vm7, %v4469_v7, %v4597_v63 }
 0x5e3   : > { %v4150_v61 = vpop.f32.mrb[178].mxu1  ;;  %v4662_v19 = vsel %vm4534_vm6, %v4470_v45, %v4598_v0 }
 0x5e4   : > { %v4369_v43 = vpack.c.bf16 %v4150_v61, %v4146_v15  ;;  %v4152_v17 = vpop.f32.mrb[179].mxu1  ;;  %5037 = vmatprep.mubr.bf16.mxu0 %v4662_v19 }
 0x5e5   : > { %v4370_v9 = vpack.c.bf16 %v4152_v17, %v4148_v31  ;;  %5038 = vmatmul.mubr.bf16.gmra.mrb[44].mxu0 %v4661_v22 }
 0x5e6   : > { %v4471_v8 = vadd.bf16 %v10975_v24, %v4369_v43 }
 0x5e7   : > { %v4472_v42 = vadd.bf16 %v10979_v5, %v4370_v9 }
 0x5e8   : > { %v4599_v14 = vmul.bf16 1045249613, %v4471_v8  ;;  %vm4535_vm9 = vcmp.gt.bf16.partialorder %v4471_v8, 0 }
 0x5e9   : > { %v4156_v28 = vpop.f32.mrb[180].mxu1  ;;  %vm4536_vm8 = vcmp.gt.bf16.partialorder %v4472_v42, 0  ;;  %v4600_v58 = vmul.bf16 1045249613, %v4472_v42 }
 0x5ea   : > { %v4158_v38 = vpop.f32.mrb[181].mxu1  ;;  %v4663_v56 = vsel %vm4535_vm9, %v4471_v8, %v4599_v14 }
 0x5eb   : > { %v4160_v12 = vpop.f32.mrb[182].mxu1  ;;  %v4664_v34 = vsel %vm4536_vm8, %v4472_v42, %v4600_v58 }
 0x5ec   : > { %v4371_v37 = vpack.c.bf16 %v4160_v12, %v4156_v28  ;;  %v4162_v21 = vpop.f32.mrb[183].mxu1  ;;  %5047 = vmatprep.mubr.bf16.mxu0 %v4664_v34 }
 0x5ed   : > { %v4372_v25 = vpack.c.bf16 %v4162_v21, %v4158_v38  ;;  %5048 = vmatmul.mubr.bf16.gmra.mrb[48].mxu0 %v4663_v56 }
 0x5ee   : > { %v4473_v3 = vadd.bf16 %v10975_v24, %v4371_v37 }
 0x5ef   : > { %v4474_v1 = vadd.bf16 %v10979_v5, %v4372_v25 }
 0x5f0   : > { %v4601_v16 = vmul.bf16 1045249613, %v4473_v3  ;;  %vm4537_vm11 = vcmp.gt.bf16.partialorder %v4473_v3, 0 }
 0x5f1   : > { %v4166_v18 = vpop.f32.mrb[184].mxu1  ;;  %vm4538_vm10 = vcmp.gt.bf16.partialorder %v4474_v1, 0  ;;  %v4602_v40 = vmul.bf16 1045249613, %v4474_v1 }
 0x5f2   : > { %v4168_v57 = vpop.f32.mrb[185].mxu1  ;;  %v4665_v53 = vsel %vm4537_vm11, %v4473_v3, %v4601_v16 }
 0x5f3   : > { %v4170_v23 = vpop.f32.mrb[186].mxu1  ;;  %v4666_v41 = vsel %vm4538_vm10, %v4474_v1, %v4602_v40 }
 0x5f4   : > { %v4373_v26 = vpack.c.bf16 %v4170_v23, %v4166_v18  ;;  %v4172_v47 = vpop.f32.mrb[187].mxu1  ;;  %5057 = vmatprep.mubr.bf16.mxu0 %v4666_v41 }
 0x5f5   : > { %v4374_v52 = vpack.c.bf16 %v4172_v47, %v4168_v57  ;;  %5058 = vmatmul.mubr.bf16.gmra.mrb[52].mxu0 %v4665_v53 }
 0x5f6   : > { %v4475_v54 = vadd.bf16 %v10975_v24, %v4373_v26 }
 0x5f7   : > { %v4476_v33 = vadd.bf16 %v10979_v5, %v4374_v52 }
 0x5f8   : > { %v4603_v55 = vmul.bf16 1045249613, %v4475_v54  ;;  %vm4539_vm13 = vcmp.gt.bf16.partialorder %v4475_v54, 0 }
 0x5f9   : > { %v4176_v30 = vpop.f32.mrb[188].mxu1  ;;  %vm4540_vm12 = vcmp.gt.bf16.partialorder %v4476_v33, 0  ;;  %v4604_v39 = vmul.bf16 1045249613, %v4476_v33 }
 0x5fa   : > { %v4178_v2 = vpop.f32.mrb[189].mxu1  ;;  %v4667_v11 = vsel %vm4539_vm13, %v4475_v54, %v4603_v55 }
 0x5fb   : > { %v4180_v36 = vpop.f32.mrb[190].mxu1  ;;  %v4668_v59 = vsel %vm4540_vm12, %v4476_v33, %v4604_v39 }
 0x5fc   : > { %v4375_v4 = vpack.c.bf16 %v4180_v36, %v4176_v30  ;;  %v4182_v60 = vpop.f32.mrb[191].mxu1  ;;  %5067 = vmatprep.mubr.bf16.mxu0 %v4668_v59 }
 0x5fd   : > { %v4376_v49 = vpack.c.bf16 %v4182_v60, %v4178_v2  ;;  %5068 = vmatmul.mubr.bf16.gmra.mrb[56].mxu0 %v4667_v11 }
 0x5fe   : > { %v4477_v48 = vadd.bf16 %v10975_v24, %v4375_v4 }
 0x5ff   : > { %v4478_v51 = vadd.bf16 %v10979_v5, %v4376_v49 }
 0x600   : > { %v4605_v50 = vmul.bf16 1045249613, %v4477_v48  ;;  %vm4541_vm15 = vcmp.gt.bf16.partialorder %v4477_v48, 0 }
 0x601   : > { %v4186_v44 = vpop.f32.mrb[192].mxu1  ;;  %vm4542_vm14 = vcmp.gt.bf16.partialorder %v4478_v51, 0  ;;  %v4606_v46 = vmul.bf16 1045249613, %v4478_v51 }
 0x602   : > { %v4188_v35 = vpop.f32.mrb[193].mxu1  ;;  %v4669_v63 = vsel %vm4541_vm15, %v4477_v48, %v4605_v50 }
 0x603   : > { %v4190_v29 = vpop.f32.mrb[194].mxu1  ;;  %v4670_v6 = vsel %vm4542_vm14, %v4478_v51, %v4606_v46 }
 0x604   : > { %v4377_v7 = vpack.c.bf16 %v4190_v29, %v4186_v44  ;;  %v4192_v45 = vpop.f32.mrb[195].mxu1  ;;  %5077 = vmatprep.mubr.bf16.mxu0 %v4670_v6 }
 0x605   : > { %v4378_v15 = vpack.c.bf16 %v4192_v45, %v4188_v35  ;;  %5078 = vmatmul.mubr.bf16.gmra.mrb[60].mxu0 %v4669_v63 }
 0x606   : > { %v4479_v0 = vadd.bf16 %v10975_v24, %v4377_v7 }
 0x607   : > { %v4480_v31 = vadd.bf16 %v10979_v5, %v4378_v15 }
 0x608   : > { %v4607_v27 = vmul.bf16 1045249613, %v4479_v0  ;;  %vm4543_vm1 = vcmp.gt.bf16.partialorder %v4479_v0, 0 }
 0x609   : > { %v4196_v62 = vpop.f32.mrb[196].mxu1  ;;  %vm4544_vm0 = vcmp.gt.bf16.partialorder %v4480_v31, 0  ;;  %v4608_v61 = vmul.bf16 1045249613, %v4480_v31 }
 0x60a   : > { %v4198_v19 = vpop.f32.mrb[197].mxu1  ;;  %v4671_v8 = vsel %vm4543_vm1, %v4479_v0, %v4607_v27 }
 0x60b   : > { %v4200_v43 = vpop.f32.mrb[198].mxu1  ;;  %v4672_v17 = vsel %vm4544_vm0, %v4480_v31, %v4608_v61 }
 0x60c   : > { %v4379_v22 = vpack.c.bf16 %v4200_v43, %v4196_v62  ;;  %v4202_v9 = vpop.f32.mrb[199].mxu1  ;;  %5087 = vmatprep.mubr.bf16.mxu0 %v4672_v17 }
 0x60d   : > { %v4380_v42 = vpack.c.bf16 %v4202_v9, %v4198_v19  ;;  %5088 = vmatmul.mubr.bf16.gmra.mrb[64].mxu0 %v4671_v8 }
 0x60e   : > { %v4481_v14 = vadd.bf16 %v10975_v24, %v4379_v22 }
 0x60f   : > { %v4482_v28 = vadd.bf16 %v10979_v5, %v4380_v42 }
 0x610   : > { %v4609_v58 = vmul.bf16 1045249613, %v4481_v14  ;;  %vm4545_vm3 = vcmp.gt.bf16.partialorder %v4481_v14, 0 }
 0x611   : > { %v4206_v38 = vpop.f32.mrb[200].mxu1  ;;  %vm4546_vm2 = vcmp.gt.bf16.partialorder %v4482_v28, 0  ;;  %v4610_v12 = vmul.bf16 1045249613, %v4482_v28 }
 0x612   : > { %v4208_v34 = vpop.f32.mrb[201].mxu1  ;;  %v4673_v3 = vsel %vm4545_vm3, %v4481_v14, %v4609_v58 }
 0x613   : > { %v4210_v37 = vpop.f32.mrb[202].mxu1  ;;  %v4674_v21 = vsel %vm4546_vm2, %v4482_v28, %v4610_v12 }
 0x614   : > { %v4381_v56 = vpack.c.bf16 %v4210_v37, %v4206_v38  ;;  %v4212_v25 = vpop.f32.mrb[203].mxu1  ;;  %5097 = vmatprep.mubr.bf16.mxu0 %v4674_v21 }
 0x615   : > { %v4382_v1 = vpack.c.bf16 %v4212_v25, %v4208_v34  ;;  %5098 = vmatmul.mubr.bf16.gmra.mrb[68].mxu0 %v4673_v3 }
 0x616   : > { %v4483_v16 = vadd.bf16 %v10975_v24, %v4381_v56 }
 0x617   : > { %v4484_v18 = vadd.bf16 %v10979_v5, %v4382_v1 }
 0x618   : > { %v4611_v40 = vmul.bf16 1045249613, %v4483_v16  ;;  %vm4547_vm5 = vcmp.gt.bf16.partialorder %v4483_v16, 0 }
 0x619   : > { %v4216_v57 = vpop.f32.mrb[204].mxu1  ;;  %vm4548_vm4 = vcmp.gt.bf16.partialorder %v4484_v18, 0  ;;  %v4612_v23 = vmul.bf16 1045249613, %v4484_v18 }
 0x61a   : > { %v4218_v41 = vpop.f32.mrb[205].mxu1  ;;  %v4675_v54 = vsel %vm4547_vm5, %v4483_v16, %v4611_v40 }
 0x61b   : > { %v4220_v26 = vpop.f32.mrb[206].mxu1  ;;  %v4676_v47 = vsel %vm4548_vm4, %v4484_v18, %v4612_v23 }
 0x61c   : > { %v4383_v53 = vpack.c.bf16 %v4220_v26, %v4216_v57  ;;  %v4222_v52 = vpop.f32.mrb[207].mxu1  ;;  %5107 = vmatprep.mubr.bf16.mxu0 %v4676_v47 }
 0x61d   : > { %v4384_v33 = vpack.c.bf16 %v4222_v52, %v4218_v41  ;;  %5108 = vmatmul.mubr.bf16.gmra.mrb[72].mxu0 %v4675_v54 }
 0x61e   : > { %v4485_v55 = vadd.bf16 %v10975_v24, %v4383_v53 }
 0x61f   : > { %v4486_v30 = vadd.bf16 %v10979_v5, %v4384_v33 }
 0x620   : > { %v4613_v39 = vmul.bf16 1045249613, %v4485_v55  ;;  %vm4549_vm7 = vcmp.gt.bf16.partialorder %v4485_v55, 0 }
 0x621   : > { %v4226_v2 = vpop.f32.mrb[208].mxu1  ;;  %vm4550_vm6 = vcmp.gt.bf16.partialorder %v4486_v30, 0  ;;  %v4614_v36 = vmul.bf16 1045249613, %v4486_v30 }
 0x622   : > { %v4228_v59 = vpop.f32.mrb[209].mxu1  ;;  %v4677_v48 = vsel %vm4549_vm7, %v4485_v55, %v4613_v39 }
 0x623   : > { %v4230_v4 = vpop.f32.mrb[210].mxu1  ;;  %v4678_v60 = vsel %vm4550_vm6, %v4486_v30, %v4614_v36 }
 0x624   : > { %v4385_v11 = vpack.c.bf16 %v4230_v4, %v4226_v2  ;;  %v4232_v49 = vpop.f32.mrb[211].mxu1  ;;  %5117 = vmatprep.mubr.bf16.mxu0 %v4678_v60 }
 0x625   : > { %v4386_v51 = vpack.c.bf16 %v4232_v49, %v4228_v59  ;;  %5118 = vmatmul.mubr.bf16.gmra.mrb[76].mxu0 %v4677_v48 }
 0x626   : > { %v4487_v50 = vadd.bf16 %v10975_v24, %v4385_v11 }
 0x627   : > { %v4488_v44 = vadd.bf16 %v10979_v5, %v4386_v51 }
 0x628   : > { %v4615_v46 = vmul.bf16 1045249613, %v4487_v50  ;;  %vm4551_vm9 = vcmp.gt.bf16.partialorder %v4487_v50, 0 }
 0x629   : > { %v4236_v35 = vpop.f32.mrb[212].mxu1  ;;  %vm4552_vm8 = vcmp.gt.bf16.partialorder %v4488_v44, 0  ;;  %v4616_v29 = vmul.bf16 1045249613, %v4488_v44 }
 0x62a   : > { %v4238_v6 = vpop.f32.mrb[213].mxu1  ;;  %v4679_v0 = vsel %vm4551_vm9, %v4487_v50, %v4615_v46 }
 0x62b   : > { %v4240_v7 = vpop.f32.mrb[214].mxu1  ;;  %v4680_v45 = vsel %vm4552_vm8, %v4488_v44, %v4616_v29 }
 0x62c   : > { %v4387_v63 = vpack.c.bf16 %v4240_v7, %v4236_v35  ;;  %v4242_v15 = vpop.f32.mrb[215].mxu1  ;;  %5127 = vmatprep.mubr.bf16.mxu0 %v4680_v45 }
 0x62d   : > { %v4388_v31 = vpack.c.bf16 %v4242_v15, %v4238_v6  ;;  %5128 = vmatmul.mubr.bf16.gmra.mrb[80].mxu0 %v4679_v0 }
 0x62e   : > { %v4489_v27 = vadd.bf16 %v10975_v24, %v4387_v63 }
 0x62f   : > { %v4490_v62 = vadd.bf16 %v10979_v5, %v4388_v31 }
 0x630   : > { %v4617_v61 = vmul.bf16 1045249613, %v4489_v27  ;;  %vm4553_vm11 = vcmp.gt.bf16.partialorder %v4489_v27, 0 }
 0x631   : > { %v4246_v19 = vpop.f32.mrb[216].mxu1  ;;  %vm4554_vm10 = vcmp.gt.bf16.partialorder %v4490_v62, 0  ;;  %v4618_v43 = vmul.bf16 1045249613, %v4490_v62 }
 0x632   : > { %v4248_v17 = vpop.f32.mrb[217].mxu1  ;;  %v4681_v14 = vsel %vm4553_vm11, %v4489_v27, %v4617_v61  ;;  %v7716_v27 = vld.sshfl [vmem:[#allocation20] sm:$0x11 pattern:$0x75316420] }
 0x633   : > { %v4250_v22 = vpop.f32.mrb[218].mxu1  ;;  %v4682_v9 = vsel %vm4554_vm10, %v4490_v62, %v4618_v43 }
 0x634   : > { %v4389_v8 = vpack.c.bf16 %v4250_v22, %v4246_v19  ;;  %v4252_v42 = vpop.f32.mrb[219].mxu1  ;;  %5137 = vmatprep.mubr.bf16.mxu0 %v4682_v9 }
 0x635   : > { %v4390_v28 = vpack.c.bf16 %v4252_v42, %v4248_v17  ;;  %5138 = vmatmul.mubr.bf16.gmra.mrb[84].mxu0 %v4681_v14  ;;  %v5321_v17 = vcombine.high %v7716_v27, %v7716_v27  ;;  %v5328_v14 = vrot.slane %v7716_v27, %v10231_v13 }
 0x636   : > { %v4491_v58 = vadd.bf16 %v10975_v24, %v4389_v8 }
 0x637   : > { %v4492_v38 = vadd.bf16 %v10979_v5, %v4390_v28 }
 0x638   : > { %v4619_v12 = vmul.bf16 1045249613, %v4491_v58  ;;  %vm4555_vm13 = vcmp.gt.bf16.partialorder %v4491_v58, 0 }
 0x639   : > { %v4256_v34 = vpop.f32.mrb[220].mxu1  ;;  %vm4556_vm12 = vcmp.gt.bf16.partialorder %v4492_v38, 0  ;;  %v4620_v37 = vmul.bf16 1045249613, %v4492_v38 }
 0x63a   : > { %v4258_v21 = vpop.f32.mrb[221].mxu1  ;;  %v4683_v16 = vsel %vm4555_vm13, %v4491_v58, %v4619_v12 }
 0x63b   : > { %v4260_v56 = vpop.f32.mrb[222].mxu1  ;;  %v4684_v25 = vsel %vm4556_vm12, %v4492_v38, %v4620_v37  ;;  %v5335_v38 = vrot.slane %v5321_v17, %v10231_v13 }
 0x63c   : > { %v4391_v3 = vpack.c.bf16 %v4260_v56, %v4256_v34  ;;  %v4262_v1 = vpop.f32.mrb[223].mxu1  ;;  %5147 = vmatprep.mubr.bf16.mxu0 %v4684_v25  ;;  %v5337_v25 = vpack.i.b16 %v5328_v14, %v5328_v14 }
 0x63d   : > { %v4392_v18 = vpack.c.bf16 %v4262_v1, %v4258_v21  ;;  %5148 = vmatmul.mubr.bf16.gmra.mrb[88].mxu0 %v4683_v16  ;;  %v5344_v1 = vpack.i.b16 %v5335_v38, %v5335_v38 }
 0x63e   : > { %v4493_v40 = vadd.bf16 %v10975_v24, %v4391_v3 }
 0x63f   : > { %v4494_v57 = vadd.bf16 %v10979_v5, %v4392_v18 }
 0x640   : > { %v4621_v23 = vmul.bf16 1045249613, %v4493_v40  ;;  %vm4557_vm15 = vcmp.gt.bf16.partialorder %v4493_v40, 0 }
 0x641   : > { %v4266_v41 = vpop.f32.mrb[224].mxu1  ;;  %vm4558_vm14 = vcmp.gt.bf16.partialorder %v4494_v57, 0  ;;  %v4622_v26 = vmul.bf16 1045249613, %v4494_v57 }
 0x642   : > { %v4268_v47 = vpop.f32.mrb[225].mxu1  ;;  %v4685_v55 = vsel %vm4557_vm15, %v4493_v40, %v4621_v23 }
 0x643   : > { %v4270_v53 = vpop.f32.mrb[226].mxu1  ;;  %v4686_v52 = vsel %vm4558_vm14, %v4494_v57, %v4622_v26 }
 0x644   : > { %v4393_v54 = vpack.c.bf16 %v4270_v53, %v4266_v41  ;;  %v4272_v33 = vpop.f32.mrb[227].mxu1  ;;  %5157 = vmatprep.mubr.bf16.mxu0 %v4686_v52  ;;  %v11089_v41 = vrot.slane %v5337_v25, %v10238_v20  ;;  %v11092_v53 = vrot.slane %v5344_v1, %v10238_v20 }
 0x645   : > { %v4394_v30 = vpack.c.bf16 %v4272_v33, %v4268_v47  ;;  %5158 = vmatmul.mubr.bf16.gmra.mrb[92].mxu0 %v4685_v55 }
 0x646   : > { %v4495_v39 = vadd.bf16 %v10975_v24, %v4393_v54 }
 0x647   : > { %v4496_v2 = vadd.bf16 %v10979_v5, %v4394_v30 }
 0x648   : > { %v4623_v36 = vmul.bf16 1045249613, %v4495_v39  ;;  %vm4559_vm1 = vcmp.gt.bf16.partialorder %v4495_v39, 0 }
 0x649   : > { %v4276_v59 = vpop.f32.mrb[228].mxu1  ;;  %vm4560_vm0 = vcmp.gt.bf16.partialorder %v4496_v2, 0  ;;  %v4624_v4 = vmul.bf16 1045249613, %v4496_v2 }
 0x64a   : > { %v4278_v60 = vpop.f32.mrb[229].mxu1  ;;  %v4687_v50 = vsel %vm4559_vm1, %v4495_v39, %v4623_v36 }
 0x64b   : > { %v4280_v11 = vpop.f32.mrb[230].mxu1  ;;  %v4688_v49 = vsel %vm4560_vm0, %v4496_v2, %v4624_v4 }
 0x64c   : > { %v4395_v48 = vpack.c.bf16 %v4280_v11, %v4276_v59  ;;  %v4282_v51 = vpop.f32.mrb[231].mxu1  ;;  %5167 = vmatprep.mubr.bf16.mxu0 %v4688_v49 }
 0x64d   : > { %v4396_v44 = vpack.c.bf16 %v4282_v51, %v4278_v60  ;;  %5168 = vmatmul.mubr.bf16.gmra.mrb[96].mxu0 %v4687_v50 }
 0x64e   : > { %v4497_v46 = vadd.bf16 %v10975_v24, %v4395_v48 }
 0x64f   : > { %v4498_v35 = vadd.bf16 %v10979_v5, %v4396_v44 }
 0x650   : > { %v4625_v29 = vmul.bf16 1045249613, %v4497_v46  ;;  %vm4561_vm3 = vcmp.gt.bf16.partialorder %v4497_v46, 0 }
 0x651   : > { %v4286_v6 = vpop.f32.mrb[232].mxu1  ;;  %vm4562_vm2 = vcmp.gt.bf16.partialorder %v4498_v35, 0  ;;  %v4626_v7 = vmul.bf16 1045249613, %v4498_v35 }
 0x652   : > { %v4288_v45 = vpop.f32.mrb[233].mxu1  ;;  %v4689_v62 = vsel %vm4561_vm3, %v4497_v46, %v4625_v29 }
 0x653   : > { %v4290_v63 = vpop.f32.mrb[234].mxu1  ;;  %v4690_v15 = vsel %vm4562_vm2, %v4498_v35, %v4626_v7 }
 0x654   : > { %v4397_v0 = vpack.c.bf16 %v4290_v63, %v4286_v6  ;;  %v4292_v31 = vpop.f32.mrb[235].mxu1  ;;  %5177 = vmatprep.mubr.bf16.mxu0 %v4690_v15 }
 0x655   : > { %v4398_v61 = vpack.c.bf16 %v4292_v31, %v4288_v45  ;;  %5178 = vmatmul.mubr.bf16.gmra.mrb[100].mxu0 %v4689_v62 }
 0x656   : > { %v4499_v19 = vadd.bf16 %v10975_v24, %v4397_v0 }
 0x657   : > { %v4500_v43 = vadd.bf16 %v10979_v5, %v4398_v61 }
 0x658   : > { %v4627_v22 = vmul.bf16 1045249613, %v4499_v19  ;;  %vm4563_vm5 = vcmp.gt.bf16.partialorder %v4499_v19, 0 }
 0x659   : > { %v4296_v9 = vpop.f32.mrb[236].mxu1  ;;  %vm4564_vm4 = vcmp.gt.bf16.partialorder %v4500_v43, 0  ;;  %v4628_v8 = vmul.bf16 1045249613, %v4500_v43 }
 0x65a   : > { %v4298_v42 = vpop.f32.mrb[237].mxu1  ;;  %v4691_v37 = vsel %vm4563_vm5, %v4499_v19, %v4627_v22 }
 0x65b   : > { %v4300_v28 = vpop.f32.mrb[238].mxu1  ;;  %v4692_v58 = vsel %vm4564_vm4, %v4500_v43, %v4628_v8 }
 0x65c   : > { %v4399_v12 = vpack.c.bf16 %v4300_v28, %v4296_v9  ;;  %v4302_v34 = vpop.f32.mrb[239].mxu1  ;;  %5187 = vmatprep.mubr.bf16.mxu0 %v4692_v58 }
 0x65d   : > { %v4400_v21 = vpack.c.bf16 %v4302_v34, %v4298_v42  ;;  %5188 = vmatmul.mubr.bf16.gmra.mrb[104].mxu0 %v4691_v37 }
 0x65e   : > { %v4501_v56 = vadd.bf16 %v10975_v24, %v4399_v12 }
 0x65f   : > { %v4502_v3 = vadd.bf16 %v10979_v5, %v4400_v21  ;;  %v4929_v18 = vpop.f32.mrb[0].mxu0 }
 0x660   : > { %v4629_v16 = vmul.bf16 1045249613, %v4501_v56  ;;  %vm4565_vm7 = vcmp.gt.bf16.partialorder %v4501_v56, 0  ;;  %v4931_v23 = vpop.f32.mrb[1].mxu0 }
 0x661   : > { %v4306_v40 = vpop.f32.mrb[240].mxu1  ;;  %vm4566_vm6 = vcmp.gt.bf16.partialorder %v4502_v3, 0  ;;  %v4630_v57 = vmul.bf16 1045249613, %v4502_v3  ;;  %v4933_v26 = vpop.f32.mrb[2].mxu0 }
 0x662   : > { %v4308_v13 = vpop.f32.mrb[241].mxu1  ;;  %v5248_v54 = vpack.c.bf16 %v4933_v26, %v4929_v18  ;;  %v4935_v55 = vpop.f32.mrb[3].mxu0  ;;  %v4693_v39 = vsel %vm4565_vm7, %v4501_v56, %v4629_v16 }
 0x663   : > { %v4310_v47 = vpop.f32.mrb[242].mxu1  ;;  %v4694_v52 = vsel %vm4566_vm6, %v4502_v3, %v4630_v57  ;;  %v5249_v2 = vpack.c.bf16 %v4935_v55, %v4931_v23 }
 0x664   : > { %v4401_v33 = vpack.c.bf16 %v4310_v47, %v4306_v40  ;;  %v4312_v30 = vpop.f32.mrb[243].mxu1  ;;  %5197 = vmatprep.mubr.bf16.mxu0 %v4694_v52  ;;  %v5350_v59 = vadd.bf16 %v11089_v41, %v5248_v54 }
 0x665   : > { %v4402_v36 = vpack.c.bf16 %v4312_v30, %v4308_v13  ;;  %5198 = vmatmul.mubr.bf16.gmra.mrb[108].mxu0 %v4693_v39  ;;  %v5351_v60 = vadd.bf16 %v11092_v53, %v5249_v2 }
 0x666   : > { %v4503_v4 = vadd.bf16 %v10975_v24, %v4401_v33  ;;  %vm5414_vm8 = vcmp.gt.bf16.partialorder %v5350_v59, 0  ;;  %v5478_v49 = vmul.bf16 1045249613, %v5350_v59 }
 0x667   : > { %v4504_v11 = vadd.bf16 %v10979_v5, %v4402_v36  ;;  %v4939_v51 = vpop.f32.mrb[4].mxu0  ;;  %vm5415_vm9 = vcmp.gt.bf16.partialorder %v5351_v60, 0  ;;  %v5479_v44 = vmul.bf16 1045249613, %v5351_v60 }
 0x668   : > { %v4631_v48 = vmul.bf16 1045249613, %v4503_v4  ;;  %vm4567_vm11 = vcmp.gt.bf16.partialorder %v4503_v4, 0  ;;  %v4941_v46 = vpop.f32.mrb[5].mxu0  ;;  %v5542_v63 = vsel %vm5414_vm8, %v5350_v59, %v5478_v49 }
 0x669   : > { %v4316_v50 = vpop.f32.mrb[244].mxu1  ;;  %vm4568_vm10 = vcmp.gt.bf16.partialorder %v4504_v11, 0  ;;  %v4632_v29 = vmul.bf16 1045249613, %v4504_v11  ;;  %v4943_v6 = vpop.f32.mrb[6].mxu0  ;;  %v5543_v45 = vsel %vm5415_vm9, %v5351_v60, %v5479_v44 }
 0x66a   : > { %v4318_v35 = vpop.f32.mrb[245].mxu1  ;;  %v5250_v15 = vpack.c.bf16 %v4943_v6, %v4939_v51  ;;  %v4945_v31 = vpop.f32.mrb[7].mxu0  ;;  %5842 = vmatprep.mubr.bf16.mxu1 %v5543_v45  ;;  %v4695_v61 = vsel %vm4567_vm11, %v4503_v4, %v4631_v48 }
 0x66b   : > { %v4320_v7 = vpop.f32.mrb[246].mxu1  ;;  %v4696_v62 = vsel %vm4568_vm10, %v4504_v11, %v4632_v29  ;;  %v5251_v19 = vpack.c.bf16 %v4945_v31, %v4941_v46  ;;  %5843 = vmatmul.mubr.bf16.vlgmr.msra.gmra.mrb[0].mxu1 %v5542_v63 }
 0x66c   : > { %v4403_v0 = vpack.c.bf16 %v4320_v7, %v4316_v50  ;;  %v4322_v27 = vpop.f32.mrb[247].mxu1  ;;  %5207 = vmatprep.mubr.bf16.mxu0 %v4696_v62  ;;  %v5352_v17 = vadd.bf16 %v11089_v41, %v5250_v15 }
 0x66d   : > { %v4404_v43 = vpack.c.bf16 %v4322_v27, %v4318_v35  ;;  %5208 = vmatmul.mubr.bf16.gmra.mrb[112].mxu0 %v4695_v61  ;;  %v5353_v9 = vadd.bf16 %v11092_v53, %v5251_v19 }
 0x66e   : > { %v4505_v22 = vadd.bf16 %v10975_v24, %v4403_v0  ;;  %vm5416_vm12 = vcmp.gt.bf16.partialorder %v5352_v17, 0  ;;  %v5480_v42 = vmul.bf16 1045249613, %v5352_v17 }
 0x66f   : > { %v4506_v8 = vadd.bf16 %v10979_v5, %v4404_v43  ;;  %vm5417_vm13 = vcmp.gt.bf16.partialorder %v5353_v9, 0  ;;  %v5481_v38 = vmul.bf16 1045249613, %v5353_v9 }
 0x670   : > { %v4633_v14 = vmul.bf16 1045249613, %v4505_v22  ;;  %v4949_v28 = vpop.f32.mrb[8].mxu0  ;;  %vm4569_vm15 = vcmp.gt.bf16.partialorder %v4505_v22, 0  ;;  %v5544_v3 = vsel %vm5416_vm12, %v5352_v17, %v5480_v42 }
 0x671   : > { %v4326_v58 = vpop.f32.mrb[248].mxu1  ;;  %vm4570_vm14 = vcmp.gt.bf16.partialorder %v4506_v8, 0  ;;  %v4951_v12 = vpop.f32.mrb[9].mxu0  ;;  %v4634_v37 = vmul.bf16 1045249613, %v4506_v8  ;;  %v5545_v25 = vsel %vm5417_vm13, %v5353_v9, %v5481_v38 }
 0x672   : > { %v4328_v34 = vpop.f32.mrb[249].mxu1  ;;  %v4953_v21 = vpop.f32.mrb[10].mxu0  ;;  %5852 = vmatprep.mubr.bf16.mxu1 %v5545_v25  ;;  %v4697_v23 = vsel %vm4569_vm15, %v4505_v22, %v4633_v14 }
 0x673   : > { %v4330_v56 = vpop.f32.mrb[250].mxu1  ;;  %v5252_v1 = vpack.c.bf16 %v4953_v21, %v4949_v28  ;;  %v4955_v18 = vpop.f32.mrb[11].mxu0  ;;  %v4698_v57 = vsel %vm4570_vm14, %v4506_v8, %v4634_v37  ;;  %5853 = vmatmul.mubr.bf16.gmra.mrb[4].mxu1 %v5544_v3 }
 0x674   : > { %v4405_v16 = vpack.c.bf16 %v4330_v56, %v4326_v58  ;;  %v4332_v40 = vpop.f32.mrb[251].mxu1  ;;  %v5253_v13 = vpack.c.bf16 %v4955_v18, %v4951_v12  ;;  %5217 = vmatprep.mubr.bf16.mxu0 %v4698_v57 }
 0x675   : > { %v4406_v26 = vpack.c.bf16 %v4332_v40, %v4328_v34  ;;  %v5354_v47 = vadd.bf16 %v11089_v41, %v5252_v1  ;;  %5218 = vmatmul.mubr.bf16.gmra.mrb[116].mxu0 %v4697_v23 }
 0x676   : > { %v4507_v52 = vadd.bf16 %v10975_v24, %v4405_v16  ;;  %v5355_v54 = vadd.bf16 %v11092_v53, %v5253_v13 }
 0x677   : > { %v4508_v33 = vadd.bf16 %v10979_v5, %v4406_v26  ;;  %vm5418_vm0 = vcmp.gt.bf16.partialorder %v5354_v47, 0  ;;  %v5482_v55 = vmul.bf16 1045249613, %v5354_v47 }
 0x678   : > { %v4635_v30 = vmul.bf16 1045249613, %v4507_v52  ;;  %v4959_v39 = vpop.f32.mrb[12].mxu0  ;;  %vm5419_vm1 = vcmp.gt.bf16.partialorder %v5355_v54, 0  ;;  %v5483_v36 = vmul.bf16 1045249613, %v5355_v54 }
 0x679   : > { %v4336_v2 = vpop.f32.mrb[252].mxu1  ;;  %vm4572_vm2 = vcmp.gt.bf16.partialorder %v4508_v33, 0  ;;  %vm4571_vm3 = vcmp.gt.bf16.partialorder %v4507_v52, 0  ;;  %v4961_v59 = vpop.f32.mrb[13].mxu0  ;;  %v4636_v60 = vmul.bf16 1045249613, %v4508_v33  ;;  %v5546_v51 = vsel %vm5418_vm0, %v5354_v47, %v5482_v55 }
 0x67a   : > { %v4338_v4 = vpop.f32.mrb[253].mxu1  ;;  %v4963_v11 = vpop.f32.mrb[14].mxu0  ;;  %v5547_v48 = vsel %vm5419_vm1, %v5355_v54, %v5483_v36  ;;  %v4699_v6 = vsel %vm4571_vm3, %v4507_v52, %v4635_v30 }
 0x67b   : > { %v4340_v49 = vpop.f32.mrb[254].mxu1  ;;  %v5254_v50 = vpack.c.bf16 %v4963_v11, %v4959_v39  ;;  %v4965_v46 = vpop.f32.mrb[15].mxu0  ;;  %5862 = vmatprep.mubr.bf16.mxu1 %v5547_v48  ;;  %v4700_v29 = vsel %vm4572_vm2, %v4508_v33, %v4636_v60 }
 0x67c   : > { %v4407_v44 = vpack.c.bf16 %v4340_v49, %v4336_v2  ;;  %v4342_v35 = vpop.f32.mrb[255].mxu1  ;;  %v5255_v7 = vpack.c.bf16 %v4965_v46, %v4961_v59  ;;  %5227 = vmatprep.mubr.bf16.mxu0 %v4700_v29  ;;  %5863 = vmatmul.mubr.bf16.gmra.mrb[8].mxu1 %v5546_v51 }
 0x67d   : > { %v4408_v45 = vpack.c.bf16 %v4342_v35, %v4338_v4  ;;  %v5356_v63 = vadd.bf16 %v11089_v41, %v5254_v50  ;;  %5228 = vmatmul.mubr.bf16.gmra.mrb[120].mxu0 %v4699_v6 }
 0x67e   : > { %v4509_v15 = vadd.bf16 %v10975_v24, %v4407_v44  ;;  %v5357_v0 = vadd.bf16 %v11092_v53, %v5255_v7 }
 0x67f   : > { %v4510_v31 = vadd.bf16 %v10979_v5, %v4408_v45  ;;  %v5484_v27 = vmul.bf16 1045249613, %v5356_v63  ;;  %vm5420_vm4 = vcmp.gt.bf16.partialorder %v5356_v63, 0 }
 0x680   : > { %v4637_v62 = vmul.bf16 1045249613, %v4509_v15  ;;  %v4969_v61 = vpop.f32.mrb[16].mxu0  ;;  %vm5421_vm5 = vcmp.gt.bf16.partialorder %v5357_v0, 0  ;;  %v5485_v19 = vmul.bf16 1045249613, %v5357_v0 }
 0x681   : > { %vm4574_vm6 = vcmp.gt.bf16.partialorder %v4510_v31, 0  ;;  %vm4573_vm7 = vcmp.gt.bf16.partialorder %v4509_v15, 0  ;;  %v4971_v43 = vpop.f32.mrb[17].mxu0  ;;  %v4638_v17 = vmul.bf16 1045249613, %v4510_v31  ;;  %v5548_v8 = vsel %vm5420_vm4, %v5356_v63, %v5484_v27 }
 0x682   : > { %v4973_v22 = vpop.f32.mrb[18].mxu0  ;;  %v5549_v9 = vsel %vm5421_vm5, %v5357_v0, %v5485_v19  ;;  %v4701_v28 = vsel %vm4573_vm7, %v4509_v15, %v4637_v62 }
 0x683   : > { %v5256_v42 = vpack.c.bf16 %v4973_v22, %v4969_v61  ;;  %v4975_v24 = vpop.f32.mrb[19].mxu0  ;;  %5872 = vmatprep.mubr.bf16.mxu1 %v5549_v9  ;;  %v4702_v14 = vsel %vm4574_vm6, %v4510_v31, %v4638_v17 }
 0x684   : > { %v5257_v58 = vpack.c.bf16 %v4975_v24, %v4971_v43  ;;  %5237 = vmatprep.mubr.bf16.mxu0 %v4702_v14  ;;  %5873 = vmatmul.mubr.bf16.gmra.mrb[12].mxu1 %v5548_v8 }
 0x685   : > { %v5358_v5 = vadd.bf16 %v11089_v41, %v5256_v42  ;;  %5238 = vmatmul.mubr.bf16.gmra.mrb[124].mxu0 %v4701_v28 }
 0x686   : > { %v5359_v38 = vadd.bf16 %v11092_v53, %v5257_v58 }
 0x687   : > { %v5486_v12 = vmul.bf16 1045249613, %v5358_v5  ;;  %vm5422_vm8 = vcmp.gt.bf16.partialorder %v5358_v5, 0 }
 0x688   : > { %v4979_v34 = vpop.f32.mrb[20].mxu0  ;;  %vm5423_vm9 = vcmp.gt.bf16.partialorder %v5359_v38, 0  ;;  %v5487_v37 = vmul.bf16 1045249613, %v5359_v38 }
 0x689   : > { %v4981_v21 = vpop.f32.mrb[21].mxu0  ;;  %v5550_v3 = vsel %vm5422_vm8, %v5358_v5, %v5486_v12 }
 0x68a   : > { %v4983_v56 = vpop.f32.mrb[22].mxu0  ;;  %v5551_v25 = vsel %vm5423_vm9, %v5359_v38, %v5487_v37 }
 0x68b   : > { %v5258_v1 = vpack.c.bf16 %v4983_v56, %v4979_v34  ;;  %v4985_v16 = vpop.f32.mrb[23].mxu0  ;;  %5882 = vmatprep.mubr.bf16.mxu1 %v5551_v25 }
 0x68c   : > { %v5259_v18 = vpack.c.bf16 %v4985_v16, %v4981_v21  ;;  %5883 = vmatmul.mubr.bf16.gmra.mrb[16].mxu1 %v5550_v3 }
 0x68d   : > { %v5360_v40 = vadd.bf16 %v11089_v41, %v5258_v1 }
 0x68e   : > { %v5361_v57 = vadd.bf16 %v11092_v53, %v5259_v18 }
 0x68f   : > { %v5488_v23 = vmul.bf16 1045249613, %v5360_v40  ;;  %vm5424_vm10 = vcmp.gt.bf16.partialorder %v5360_v40, 0 }
 0x690   : > { %v4989_v13 = vpop.f32.mrb[24].mxu0  ;;  %vm5425_vm11 = vcmp.gt.bf16.partialorder %v5361_v57, 0  ;;  %v5489_v26 = vmul.bf16 1045249613, %v5361_v57 }
 0x691   : > { %v4991_v47 = vpop.f32.mrb[25].mxu0  ;;  %v5552_v33 = vsel %vm5424_vm10, %v5360_v40, %v5488_v23 }
 0x692   : > { %v4993_v52 = vpop.f32.mrb[26].mxu0  ;;  %v5553_v54 = vsel %vm5425_vm11, %v5361_v57, %v5489_v26 }
 0x693   : > { %v5260_v55 = vpack.c.bf16 %v4993_v52, %v4989_v13  ;;  %v4995_v30 = vpop.f32.mrb[27].mxu0  ;;  %5892 = vmatprep.mubr.bf16.mxu1 %v5553_v54 }
 0x694   : > { %v5261_v39 = vpack.c.bf16 %v4995_v30, %v4991_v47  ;;  %5893 = vmatmul.mubr.bf16.gmra.mrb[20].mxu1 %v5552_v33 }
 0x695   : > { %v5362_v2 = vadd.bf16 %v11089_v41, %v5260_v55 }
 0x696   : > { %v5363_v36 = vadd.bf16 %v11092_v53, %v5261_v39 }
 0x697   : > { %v5490_v59 = vmul.bf16 1045249613, %v5362_v2  ;;  %vm5426_vm12 = vcmp.gt.bf16.partialorder %v5362_v2, 0 }
 0x698   : > { %v4999_v4 = vpop.f32.mrb[28].mxu0  ;;  %vm5427_vm13 = vcmp.gt.bf16.partialorder %v5363_v36, 0  ;;  %v5491_v60 = vmul.bf16 1045249613, %v5363_v36 }
 0x699   : > { %v5001_v11 = vpop.f32.mrb[29].mxu0  ;;  %v5554_v51 = vsel %vm5426_vm12, %v5362_v2, %v5490_v59 }
 0x69a   : > { %v5003_v49 = vpop.f32.mrb[30].mxu0  ;;  %v5555_v48 = vsel %vm5427_vm13, %v5363_v36, %v5491_v60 }
 0x69b   : > { %v5262_v50 = vpack.c.bf16 %v5003_v49, %v4999_v4  ;;  %v5005_v44 = vpop.f32.mrb[31].mxu0  ;;  %5902 = vmatprep.mubr.bf16.mxu1 %v5555_v48 }
 0x69c   : > { %v5263_v46 = vpack.c.bf16 %v5005_v44, %v5001_v11  ;;  %5903 = vmatmul.mubr.bf16.gmra.mrb[24].mxu1 %v5554_v51 }
 0x69d   : > { %v5364_v35 = vadd.bf16 %v11089_v41, %v5262_v50 }
 0x69e   : > { %v5365_v29 = vadd.bf16 %v11092_v53, %v5263_v46 }
 0x69f   : > { %v5492_v6 = vmul.bf16 1045249613, %v5364_v35  ;;  %vm5428_vm14 = vcmp.gt.bf16.partialorder %v5364_v35, 0 }
 0x6a0   : > { %v5009_v7 = vpop.f32.mrb[32].mxu0  ;;  %vm5429_vm15 = vcmp.gt.bf16.partialorder %v5365_v29, 0  ;;  %v5493_v45 = vmul.bf16 1045249613, %v5365_v29 }
 0x6a1   : > { %v5011_v63 = vpop.f32.mrb[33].mxu0  ;;  %v5556_v31 = vsel %vm5428_vm14, %v5364_v35, %v5492_v6 }
 0x6a2   : > { %v5013_v15 = vpop.f32.mrb[34].mxu0  ;;  %v5557_v0 = vsel %vm5429_vm15, %v5365_v29, %v5493_v45 }
 0x6a3   : > { %v5264_v27 = vpack.c.bf16 %v5013_v15, %v5009_v7  ;;  %v5015_v62 = vpop.f32.mrb[35].mxu0  ;;  %5912 = vmatprep.mubr.bf16.mxu1 %v5557_v0 }
 0x6a4   : > { %v5265_v61 = vpack.c.bf16 %v5015_v62, %v5011_v63  ;;  %5913 = vmatmul.mubr.bf16.gmra.mrb[28].mxu1 %v5556_v31 }
 0x6a5   : > { %v5366_v19 = vadd.bf16 %v11089_v41, %v5264_v27 }
 0x6a6   : > { %v5367_v43 = vadd.bf16 %v11092_v53, %v5265_v61 }
 0x6a7   : > { %v5494_v17 = vmul.bf16 1045249613, %v5366_v19  ;;  %vm5430_vm0 = vcmp.gt.bf16.partialorder %v5366_v19, 0 }
 0x6a8   : > { %v5019_v22 = vpop.f32.mrb[36].mxu0  ;;  %vm5431_vm1 = vcmp.gt.bf16.partialorder %v5367_v43, 0  ;;  %v5495_v9 = vmul.bf16 1045249613, %v5367_v43 }
 0x6a9   : > { %v5021_v8 = vpop.f32.mrb[37].mxu0  ;;  %v5558_v14 = vsel %vm5430_vm0, %v5366_v19, %v5494_v17 }
 0x6aa   : > { %v5023_v42 = vpop.f32.mrb[38].mxu0  ;;  %v5559_v24 = vsel %vm5431_vm1, %v5367_v43, %v5495_v9 }
 0x6ab   : > { %v5266_v28 = vpack.c.bf16 %v5023_v42, %v5019_v22  ;;  %v5025_v58 = vpop.f32.mrb[39].mxu0  ;;  %5922 = vmatprep.mubr.bf16.mxu1 %v5559_v24 }
 0x6ac   : > { %v5267_v5 = vpack.c.bf16 %v5025_v58, %v5021_v8  ;;  %5923 = vmatmul.mubr.bf16.gmra.mrb[32].mxu1 %v5558_v14 }
 0x6ad   : > { %v5368_v38 = vadd.bf16 %v11089_v41, %v5266_v28 }
 0x6ae   : > { %v5369_v12 = vadd.bf16 %v11092_v53, %v5267_v5 }
 0x6af   : > { %v5496_v34 = vmul.bf16 1045249613, %v5368_v38  ;;  %vm5432_vm2 = vcmp.gt.bf16.partialorder %v5368_v38, 0 }
 0x6b0   : > { %v5029_v37 = vpop.f32.mrb[40].mxu0  ;;  %vm5433_vm3 = vcmp.gt.bf16.partialorder %v5369_v12, 0  ;;  %v5497_v21 = vmul.bf16 1045249613, %v5369_v12 }
 0x6b1   : > { %v5031_v56 = vpop.f32.mrb[41].mxu0  ;;  %v5560_v1 = vsel %vm5432_vm2, %v5368_v38, %v5496_v34 }
 0x6b2   : > { %v5033_v25 = vpop.f32.mrb[42].mxu0  ;;  %v5561_v3 = vsel %vm5433_vm3, %v5369_v12, %v5497_v21 }
 0x6b3   : > { %v5268_v16 = vpack.c.bf16 %v5033_v25, %v5029_v37  ;;  %v5035_v18 = vpop.f32.mrb[43].mxu0  ;;  %5932 = vmatprep.mubr.bf16.mxu1 %v5561_v3 }
 0x6b4   : > { %v5269_v40 = vpack.c.bf16 %v5035_v18, %v5031_v56  ;;  %5933 = vmatmul.mubr.bf16.gmra.mrb[36].mxu1 %v5560_v1 }
 0x6b5   : > { %v5370_v57 = vadd.bf16 %v11089_v41, %v5268_v16 }
 0x6b6   : > { %v5371_v23 = vadd.bf16 %v11092_v53, %v5269_v40 }
 0x6b7   : > { %v5498_v13 = vmul.bf16 1045249613, %v5370_v57  ;;  %vm5434_vm4 = vcmp.gt.bf16.partialorder %v5370_v57, 0 }
 0x6b8   : > { %v5039_v26 = vpop.f32.mrb[44].mxu0  ;;  %vm5435_vm5 = vcmp.gt.bf16.partialorder %v5371_v23, 0  ;;  %v5499_v47 = vmul.bf16 1045249613, %v5371_v23 }
 0x6b9   : > { %v5041_v52 = vpop.f32.mrb[45].mxu0  ;;  %v5562_v55 = vsel %vm5434_vm4, %v5370_v57, %v5498_v13 }
 0x6ba   : > { %v5043_v54 = vpop.f32.mrb[46].mxu0  ;;  %v5563_v33 = vsel %vm5435_vm5, %v5371_v23, %v5499_v47 }
 0x6bb   : > { %v5270_v30 = vpack.c.bf16 %v5043_v54, %v5039_v26  ;;  %v5045_v39 = vpop.f32.mrb[47].mxu0  ;;  %5942 = vmatprep.mubr.bf16.mxu1 %v5563_v33 }
 0x6bc   : > { %v5271_v2 = vpack.c.bf16 %v5045_v39, %v5041_v52  ;;  %5943 = vmatmul.mubr.bf16.gmra.mrb[40].mxu1 %v5562_v55 }
 0x6bd   : > { %v5372_v36 = vadd.bf16 %v11089_v41, %v5270_v30 }
 0x6be   : > { %v5373_v59 = vadd.bf16 %v11092_v53, %v5271_v2 }
 0x6bf   : > { %v5500_v4 = vmul.bf16 1045249613, %v5372_v36  ;;  %vm5436_vm6 = vcmp.gt.bf16.partialorder %v5372_v36, 0 }
 0x6c0   : > { %v5049_v60 = vpop.f32.mrb[48].mxu0  ;;  %vm5437_vm7 = vcmp.gt.bf16.partialorder %v5373_v59, 0  ;;  %v5501_v11 = vmul.bf16 1045249613, %v5373_v59 }
 0x6c1   : > { %v5051_v49 = vpop.f32.mrb[49].mxu0  ;;  %v5564_v50 = vsel %vm5436_vm6, %v5372_v36, %v5500_v4 }
 0x6c2   : > { %v5053_v48 = vpop.f32.mrb[50].mxu0  ;;  %v5565_v51 = vsel %vm5437_vm7, %v5373_v59, %v5501_v11 }
 0x6c3   : > { %v5272_v44 = vpack.c.bf16 %v5053_v48, %v5049_v60  ;;  %v5055_v46 = vpop.f32.mrb[51].mxu0  ;;  %5952 = vmatprep.mubr.bf16.mxu1 %v5565_v51 }
 0x6c4   : > { %v5273_v35 = vpack.c.bf16 %v5055_v46, %v5051_v49  ;;  %5953 = vmatmul.mubr.bf16.gmra.mrb[44].mxu1 %v5564_v50 }
 0x6c5   : > { %v5374_v29 = vadd.bf16 %v11089_v41, %v5272_v44 }
 0x6c6   : > { %v5375_v6 = vadd.bf16 %v11092_v53, %v5273_v35 }
 0x6c7   : > { %v5502_v7 = vmul.bf16 1045249613, %v5374_v29  ;;  %vm5438_vm8 = vcmp.gt.bf16.partialorder %v5374_v29, 0 }
 0x6c8   : > { %v5059_v45 = vpop.f32.mrb[52].mxu0  ;;  %vm5439_vm9 = vcmp.gt.bf16.partialorder %v5375_v6, 0  ;;  %v5503_v63 = vmul.bf16 1045249613, %v5375_v6 }
 0x6c9   : > { %v5061_v15 = vpop.f32.mrb[53].mxu0  ;;  %v5566_v27 = vsel %vm5438_vm8, %v5374_v29, %v5502_v7 }
 0x6ca   : > { %v5063_v0 = vpop.f32.mrb[54].mxu0  ;;  %v5567_v31 = vsel %vm5439_vm9, %v5375_v6, %v5503_v63 }
 0x6cb   : > { %v5274_v62 = vpack.c.bf16 %v5063_v0, %v5059_v45  ;;  %v5065_v61 = vpop.f32.mrb[55].mxu0  ;;  %5962 = vmatprep.mubr.bf16.mxu1 %v5567_v31 }
 0x6cc   : > { %v5275_v19 = vpack.c.bf16 %v5065_v61, %v5061_v15  ;;  %5963 = vmatmul.mubr.bf16.gmra.mrb[48].mxu1 %v5566_v27 }
 0x6cd   : > { %v5376_v43 = vadd.bf16 %v11089_v41, %v5274_v62 }
 0x6ce   : > { %v5377_v17 = vadd.bf16 %v11092_v53, %v5275_v19 }
 0x6cf   : > { %v5504_v22 = vmul.bf16 1045249613, %v5376_v43  ;;  %vm5440_vm10 = vcmp.gt.bf16.partialorder %v5376_v43, 0 }
 0x6d0   : > { %v5069_v9 = vpop.f32.mrb[56].mxu0  ;;  %vm5441_vm11 = vcmp.gt.bf16.partialorder %v5377_v17, 0  ;;  %v5505_v8 = vmul.bf16 1045249613, %v5377_v17 }
 0x6d1   : > { %v5071_v42 = vpop.f32.mrb[57].mxu0  ;;  %v5568_v28 = vsel %vm5440_vm10, %v5376_v43, %v5504_v22 }
 0x6d2   : > { %v5073_v24 = vpop.f32.mrb[58].mxu0  ;;  %v5569_v14 = vsel %vm5441_vm11, %v5377_v17, %v5505_v8 }
 0x6d3   : > { %v5276_v58 = vpack.c.bf16 %v5073_v24, %v5069_v9  ;;  %v5075_v5 = vpop.f32.mrb[59].mxu0  ;;  %5972 = vmatprep.mubr.bf16.mxu1 %v5569_v14 }
 0x6d4   : > { %v5277_v38 = vpack.c.bf16 %v5075_v5, %v5071_v42  ;;  %5973 = vmatmul.mubr.bf16.gmra.mrb[52].mxu1 %v5568_v28 }
 0x6d5   : > { %v5378_v12 = vadd.bf16 %v11089_v41, %v5276_v58 }
 0x6d6   : > { %v5379_v34 = vadd.bf16 %v11092_v53, %v5277_v38 }
 0x6d7   : > { %v5506_v37 = vmul.bf16 1045249613, %v5378_v12  ;;  %vm5442_vm12 = vcmp.gt.bf16.partialorder %v5378_v12, 0 }
 0x6d8   : > { %v5079_v21 = vpop.f32.mrb[60].mxu0  ;;  %vm5443_vm13 = vcmp.gt.bf16.partialorder %v5379_v34, 0  ;;  %v5507_v56 = vmul.bf16 1045249613, %v5379_v34 }
 0x6d9   : > { %v5081_v25 = vpop.f32.mrb[61].mxu0  ;;  %v5570_v16 = vsel %vm5442_vm12, %v5378_v12, %v5506_v37 }
 0x6da   : > { %v5083_v3 = vpop.f32.mrb[62].mxu0  ;;  %v5571_v1 = vsel %vm5443_vm13, %v5379_v34, %v5507_v56 }
 0x6db   : > { %v5278_v18 = vpack.c.bf16 %v5083_v3, %v5079_v21  ;;  %v5085_v40 = vpop.f32.mrb[63].mxu0  ;;  %5982 = vmatprep.mubr.bf16.mxu1 %v5571_v1 }
 0x6dc   : > { %v5279_v57 = vpack.c.bf16 %v5085_v40, %v5081_v25  ;;  %5983 = vmatmul.mubr.bf16.gmra.mrb[56].mxu1 %v5570_v16 }
 0x6dd   : > { %v5380_v23 = vadd.bf16 %v11089_v41, %v5278_v18 }
 0x6de   : > { %v5381_v13 = vadd.bf16 %v11092_v53, %v5279_v57 }
 0x6df   : > { %v5508_v26 = vmul.bf16 1045249613, %v5380_v23  ;;  %vm5444_vm14 = vcmp.gt.bf16.partialorder %v5380_v23, 0 }
 0x6e0   : > { %v5089_v47 = vpop.f32.mrb[64].mxu0  ;;  %vm5445_vm15 = vcmp.gt.bf16.partialorder %v5381_v13, 0  ;;  %v5509_v52 = vmul.bf16 1045249613, %v5381_v13 }
 0x6e1   : > { %v5091_v54 = vpop.f32.mrb[65].mxu0  ;;  %v5572_v30 = vsel %vm5444_vm14, %v5380_v23, %v5508_v26 }
 0x6e2   : > { %v5093_v33 = vpop.f32.mrb[66].mxu0  ;;  %v5573_v55 = vsel %vm5445_vm15, %v5381_v13, %v5509_v52 }
 0x6e3   : > { %v5280_v39 = vpack.c.bf16 %v5093_v33, %v5089_v47  ;;  %v5095_v2 = vpop.f32.mrb[67].mxu0  ;;  %5992 = vmatprep.mubr.bf16.mxu1 %v5573_v55 }
 0x6e4   : > { %v5281_v36 = vpack.c.bf16 %v5095_v2, %v5091_v54  ;;  %5993 = vmatmul.mubr.bf16.gmra.mrb[60].mxu1 %v5572_v30 }
 0x6e5   : > { %v5382_v59 = vadd.bf16 %v11089_v41, %v5280_v39 }
 0x6e6   : > { %v5383_v4 = vadd.bf16 %v11092_v53, %v5281_v36 }
 0x6e7   : > { %v5510_v60 = vmul.bf16 1045249613, %v5382_v59  ;;  %vm5446_vm0 = vcmp.gt.bf16.partialorder %v5382_v59, 0 }
 0x6e8   : > { %v5099_v11 = vpop.f32.mrb[68].mxu0  ;;  %vm5447_vm1 = vcmp.gt.bf16.partialorder %v5383_v4, 0  ;;  %v5511_v49 = vmul.bf16 1045249613, %v5383_v4 }
 0x6e9   : > { %v5101_v48 = vpop.f32.mrb[69].mxu0  ;;  %v5574_v44 = vsel %vm5446_vm0, %v5382_v59, %v5510_v60 }
 0x6ea   : > { %v5103_v51 = vpop.f32.mrb[70].mxu0  ;;  %v5575_v50 = vsel %vm5447_vm1, %v5383_v4, %v5511_v49 }
 0x6eb   : > { %v5282_v46 = vpack.c.bf16 %v5103_v51, %v5099_v11  ;;  %v5105_v35 = vpop.f32.mrb[71].mxu0  ;;  %6002 = vmatprep.mubr.bf16.mxu1 %v5575_v50 }
 0x6ec   : > { %v5283_v29 = vpack.c.bf16 %v5105_v35, %v5101_v48  ;;  %6003 = vmatmul.mubr.bf16.gmra.mrb[64].mxu1 %v5574_v44 }
 0x6ed   : > { %v5384_v6 = vadd.bf16 %v11089_v41, %v5282_v46 }
 0x6ee   : > { %v5385_v7 = vadd.bf16 %v11092_v53, %v5283_v29 }
 0x6ef   : > { %v5512_v45 = vmul.bf16 1045249613, %v5384_v6  ;;  %vm5448_vm2 = vcmp.gt.bf16.partialorder %v5384_v6, 0 }
 0x6f0   : > { %v5109_v63 = vpop.f32.mrb[72].mxu0  ;;  %vm5449_vm3 = vcmp.gt.bf16.partialorder %v5385_v7, 0  ;;  %v5513_v15 = vmul.bf16 1045249613, %v5385_v7 }
 0x6f1   : > { %v5111_v0 = vpop.f32.mrb[73].mxu0  ;;  %v5576_v62 = vsel %vm5448_vm2, %v5384_v6, %v5512_v45 }
 0x6f2   : > { %v5113_v31 = vpop.f32.mrb[74].mxu0  ;;  %v5577_v27 = vsel %vm5449_vm3, %v5385_v7, %v5513_v15 }
 0x6f3   : > { %v5284_v61 = vpack.c.bf16 %v5113_v31, %v5109_v63  ;;  %v5115_v19 = vpop.f32.mrb[75].mxu0  ;;  %6012 = vmatprep.mubr.bf16.mxu1 %v5577_v27 }
 0x6f4   : > { %v5285_v43 = vpack.c.bf16 %v5115_v19, %v5111_v0  ;;  %6013 = vmatmul.mubr.bf16.gmra.mrb[68].mxu1 %v5576_v62 }
 0x6f5   : > { %v5386_v17 = vadd.bf16 %v11089_v41, %v5284_v61 }
 0x6f6   : > { %v5387_v22 = vadd.bf16 %v11092_v53, %v5285_v43 }
 0x6f7   : > { %v5514_v9 = vmul.bf16 1045249613, %v5386_v17  ;;  %vm5450_vm4 = vcmp.gt.bf16.partialorder %v5386_v17, 0 }
 0x6f8   : > { %v5119_v8 = vpop.f32.mrb[76].mxu0  ;;  %vm5451_vm5 = vcmp.gt.bf16.partialorder %v5387_v22, 0  ;;  %v5515_v42 = vmul.bf16 1045249613, %v5387_v22 }
 0x6f9   : > { %v5121_v24 = vpop.f32.mrb[77].mxu0  ;;  %v5578_v58 = vsel %vm5450_vm4, %v5386_v17, %v5514_v9 }
 0x6fa   : > { %v5123_v14 = vpop.f32.mrb[78].mxu0  ;;  %v5579_v28 = vsel %vm5451_vm5, %v5387_v22, %v5515_v42 }
 0x6fb   : > { %v5286_v5 = vpack.c.bf16 %v5123_v14, %v5119_v8  ;;  %v5125_v38 = vpop.f32.mrb[79].mxu0  ;;  %6022 = vmatprep.mubr.bf16.mxu1 %v5579_v28 }
 0x6fc   : > { %v5287_v12 = vpack.c.bf16 %v5125_v38, %v5121_v24  ;;  %6023 = vmatmul.mubr.bf16.gmra.mrb[72].mxu1 %v5578_v58 }
 0x6fd   : > { %v5388_v34 = vadd.bf16 %v11089_v41, %v5286_v5 }
 0x6fe   : > { %v5389_v37 = vadd.bf16 %v11092_v53, %v5287_v12 }
 0x6ff   : > { %v5516_v21 = vmul.bf16 1045249613, %v5388_v34  ;;  %vm5452_vm6 = vcmp.gt.bf16.partialorder %v5388_v34, 0 }
 0x700   : > { %v5129_v56 = vpop.f32.mrb[80].mxu0  ;;  %vm5453_vm7 = vcmp.gt.bf16.partialorder %v5389_v37, 0  ;;  %v5517_v25 = vmul.bf16 1045249613, %v5389_v37 }
 0x701   : > { %v5131_v3 = vpop.f32.mrb[81].mxu0  ;;  %v5580_v18 = vsel %vm5452_vm6, %v5388_v34, %v5516_v21 }
 0x702   : > { %v5133_v1 = vpop.f32.mrb[82].mxu0  ;;  %v5581_v16 = vsel %vm5453_vm7, %v5389_v37, %v5517_v25 }
 0x703   : > { %v5288_v40 = vpack.c.bf16 %v5133_v1, %v5129_v56  ;;  %v5135_v57 = vpop.f32.mrb[83].mxu0  ;;  %6032 = vmatprep.mubr.bf16.mxu1 %v5581_v16 }
 0x704   : > { %v5289_v23 = vpack.c.bf16 %v5135_v57, %v5131_v3  ;;  %6033 = vmatmul.mubr.bf16.gmra.mrb[76].mxu1 %v5580_v18 }
 0x705   : > { %v5390_v13 = vadd.bf16 %v11089_v41, %v5288_v40 }
 0x706   : > { %v5391_v26 = vadd.bf16 %v11092_v53, %v5289_v23 }
 0x707   : > { %v5518_v47 = vmul.bf16 1045249613, %v5390_v13  ;;  %vm5454_vm8 = vcmp.gt.bf16.partialorder %v5390_v13, 0 }
 0x708   : > { %v5139_v52 = vpop.f32.mrb[84].mxu0  ;;  %vm5455_vm9 = vcmp.gt.bf16.partialorder %v5391_v26, 0  ;;  %v5519_v54 = vmul.bf16 1045249613, %v5391_v26 }
 0x709   : > { %v5141_v33 = vpop.f32.mrb[85].mxu0  ;;  %v5582_v39 = vsel %vm5454_vm8, %v5390_v13, %v5518_v47 }
 0x70a   : > { %v5143_v55 = vpop.f32.mrb[86].mxu0  ;;  %v5583_v30 = vsel %vm5455_vm9, %v5391_v26, %v5519_v54 }
 0x70b   : > { %v5290_v2 = vpack.c.bf16 %v5143_v55, %v5139_v52  ;;  %v5145_v36 = vpop.f32.mrb[87].mxu0  ;;  %6042 = vmatprep.mubr.bf16.mxu1 %v5583_v30 }
 0x70c   : > { %v5291_v59 = vpack.c.bf16 %v5145_v36, %v5141_v33  ;;  %6043 = vmatmul.mubr.bf16.gmra.mrb[80].mxu1 %v5582_v39 }
 0x70d   : > { %v5392_v4 = vadd.bf16 %v11089_v41, %v5290_v2 }
 0x70e   : > { %v5393_v60 = vadd.bf16 %v11092_v53, %v5291_v59 }
 0x70f   : > { %v5520_v11 = vmul.bf16 1045249613, %v5392_v4  ;;  %vm5456_vm10 = vcmp.gt.bf16.partialorder %v5392_v4, 0 }
 0x710   : > { %v5149_v49 = vpop.f32.mrb[88].mxu0  ;;  %vm5457_vm11 = vcmp.gt.bf16.partialorder %v5393_v60, 0  ;;  %v5521_v48 = vmul.bf16 1045249613, %v5393_v60 }
 0x711   : > { %v5151_v51 = vpop.f32.mrb[89].mxu0  ;;  %v5584_v46 = vsel %vm5456_vm10, %v5392_v4, %v5520_v11 }
 0x712   : > { %v5153_v50 = vpop.f32.mrb[90].mxu0  ;;  %v5585_v44 = vsel %vm5457_vm11, %v5393_v60, %v5521_v48 }
 0x713   : > { %v5292_v35 = vpack.c.bf16 %v5153_v50, %v5149_v49  ;;  %v5155_v29 = vpop.f32.mrb[91].mxu0  ;;  %6052 = vmatprep.mubr.bf16.mxu1 %v5585_v44  ;;  %v5638_v50 = vld [vmem:[#allocation23] sm:$0x3] }
 0x714   : > { %v5293_v6 = vpack.c.bf16 %v5155_v29, %v5151_v51  ;;  %6053 = vmatmul.mubr.bf16.gmra.mrb[84].mxu1 %v5584_v46 }
 0x715   : > { %v5394_v7 = vadd.bf16 %v11089_v41, %v5292_v35 }
 0x716   : > { %v5395_v45 = vadd.bf16 %v11092_v53, %v5293_v6 }
 0x717   : > { %v5522_v63 = vmul.bf16 1045249613, %v5394_v7  ;;  %vm5458_vm12 = vcmp.gt.bf16.partialorder %v5394_v7, 0 }
 0x718   : > { %v5159_v15 = vpop.f32.mrb[92].mxu0  ;;  %vm5459_vm13 = vcmp.gt.bf16.partialorder %v5395_v45, 0  ;;  %v5523_v0 = vmul.bf16 1045249613, %v5395_v45 }
 0x719   : > { %v5161_v31 = vpop.f32.mrb[93].mxu0  ;;  %v5586_v61 = vsel %vm5458_vm12, %v5394_v7, %v5522_v63 }
 0x71a   : > { %v5163_v27 = vpop.f32.mrb[94].mxu0  ;;  %v5587_v62 = vsel %vm5459_vm13, %v5395_v45, %v5523_v0  ;;  %v11157_v45 = vrot.slane %v5638_v50, %v10238_v20 }
 0x71b   : > { %v5294_v19 = vpack.c.bf16 %v5163_v27, %v5159_v15  ;;  %v5165_v43 = vpop.f32.mrb[95].mxu0  ;;  %6062 = vmatprep.mubr.bf16.mxu1 %v5587_v62  ;;  %v11161_v15 = vrot.slane %v5638_v50, %v2963_v32 }
 0x71c   : > { %v5295_v17 = vpack.c.bf16 %v5165_v43, %v5161_v31  ;;  %6063 = vmatmul.mubr.bf16.gmra.mrb[88].mxu1 %v5586_v61 }
 0x71d   : > { %v5396_v22 = vadd.bf16 %v11089_v41, %v5294_v19 }
 0x71e   : > { %v5397_v9 = vadd.bf16 %v11092_v53, %v5295_v17 }
 0x71f   : > { %v5524_v8 = vmul.bf16 1045249613, %v5396_v22  ;;  %vm5460_vm14 = vcmp.gt.bf16.partialorder %v5396_v22, 0 }
 0x720   : > { %v5169_v42 = vpop.f32.mrb[96].mxu0  ;;  %vm5461_vm15 = vcmp.gt.bf16.partialorder %v5397_v9, 0  ;;  %v5525_v24 = vmul.bf16 1045249613, %v5397_v9 }
 0x721   : > { %v5171_v14 = vpop.f32.mrb[97].mxu0  ;;  %v5588_v5 = vsel %vm5460_vm14, %v5396_v22, %v5524_v8 }
 0x722   : > { %v5173_v28 = vpop.f32.mrb[98].mxu0  ;;  %v5589_v58 = vsel %vm5461_vm15, %v5397_v9, %v5525_v24 }
 0x723   : > { %v5296_v38 = vpack.c.bf16 %v5173_v28, %v5169_v42  ;;  %v5175_v12 = vpop.f32.mrb[99].mxu0  ;;  %6072 = vmatprep.mubr.bf16.mxu1 %v5589_v58 }
 0x724   : > { %v5297_v34 = vpack.c.bf16 %v5175_v12, %v5171_v14  ;;  %6073 = vmatmul.mubr.bf16.gmra.mrb[92].mxu1 %v5588_v5 }
 0x725   : > { %v5398_v37 = vadd.bf16 %v11089_v41, %v5296_v38 }
 0x726   : > { %v5399_v21 = vadd.bf16 %v11092_v53, %v5297_v34 }
 0x727   : > { %v5526_v56 = vmul.bf16 1045249613, %v5398_v37  ;;  %vm5462_vm0 = vcmp.gt.bf16.partialorder %v5398_v37, 0 }
 0x728   : > { %v5179_v25 = vpop.f32.mrb[100].mxu0  ;;  %vm5463_vm1 = vcmp.gt.bf16.partialorder %v5399_v21, 0  ;;  %v5527_v3 = vmul.bf16 1045249613, %v5399_v21 }
 0x729   : > { %v5181_v1 = vpop.f32.mrb[101].mxu0  ;;  %v5590_v40 = vsel %vm5462_vm0, %v5398_v37, %v5526_v56 }
 0x72a   : > { %v5183_v16 = vpop.f32.mrb[102].mxu0  ;;  %v5591_v18 = vsel %vm5463_vm1, %v5399_v21, %v5527_v3 }
 0x72b   : > { %v5298_v57 = vpack.c.bf16 %v5183_v16, %v5179_v25  ;;  %v5185_v23 = vpop.f32.mrb[103].mxu0  ;;  %6082 = vmatprep.mubr.bf16.mxu1 %v5591_v18 }
 0x72c   : > { %v5299_v13 = vpack.c.bf16 %v5185_v23, %v5181_v1  ;;  %6083 = vmatmul.mubr.bf16.gmra.mrb[96].mxu1 %v5590_v40 }
 0x72d   : > { %v5400_v26 = vadd.bf16 %v11089_v41, %v5298_v57 }
 0x72e   : > { %v5401_v47 = vadd.bf16 %v11092_v53, %v5299_v13 }
 0x72f   : > { %v5528_v52 = vmul.bf16 1045249613, %v5400_v26  ;;  %vm5464_vm2 = vcmp.gt.bf16.partialorder %v5400_v26, 0 }
 0x730   : > { %v5189_v54 = vpop.f32.mrb[104].mxu0  ;;  %vm5465_vm3 = vcmp.gt.bf16.partialorder %v5401_v47, 0  ;;  %v5529_v33 = vmul.bf16 1045249613, %v5401_v47 }
 0x731   : > { %v5191_v55 = vpop.f32.mrb[105].mxu0  ;;  %v5592_v2 = vsel %vm5464_vm2, %v5400_v26, %v5528_v52 }
 0x732   : > { %v5193_v30 = vpop.f32.mrb[106].mxu0  ;;  %v5593_v39 = vsel %vm5465_vm3, %v5401_v47, %v5529_v33 }
 0x733   : > { %v5300_v36 = vpack.c.bf16 %v5193_v30, %v5189_v54  ;;  %v5195_v59 = vpop.f32.mrb[107].mxu0  ;;  %6092 = vmatprep.mubr.bf16.mxu1 %v5593_v39 }
 0x734   : > { %v5301_v4 = vpack.c.bf16 %v5195_v59, %v5191_v55  ;;  %6093 = vmatmul.mubr.bf16.gmra.mrb[100].mxu1 %v5592_v2 }
 0x735   : > { %v5402_v60 = vadd.bf16 %v11089_v41, %v5300_v36 }
 0x736   : > { %v5403_v11 = vadd.bf16 %v11092_v53, %v5301_v4 }
 0x737   : > { %v5530_v49 = vmul.bf16 1045249613, %v5402_v60  ;;  %vm5466_vm4 = vcmp.gt.bf16.partialorder %v5402_v60, 0 }
 0x738   : > { %v5199_v48 = vpop.f32.mrb[108].mxu0  ;;  %vm5467_vm5 = vcmp.gt.bf16.partialorder %v5403_v11, 0  ;;  %v5531_v51 = vmul.bf16 1045249613, %v5403_v11 }
 0x739   : > { %v5201_v44 = vpop.f32.mrb[109].mxu0  ;;  %v5594_v29 = vsel %vm5466_vm4, %v5402_v60, %v5530_v49 }
 0x73a   : > { %v5203_v46 = vpop.f32.mrb[110].mxu0  ;;  %v5595_v35 = vsel %vm5467_vm5, %v5403_v11, %v5531_v51 }
 0x73b   : > { %v5302_v6 = vpack.c.bf16 %v5203_v46, %v5199_v48  ;;  %v5205_v7 = vpop.f32.mrb[111].mxu0  ;;  %6102 = vmatprep.mubr.bf16.mxu1 %v5595_v35 }
 0x73c   : > { %v5303_v63 = vpack.c.bf16 %v5205_v7, %v5201_v44  ;;  %6103 = vmatmul.mubr.bf16.gmra.mrb[104].mxu1 %v5594_v29 }
 0x73d   : > { %v5404_v0 = vadd.bf16 %v11089_v41, %v5302_v6 }
 0x73e   : > { %v5405_v31 = vadd.bf16 %v11092_v53, %v5303_v63  ;;  %v5844_v62 = vpop.f32.mrb[0].mxu1 }
 0x73f   : > { %v5532_v27 = vmul.bf16 1045249613, %v5404_v0  ;;  %vm5468_vm6 = vcmp.gt.bf16.partialorder %v5404_v0, 0  ;;  %v5845_v61 = vadd.f32 %v5844_v62, %v11157_v45  ;;  %v5846_v43 = vpop.f32.mrb[1].mxu1 }
 0x740   : > { %v5209_v19 = vpop.f32.mrb[112].mxu0  ;;  %vm5469_vm7 = vcmp.gt.bf16.partialorder %v5405_v31, 0  ;;  %v5533_v20 = vmul.bf16 1045249613, %v5405_v31  ;;  %v5847_v17 = vadd.f32 %v5846_v43, %v11161_v15  ;;  %v5848_v9 = vpop.f32.mrb[2].mxu1 }
 0x741   : > { %v5211_v22 = vpop.f32.mrb[113].mxu0  ;;  %v7749_v10 = vmul.f32 -1.442695, %v5845_v61  ;;  %v5849_v32 = vadd.f32 %v5848_v9, %v11157_v45  ;;  %v5850_v42 = vpop.f32.mrb[3].mxu1  ;;  %v5596_v14 = vsel %vm5468_vm6, %v5404_v0, %v5532_v27 }
 0x742   : > { %v5213_v8 = vpop.f32.mrb[114].mxu0  ;;  %v5597_v24 = vsel %vm5469_vm7, %v5405_v31, %v5533_v20  ;;  %v7750_v28 = vmul.f32 -1.442695, %v5847_v17  ;;  %v5851_v5 = vadd.f32 %v5850_v42, %v11161_v15 }
 0x743   : > { %v5304_v58 = vpack.c.bf16 %v5213_v8, %v5209_v19  ;;  %v5215_v38 = vpop.f32.mrb[115].mxu0  ;;  %6112 = vmatprep.mubr.bf16.mxu1 %v5597_v24  ;;  %8565 = vpow2.f32 %v7749_v10  ;;  %v7751_v12 = vmul.f32 -1.442695, %v5849_v32 }
 0x744   : > { %v5305_v34 = vpack.c.bf16 %v5215_v38, %v5211_v22  ;;  %6113 = vmatmul.mubr.bf16.gmra.mrb[108].mxu1 %v5596_v14  ;;  %8567 = vpow2.f32 %v7750_v28  ;;  %v7752_v21 = vmul.f32 -1.442695, %v5851_v5 }
 0x745   : > { %v5406_v37 = vadd.bf16 %v11089_v41, %v5304_v58  ;;  %8569 = vpow2.f32 %v7751_v12 }
 0x746   : > { %v5407_v56 = vadd.bf16 %v11092_v53, %v5305_v34  ;;  %8571 = vpow2.f32 %v7752_v21  ;;  %v5854_v3 = vpop.f32.mrb[4].mxu1 }
 0x747   : > { %v5534_v25 = vmul.bf16 1045249613, %v5406_v37  ;;  %vm5470_vm8 = vcmp.gt.bf16.partialorder %v5406_v37, 0  ;;  %v5855_v1 = vadd.f32 %v5854_v3, %v11157_v45  ;;  %v5856_v18 = vpop.f32.mrb[5].mxu1 }
 0x748   : > { %v5219_v16 = vpop.f32.mrb[116].mxu0  ;;  %vm5471_vm9 = vcmp.gt.bf16.partialorder %v5407_v56, 0  ;;  %v5535_v40 = vmul.bf16 1045249613, %v5407_v56  ;;  %v5857_v57 = vadd.f32 %v5856_v18, %v11161_v15  ;;  %v5858_v13 = vpop.f32.mrb[6].mxu1 }
 0x749   : > { %v5221_v23 = vpop.f32.mrb[117].mxu0  ;;  %v7753_v26 = vmul.f32 -1.442695, %v5855_v1  ;;  %v5859_v47 = vadd.f32 %v5858_v13, %v11157_v45  ;;  %v5860_v54 = vpop.f32.mrb[7].mxu1  ;;  %v5598_v55 = vsel %vm5470_vm8, %v5406_v37, %v5534_v25 }
 0x74a   : > { %v5223_v52 = vpop.f32.mrb[118].mxu0  ;;  %v5599_v33 = vsel %vm5471_vm9, %v5407_v56, %v5535_v40  ;;  %v7754_v30 = vmul.f32 -1.442695, %v5857_v57  ;;  %v5861_v2 = vadd.f32 %v5860_v54, %v11161_v15 }
 0x74b   : > { %v5306_v39 = vpack.c.bf16 %v5223_v52, %v5219_v16  ;;  %v5225_v36 = vpop.f32.mrb[119].mxu0  ;;  %6122 = vmatprep.mubr.bf16.mxu1 %v5599_v33  ;;  %8573 = vpow2.f32 %v7753_v26  ;;  %v7755_v59 = vmul.f32 -1.442695, %v5859_v47 }
 0x74c   : > { %v5307_v4 = vpack.c.bf16 %v5225_v36, %v5221_v23  ;;  %6123 = vmatmul.mubr.bf16.gmra.mrb[112].mxu1 %v5598_v55  ;;  %8575 = vpow2.f32 %v7754_v30  ;;  %v7756_v11 = vmul.f32 -1.442695, %v5861_v2 }
 0x74d   : > { %v5408_v60 = vadd.bf16 %v11089_v41, %v5306_v39  ;;  %v8566_v49 = vpop.eup %8565  ;;  %8577 = vpow2.f32 %v7755_v59 }
 0x74e   : > { %v5409_v48 = vadd.bf16 %v11092_v53, %v5307_v4  ;;  %v8568_v51 = vpop.eup %8567  ;;  %v6547_v50 = vadd.f32 1.0, %v8566_v49  ;;  %8579 = vpow2.f32 %v7756_v11 }
 0x74f   : > { %v5536_v44 = vmul.bf16 1045249613, %v5408_v60  ;;  %v5864_v46 = vpop.f32.mrb[8].mxu1  ;;  %v8570_v35 = vpop.eup %8569  ;;  %v6548_v29 = vadd.f32 1.0, %v8568_v51  ;;  %vm5472_vm10 = vcmp.gt.bf16.partialorder %v5408_v60, 0 }
 0x750   : > { %v5865_v6 = vadd.f32 %v5864_v46, %v11157_v45  ;;  %v5229_v7 = vpop.f32.mrb[120].mxu0  ;;  %v5866_v63 = vpop.f32.mrb[9].mxu1  ;;  %v5537_v0 = vmul.bf16 1045249613, %v5409_v48  ;;  %8581 = vrcp.f32 %v6547_v50  ;;  %v6549_v27 = vadd.f32 1.0, %v8570_v35 }
 0x751   : > { %v8572_v31 = vpop.eup %8571  ;;  %v5867_v62 = vadd.f32 %v5866_v63, %v11161_v15  ;;  %v5231_v61 = vpop.f32.mrb[121].mxu0  ;;  %vm5473_vm11 = vcmp.gt.bf16.partialorder %v5409_v48, 0  ;;  %8583 = vrcp.f32 %v6548_v29  ;;  %v5600_v58 = vsel %vm5472_vm10, %v5408_v60, %v5536_v44 }
 0x752   : > { %v5868_v19 = vpop.f32.mrb[10].mxu1  ;;  %v6550_v43 = vadd.f32 1.0, %v8572_v31  ;;  %v7757_v20 = vmul.f32 -1.442695, %v5865_v6  ;;  %v5233_v22 = vpop.f32.mrb[122].mxu0  ;;  %8585 = vrcp.f32 %v6549_v27  ;;  %v5601_v28 = vsel %vm5473_vm11, %v5409_v48, %v5537_v0 }
 0x753   : > { %v5869_v17 = vadd.f32 %v5868_v19, %v11157_v45  ;;  %v5870_v9 = vpop.f32.mrb[11].mxu1  ;;  %v7758_v10 = vmul.f32 -1.442695, %v5867_v62  ;;  %v5308_v32 = vpack.c.bf16 %v5233_v22, %v5229_v7  ;;  %v5235_v42 = vpop.f32.mrb[123].mxu0  ;;  %6132 = vmatprep.mubr.bf16.mxu1 %v5601_v28 }
 0x754   : > { %v5871_v8 = vadd.f32 %v5870_v9, %v11161_v15  ;;  %8587 = vrcp.f32 %v6550_v43  ;;  %v5309_v14 = vpack.c.bf16 %v5235_v42, %v5231_v61  ;;  %6133 = vmatmul.mubr.bf16.gmra.mrb[116].mxu1 %v5600_v58 }
 0x755   : > { %v7759_v24 = vmul.f32 -1.442695, %v5869_v17  ;;  %8589 = vpow2.f32 %v7757_v20  ;;  %v5410_v5 = vadd.bf16 %v11089_v41, %v5308_v32  ;;  %v8574_v12 = vpop.eup %8573 }
 0x756   : > { %v7760_v38 = vmul.f32 -1.442695, %v5871_v8  ;;  %8591 = vpow2.f32 %v7758_v10  ;;  %v5411_v34 = vadd.bf16 %v11092_v53, %v5309_v14  ;;  %v8576_v37 = vpop.eup %8575  ;;  %v6551_v21 = vadd.f32 1.0, %v8574_v12 }
 0x757   : > { %8593 = vpow2.f32 %v7759_v24  ;;  %vm5474_vm12 = vcmp.gt.bf16.partialorder %v5410_v5, 0  ;;  %v5874_v56 = vpop.f32.mrb[12].mxu1  ;;  %v8578_v25 = vpop.eup %8577  ;;  %v6552_v3 = vadd.f32 1.0, %v8576_v37  ;;  %v5538_v1 = vmul.bf16 1045249613, %v5410_v5 }
 0x758   : > { %8595 = vpow2.f32 %v7760_v38  ;;  %v5875_v16 = vadd.f32 %v5874_v56, %v11157_v45  ;;  %v5239_v18 = vpop.f32.mrb[124].mxu0  ;;  %v5876_v40 = vpop.f32.mrb[13].mxu1  ;;  %v6553_v23 = vadd.f32 1.0, %v8578_v25  ;;  %vm5475_vm13 = vcmp.gt.bf16.partialorder %v5411_v34, 0 }
 0x759   : > { %v8580_v57 = vpop.eup %8579  ;;  %8597 = vrcp.f32 %v6551_v21  ;;  %v5877_v13 = vadd.f32 %v5876_v40, %v11161_v15  ;;  %v5241_v26 = vpop.f32.mrb[125].mxu0  ;;  %v5539_v48 = vmul.bf16 1045249613, %v5411_v34  ;;  %v5602_v7 = vsel %vm5474_vm12, %v5410_v5, %v5538_v1 }
 0x75a   : > { %v5878_v47 = vpop.f32.mrb[14].mxu1  ;;  %8599 = vrcp.f32 %v6552_v3  ;;  %v6554_v52 = vadd.f32 1.0, %v8580_v57  ;;  %v7761_v54 = vmul.f32 -1.442695, %v5875_v16  ;;  %v5243_v55 = vpop.f32.mrb[126].mxu0 }
 0x75b   : > { %v5879_v33 = vadd.f32 %v5878_v47, %v11157_v45  ;;  %v5880_v30 = vpop.f32.mrb[15].mxu1  ;;  %v8582_v39 = vpop.eup %8581  ;;  %8601 = vrcp.f32 %v6553_v23  ;;  %v7762_v2 = vmul.f32 -1.442695, %v5877_v13  ;;  %v5310_v36 = vpack.c.bf16 %v5243_v55, %v5239_v18 }
 0x75c   : > { %v5881_v59 = vadd.f32 %v5880_v30, %v11161_v15  ;;  %v5245_v4 = vpop.f32.mrb[127].mxu0  ;;  %v8584_v60 = vpop.eup %8583  ;;  %6931 = vst [vmem:[%s11190_s3] sm:$0xff] %v8582_v39  ;;  %8603 = vrcp.f32 %v6554_v52  ;;  %v5603_v29 = vsel %vm5475_vm13, %v5411_v34, %v5539_v48 }
 0x75d   : > { %v7763_v11 = vmul.f32 -1.442695, %v5879_v33  ;;  %v5311_v49 = vpack.c.bf16 %v5245_v4, %v5241_v26  ;;  %v8586_v51 = vpop.eup %8585  ;;  %6932 = vst [vmem:[%s11190_s3 + $0x8] sm:$0xff] %v8584_v60  ;;  %8605 = vpow2.f32 %v7761_v54  ;;  %v5412_v50 = vadd.bf16 %v11089_v41, %v5310_v36  ;;  %6142 = vmatprep.mubr.bf16.mxu1 %v5603_v29 }
 0x75e   : > { %v7764_v44 = vmul.f32 -1.442695, %v5881_v59  ;;  %v8588_v46 = vpop.eup %8587  ;;  %6933 = vst [vmem:[%s11190_s3 + $0x10] sm:$0xff] %v8586_v51  ;;  %8607 = vpow2.f32 %v7762_v2  ;;  %6143 = vmatmul.mubr.bf16.gmra.mrb[120].mxu1 %v5602_v7 }
 0x75f   : > { %v5413_v35 = vadd.bf16 %v11092_v53, %v5311_v49  ;;  %v8590_v6 = vpop.eup %8589  ;;  %6934 = vst [vmem:[%s11190_s3 + $0x18] sm:$0xff] %v8588_v46  ;;  %8609 = vpow2.f32 %v7763_v11  ;;  %v5884_v63 = vpop.f32.mrb[16].mxu1  ;;  %v5540_v27 = vmul.bf16 1045249613, %v5412_v50  ;;  %vm5476_vm15 = vcmp.gt.bf16.partialorder %v5412_v50, 0 }
 0x760   : > { %v8592_v0 = vpop.eup %8591  ;;  %v6555_v31 = vadd.f32 1.0, %v8590_v6  ;;  %8611 = vpow2.f32 %v7764_v44  ;;  %v5885_v41 = vadd.f32 %v5884_v63, %v11157_v45  ;;  %v5886_v62 = vpop.f32.mrb[17].mxu1 }
 0x761   : > { %v8594_v61 = vpop.eup %8593  ;;  %v6556_v19 = vadd.f32 1.0, %v8592_v0  ;;  %v5887_v53 = vadd.f32 %v5886_v62, %v11161_v15  ;;  %v5888_v43 = vpop.f32.mrb[18].mxu1  ;;  %vm5477_vm14 = vcmp.gt.bf16.partialorder %v5413_v35, 0  ;;  %v5541_v20 = vmul.bf16 1045249613, %v5413_v35 }
 0x762   : > { %v8596_v17 = vpop.eup %8595  ;;  %8613 = vrcp.f32 %v6555_v31  ;;  %v6557_v22 = vadd.f32 1.0, %v8594_v61  ;;  %v7765_v9 = vmul.f32 -1.442695, %v5885_v41  ;;  %v5889_v10 = vadd.f32 %v5888_v43, %v11157_v45  ;;  %v5890_v32 = vpop.f32.mrb[19].mxu1 }
 0x763   : > { %v8598_v8 = vpop.eup %8597  ;;  %8615 = vrcp.f32 %v6556_v19  ;;  %v6558_v42 = vadd.f32 1.0, %v8596_v17  ;;  %v7766_v24 = vmul.f32 -1.442695, %v5887_v53  ;;  %v5891_v14 = vadd.f32 %v5890_v32, %v11161_v15 }
 0x764   : > { %v8600_v28 = vpop.eup %8599  ;;  %6935 = vst [vmem:[%s11190_s3 + $0x20] sm:$0xff] %v8598_v8  ;;  %8617 = vrcp.f32 %v6557_v22  ;;  %v7767_v58 = vmul.f32 -1.442695, %v5889_v10  ;;  %v5605_v5 = vsel %vm5477_vm14, %v5413_v35, %v5541_v20  ;;  %v5604_v21 = vsel %vm5476_vm15, %v5412_v50, %v5540_v27 }
 0x765   : > { %v8602_v38 = vpop.eup %8601  ;;  %6936 = vst [vmem:[%s11190_s3 + $0x28] sm:$0xff] %v8600_v28  ;;  %8619 = vrcp.f32 %v6558_v42  ;;  %v7768_v12 = vmul.f32 -1.442695, %v5891_v14  ;;  %6152 = vmatprep.mubr.bf16.mxu1 %v5605_v5 }
 0x766   : > { %v8604_v34 = vpop.eup %8603  ;;  %6937 = vst [vmem:[%s11190_s3 + $0x30] sm:$0xff] %v8602_v38  ;;  %8621 = vpow2.f32 %v7765_v9  ;;  %6153 = vmatmul.mubr.bf16.gmra.mrb[124].mxu1 %v5604_v21 }
 0x767   : > { %v8606_v37 = vpop.eup %8605  ;;  %6938 = vst [vmem:[%s11190_s3 + $0x38] sm:$0xff] %v8604_v34  ;;  %8623 = vpow2.f32 %v7766_v24  ;;  %v5894_v56 = vpop.f32.mrb[20].mxu1 }
 0x768   : > { %v8608_v25 = vpop.eup %8607  ;;  %v6559_v3 = vadd.f32 1.0, %v8606_v37  ;;  %8625 = vpow2.f32 %v7767_v58  ;;  %v5895_v1 = vadd.f32 %v5894_v56, %v11157_v45  ;;  %v5896_v16 = vpop.f32.mrb[21].mxu1 }
 0x769   : > { %v8610_v18 = vpop.eup %8609  ;;  %v6560_v40 = vadd.f32 1.0, %v8608_v25  ;;  %8627 = vpow2.f32 %v7768_v12  ;;  %v5897_v57 = vadd.f32 %v5896_v16, %v11161_v15  ;;  %v5898_v23 = vpop.f32.mrb[22].mxu1 }
 0x76a   : > { %v8612_v13 = vpop.eup %8611  ;;  %8629 = vrcp.f32 %v6559_v3  ;;  %v6561_v26 = vadd.f32 1.0, %v8610_v18  ;;  %v7769_v47 = vmul.f32 -1.442695, %v5895_v1  ;;  %v5899_v52 = vadd.f32 %v5898_v23, %v11157_v45  ;;  %v5900_v54 = vpop.f32.mrb[23].mxu1 }
 0x76b   : > { %8631 = vrcp.f32 %v6560_v40  ;;  %v6562_v33 = vadd.f32 1.0, %v8612_v13  ;;  %v7770_v55 = vmul.f32 -1.442695, %v5897_v57  ;;  %v5901_v30 = vadd.f32 %v5900_v54, %v11161_v15 }
 0x76c   : > { %v8614_v39 = vpop.eup %8613  ;;  %8633 = vrcp.f32 %v6561_v26  ;;  %v7771_v2 = vmul.f32 -1.442695, %v5899_v52 }
 0x76d   : > { %v8616_v36 = vpop.eup %8615  ;;  %6939 = vst [vmem:[%s11190_s3 + $0x40] sm:$0xff] %v8614_v39  ;;  %8635 = vrcp.f32 %v6562_v33  ;;  %v7772_v59 = vmul.f32 -1.442695, %v5901_v30 }
 0x76e   : > { %v8618_v4 = vpop.eup %8617  ;;  %6940 = vst [vmem:[%s11190_s3 + $0x48] sm:$0xff] %v8616_v36  ;;  %8637 = vpow2.f32 %v7769_v47 }
 0x76f   : > { %v8620_v60 = vpop.eup %8619  ;;  %6941 = vst [vmem:[%s11190_s3 + $0x50] sm:$0xff] %v8618_v4  ;;  %8639 = vpow2.f32 %v7770_v55  ;;  %v5904_v11 = vpop.f32.mrb[24].mxu1 }
 0x770   : > { %v8622_v49 = vpop.eup %8621  ;;  %6942 = vst [vmem:[%s11190_s3 + $0x58] sm:$0xff] %v8620_v60  ;;  %8641 = vpow2.f32 %v7771_v2  ;;  %v5905_v48 = vadd.f32 %v5904_v11, %v11157_v45  ;;  %v5906_v51 = vpop.f32.mrb[25].mxu1 }
 0x771   : > { %v8624_v50 = vpop.eup %8623  ;;  %v6563_v44 = vadd.f32 1.0, %v8622_v49  ;;  %8643 = vpow2.f32 %v7772_v59  ;;  %v5907_v46 = vadd.f32 %v5906_v51, %v11161_v15  ;;  %v5908_v35 = vpop.f32.mrb[26].mxu1 }
 0x772   : > { %v8626_v29 = vpop.eup %8625  ;;  %v6564_v6 = vadd.f32 1.0, %v8624_v50  ;;  %v5909_v7 = vadd.f32 %v5908_v35, %v11157_v45  ;;  %v5910_v63 = vpop.f32.mrb[27].mxu1  ;;  %v7773_v27 = vmul.f32 -1.442695, %v5905_v48 }
 0x773   : > { %v8628_v0 = vpop.eup %8627  ;;  %8645 = vrcp.f32 %v6563_v44  ;;  %v6565_v31 = vadd.f32 1.0, %v8626_v29  ;;  %v5911_v41 = vadd.f32 %v5910_v63, %v11161_v15  ;;  %v7774_v19 = vmul.f32 -1.442695, %v5907_v46 }
 0x774   : > { %v8630_v62 = vpop.eup %8629  ;;  %8647 = vrcp.f32 %v6564_v6  ;;  %v6566_v61 = vadd.f32 1.0, %v8628_v0  ;;  %v7775_v43 = vmul.f32 -1.442695, %v5909_v7 }
 0x775   : > { %v8632_v53 = vpop.eup %8631  ;;  %6943 = vst [vmem:[%s11190_s3 + $0x60] sm:$0xff] %v8630_v62  ;;  %8649 = vrcp.f32 %v6565_v31  ;;  %v7776_v17 = vmul.f32 -1.442695, %v5911_v41 }
 0x776   : > { %v8634_v20 = vpop.eup %8633  ;;  %6944 = vst [vmem:[%s11190_s3 + $0x68] sm:$0xff] %v8632_v53  ;;  %8651 = vrcp.f32 %v6566_v61 }
 0x777   : > { %v8636_v22 = vpop.eup %8635  ;;  %6945 = vst [vmem:[%s11190_s3 + $0x70] sm:$0xff] %v8634_v20  ;;  %8653 = vpow2.f32 %v7773_v27  ;;  %v5914_v9 = vpop.f32.mrb[28].mxu1 }
 0x778   : > { %v8638_v10 = vpop.eup %8637  ;;  %6946 = vst [vmem:[%s11190_s3 + $0x78] sm:$0xff] %v8636_v22  ;;  %8655 = vpow2.f32 %v7774_v19  ;;  %v5915_v32 = vadd.f32 %v5914_v9, %v11157_v45  ;;  %v5916_v8 = vpop.f32.mrb[29].mxu1 }
 0x779   : > { %v8640_v42 = vpop.eup %8639  ;;  %v6567_v24 = vadd.f32 1.0, %v8638_v10  ;;  %8657 = vpow2.f32 %v7775_v43  ;;  %v5917_v14 = vadd.f32 %v5916_v8, %v11161_v15  ;;  %v5918_v28 = vpop.f32.mrb[30].mxu1 }
 0x77a   : > { %v8642_v58 = vpop.eup %8641  ;;  %v6568_v5 = vadd.f32 1.0, %v8640_v42  ;;  %8659 = vpow2.f32 %v7776_v17  ;;  %v5919_v38 = vadd.f32 %v5918_v28, %v11157_v45  ;;  %v5920_v12 = vpop.f32.mrb[31].mxu1  ;;  %v7777_v21 = vmul.f32 -1.442695, %v5915_v32 }
 0x77b   : > { %v8644_v34 = vpop.eup %8643  ;;  %8661 = vrcp.f32 %v6567_v24  ;;  %v6569_v37 = vadd.f32 1.0, %v8642_v58  ;;  %v5921_v56 = vadd.f32 %v5920_v12, %v11161_v15  ;;  %v7778_v3 = vmul.f32 -1.442695, %v5917_v14 }
 0x77c   : > { %8663 = vrcp.f32 %v6568_v5  ;;  %v6570_v25 = vadd.f32 1.0, %v8644_v34  ;;  %v7779_v16 = vmul.f32 -1.442695, %v5919_v38 }
 0x77d   : > { %v8646_v1 = vpop.eup %8645  ;;  %8665 = vrcp.f32 %v6569_v37  ;;  %v7780_v40 = vmul.f32 -1.442695, %v5921_v56 }
 0x77e   : > { %v8648_v18 = vpop.eup %8647  ;;  %6947 = vst [vmem:[%s11190_s3 + $0x80] sm:$0xff] %v8646_v1  ;;  %8667 = vrcp.f32 %v6570_v25 }
 0x77f   : > { %v8650_v57 = vpop.eup %8649  ;;  %6948 = vst [vmem:[%s11190_s3 + $0x88] sm:$0xff] %v8648_v18  ;;  %8669 = vpow2.f32 %v7777_v21  ;;  %v5924_v23 = vpop.f32.mrb[32].mxu1 }
 0x780   : > { %v8652_v13 = vpop.eup %8651  ;;  %6949 = vst [vmem:[%s11190_s3 + $0x90] sm:$0xff] %v8650_v57  ;;  %8671 = vpow2.f32 %v7778_v3  ;;  %v5925_v26 = vadd.f32 %v5924_v23, %v11157_v45  ;;  %v5926_v47 = vpop.f32.mrb[33].mxu1 }
 0x781   : > { %v8654_v52 = vpop.eup %8653  ;;  %6950 = vst [vmem:[%s11190_s3 + $0x98] sm:$0xff] %v8652_v13  ;;  %8673 = vpow2.f32 %v7779_v16  ;;  %v5927_v54 = vadd.f32 %v5926_v47, %v11161_v15  ;;  %v5928_v33 = vpop.f32.mrb[34].mxu1 }
 0x782   : > { %v8656_v55 = vpop.eup %8655  ;;  %v6571_v30 = vadd.f32 1.0, %v8654_v52  ;;  %8675 = vpow2.f32 %v7780_v40  ;;  %v5929_v39 = vadd.f32 %v5928_v33, %v11157_v45  ;;  %v5930_v2 = vpop.f32.mrb[35].mxu1  ;;  %v7781_v49 = vmul.f32 -1.442695, %v5925_v26 }
 0x783   : > { %v8658_v36 = vpop.eup %8657  ;;  %v6572_v59 = vadd.f32 1.0, %v8656_v55  ;;  %v5931_v4 = vadd.f32 %v5930_v2, %v11161_v15  ;;  %v7782_v50 = vmul.f32 -1.442695, %v5927_v54 }
 0x784   : > { %v8660_v60 = vpop.eup %8659  ;;  %8677 = vrcp.f32 %v6571_v30  ;;  %v6573_v11 = vadd.f32 1.0, %v8658_v36  ;;  %v7783_v46 = vmul.f32 -1.442695, %v5929_v39 }
 0x785   : > { %v8662_v48 = vpop.eup %8661  ;;  %8679 = vrcp.f32 %v6572_v59  ;;  %v6574_v51 = vadd.f32 1.0, %v8660_v60  ;;  %v7784_v29 = vmul.f32 -1.442695, %v5931_v4 }
 0x786   : > { %v8664_v44 = vpop.eup %8663  ;;  %6951 = vst [vmem:[%s11190_s3 + $0xa0] sm:$0xff] %v8662_v48  ;;  %8681 = vrcp.f32 %v6573_v11 }
 0x787   : > { %v8666_v35 = vpop.eup %8665  ;;  %6952 = vst [vmem:[%s11190_s3 + $0xa8] sm:$0xff] %v8664_v44  ;;  %8683 = vrcp.f32 %v6574_v51  ;;  %v5934_v6 = vpop.f32.mrb[36].mxu1 }
 0x788   : > { %v8668_v7 = vpop.eup %8667  ;;  %6953 = vst [vmem:[%s11190_s3 + $0xb0] sm:$0xff] %v8666_v35  ;;  %8685 = vpow2.f32 %v7781_v49  ;;  %v5935_v63 = vadd.f32 %v5934_v6, %v11157_v45  ;;  %v5936_v0 = vpop.f32.mrb[37].mxu1 }
 0x789   : > { %v8670_v31 = vpop.eup %8669  ;;  %6954 = vst [vmem:[%s11190_s3 + $0xb8] sm:$0xff] %v8668_v7  ;;  %8687 = vpow2.f32 %v7782_v50  ;;  %v5937_v27 = vadd.f32 %v5936_v0, %v11161_v15  ;;  %v5938_v41 = vpop.f32.mrb[38].mxu1 }
 0x78a   : > { %v8672_v62 = vpop.eup %8671  ;;  %v6575_v61 = vadd.f32 1.0, %v8670_v31  ;;  %8689 = vpow2.f32 %v7783_v46  ;;  %v5939_v19 = vadd.f32 %v5938_v41, %v11157_v45  ;;  %v5940_v53 = vpop.f32.mrb[39].mxu1  ;;  %v7785_v10 = vmul.f32 -1.442695, %v5935_v63 }
 0x78b   : > { %v8674_v43 = vpop.eup %8673  ;;  %v6576_v20 = vadd.f32 1.0, %v8672_v62  ;;  %8691 = vpow2.f32 %v7784_v29  ;;  %v5941_v17 = vadd.f32 %v5940_v53, %v11161_v15  ;;  %v7786_v8 = vmul.f32 -1.442695, %v5937_v27 }
 0x78c   : > { %v8676_v22 = vpop.eup %8675  ;;  %8693 = vrcp.f32 %v6575_v61  ;;  %v6577_v9 = vadd.f32 1.0, %v8674_v43  ;;  %v7787_v24 = vmul.f32 -1.442695, %v5939_v19 }
 0x78d   : > { %8695 = vrcp.f32 %v6576_v20  ;;  %v6578_v32 = vadd.f32 1.0, %v8676_v22  ;;  %v7788_v28 = vmul.f32 -1.442695, %v5941_v17 }
 0x78e   : > { %v8678_v42 = vpop.eup %8677  ;;  %8697 = vrcp.f32 %v6577_v9 }
 0x78f   : > { %v8680_v14 = vpop.eup %8679  ;;  %6955 = vst [vmem:[%s11190_s3 + $0xc0] sm:$0xff] %v8678_v42  ;;  %8699 = vrcp.f32 %v6578_v32  ;;  %v5944_v58 = vpop.f32.mrb[40].mxu1 }
 0x790   : > { %v8682_v5 = vpop.eup %8681  ;;  %6956 = vst [vmem:[%s11190_s3 + $0xc8] sm:$0xff] %v8680_v14  ;;  %8701 = vpow2.f32 %v7785_v10  ;;  %v5945_v38 = vadd.f32 %v5944_v58, %v11157_v45  ;;  %v5946_v12 = vpop.f32.mrb[41].mxu1 }
 0x791   : > { %v8684_v34 = vpop.eup %8683  ;;  %6957 = vst [vmem:[%s11190_s3 + $0xd0] sm:$0xff] %v8682_v5  ;;  %8703 = vpow2.f32 %v7786_v8  ;;  %v5947_v37 = vadd.f32 %v5946_v12, %v11161_v15  ;;  %v5948_v21 = vpop.f32.mrb[42].mxu1 }
 0x792   : > { %v8686_v56 = vpop.eup %8685  ;;  %6958 = vst [vmem:[%s11190_s3 + $0xd8] sm:$0xff] %v8684_v34  ;;  %8705 = vpow2.f32 %v7787_v24  ;;  %v7789_v25 = vmul.f32 -1.442695, %v5945_v38  ;;  %v5949_v3 = vadd.f32 %v5948_v21, %v11157_v45  ;;  %v5950_v1 = vpop.f32.mrb[43].mxu1 }
 0x793   : > { %v8688_v16 = vpop.eup %8687  ;;  %v6579_v18 = vadd.f32 1.0, %v8686_v56  ;;  %8707 = vpow2.f32 %v7788_v28  ;;  %v5951_v40 = vadd.f32 %v5950_v1, %v11161_v15  ;;  %v7790_v47 = vmul.f32 -1.442695, %v5947_v37 }
 0x794   : > { %v8690_v57 = vpop.eup %8689  ;;  %v6580_v23 = vadd.f32 1.0, %v8688_v16  ;;  %8709 = vpow2.f32 %v7789_v25  ;;  %v7791_v33 = vmul.f32 -1.442695, %v5949_v3 }
 0x795   : > { %v8692_v13 = vpop.eup %8691  ;;  %8711 = vrcp.f32 %v6579_v18  ;;  %v6581_v26 = vadd.f32 1.0, %v8690_v57  ;;  %v7792_v30 = vmul.f32 -1.442695, %v5951_v40 }
 0x796   : > { %v8694_v52 = vpop.eup %8693  ;;  %8713 = vrcp.f32 %v6580_v23  ;;  %v6582_v54 = vadd.f32 1.0, %v8692_v13 }
 0x797   : > { %v8696_v55 = vpop.eup %8695  ;;  %6959 = vst [vmem:[%s11190_s3 + $0xe0] sm:$0xff] %v8694_v52  ;;  %8715 = vrcp.f32 %v6581_v26  ;;  %v5954_v39 = vpop.f32.mrb[44].mxu1 }
 0x798   : > { %v8698_v2 = vpop.eup %8697  ;;  %6960 = vst [vmem:[%s11190_s3 + $0xe8] sm:$0xff] %v8696_v55  ;;  %8717 = vrcp.f32 %v6582_v54  ;;  %v5955_v36 = vadd.f32 %v5954_v39, %v11157_v45  ;;  %v5956_v59 = vpop.f32.mrb[45].mxu1 }
 0x799   : > { %v8700_v4 = vpop.eup %8699  ;;  %6961 = vst [vmem:[%s11190_s3 + $0xf0] sm:$0xff] %v8698_v2  ;;  %8719 = vpow2.f32 %v7790_v47  ;;  %v5958_v60 = vpop.f32.mrb[46].mxu1  ;;  %v5957_v48 = vadd.f32 %v5956_v59, %v11161_v15 }
 0x79a   : > { %v8702_v11 = vpop.eup %8701  ;;  %6962 = vst [vmem:[%s11190_s3 + $0xf8] sm:$0xff] %v8700_v4  ;;  %8721 = vpow2.f32 %v7791_v33  ;;  %v7793_v49 = vmul.f32 -1.442695, %v5955_v36  ;;  %v5960_v51 = vpop.f32.mrb[47].mxu1  ;;  %v5959_v46 = vadd.f32 %v5958_v60, %v11157_v45 }
 0x79b   : > { %v8704_v50 = vpop.eup %8703  ;;  %v6583_v44 = vadd.f32 1.0, %v8702_v11  ;;  %8723 = vpow2.f32 %v7792_v30  ;;  %v5961_v6 = vadd.f32 %v5960_v51, %v11161_v15  ;;  %v7794_v27 = vmul.f32 -1.442695, %v5957_v48 }
 0x79c   : > { %v8706_v35 = vpop.eup %8705  ;;  %v6584_v29 = vadd.f32 1.0, %v8704_v50  ;;  %8725 = vpow2.f32 %v7793_v49  ;;  %v7795_v61 = vmul.f32 -1.442695, %v5959_v46 }
 0x79d   : > { %v8708_v7 = vpop.eup %8707  ;;  %8727 = vrcp.f32 %v6583_v44  ;;  %v6585_v63 = vadd.f32 1.0, %v8706_v35  ;;  %v7796_v43 = vmul.f32 -1.442695, %v5961_v6 }
 0x79e   : > { %v8710_v0 = vpop.eup %8709  ;;  %8729 = vrcp.f32 %v6584_v29  ;;  %v6586_v31 = vadd.f32 1.0, %v8708_v7 }
 0x79f   : > { %v8712_v41 = vpop.eup %8711  ;;  %8731 = vrcp.f32 %v6585_v63  ;;  %v6587_v62 = vadd.f32 1.0, %v8710_v0  ;;  %v5964_v19 = vpop.f32.mrb[48].mxu1 }
 0x7a0   : > { %v8714_v53 = vpop.eup %8713  ;;  %6963 = vst [vmem:[%s11190_s3 + $0x100] sm:$0xff] %v8712_v41  ;;  %8733 = vrcp.f32 %v6586_v31  ;;  %v5965_v20 = vadd.f32 %v5964_v19, %v11157_v45  ;;  %v5966_v17 = vpop.f32.mrb[49].mxu1 }
 0x7a1   : > { %v8716_v22 = vpop.eup %8715  ;;  %6964 = vst [vmem:[%s11190_s3 + $0x108] sm:$0xff] %v8714_v53  ;;  %8735 = vrcp.f32 %v6587_v62  ;;  %v5968_v9 = vpop.f32.mrb[50].mxu1  ;;  %v5967_v8 = vadd.f32 %v5966_v17, %v11161_v15 }
 0x7a2   : > { %v8718_v10 = vpop.eup %8717  ;;  %6965 = vst [vmem:[%s11190_s3 + $0x110] sm:$0xff] %v8716_v22  ;;  %8737 = vpow2.f32 %v7794_v27  ;;  %v7797_v32 = vmul.f32 -1.442695, %v5965_v20  ;;  %v5970_v42 = vpop.f32.mrb[51].mxu1  ;;  %v5969_v14 = vadd.f32 %v5968_v9, %v11157_v45 }
 0x7a3   : > { %v8720_v24 = vpop.eup %8719  ;;  %6966 = vst [vmem:[%s11190_s3 + $0x118] sm:$0xff] %v8718_v10  ;;  %8739 = vpow2.f32 %v7795_v61  ;;  %v5971_v5 = vadd.f32 %v5970_v42, %v11161_v15  ;;  %v7798_v21 = vmul.f32 -1.442695, %v5967_v8 }
 0x7a4   : > { %v8722_v28 = vpop.eup %8721  ;;  %v6588_v58 = vadd.f32 1.0, %v8720_v24  ;;  %8741 = vpow2.f32 %v7796_v43  ;;  %v7799_v3 = vmul.f32 -1.442695, %v5969_v14 }
 0x7a5   : > { %v8724_v38 = vpop.eup %8723  ;;  %v6589_v12 = vadd.f32 1.0, %v8722_v28  ;;  %8743 = vpow2.f32 %v7797_v32  ;;  %v7800_v18 = vmul.f32 -1.442695, %v5971_v5 }
 0x7a6   : > { %v8726_v34 = vpop.eup %8725  ;;  %8745 = vrcp.f32 %v6588_v58  ;;  %v6590_v37 = vadd.f32 1.0, %v8724_v38 }
 0x7a7   : > { %v8728_v56 = vpop.eup %8727  ;;  %8747 = vrcp.f32 %v6589_v12  ;;  %v6591_v25 = vadd.f32 1.0, %v8726_v34  ;;  %v5974_v1 = vpop.f32.mrb[52].mxu1 }
 0x7a8   : > { %v8730_v16 = vpop.eup %8729  ;;  %6967 = vst [vmem:[%s11190_s3 + $0x120] sm:$0xff] %v8728_v56  ;;  %8749 = vrcp.f32 %v6590_v37  ;;  %v5975_v40 = vadd.f32 %v5974_v1, %v11157_v45  ;;  %v5976_v57 = vpop.f32.mrb[53].mxu1 }
 0x7a9   : > { %v8732_v23 = vpop.eup %8731  ;;  %6968 = vst [vmem:[%s11190_s3 + $0x128] sm:$0xff] %v8730_v16  ;;  %8751 = vrcp.f32 %v6591_v25  ;;  %v5977_v13 = vadd.f32 %v5976_v57, %v11161_v15  ;;  %v5978_v26 = vpop.f32.mrb[54].mxu1 }
 0x7aa   : > { %v8734_v47 = vpop.eup %8733  ;;  %6969 = vst [vmem:[%s11190_s3 + $0x130] sm:$0xff] %v8732_v23  ;;  %8753 = vpow2.f32 %v7798_v21  ;;  %v7801_v52 = vmul.f32 -1.442695, %v5975_v40  ;;  %v5980_v54 = vpop.f32.mrb[55].mxu1  ;;  %v5979_v30 = vadd.f32 %v5978_v26, %v11157_v45 }
 0x7ab   : > { %v8736_v33 = vpop.eup %8735  ;;  %6970 = vst [vmem:[%s11190_s3 + $0x138] sm:$0xff] %v8734_v47  ;;  %8755 = vpow2.f32 %v7799_v3  ;;  %v7802_v55 = vmul.f32 -1.442695, %v5977_v13  ;;  %v5981_v2 = vadd.f32 %v5980_v54, %v11161_v15 }
 0x7ac   : > { %v8738_v39 = vpop.eup %8737  ;;  %6971 = vst [vmem:[%s11190_s3 + $0x140] sm:$0xff] %v8736_v33  ;;  %8757 = vpow2.f32 %v7800_v18  ;;  %v7803_v48 = vmul.f32 -1.442695, %v5979_v30 }
 0x7ad   : > { %v8740_v36 = vpop.eup %8739  ;;  %v6592_v59 = vadd.f32 1.0, %v8738_v39  ;;  %8759 = vpow2.f32 %v7801_v52  ;;  %v7804_v46 = vmul.f32 -1.442695, %v5981_v2 }
 0x7ae   : > { %v8742_v4 = vpop.eup %8741  ;;  %v6593_v60 = vadd.f32 1.0, %v8740_v36  ;;  %8761 = vpow2.f32 %v7802_v55 }
 0x7af   : > { %v8744_v11 = vpop.eup %8743  ;;  %8763 = vrcp.f32 %v6592_v59  ;;  %v6594_v49 = vadd.f32 1.0, %v8742_v4  ;;  %v5984_v51 = vpop.f32.mrb[56].mxu1 }
 0x7b0   : > { %v8746_v50 = vpop.eup %8745  ;;  %8765 = vrcp.f32 %v6593_v60  ;;  %v6595_v44 = vadd.f32 1.0, %v8744_v11  ;;  %v5985_v35 = vadd.f32 %v5984_v51, %v11157_v45  ;;  %v5986_v29 = vpop.f32.mrb[57].mxu1 }
 0x7b1   : > { %v8748_v6 = vpop.eup %8747  ;;  %6972 = vst [vmem:[%s11190_s3 + $0x148] sm:$0xff] %v8746_v50  ;;  %8767 = vrcp.f32 %v6594_v49  ;;  %v5987_v7 = vadd.f32 %v5986_v29, %v11161_v15  ;;  %v5988_v63 = vpop.f32.mrb[58].mxu1 }
 0x7b2   : > { %v8750_v0 = vpop.eup %8749  ;;  %6973 = vst [vmem:[%s11190_s3 + $0x150] sm:$0xff] %v8748_v6  ;;  %8769 = vrcp.f32 %v6595_v44  ;;  %v7805_v31 = vmul.f32 -1.442695, %v5985_v35  ;;  %v5990_v27 = vpop.f32.mrb[59].mxu1  ;;  %v5989_v19 = vadd.f32 %v5988_v63, %v11157_v45 }
 0x7b3   : > { %v8752_v41 = vpop.eup %8751  ;;  %6974 = vst [vmem:[%s11190_s3 + $0x158] sm:$0xff] %v8750_v0  ;;  %8771 = vpow2.f32 %v7803_v48  ;;  %v7806_v62 = vmul.f32 -1.442695, %v5987_v7  ;;  %v5991_v20 = vadd.f32 %v5990_v27, %v11161_v15 }
 0x7b4   : > { %v8754_v61 = vpop.eup %8753  ;;  %6975 = vst [vmem:[%s11190_s3 + $0x160] sm:$0xff] %v8752_v41  ;;  %8773 = vpow2.f32 %v7804_v46  ;;  %v7807_v24 = vmul.f32 -1.442695, %v5989_v19 }
 0x7b5   : > { %v8756_v53 = vpop.eup %8755  ;;  %v6596_v43 = vadd.f32 1.0, %v8754_v61  ;;  %8775 = vpow2.f32 %v7805_v31  ;;  %v7808_v38 = vmul.f32 -1.442695, %v5991_v20 }
 0x7b6   : > { %v8758_v17 = vpop.eup %8757  ;;  %v6597_v22 = vadd.f32 1.0, %v8756_v53  ;;  %8777 = vpow2.f32 %v7806_v62 }
 0x7b7   : > { %v8760_v9 = vpop.eup %8759  ;;  %8779 = vrcp.f32 %v6596_v43  ;;  %v6598_v10 = vadd.f32 1.0, %v8758_v17  ;;  %v5994_v32 = vpop.f32.mrb[60].mxu1 }
 0x7b8   : > { %v8762_v8 = vpop.eup %8761  ;;  %8781 = vrcp.f32 %v6597_v22  ;;  %v6599_v42 = vadd.f32 1.0, %v8760_v9  ;;  %v5995_v14 = vadd.f32 %v5994_v32, %v11157_v45  ;;  %v5996_v28 = vpop.f32.mrb[61].mxu1 }
 0x7b9   : > { %v8764_v58 = vpop.eup %8763  ;;  %8783 = vrcp.f32 %v6598_v10  ;;  %v6600_v5 = vadd.f32 1.0, %v8762_v8  ;;  %v5997_v12 = vadd.f32 %v5996_v28, %v11161_v15  ;;  %v5998_v34 = vpop.f32.mrb[62].mxu1 }
 0x7ba   : > { %v8766_v37 = vpop.eup %8765  ;;  %6976 = vst [vmem:[%s11190_s3 + $0x168] sm:$0xff] %v8764_v58  ;;  %8785 = vrcp.f32 %v6599_v42  ;;  %v7809_v21 = vmul.f32 -1.442695, %v5995_v14  ;;  %v6000_v56 = vpop.f32.mrb[63].mxu1  ;;  %v5999_v16 = vadd.f32 %v5998_v34, %v11157_v45 }
 0x7bb   : > { %v8768_v25 = vpop.eup %8767  ;;  %6977 = vst [vmem:[%s11190_s3 + $0x170] sm:$0xff] %v8766_v37  ;;  %8787 = vrcp.f32 %v6600_v5  ;;  %v7810_v3 = vmul.f32 -1.442695, %v5997_v12  ;;  %v6001_v40 = vadd.f32 %v6000_v56, %v11161_v15 }
 0x7bc   : > { %v8770_v1 = vpop.eup %8769  ;;  %6978 = vst [vmem:[%s11190_s3 + $0x178] sm:$0xff] %v8768_v25  ;;  %8789 = vpow2.f32 %v7807_v24  ;;  %v7811_v33 = vmul.f32 -1.442695, %v5999_v16 }
 0x7bd   : > { %v8772_v18 = vpop.eup %8771  ;;  %6979 = vst [vmem:[%s11190_s3 + $0x180] sm:$0xff] %v8770_v1  ;;  %8791 = vpow2.f32 %v7808_v38  ;;  %v7812_v36 = vmul.f32 -1.442695, %v6001_v40 }
 0x7be   : > { %v8774_v57 = vpop.eup %8773  ;;  %v6601_v23 = vadd.f32 1.0, %v8772_v18  ;;  %8793 = vpow2.f32 %v7809_v21 }
 0x7bf   : > { %v8776_v13 = vpop.eup %8775  ;;  %v6602_v26 = vadd.f32 1.0, %v8774_v57  ;;  %8795 = vpow2.f32 %v7810_v3  ;;  %v6004_v47 = vpop.f32.mrb[64].mxu1 }
 0x7c0   : > { %v8778_v52 = vpop.eup %8777  ;;  %8797 = vrcp.f32 %v6601_v23  ;;  %v6603_v54 = vadd.f32 1.0, %v8776_v13  ;;  %v6005_v55 = vadd.f32 %v6004_v47, %v11157_v45  ;;  %v6006_v30 = vpop.f32.mrb[65].mxu1 }
 0x7c1   : > { %v8780_v39 = vpop.eup %8779  ;;  %8799 = vrcp.f32 %v6602_v26  ;;  %v6604_v2 = vadd.f32 1.0, %v8778_v52  ;;  %v6007_v59 = vadd.f32 %v6006_v30, %v11161_v15  ;;  %v6008_v4 = vpop.f32.mrb[66].mxu1 }
 0x7c2   : > { %v8782_v60 = vpop.eup %8781  ;;  %6980 = vst [vmem:[%s11190_s3 + $0x188] sm:$0xff] %v8780_v39  ;;  %8801 = vrcp.f32 %v6603_v54  ;;  %v7813_v11 = vmul.f32 -1.442695, %v6005_v55  ;;  %v6009_v49 = vadd.f32 %v6008_v4, %v11157_v45  ;;  %v6010_v48 = vpop.f32.mrb[67].mxu1 }
 0x7c3   : > { %v8784_v51 = vpop.eup %8783  ;;  %6981 = vst [vmem:[%s11190_s3 + $0x190] sm:$0xff] %v8782_v60  ;;  %8803 = vrcp.f32 %v6604_v2  ;;  %v7814_v50 = vmul.f32 -1.442695, %v6007_v59  ;;  %v6011_v29 = vadd.f32 %v6010_v48, %v11161_v15 }
 0x7c4   : > { %v8786_v44 = vpop.eup %8785  ;;  %6982 = vst [vmem:[%s11190_s3 + $0x198] sm:$0xff] %v8784_v51  ;;  %8805 = vpow2.f32 %v7811_v33  ;;  %v7815_v46 = vmul.f32 -1.442695, %v6009_v49 }
 0x7c5   : > { %v8788_v35 = vpop.eup %8787  ;;  %6983 = vst [vmem:[%s11190_s3 + $0x1a0] sm:$0xff] %v8786_v44  ;;  %8807 = vpow2.f32 %v7812_v36  ;;  %v7816_v53 = vmul.f32 -1.442695, %v6011_v29 }
 0x7c6   : > { %v8790_v6 = vpop.eup %8789  ;;  %6984 = vst [vmem:[%s11190_s3 + $0x1a8] sm:$0xff] %v8788_v35  ;;  %8809 = vpow2.f32 %v7813_v11 }
 0x7c7   : > { %v8792_v7 = vpop.eup %8791  ;;  %v6605_v63 = vadd.f32 1.0, %v8790_v6  ;;  %8811 = vpow2.f32 %v7814_v50  ;;  %v6014_v0 = vpop.f32.mrb[68].mxu1 }
 0x7c8   : > { %v8794_v31 = vpop.eup %8793  ;;  %v6606_v27 = vadd.f32 1.0, %v8792_v7  ;;  %8813 = vpow2.f32 %v7815_v46  ;;  %v6015_v41 = vadd.f32 %v6014_v0, %v11157_v45  ;;  %v6016_v62 = vpop.f32.mrb[69].mxu1 }
 0x7c9   : > { %v8796_v61 = vpop.eup %8795  ;;  %8815 = vrcp.f32 %v6605_v63  ;;  %v6607_v19 = vadd.f32 1.0, %v8794_v31  ;;  %v6017_v43 = vadd.f32 %v6016_v62, %v11161_v15  ;;  %v6018_v20 = vpop.f32.mrb[70].mxu1 }
 0x7ca   : > { %v8798_v17 = vpop.eup %8797  ;;  %8817 = vrcp.f32 %v6606_v27  ;;  %v6608_v22 = vadd.f32 1.0, %v8796_v61  ;;  %v7817_v9 = vmul.f32 -1.442695, %v6015_v41  ;;  %v6019_v10 = vadd.f32 %v6018_v20, %v11157_v45  ;;  %v6020_v32 = vpop.f32.mrb[71].mxu1 }
 0x7cb   : > { %v8800_v8 = vpop.eup %8799  ;;  %6985 = vst [vmem:[%s11190_s3 + $0x1b0] sm:$0xff] %v8798_v17  ;;  %8819 = vrcp.f32 %v6607_v19  ;;  %v7818_v42 = vmul.f32 -1.442695, %v6017_v43  ;;  %v6021_v5 = vadd.f32 %v6020_v32, %v11161_v15 }
 0x7cc   : > { %v8802_v24 = vpop.eup %8801  ;;  %6986 = vst [vmem:[%s11190_s3 + $0x1b8] sm:$0xff] %v8800_v8  ;;  %8821 = vrcp.f32 %v6608_v22  ;;  %v7819_v14 = vmul.f32 -1.442695, %v6019_v10 }
 0x7cd   : > { %v8804_v28 = vpop.eup %8803  ;;  %6987 = vst [vmem:[%s11190_s3 + $0x1c0] sm:$0xff] %v8802_v24  ;;  %8823 = vpow2.f32 %v7816_v53  ;;  %v7820_v23 = vmul.f32 -1.442695, %v6021_v5 }
 0x7ce   : > { %v8806_v58 = vpop.eup %8805  ;;  %6988 = vst [vmem:[%s11190_s3 + $0x1c8] sm:$0xff] %v8804_v28  ;;  %8825 = vpow2.f32 %v7817_v9 }
 0x7cf   : > { %v8808_v38 = vpop.eup %8807  ;;  %v6609_v12 = vadd.f32 1.0, %v8806_v58  ;;  %8827 = vpow2.f32 %v7818_v42  ;;  %v6024_v34 = vpop.f32.mrb[72].mxu1 }
 0x7d0   : > { %v8810_v37 = vpop.eup %8809  ;;  %v6610_v21 = vadd.f32 1.0, %v8808_v38  ;;  %8829 = vpow2.f32 %v7819_v14  ;;  %v6025_v56 = vadd.f32 %v6024_v34, %v11157_v45  ;;  %v6026_v25 = vpop.f32.mrb[73].mxu1 }
 0x7d1   : > { %v8812_v3 = vpop.eup %8811  ;;  %8831 = vrcp.f32 %v6609_v12  ;;  %v6611_v1 = vadd.f32 1.0, %v8810_v37  ;;  %v6027_v16 = vadd.f32 %v6026_v25, %v11161_v15  ;;  %v6028_v18 = vpop.f32.mrb[74].mxu1 }
 0x7d2   : > { %v8814_v40 = vpop.eup %8813  ;;  %8833 = vrcp.f32 %v6610_v21  ;;  %v6612_v57 = vadd.f32 1.0, %v8812_v3  ;;  %v6029_v13 = vadd.f32 %v6028_v18, %v11157_v45  ;;  %v6030_v26 = vpop.f32.mrb[75].mxu1  ;;  %v7821_v54 = vmul.f32 -1.442695, %v6025_v56 }
 0x7d3   : > { %v8816_v47 = vpop.eup %8815  ;;  %8835 = vrcp.f32 %v6611_v1  ;;  %v6613_v52 = vadd.f32 1.0, %v8814_v40  ;;  %v7822_v55 = vmul.f32 -1.442695, %v6027_v16  ;;  %v6031_v36 = vadd.f32 %v6030_v26, %v11161_v15 }
 0x7d4   : > { %v8818_v33 = vpop.eup %8817  ;;  %6989 = vst [vmem:[%s11190_s3 + $0x1d0] sm:$0xff] %v8816_v47  ;;  %8837 = vrcp.f32 %v6612_v57  ;;  %v7823_v39 = vmul.f32 -1.442695, %v6029_v13 }
 0x7d5   : > { %v8820_v30 = vpop.eup %8819  ;;  %6990 = vst [vmem:[%s11190_s3 + $0x1d8] sm:$0xff] %v8818_v33  ;;  %8839 = vrcp.f32 %v6613_v52  ;;  %v7824_v6 = vmul.f32 -1.442695, %v6031_v36 }
 0x7d6   : > { %v8822_v2 = vpop.eup %8821  ;;  %6991 = vst [vmem:[%s11190_s3 + $0x1e0] sm:$0xff] %v8820_v30  ;;  %8841 = vpow2.f32 %v7820_v23 }
 0x7d7   : > { %v8824_v59 = vpop.eup %8823  ;;  %6992 = vst [vmem:[%s11190_s3 + $0x1e8] sm:$0xff] %v8822_v2  ;;  %8843 = vpow2.f32 %v7821_v54  ;;  %v6034_v4 = vpop.f32.mrb[76].mxu1 }
 0x7d8   : > { %v8826_v60 = vpop.eup %8825  ;;  %v6614_v11 = vadd.f32 1.0, %v8824_v59  ;;  %8845 = vpow2.f32 %v7822_v55  ;;  %v6035_v49 = vadd.f32 %v6034_v4, %v11157_v45  ;;  %v6036_v48 = vpop.f32.mrb[77].mxu1 }
 0x7d9   : > { %v8828_v51 = vpop.eup %8827  ;;  %v6615_v50 = vadd.f32 1.0, %v8826_v60  ;;  %8847 = vpow2.f32 %v7823_v39  ;;  %v6037_v44 = vadd.f32 %v6036_v48, %v11161_v15  ;;  %v6038_v46 = vpop.f32.mrb[78].mxu1 }
 0x7da   : > { %v8830_v35 = vpop.eup %8829  ;;  %8849 = vrcp.f32 %v6614_v11  ;;  %v6616_v29 = vadd.f32 1.0, %v8828_v51  ;;  %v6039_v7 = vadd.f32 %v6038_v46, %v11157_v45  ;;  %v6040_v63 = vpop.f32.mrb[79].mxu1  ;;  %v7825_v27 = vmul.f32 -1.442695, %v6035_v49 }
 0x7db   : > { %v8832_v0 = vpop.eup %8831  ;;  %8851 = vrcp.f32 %v6615_v50  ;;  %v6617_v31 = vadd.f32 1.0, %v8830_v35  ;;  %v6041_v41 = vadd.f32 %v6040_v63, %v11161_v15  ;;  %v7826_v61 = vmul.f32 -1.442695, %v6037_v44 }
 0x7dc   : > { %v8834_v62 = vpop.eup %8833  ;;  %6993 = vst [vmem:[%s11190_s3 + $0x1f0] sm:$0xff] %v8832_v0  ;;  %8853 = vrcp.f32 %v6616_v29  ;;  %v7827_v53 = vmul.f32 -1.442695, %v6039_v7 }
 0x7dd   : > { %v8836_v19 = vpop.eup %8835  ;;  %6994 = vst [vmem:[%s11190_s3 + $0x1f8] sm:$0xff] %v8834_v62  ;;  %8855 = vrcp.f32 %v6617_v31  ;;  %v7828_v20 = vmul.f32 -1.442695, %v6041_v41 }
 0x7de   : > { %v8838_v43 = vpop.eup %8837  ;;  %6995 = vst [vmem:[%s11190_s3 + $0x200] sm:$0xff] %v8836_v19  ;;  %8857 = vpow2.f32 %v7824_v6 }
 0x7df   : > { %v8840_v17 = vpop.eup %8839  ;;  %6996 = vst [vmem:[%s11190_s3 + $0x208] sm:$0xff] %v8838_v43  ;;  %8859 = vpow2.f32 %v7825_v27  ;;  %v6044_v22 = vpop.f32.mrb[80].mxu1 }
 0x7e0   : > { %v8842_v9 = vpop.eup %8841  ;;  %6997 = vst [vmem:[%s11190_s3 + $0x210] sm:$0xff] %v8840_v17  ;;  %8861 = vpow2.f32 %v7826_v61  ;;  %v6045_v10 = vadd.f32 %v6044_v22, %v11157_v45  ;;  %v6046_v32 = vpop.f32.mrb[81].mxu1 }
 0x7e1   : > { %v8844_v8 = vpop.eup %8843  ;;  %v6618_v42 = vadd.f32 1.0, %v8842_v9  ;;  %8863 = vpow2.f32 %v7827_v53  ;;  %v6047_v24 = vadd.f32 %v6046_v32, %v11161_v15  ;;  %v6048_v14 = vpop.f32.mrb[82].mxu1 }
 0x7e2   : > { %v8846_v28 = vpop.eup %8845  ;;  %v6619_v58 = vadd.f32 1.0, %v8844_v8  ;;  %8865 = vpow2.f32 %v7828_v20  ;;  %v6049_v5 = vadd.f32 %v6048_v14, %v11157_v45  ;;  %v6050_v38 = vpop.f32.mrb[83].mxu1  ;;  %v7829_v37 = vmul.f32 -1.442695, %v6045_v10 }
 0x7e3   : > { %v8848_v12 = vpop.eup %8847  ;;  %8867 = vrcp.f32 %v6618_v42  ;;  %v6620_v34 = vadd.f32 1.0, %v8846_v28  ;;  %v6051_v21 = vadd.f32 %v6050_v38, %v11161_v15  ;;  %v7830_v3 = vmul.f32 -1.442695, %v6047_v24 }
 0x7e4   : > { %v8850_v56 = vpop.eup %8849  ;;  %8869 = vrcp.f32 %v6619_v58  ;;  %v6621_v25 = vadd.f32 1.0, %v8848_v12 }
 0x7e5   : > { %9486 = shalt.err (!%p9483_p2)
}
 0x7e6   : > { %s9487_s30 = scalar_lea.hbm %s11337_s27, 16384  ;;  %s9491_s7 = scalar_lea.hbm %s11613_s24, 65536 }
 0x7e7   : > { %p9488_p9 = scmp.ne.s32.totalorder %s11337_s27, %s9487_s30  ;;  %p9492_p6 = scmp.lt.u32.totalorder %s11337_s27, %s11613_s24 }
 0x7e8   : > { %p9493_p8 = scmp.lt.u32.totalorder %s9491_s7, %s9487_s30  ;;  %p9495_p11 = scmp.lt.u32.totalorder %s9487_s30, %s11337_s27 }
 0x7e9   : > { %p9489_p10 = pnand %p9488_p9, %p11614_p0 }
 0x7ea   : > { %p9494_p7 = por %p9493_p8, %p9492_p6 }
 0x7eb   : > { %p9490_p4 = pneg %p9489_p10 }
 0x7ec   : > { %p9496_p12 = por %p9495_p11, %p9494_p7 }
 0x7ee   : > { %p9497_p13 = pnand %p9496_p12, %p9490_p4 }
 0x7f0   : > { %9500 = shalt.err (!%p9497_p13)
}
 0x7f1   : > { %s9624_s8 = smov 256   ;;  %s9625_s6 = smov 16   ;;  %v8852_v1 = vpop.eup %8851  ;;  %6998 = vst [vmem:[%s11190_s3 + $0x218] sm:$0xff] %v8850_v56  ;;  %8871 = vrcp.f32 %v6620_v34  ;;  %v7831_v16 = vmul.f32 -1.442695, %v6049_v5  ;;  %v6054_v23 = vpop.f32.mrb[84].mxu1 }
 0x7f2   : > { %7947 = dma.vmem_to_hbm [thread:$0]  (%p11614_p0), %s11341_s4, 16384, %s11337_s27, %s7193_s23, %s9624_s8, %s9624_s8, %s9625_s6   ;;  %v8854_v18 = vpop.eup %8853  ;;  %8873 = vrcp.f32 %v6621_v25  ;;  %v7832_v40 = vmul.f32 -1.442695, %v6051_v21  ;;  %v6055_v26 = vadd.f32 %v6054_v23, %v11157_v45  ;;  %v6056_v47 = vpop.f32.mrb[85].mxu1 }
 0x7f3   : > { %6999 = vst [vmem:[%s11190_s3 + $0x220] sm:$0xff] %v8852_v1  ;;  %v8856_v57 = vpop.eup %8855  ;;  %7000 = vst [vmem:[%s11190_s3 + $0x228] sm:$0xff] %v8854_v18  ;;  %8875 = vpow2.f32 %v7829_v37  ;;  %v6057_v33 = vadd.f32 %v6056_v47, %v11161_v15  ;;  %v6058_v55 = vpop.f32.mrb[86].mxu1  ;;  %s7207_s27 = sshll.u32 %s11190_s3, 4  ;;  %s11615_s1 = sld [smem:[#allocation51_spill]]  ;;  %s11482_s27 = int_to_ptr.vmem [resolvable:$true] %s7207_s27 }
 0x7f4   : > { %v8858_v13 = vpop.eup %8857  ;;  %7001 = vst [vmem:[%s11190_s3 + $0x230] sm:$0xff] %v8856_v57  ;;  %8877 = vpow2.f32 %v7830_v3  ;;  %v6059_v2 = vadd.f32 %v6058_v55, %v11157_v45  ;;  %v6060_v36 = vpop.f32.mrb[87].mxu1  ;;  %v7833_v48 = vmul.f32 -1.442695, %v6055_v26  ;;  %s7188_s2 = scalar_lea.sflag [#allocation4], %s10130_s15  ;;  %s9501_s22 = scalar_lea.vmem %s11482_s27, 16384 }
 0x7f5   : > { %v8860_v52 = vpop.eup %8859  ;;  %v6622_v54 = vadd.f32 1.0, %v8858_v13  ;;  %8879 = vpow2.f32 %v7831_v16  ;;  %v6061_v60 = vadd.f32 %v6060_v36, %v11161_v15  ;;  %v7834_v44 = vmul.f32 -1.442695, %v6057_v33  ;;  %v6064_v7 = vpop.f32.mrb[88].mxu1  ;;  %p9502_p1 = scmp.ne.s32.totalorder %s11482_s27, %s9501_s22  ;;  %s9626_s7 = smov [#allocation25]  }
 0x7f6   : > { %v8862_v30 = vpop.eup %8861  ;;  %v6623_v39 = vadd.f32 1.0, %v8860_v52  ;;  %8881 = vpow2.f32 %v7832_v40  ;;  %v7835_v35 = vmul.f32 -1.442695, %v6059_v2  ;;  %v6065_v0 = vadd.f32 %v6064_v7, %v11157_v45  ;;  %v6066_v31 = vpop.f32.mrb[89].mxu1  ;;  %s9505_s25 = sshll.u32 %s9626_s7, 4  ;;  %s9506_s25 = int_to_ptr.vmem [resolvable:$false] %s9505_s25 }
 0x7f7   : > { %v8864_v59 = vpop.eup %8863  ;;  %8883 = vrcp.f32 %v6622_v54  ;;  %v6624_v4 = vadd.f32 1.0, %v8862_v30  ;;  %v7836_v6 = vmul.f32 -1.442695, %v6061_v60  ;;  %v6067_v41 = vadd.f32 %v6066_v31, %v11161_v15  ;;  %v6068_v62 = vpop.f32.mrb[90].mxu1  ;;  %p9503_p3 = pnand %p9502_p1, %p11614_p0  ;;  %s9507_s29 = scalar_lea.vmem %s9506_s25, 32768 }
 0x7f8   : > { %v8866_v11 = vpop.eup %8865  ;;  %8885 = vrcp.f32 %v6623_v39  ;;  %v6625_v49 = vadd.f32 1.0, %v8864_v59  ;;  %v6069_v53 = vadd.f32 %v6068_v62, %v11157_v45  ;;  %v6070_v43 = vpop.f32.mrb[91].mxu1  ;;  %v7837_v32 = vmul.f32 -1.442695, %v6065_v0  ;;  %p9508_p2 = scmp.lt.s32.totalorder %s11482_s27, %s9506_s25  ;;  %p9509_p9 = scmp.lt.s32.totalorder %s9507_s29, %s9501_s22 }
 0x7f9   : > { %v8868_v51 = vpop.eup %8867  ;;  %8887 = vrcp.f32 %v6624_v4  ;;  %v6626_v50 = vadd.f32 1.0, %v8866_v11  ;;  %v6071_v22 = vadd.f32 %v6070_v43, %v11161_v15  ;;  %v7838_v24 = vmul.f32 -1.442695, %v6067_v41  ;;  %v6074_v38 = vpop.f32.mrb[92].mxu1  ;;  %s11480_s30 = scalar_lea.hbm %s11615_s1, %s7891_s26  ;;  %p9504_p5 = pneg %p9503_p3 }
 0x7fa   : > { %v8870_v46 = vpop.eup %8869  ;;  %7002 = vst [vmem:[%s11190_s3 + $0x238] sm:$0xff] %v8868_v51  ;;  %8889 = vrcp.f32 %v6625_v49  ;;  %v7839_v28 = vmul.f32 -1.442695, %v6069_v53  ;;  %v6075_v34 = vadd.f32 %v6074_v38, %v11157_v45  ;;  %v6076_v37 = vpop.f32.mrb[93].mxu1  ;;  %p9510_p10 = por %p9509_p9, %p9508_p2 }
 0x7fb   : > { %v8872_v29 = vpop.eup %8871  ;;  %7003 = vst [vmem:[%s11190_s3 + $0x240] sm:$0xff] %v8870_v46  ;;  %8891 = vrcp.f32 %v6626_v50  ;;  %v7840_v5 = vmul.f32 -1.442695, %v6071_v22  ;;  %v6077_v56 = vadd.f32 %v6076_v37, %v11161_v15  ;;  %v6078_v25 = vpop.f32.mrb[94].mxu1 }
 0x7fc   : > { %v8874_v63 = vpop.eup %8873  ;;  %7004 = vst [vmem:[%s11190_s3 + $0x248] sm:$0xff] %v8872_v29  ;;  %8893 = vpow2.f32 %v7833_v48  ;;  %v7841_v1 = vmul.f32 -1.442695, %v6075_v34  ;;  %v6079_v16 = vadd.f32 %v6078_v25, %v11157_v45  ;;  %v6080_v18 = vpop.f32.mrb[95].mxu1  ;;  %p9511_p4 = pnand %p9510_p10, %p9504_p5 }
 0x7fd   : > { %v8876_v27 = vpop.eup %8875  ;;  %7005 = vst [vmem:[%s11190_s3 + $0x250] sm:$0xff] %v8874_v63  ;;  %8895 = vpow2.f32 %v7834_v44  ;;  %v6081_v23 = vadd.f32 %v6080_v18, %v11161_v15  ;;  %v7842_v54 = vmul.f32 -1.442695, %v6077_v56 }
 0x7fe   : > { %v8878_v61 = vpop.eup %8877  ;;  %v6627_v19 = vadd.f32 1.0, %v8876_v27  ;;  %8897 = vpow2.f32 %v7835_v35  ;;  %v7843_v30 = vmul.f32 -1.442695, %v6079_v16 }
 0x7ff   : > { %v8880_v20 = vpop.eup %8879  ;;  %v6628_v17 = vadd.f32 1.0, %v8878_v61  ;;  %8899 = vpow2.f32 %v7836_v6  ;;  %v7844_v2 = vmul.f32 -1.442695, %v6081_v23  ;;  %v6084_v36 = vpop.f32.mrb[96].mxu1 }
 0x800   : > { %v8882_v9 = vpop.eup %8881  ;;  %8901 = vrcp.f32 %v6627_v19  ;;  %v6629_v10 = vadd.f32 1.0, %v8880_v20  ;;  %v6085_v4 = vadd.f32 %v6084_v36, %v11157_v45  ;;  %v6086_v60 = vpop.f32.mrb[97].mxu1 }
 0x801   : > { %v8884_v8 = vpop.eup %8883  ;;  %8903 = vrcp.f32 %v6628_v17  ;;  %v6630_v42 = vadd.f32 1.0, %v8882_v9  ;;  %v6088_v49 = vpop.f32.mrb[98].mxu1  ;;  %v6087_v50 = vadd.f32 %v6086_v60, %v11161_v15 }
 0x802   : > { %v8886_v14 = vpop.eup %8885  ;;  %7006 = vst [vmem:[%s11190_s3 + $0x258] sm:$0xff] %v8884_v8  ;;  %8905 = vrcp.f32 %v6629_v10  ;;  %v7845_v51 = vmul.f32 -1.442695, %v6085_v4  ;;  %v6090_v44 = vpop.f32.mrb[99].mxu1  ;;  %v6089_v29 = vadd.f32 %v6088_v49, %v11157_v45 }
 0x803   : > { %v8888_v58 = vpop.eup %8887  ;;  %7007 = vst [vmem:[%s11190_s3 + $0x260] sm:$0xff] %v8886_v14  ;;  %8907 = vrcp.f32 %v6630_v42  ;;  %v6091_v63 = vadd.f32 %v6090_v44, %v11161_v15  ;;  %v7846_v62 = vmul.f32 -1.442695, %v6087_v50 }
 0x804   : > { %v8890_v12 = vpop.eup %8889  ;;  %7008 = vst [vmem:[%s11190_s3 + $0x268] sm:$0xff] %v8888_v58  ;;  %8909 = vpow2.f32 %v7837_v32  ;;  %v7847_v53 = vmul.f32 -1.442695, %v6089_v29 }
 0x805   : > { %v8892_v21 = vpop.eup %8891  ;;  %7009 = vst [vmem:[%s11190_s3 + $0x270] sm:$0xff] %v8890_v12  ;;  %8911 = vpow2.f32 %v7838_v24  ;;  %v7848_v17 = vmul.f32 -1.442695, %v6091_v63 }
 0x806   : > { %v8894_v3 = vpop.eup %8893  ;;  %7010 = vst [vmem:[%s11190_s3 + $0x278] sm:$0xff] %v8892_v21  ;;  %8913 = vpow2.f32 %v7839_v28 }
 0x807   : > { %v8896_v40 = vpop.eup %8895  ;;  %v6631_v57 = vadd.f32 1.0, %v8894_v3  ;;  %8915 = vpow2.f32 %v7840_v5  ;;  %v6094_v43 = vpop.f32.mrb[100].mxu1 }
 0x808   : > { %v8898_v13 = vpop.eup %8897  ;;  %v6632_v26 = vadd.f32 1.0, %v8896_v40  ;;  %8917 = vpow2.f32 %v7841_v1  ;;  %v6095_v22 = vadd.f32 %v6094_v43, %v11157_v45  ;;  %v6096_v9 = vpop.f32.mrb[101].mxu1 }
 0x809   : > { %v8900_v47 = vpop.eup %8899  ;;  %8919 = vrcp.f32 %v6631_v57  ;;  %v6633_v52 = vadd.f32 1.0, %v8898_v13  ;;  %v6098_v32 = vpop.f32.mrb[102].mxu1  ;;  %v6097_v24 = vadd.f32 %v6096_v9, %v11161_v15 }
 0x80a   : > { %v8902_v33 = vpop.eup %8901  ;;  %8921 = vrcp.f32 %v6632_v26  ;;  %v6634_v55 = vadd.f32 1.0, %v8900_v47  ;;  %v7849_v42 = vmul.f32 -1.442695, %v6095_v22  ;;  %v6100_v14 = vpop.f32.mrb[103].mxu1  ;;  %v6099_v58 = vadd.f32 %v6098_v32, %v11157_v45 }
 0x80b   : > { %v8904_v39 = vpop.eup %8903  ;;  %7011 = vst [vmem:[%s11190_s3 + $0x280] sm:$0xff] %v8902_v33  ;;  %8923 = vrcp.f32 %v6633_v52  ;;  %v6101_v12 = vadd.f32 %v6100_v14, %v11161_v15  ;;  %v7850_v25 = vmul.f32 -1.442695, %v6097_v24 }
 0x80c   : > { %v8906_v59 = vpop.eup %8905  ;;  %7012 = vst [vmem:[%s11190_s3 + $0x288] sm:$0xff] %v8904_v39  ;;  %8925 = vrcp.f32 %v6634_v55  ;;  %v7851_v16 = vmul.f32 -1.442695, %v6099_v58 }
 0x80d   : > { %v8908_v11 = vpop.eup %8907  ;;  %7013 = vst [vmem:[%s11190_s3 + $0x290] sm:$0xff] %v8906_v59  ;;  %8927 = vpow2.f32 %v7842_v54  ;;  %v7852_v57 = vmul.f32 -1.442695, %v6101_v12 }
 0x80e   : > { %v8910_v48 = vpop.eup %8909  ;;  %7014 = vst [vmem:[%s11190_s3 + $0x298] sm:$0xff] %v8908_v11  ;;  %8929 = vpow2.f32 %v7843_v30 }
 0x80f   : > { %v8912_v46 = vpop.eup %8911  ;;  %v6635_v35 = vadd.f32 1.0, %v8910_v48  ;;  %8931 = vpow2.f32 %v7844_v2  ;;  %v6104_v18 = vpop.f32.mrb[104].mxu1 }
 0x810   : > { %v8914_v6 = vpop.eup %8913  ;;  %v6636_v7 = vadd.f32 1.0, %v8912_v46  ;;  %8933 = vpow2.f32 %v7845_v51  ;;  %v6105_v23 = vadd.f32 %v6104_v18, %v11157_v45  ;;  %v6106_v13 = vpop.f32.mrb[105].mxu1 }
 0x811   : > { %v8916_v0 = vpop.eup %8915  ;;  %8935 = vrcp.f32 %v6635_v35  ;;  %v6637_v31 = vadd.f32 1.0, %v8914_v6  ;;  %v6107_v47 = vadd.f32 %v6106_v13, %v11161_v15  ;;  %v6108_v52 = vpop.f32.mrb[106].mxu1 }
 0x812   : > { %v8918_v27 = vpop.eup %8917  ;;  %8937 = vrcp.f32 %v6636_v7  ;;  %v6638_v41 = vadd.f32 1.0, %v8916_v0  ;;  %v7853_v33 = vmul.f32 -1.442695, %v6105_v23  ;;  %v6110_v55 = vpop.f32.mrb[107].mxu1  ;;  %v6109_v2 = vadd.f32 %v6108_v52, %v11157_v45 }
 0x813   : > { %v8920_v61 = vpop.eup %8919  ;;  %8939 = vrcp.f32 %v6637_v31  ;;  %v6639_v19 = vadd.f32 1.0, %v8918_v27  ;;  %v7854_v39 = vmul.f32 -1.442695, %v6107_v47  ;;  %v6111_v59 = vadd.f32 %v6110_v55, %v11161_v15 }
 0x814   : > { %v8922_v20 = vpop.eup %8921  ;;  %7015 = vst [vmem:[%s11190_s3 + $0x2a0] sm:$0xff] %v8920_v61  ;;  %8941 = vrcp.f32 %v6638_v41  ;;  %v7855_v50 = vmul.f32 -1.442695, %v6109_v2 }
 0x815   : > { %v8924_v10 = vpop.eup %8923  ;;  %7016 = vst [vmem:[%s11190_s3 + $0x2a8] sm:$0xff] %v8922_v20  ;;  %8943 = vrcp.f32 %v6639_v19  ;;  %v7856_v29 = vmul.f32 -1.442695, %v6111_v59 }
 0x816   : > { %v8926_v8 = vpop.eup %8925  ;;  %7017 = vst [vmem:[%s11190_s3 + $0x2b0] sm:$0xff] %v8924_v10  ;;  %8945 = vpow2.f32 %v7846_v62 }
 0x817   : > { %v8928_v28 = vpop.eup %8927  ;;  %7018 = vst [vmem:[%s11190_s3 + $0x2b8] sm:$0xff] %v8926_v8  ;;  %8947 = vpow2.f32 %v7847_v53  ;;  %v6114_v44 = vpop.f32.mrb[108].mxu1 }
 0x818   : > { %v8930_v5 = vpop.eup %8929  ;;  %v6640_v38 = vadd.f32 1.0, %v8928_v28  ;;  %8949 = vpow2.f32 %v7848_v17  ;;  %v6115_v6 = vadd.f32 %v6114_v44, %v11157_v45  ;;  %v6116_v7 = vpop.f32.mrb[109].mxu1 }
 0x819   : > { %v8932_v34 = vpop.eup %8931  ;;  %v6641_v37 = vadd.f32 1.0, %v8930_v5  ;;  %8951 = vpow2.f32 %v7849_v42  ;;  %v6117_v0 = vadd.f32 %v6116_v7, %v11161_v15  ;;  %v6118_v31 = vpop.f32.mrb[110].mxu1 }
 0x81a   : > { %v8934_v21 = vpop.eup %8933  ;;  %8953 = vrcp.f32 %v6640_v38  ;;  %v6642_v56 = vadd.f32 1.0, %v8932_v34  ;;  %v7857_v41 = vmul.f32 -1.442695, %v6115_v6  ;;  %v6120_v62 = vpop.f32.mrb[111].mxu1  ;;  %v6119_v43 = vadd.f32 %v6118_v31, %v11157_v45 }
 0x81b   : > { %v8936_v3 = vpop.eup %8935  ;;  %8955 = vrcp.f32 %v6641_v37  ;;  %v6643_v1 = vadd.f32 1.0, %v8934_v21  ;;  %v7858_v19 = vmul.f32 -1.442695, %v6117_v0  ;;  %v6121_v22 = vadd.f32 %v6120_v62, %v11161_v15 }
 0x81c   : > { %v8938_v40 = vpop.eup %8937  ;;  %7019 = vst [vmem:[%s11190_s3 + $0x2c0] sm:$0xff] %v8936_v3  ;;  %8957 = vrcp.f32 %v6642_v56  ;;  %v7859_v28 = vmul.f32 -1.442695, %v6119_v43 }
 0x81d   : > { %v8940_v26 = vpop.eup %8939  ;;  %7020 = vst [vmem:[%s11190_s3 + $0x2c8] sm:$0xff] %v8938_v40  ;;  %8959 = vrcp.f32 %v6643_v1  ;;  %v7860_v34 = vmul.f32 -1.442695, %v6121_v22 }
 0x81e   : > { %v8942_v54 = vpop.eup %8941  ;;  %7021 = vst [vmem:[%s11190_s3 + $0x2d0] sm:$0xff] %v8940_v26  ;;  %8961 = vpow2.f32 %v7850_v25 }
 0x81f   : > { %v8944_v30 = vpop.eup %8943  ;;  %7022 = vst [vmem:[%s11190_s3 + $0x2d8] sm:$0xff] %v8942_v54  ;;  %8963 = vpow2.f32 %v7851_v16  ;;  %v6124_v42 = vpop.f32.mrb[112].mxu1 }
 0x820   : > { %v8946_v36 = vpop.eup %8945  ;;  %7023 = vst [vmem:[%s11190_s3 + $0x2e0] sm:$0xff] %v8944_v30  ;;  %8965 = vpow2.f32 %v7852_v57  ;;  %v6125_v58 = vadd.f32 %v6124_v42, %v11157_v45  ;;  %v6126_v5 = vpop.f32.mrb[113].mxu1 }
 0x821   : > { %v8948_v4 = vpop.eup %8947  ;;  %v6644_v60 = vadd.f32 1.0, %v8946_v36  ;;  %8967 = vpow2.f32 %v7853_v33  ;;  %v6127_v37 = vadd.f32 %v6126_v5, %v11161_v15  ;;  %v6128_v21 = vpop.f32.mrb[114].mxu1 }
 0x822   : > { %v8950_v11 = vpop.eup %8949  ;;  %v6645_v49 = vadd.f32 1.0, %v8948_v4  ;;  %8969 = vpow2.f32 %v7854_v39  ;;  %v7861_v25 = vmul.f32 -1.442695, %v6125_v58  ;;  %v6130_v3 = vpop.f32.mrb[115].mxu1  ;;  %v6129_v40 = vadd.f32 %v6128_v21, %v11157_v45 }
 0x823   : > { %v8952_v48 = vpop.eup %8951  ;;  %8971 = vrcp.f32 %v6644_v60  ;;  %v6646_v51 = vadd.f32 1.0, %v8950_v11  ;;  %v7862_v16 = vmul.f32 -1.442695, %v6127_v37  ;;  %v6131_v23 = vadd.f32 %v6130_v3, %v11161_v15 }
 0x824   : > { %v8954_v46 = vpop.eup %8953  ;;  %8973 = vrcp.f32 %v6645_v49  ;;  %v6647_v35 = vadd.f32 1.0, %v8952_v48  ;;  %v7863_v55 = vmul.f32 -1.442695, %v6129_v40 }
 0x825   : > { %v8956_v63 = vpop.eup %8955  ;;  %7024 = vst [vmem:[%s11190_s3 + $0x2e8] sm:$0xff] %v8954_v46  ;;  %8975 = vrcp.f32 %v6646_v51  ;;  %v7864_v2 = vmul.f32 -1.442695, %v6131_v23 }
 0x826   : > { %v8958_v27 = vpop.eup %8957  ;;  %7025 = vst [vmem:[%s11190_s3 + $0x2f0] sm:$0xff] %v8956_v63  ;;  %8977 = vrcp.f32 %v6647_v35 }
 0x827   : > { %v8960_v61 = vpop.eup %8959  ;;  %7026 = vst [vmem:[%s11190_s3 + $0x2f8] sm:$0xff] %v8958_v27  ;;  %8979 = vpow2.f32 %v7855_v50  ;;  %v6134_v36 = vpop.f32.mrb[116].mxu1 }
 0x828   : > { %v8962_v53 = vpop.eup %8961  ;;  %7027 = vst [vmem:[%s11190_s3 + $0x300] sm:$0xff] %v8960_v61  ;;  %8981 = vpow2.f32 %v7856_v29  ;;  %v6135_v4 = vadd.f32 %v6134_v36, %v11157_v45  ;;  %v6136_v60 = vpop.f32.mrb[117].mxu1 }
 0x829   : > { %v8964_v20 = vpop.eup %8963  ;;  %v6648_v17 = vadd.f32 1.0, %v8962_v53  ;;  %8983 = vpow2.f32 %v7857_v41  ;;  %v6137_v49 = vadd.f32 %v6136_v60, %v11161_v15  ;;  %v6138_v48 = vpop.f32.mrb[118].mxu1 }
 0x82a   : > { %v8966_v9 = vpop.eup %8965  ;;  %v6649_v10 = vadd.f32 1.0, %v8964_v20  ;;  %8985 = vpow2.f32 %v7858_v19  ;;  %v7865_v50 = vmul.f32 -1.442695, %v6135_v4  ;;  %v6139_v44 = vadd.f32 %v6138_v48, %v11157_v45  ;;  %v6140_v46 = vpop.f32.mrb[119].mxu1 }
 0x82b   : > { %v8968_v32 = vpop.eup %8967  ;;  %8987 = vrcp.f32 %v6648_v17  ;;  %v6650_v8 = vadd.f32 1.0, %v8966_v9  ;;  %v7866_v29 = vmul.f32 -1.442695, %v6137_v49  ;;  %v6141_v6 = vadd.f32 %v6140_v46, %v11161_v15 }
 0x82c   : > { %v8970_v24 = vpop.eup %8969  ;;  %8989 = vrcp.f32 %v6649_v10  ;;  %v6651_v14 = vadd.f32 1.0, %v8968_v32  ;;  %v7867_v63 = vmul.f32 -1.442695, %v6139_v44 }
 0x82d   : > { %v8972_v38 = vpop.eup %8971  ;;  %8991 = vrcp.f32 %v6650_v8  ;;  %v6652_v12 = vadd.f32 1.0, %v8970_v24  ;;  %v7868_v19 = vmul.f32 -1.442695, %v6141_v6 }
 0x82e   : > { %v8974_v56 = vpop.eup %8973  ;;  %7028 = vst [vmem:[%s11190_s3 + $0x308] sm:$0xff] %v8972_v38  ;;  %8993 = vrcp.f32 %v6651_v14 }
 0x82f   : > { %v8976_v1 = vpop.eup %8975  ;;  %7029 = vst [vmem:[%s11190_s3 + $0x310] sm:$0xff] %v8974_v56  ;;  %8995 = vrcp.f32 %v6652_v12 }
 0x830   : > { %v8978_v18 = vpop.eup %8977  ;;  %7030 = vst [vmem:[%s11190_s3 + $0x318] sm:$0xff] %v8976_v1  ;;  %8997 = vpow2.f32 %v7859_v28 }
 0x831   : > { %v8980_v57 = vpop.eup %8979  ;;  %7031 = vst [vmem:[%s11190_s3 + $0x320] sm:$0xff] %v8978_v18  ;;  %8999 = vpow2.f32 %v7860_v34  ;;  %v6144_v17 = vpop.f32.mrb[120].mxu1 }
 0x832   : > { %v8982_v13 = vpop.eup %8981  ;;  %v6653_v26 = vadd.f32 1.0, %v8980_v57  ;;  %9001 = vpow2.f32 %v7861_v25  ;;  %v6145_v9 = vadd.f32 %v6144_v17, %v11157_v45  ;;  %v6146_v10 = vpop.f32.mrb[121].mxu1 }
 0x833   : > { %v8984_v47 = vpop.eup %8983  ;;  %v6654_v52 = vadd.f32 1.0, %v8982_v13  ;;  %9003 = vpow2.f32 %v7862_v16  ;;  %v6148_v8 = vpop.f32.mrb[122].mxu1  ;;  %v6147_v14 = vadd.f32 %v6146_v10, %v11161_v15 }
 0x834   : > { %v8986_v54 = vpop.eup %8985  ;;  %9005 = vrcp.f32 %v6653_v26  ;;  %v6655_v33 = vadd.f32 1.0, %v8984_v47  ;;  %v7869_v24 = vmul.f32 -1.442695, %v6145_v9  ;;  %v6150_v28 = vpop.f32.mrb[123].mxu1  ;;  %v6149_v38 = vadd.f32 %v6148_v8, %v11157_v45 }
 0x835   : > { %v8988_v30 = vpop.eup %8987  ;;  %9007 = vrcp.f32 %v6654_v52  ;;  %v6656_v39 = vadd.f32 1.0, %v8986_v54  ;;  %v6151_v37 = vadd.f32 %v6150_v28, %v11161_v15  ;;  %v7870_v1 = vmul.f32 -1.442695, %v6147_v14 }
 0x836   : > { %v8990_v59 = vpop.eup %8989  ;;  %7032 = vst [vmem:[%s11190_s3 + $0x328] sm:$0xff] %v8988_v30  ;;  %9009 = vrcp.f32 %v6655_v33  ;;  %v7871_v40 = vmul.f32 -1.442695, %v6149_v38 }
 0x837   : > { %v8992_v11 = vpop.eup %8991  ;;  %7033 = vst [vmem:[%s11190_s3 + $0x330] sm:$0xff] %v8990_v59  ;;  %9011 = vrcp.f32 %v6656_v39  ;;  %v7872_v13 = vmul.f32 -1.442695, %v6151_v37 }
 0x838   : > { %v8994_v51 = vpop.eup %8993  ;;  %7034 = vst [vmem:[%s11190_s3 + $0x338] sm:$0xff] %v8992_v11  ;;  %9013 = vpow2.f32 %v7863_v55 }
 0x839   : > { %v8996_v35 = vpop.eup %8995  ;;  %7035 = vst [vmem:[%s11190_s3 + $0x340] sm:$0xff] %v8994_v51  ;;  %9015 = vpow2.f32 %v7864_v2  ;;  %v6154_v57 = vpop.f32.mrb[124].mxu1 }
 0x83a   : > { %v8998_v7 = vpop.eup %8997  ;;  %7036 = vst [vmem:[%s11190_s3 + $0x348] sm:$0xff] %v8996_v35  ;;  %9017 = vpow2.f32 %v7865_v50  ;;  %v6155_v26 = vadd.f32 %v6154_v57, %v11157_v45  ;;  %v6156_v47 = vpop.f32.mrb[125].mxu1 }
 0x83b   : > { %v9000_v0 = vpop.eup %8999  ;;  %v6657_v31 = vadd.f32 1.0, %v8998_v7  ;;  %9019 = vpow2.f32 %v7866_v29  ;;  %v6157_v54 = vadd.f32 %v6156_v47, %v11161_v15  ;;  %v6158_v33 = vpop.f32.mrb[126].mxu1 }
 0x83c   : > { %v9002_v27 = vpop.eup %9001  ;;  %v6658_v41 = vadd.f32 1.0, %v9000_v0  ;;  %9021 = vpow2.f32 %v7867_v63  ;;  %v7873_v30 = vmul.f32 -1.442695, %v6155_v26  ;;  %v6159_v39 = vadd.f32 %v6158_v33, %v11157_v45  ;;  %v6160_v2 = vpop.f32.mrb[127].mxu1 }
 0x83d   : > { %v9004_v62 = vpop.eup %9003  ;;  %9023 = vrcp.f32 %v6657_v31  ;;  %v6659_v61 = vadd.f32 1.0, %v9002_v27  ;;  %v7874_v59 = vmul.f32 -1.442695, %v6157_v54  ;;  %v6161_v4 = vadd.f32 %v6160_v2, %v11161_v15 }
 0x83e   : > { %v9006_v53 = vpop.eup %9005  ;;  %9025 = vrcp.f32 %v6658_v41  ;;  %v6660_v43 = vadd.f32 1.0, %v9004_v62  ;;  %v7875_v11 = vmul.f32 -1.442695, %v6159_v39 }
 0x83f   : > { %v9008_v20 = vpop.eup %9007  ;;  %7037 = vst [vmem:[%s11190_s3 + $0x350] sm:$0xff] %v9006_v53  ;;  %9027 = vrcp.f32 %v6659_v61  ;;  %v7876_v48 = vmul.f32 -1.442695, %v6161_v4 }
 0x840   : > { %v9010_v22 = vpop.eup %9009  ;;  %7038 = vst [vmem:[%s11190_s3 + $0x358] sm:$0xff] %v9008_v20  ;;  %9029 = vrcp.f32 %v6660_v43 }
 0x841   : > { %v9012_v32 = vpop.eup %9011  ;;  %7039 = vst [vmem:[%s11190_s3 + $0x360] sm:$0xff] %v9010_v22  ;;  %9031 = vpow2.f32 %v7868_v19 }
 0x842   : > { %v9014_v42 = vpop.eup %9013  ;;  %7040 = vst [vmem:[%s11190_s3 + $0x368] sm:$0xff] %v9012_v32  ;;  %9033 = vpow2.f32 %v7869_v24 }
 0x843   : > { %v9016_v58 = vpop.eup %9015  ;;  %v6661_v5 = vadd.f32 1.0, %v9014_v42 }
 0x844   : > { %v9018_v12 = vpop.eup %9017  ;;  %v6662_v34 = vadd.f32 1.0, %v9016_v58 }
 0x845   : > { %v9020_v21 = vpop.eup %9019  ;;  %9035 = vrcp.f32 %v6661_v5  ;;  %v6663_v56 = vadd.f32 1.0, %v9018_v12 }
 0x846   : > { %v9022_v25 = vpop.eup %9021  ;;  %9037 = vrcp.f32 %v6662_v34  ;;  %v6664_v3 = vadd.f32 1.0, %v9020_v21 }
 0x847   : > { %v9024_v16 = vpop.eup %9023  ;;  %9039 = vrcp.f32 %v6663_v56  ;;  %v6665_v18 = vadd.f32 1.0, %v9022_v25 }
 0x848   : > { %v9026_v23 = vpop.eup %9025  ;;  %7041 = vst [vmem:[%s11190_s3 + $0x370] sm:$0xff] %v9024_v16  ;;  %9041 = vrcp.f32 %v6664_v3 }
 0x849   : > { %v9028_v52 = vpop.eup %9027  ;;  %7042 = vst [vmem:[%s11190_s3 + $0x378] sm:$0xff] %v9026_v23  ;;  %9043 = vrcp.f32 %v6665_v18 }
 0x84a   : > { %v9030_v55 = vpop.eup %9029  ;;  %7043 = vst [vmem:[%s11190_s3 + $0x380] sm:$0xff] %v9028_v52  ;;  %9045 = vpow2.f32 %v7870_v1 }
 0x84b   : > { %v9032_v36 = vpop.eup %9031  ;;  %7044 = vst [vmem:[%s11190_s3 + $0x388] sm:$0xff] %v9030_v55  ;;  %9047 = vpow2.f32 %v7871_v40 }
 0x84c   : > { %v6666_v60 = vadd.f32 1.0, %v9032_v36  ;;  %9049 = vpow2.f32 %v7872_v13  ;;  %v9034_v49 = vpop.eup %9033 }
 0x84d   : > { %9051 = vpow2.f32 %v7873_v30  ;;  %v6667_v51 = vadd.f32 1.0, %v9034_v49 }
 0x84e   : > { %9053 = vrcp.f32 %v6666_v60 }
 0x84f   : > { %v9036_v45 = vpop.eup %9035  ;;  %9055 = vpow2.f32 %v7874_v59 }
 0x850   : > { %v9038_v50 = vpop.eup %9037  ;;  %7045 = vst [vmem:[%s11190_s3 + $0x390] sm:$0xff] %v9036_v45  ;;  %9057 = vpow2.f32 %v7875_v11 }
 0x851   : > { %v9040_v44 = vpop.eup %9039  ;;  %7046 = vst [vmem:[%s11190_s3 + $0x398] sm:$0xff] %v9038_v50  ;;  %9059 = vrcp.f32 %v6667_v51 }
 0x852   : > { %v9042_v15 = vpop.eup %9041  ;;  %7047 = vst [vmem:[%s11190_s3 + $0x3a0] sm:$0xff] %v9040_v44  ;;  %9061 = vpow2.f32 %v7876_v48 }
 0x853   : > { %v9044_v46 = vpop.eup %9043  ;;  %7048 = vst [vmem:[%s11190_s3 + $0x3a8] sm:$0xff] %v9042_v15 }
 0x854   : > { %v9046_v35 = vpop.eup %9045  ;;  %7049 = vst [vmem:[%s11190_s3 + $0x3b0] sm:$0xff] %v9044_v46 }
 0x855   : > { %v9048_v29 = vpop.eup %9047  ;;  %v6668_v6 = vadd.f32 1.0, %v9046_v35 }
 0x856   : > { %v9050_v7 = vpop.eup %9049  ;;  %v6669_v63 = vadd.f32 1.0, %v9048_v29 }
 0x857   : > { %v9052_v0 = vpop.eup %9051  ;;  %9063 = vrcp.f32 %v6668_v6  ;;  %v6670_v31 = vadd.f32 1.0, %v9050_v7 }
 0x858   : > { %v9054_v27 = vpop.eup %9053  ;;  %9065 = vrcp.f32 %v6669_v63  ;;  %v6671_v41 = vadd.f32 1.0, %v9052_v0 }
 0x859   : > { %v9056_v62 = vpop.eup %9055  ;;  %7050 = vst [vmem:[%s11190_s3 + $0x3b8] sm:$0xff] %v9054_v27  ;;  %9067 = vrcp.f32 %v6670_v31 }
 0x85a   : > { %v9058_v61 = vpop.eup %9057  ;;  %9069 = vrcp.f32 %v6671_v41  ;;  %v6672_v19 = vadd.f32 1.0, %v9056_v62 }
 0x85b   : > { %v9060_v53 = vpop.eup %9059  ;;  %v6673_v43 = vadd.f32 1.0, %v9058_v61 }
 0x85c   : > { %v9062_v20 = vpop.eup %9061  ;;  %7051 = vst [vmem:[%s11190_s3 + $0x3c0] sm:$0xff] %v9060_v53  ;;  %9071 = vrcp.f32 %v6672_v19 }
 0x85d   : > { %9073 = vrcp.f32 %v6673_v43  ;;  %v6674_v17 = vadd.f32 1.0, %v9062_v20 }
 0x85f   : > { %9075 = vrcp.f32 %v6674_v17 }
 0x861   : > { %v9064_v22 = vpop.eup %9063 }
 0x862   : > { %v9066_v9 = vpop.eup %9065  ;;  %7052 = vst [vmem:[%s11190_s3 + $0x3c8] sm:$0xff] %v9064_v22 }
 0x863   : > { %v9068_v10 = vpop.eup %9067  ;;  %7053 = vst [vmem:[%s11190_s3 + $0x3d0] sm:$0xff] %v9066_v9 }
 0x864   : > { %v9070_v32 = vpop.eup %9069  ;;  %7054 = vst [vmem:[%s11190_s3 + $0x3d8] sm:$0xff] %v9068_v10 }
 0x865   : > { %7055 = vst [vmem:[%s11190_s3 + $0x3e0] sm:$0xff] %v9070_v32 }
 0x866   : > { %v9072_v8 = vpop.eup %9071 }
 0x867   : > { %v9074_v42 = vpop.eup %9073  ;;  %7056 = vst [vmem:[%s11190_s3 + $0x3e8] sm:$0xff] %v9072_v8 }
 0x868   : > { %7057 = vst [vmem:[%s11190_s3 + $0x3f0] sm:$0xff] %v9074_v42 }
 0x869   : > { %v9076_v24 = vpop.eup %9075 }
 0x86a   : > { %7058 = vst [vmem:[%s11190_s3 + $0x3f8] sm:$0xff] %v9076_v24 }
 0x86b   : > { %9514 = shalt.err (!%p9511_p4)
}
 0x86c   : > { %s9515_s3 = scalar_lea.hbm %s11480_s30, 16384  ;;  %s9519_s4 = scalar_lea.hbm %s11615_s1, 65536 }
 0x86d   : > { %p9516_p6 = scmp.ne.s32.totalorder %s11480_s30, %s9515_s3  ;;  %p9520_p11 = scmp.lt.u32.totalorder %s11480_s30, %s11615_s1 }
 0x86e   : > { %p9521_p12 = scmp.lt.u32.totalorder %s9519_s4, %s9515_s3  ;;  %p9523_p1 = scmp.lt.u32.totalorder %s9515_s3, %s11480_s30 }
 0x86f   : > { %p9517_p8 = pnand %p9516_p6, %p11614_p0 }
 0x870   : > { %p9522_p13 = por %p9521_p12, %p9520_p11 }
 0x871   : > { %p9518_p7 = pneg %p9517_p8 }
 0x872   : > { %p9524_p3 = por %p9523_p1, %p9522_p13 }
 0x874   : > { %p9525_p5 = pnand %p9524_p3, %p9518_p7 }
 0x876   : > { %9528 = shalt.err (!%p9525_p5)
}
 0x877   : > { %7946 = dma.vmem_to_hbm [thread:$0]  (%p11614_p0), %s11482_s27, 16384, %s11480_s30, %s7188_s2, %s9624_s8, %s9624_s8, %s9625_s6  }
 0x878 PF: > { %s11616_s22 = sld [smem:[#allocation39_spill]]  ;;  %p8026_p2 = scmp.ge.s32.totalorder %s9603_s21, 2 }
 0x879   : > { %p11617_p9 = scmp.ne.s32.totalorder %s11591_s16, 0 }
 0x87b   : > { %p7995_p10 = pnand %p8026_p2, %p11617_p9 }
 0x87e   : > { %s7239_s25 = sand.u32 1, %s11616_s22  }
 0x87f   : > { %s7240_s29 = scalar_lea.sflag [#allocation4], %s7239_s25 }
 0x880   : > { %9582 = dma.done.wait (!%p7995_p10), %s7240_s29, 16384  }
 0x881   : > { %9584 = vsyncadd (!%p7995_p10), %s7240_s29, 4294950912  ;;  %s7249_s18 = scalar_lea.sflag [#allocation27], %s7239_s25 }
 0x882   : > { %9586 = dma.done.wait (!%p7995_p10), %s7249_s18, 16384  }
 0x883   : > { %9588 = vsyncadd (!%p7995_p10), %s7249_s18, 4294950912  ;;  %p41_p0 = scmp.ge.s32.totalorder %s10008_s28, 6   ;;  %s11618_s18 = smov %s9595_s19 }
 0x884   : > { %s11619_s19 = smov %s9599_s20  ;;  %s11620_s20 = smov %s10019_s14 }
 0x885   : > { %s11621_s21 = smov %s10008_s28  ;;  %43 = sbr.rel (!%p41_p0) target bundleno = 27 (0x1b), region = 199 }
 0x88c   :  { %7254 = vsyncpa [#allocation3], 1 }
 0x88d   :  { %7256 = vsyncpa [#allocation3 + $0x1], 1 }
 0x88e   :  { %7257 = vsyncpa [#allocation6], 1 }
 0x88f   :  { %7259 = vsyncpa [#allocation6 + $0x1], 1 }
 0x890   :  { %7260 = vsyncpa [#allocation9], 1 }
 0x891   :  { %7261 = vsyncpa [#allocation12], 1 }
 0x892   :  { %7262 = vsyncpa [#allocation15], 1 }
 0x893   :  { %7263 = vsyncpa [#allocation18], 1 }
 0x894   :  { %7264 = vsyncpa [#allocation21], 1 }
 0x895   :  { %7265 = vsyncpa [#allocation24], 1 }
 0x896   :  { %7266 = vsyncpa [#allocation4], 1 }
 0x897   :  { %7268 = vsyncpa [#allocation4 + $0x1], 1 }
 0x898   :  { %7269 = vsyncpa [#allocation27], 1 }
 0x899   :  { %7271 = vsyncpa [#allocation27 + $0x1], 1 }

</bundles_post_ra>
